<compile_context>
chip_gen: v5e
topology: v5e:2x2
jax: 0.10.0
libtpu: 0.0.40
codegen_flags: <defaults>
</compile_context>

<pallas_src>
import jax
import jax.numpy as jnp
from jax.experimental import pallas as pl
from jax.experimental.pallas import tpu as pltpu


# ----------------------------------------------------------------------------
# Fused forward kernel builder
# ----------------------------------------------------------------------------
def _build_fused_call(N, H, W, Cin):
    assert H % 8 == 0 and W % 8 == 0, "spatial dims must be divisible by 8"
    H2, W2 = H // 2, W // 2          # conv2 spatial (after pool1)
    H3, W3 = H // 4, W // 4          # conv3 spatial (after pool2)
    HL, WL = H // 8, W // 8          # latent spatial (after pool3)
    ML = HL * WL                     # latent rows per batch element
    TAPS = tuple((di, dj) for di in range(3) for dj in range(3))
    use_mxu1 = Cin >= 16             # enc1 with Cin=1 goes to the VPU instead

    def conv3x3(load_tap, w_ref, h, w, cin, cout, use_mxu):
        """3x3 'same' conv; taps come from a zero-haloed VMEM buffer."""
        if use_mxu:
            # build the (h*w, 9*cin) patch tile in VMEM, one bf16 MXU matmul
            patches = jnp.concatenate([load_tap(di, dj) for di, dj in TAPS], axis=-1)
            patches = patches.reshape(h * w, 9 * cin).astype(jnp.bfloat16)
            return jnp.dot(patches, w_ref[...].astype(jnp.bfloat16),
                           preferred_element_type=jnp.float32)
        # tiny Cin: 9*cin VPU multiply-adds, skip the (badly filled) MXU
        acc = jnp.zeros((h, w, cout), jnp.float32)
        for t, (di, dj) in enumerate(TAPS):
            xs = load_tap(di, dj)                                   # (h, w, cin) f32
            for ci in range(cin):
                r = t * cin + ci
                acc = acc + xs[:, :, ci:ci + 1] * w_ref[r:r + 1, :]
        return acc.reshape(h * w, cout)

    def relu_pool(acc, b_ref, h, w, c):
        """bias + ReLU + 2x2/2 max-pool (all f32, VPU).  acc: (h*w, c)."""
        y = jnp.maximum(acc + b_ref[...], 0.0)
        y = y.reshape(h // 2, 2, w // 2, 2, c)
        return jnp.max(y, axis=(1, 3))                              # (h/2, w/2, c)

    def kernel(x_ref, w1_ref, b1_ref, w2_ref, b2_ref, w3_ref, b3_ref,
               dw1_ref, db1_ref, dw2_ref, db2_ref, dw3_ref, db3_ref,
               o_ref, pad2_ref, pad3_ref):
        # zero the halo scratch buffers (borders must read as 0 for 'same' convs)
        pad2_ref[...] = jnp.zeros_like(pad2_ref)
        pad3_ref[...] = jnp.zeros_like(pad3_ref)

        # ---------------- encoder ----------------
        a1 = conv3x3(lambda di, dj: x_ref[0, di:di + H, dj:dj + W, :],
                     w1_ref, H, W, Cin, 32, use_mxu1)               # (H*W, 32)
        pad2_ref[1:H2 + 1, 1:W2 + 1, :] = relu_pool(a1, b1_ref, H, W, 32)

        a2 = conv3x3(lambda di, dj: pad2_ref[di:di + H2, dj:dj + W2, :],
                     w2_ref, H2, W2, 32, 64, True)                  # (H2*W2, 64)
        pad3_ref[1:H3 + 1, 1:W3 + 1, :] = relu_pool(a2, b2_ref, H2, W2, 64)

        a3 = conv3x3(lambda di, dj: pad3_ref[di:di + H3, dj:dj + W3, :],
                     w3_ref, H3, W3, 64, 128, True)                 # (H3*W3, 128)
        z = relu_pool(a3, b3_ref, H3, W3, 128).reshape(ML, 128)     # latent

        # ---------------- decoder (3 block-diagonal matmuls) ----------------
        d1 = jnp.maximum(jnp.dot(z.astype(jnp.bfloat16), dw1_ref[...],
                                 preferred_element_type=jnp.float32) + db1_ref[...], 0.0)
        d2 = jnp.maximum(jnp.dot(d1.astype(jnp.bfloat16), dw2_ref[...],
                                 preferred_element_type=jnp.float32) + db2_ref[...], 0.0)
        d3 = jnp.maximum(jnp.dot(d2.astype(jnp.bfloat16), dw3_ref[...],
                                 preferred_element_type=jnp.float32) + db3_ref[...], 0.0)
        o_ref[0] = d3.astype(o_ref.dtype)                           # (ML, 192) lane-dense

    def full(shape):  # whole (small) 2-D weight/bias resident in VMEM, never re-fetched
        return pl.BlockSpec(shape, lambda b: (0, 0))

    return pl.pallas_call(
        kernel,
        out_shape=jax.ShapeDtypeStruct((N, ML, 192), jnp.float32),
        grid=(N,),
        in_specs=[
            pl.BlockSpec((1, H + 2, W + 2, Cin), lambda b: (b, 0, 0, 0)),
            full((9 * Cin, 32)), full((1, 32)),
            full((9 * 32, 64)), full((1, 64)),
            full((9 * 64, 128)), full((1, 128)),
            full((128, 256)), full((1, 256)),
            full((256, 512)), full((1, 512)),
            full((512, 192)), full((1, 192)),
        ],
        out_specs=pl.BlockSpec((1, ML, 192), lambda b: (b, 0, 0)),
        scratch_shapes=[
            pltpu.VMEM((H2 + 2, W2 + 2, 32), jnp.float32),   # haloed input of conv2
            pltpu.VMEM((H3 + 2, W3 + 2, 64), jnp.float32),   # haloed input of conv3
        ],
        compiler_params=pltpu.CompilerParams(dimension_semantics=("parallel",)),
    )


# ----------------------------------------------------------------------------
# Public forward (wrapper does only tiny layout glue + weight prep)
# ----------------------------------------------------------------------------
@jax.jit
def autoencoder_forward(params, x_nchw):
    """x_nchw: (N, Cin, H, W) float32, H, W divisible by 8. Returns (N, 3, H, W)."""
    N, Cin, H, W = x_nchw.shape
    f32, bf16 = jnp.float32, jnp.bfloat16
    use_mxu1 = Cin >= 16

    # NCHW -> NHWC + zero halo for the first 3x3 conv (tiny tensor, cheap XLA glue).
    x = jnp.transpose(x_nchw, (0, 2, 3, 1)).astype(f32)
    x = jnp.pad(x, ((0, 0), (1, 1), (1, 1), (0, 0)))

    def enc_w(w):  # (Cout, Cin, 3, 3) -> (9*Cin, Cout), rows ordered (di, dj, ci)
        cout, cin = w.shape[0], w.shape[1]
        return jnp.transpose(w, (2, 3, 1, 0)).reshape(9 * cin, cout)

    def dec_w(w):  # (Cin, Cout, 2, 2) -> (Cin, 4*Cout), cols ordered (a, b, co)
        cin, cout = w.shape[0], w.shape[1]
        return jnp.transpose(w, (0, 2, 3, 1)).reshape(cin, 4 * cout)

    w1 = enc_w(params["enc1_w"]).astype(bf16 if use_mxu1 else f32)
    w2 = enc_w(params["enc2_w"]).astype(bf16)
    w3 = enc_w(params["enc3_w"]).astype(bf16)
    b1 = params["enc1_b"].reshape(1, 32).astype(f32)
    b2 = params["enc2_b"].reshape(1, 64).astype(f32)
    b3 = params["enc3_b"].reshape(1, 128).astype(f32)

    # decoder: k=2/s=2 transposed convs are position-wise -> block-diagonal matmuls.
    dw1 = dec_w(params["dec1_w"]).astype(bf16)                                    # (128, 256)
    dw2 = jnp.kron(jnp.eye(4, dtype=f32), dec_w(params["dec2_w"])).astype(bf16)   # (256, 512)
    dw3 = jnp.kron(jnp.eye(16, dtype=f32), dec_w(params["dec3_w"])).astype(bf16)  # (512, 192)
    db1 = jnp.tile(params["dec1_b"], 4).reshape(1, 256).astype(f32)
    db2 = jnp.tile(params["dec2_b"], 16).reshape(1, 512).astype(f32)
    db3 = jnp.tile(params["dec3_b"], 64).reshape(1, 192).astype(f32)

    fused = _build_fused_call(N, H, W, Cin)
    out = fused(x, w1, b1, w2, b2, w3, b3, dw1, db1, dw2, db2, dw3, db3)  # (N, ML, 192)

    # lane-dense kernel output -> NCHW pixels.
    # out column = 96*a1 + 48*b1 + 24*a2 + 12*b2 + 6*a3 + 3*b3 + c
    # output pixel = (8*i + 4*a1 + 2*a2 + a3, 8*j + 4*b1 + 2*b2 + b3)
    HL, WL = H // 8, W // 8
    y = out.reshape(N, HL, WL, 2, 2, 2, 2, 2, 2, 3)       # (n,i,j,a1,b1,a2,b2,a3,b3,c)
    y = jnp.transpose(y, (0, 9, 1, 3, 5, 7, 2, 4, 6, 8))  # (n,c,i,a1,a2,a3,j,b1,b2,b3)
    return y.reshape(N, 3, H, W)


# ----------------------------------------------------------------------------
# Parameters (deterministic synthetic init, PyTorch weight layouts)
# ----------------------------------------------------------------------------
def init_params(key, in_channels=1):
    def conv_w(k, cout, cin, kh, kw):
        scale = 1.0 / jnp.sqrt(cin * kh * kw)
        return jax.random.uniform(k, (cout, cin, kh, kw), jnp.float32, -scale, scale)

    def deconv_w(k, cin, cout, kh, kw):
        scale = 1.0 / jnp.sqrt(cin * kh * kw)
        return jax.random.uniform(k, (cin, cout, kh, kw), jnp.float32, -scale, scale)

    ks = jax.random.split(key, 12)
    return {
        "enc1_w": conv_w(ks[0], 32, in_channels, 3, 3),
        "enc1_b": jax.random.uniform(ks[1], (32,), jnp.float32, -0.1, 0.1),
        "enc2_w": conv_w(ks[2], 64, 32, 3, 3),
        "enc2_b": jax.random.uniform(ks[3], (64,), jnp.float32, -0.1, 0.1),
        "enc3_w": conv_w(ks[4], 128, 64, 3, 3),
        "enc3_b": jax.random.uniform(ks[5], (128,), jnp.float32, -0.1, 0.1),
        "dec1_w": deconv_w(ks[6], 128, 64, 2, 2),
        "dec1_b": jax.random.uniform(ks[7], (64,), jnp.float32, -0.1, 0.1),
        "dec2_w": deconv_w(ks[8], 64, 32, 2, 2),
        "dec2_b": jax.random.uniform(ks[9], (32,), jnp.float32, -0.1, 0.1),
        "dec3_w": deconv_w(ks[10], 32, 3, 2, 2),
        "dec3_b": jax.random.uniform(ks[11], (3,), jnp.float32, -0.1, 0.1),
    }


if __name__ == "__main__":
    key = jax.random.PRNGKey(0)
    pkey, xkey = jax.random.split(key)

    in_channels = 1
    params = init_params(pkey, in_channels=in_channels)

    # batch=2, 1 channel, 16x16 spatial (consistent with the module contract)
    x = jax.random.normal(xkey, (2, in_channels, 16, 16), dtype=jnp.float32)

    y = autoencoder_forward(params, x)
    y = jax.block_until_ready(y)

    assert y.shape == (2, 3, 16, 16), y.shape
    assert y.dtype == jnp.float32
    assert bool(jnp.all(y >= 0.0))  # final ReLU

    print("KERNEL_OK")
</pallas_src>

<mosaic_0001>
module attributes {stable_mosaic.version = 11 : i64} {
  func.func @kernel(%arg0: i32, %arg1: memref<1x18x18x1xf32, #tpu.memory_space<vmem>>, %arg2: memref<9x32xf32, #tpu.memory_space<vmem>>, %arg3: memref<1x32xf32, #tpu.memory_space<vmem>>, %arg4: memref<288x64xbf16, #tpu.memory_space<vmem>>, %arg5: memref<1x64xf32, #tpu.memory_space<vmem>>, %arg6: memref<576x128xbf16, #tpu.memory_space<vmem>>, %arg7: memref<1x128xf32, #tpu.memory_space<vmem>>, %arg8: memref<128x256xbf16, #tpu.memory_space<vmem>>, %arg9: memref<1x256xf32, #tpu.memory_space<vmem>>, %arg10: memref<256x512xbf16, #tpu.memory_space<vmem>>, %arg11: memref<1x512xf32, #tpu.memory_space<vmem>>, %arg12: memref<512x192xbf16, #tpu.memory_space<vmem>>, %arg13: memref<1x192xf32, #tpu.memory_space<vmem>>, %arg14: memref<1x4x192xf32, #tpu.memory_space<vmem>>, %arg15: memref<10x10x32xf32, #tpu.memory_space<vmem>>, %arg16: memref<6x6x64xf32, #tpu.memory_space<vmem>>) attributes {dimension_semantics = [#tpu.dimension_semantics<parallel>], iteration_bounds = array<i64: 2>, scalar_prefetch = 0 : i64, scratch_operands = 2 : i64, tpu.core_type = #tpu.core_type<tc>, window_params = [{transform_indices = @transform_0, window_bounds = array<i64: 1, 18, 18, 1>}, {pipeline_mode = #tpu.pipeline_mode<synchronous>, transform_indices = @transform_1, window_bounds = array<i64: 9, 32>}, {pipeline_mode = #tpu.pipeline_mode<synchronous>, transform_indices = @transform_2, window_bounds = array<i64: 1, 32>}, {pipeline_mode = #tpu.pipeline_mode<synchronous>, transform_indices = @transform_3, window_bounds = array<i64: 288, 64>}, {pipeline_mode = #tpu.pipeline_mode<synchronous>, transform_indices = @transform_4, window_bounds = array<i64: 1, 64>}, {pipeline_mode = #tpu.pipeline_mode<synchronous>, transform_indices = @transform_5, window_bounds = array<i64: 576, 128>}, {pipeline_mode = #tpu.pipeline_mode<synchronous>, transform_indices = @transform_6, window_bounds = array<i64: 1, 128>}, {pipeline_mode = #tpu.pipeline_mode<synchronous>, transform_indices = @transform_7, window_bounds = array<i64: 128, 256>}, {pipeline_mode = #tpu.pipeline_mode<synchronous>, transform_indices = @transform_8, window_bounds = array<i64: 1, 256>}, {pipeline_mode = #tpu.pipeline_mode<synchronous>, transform_indices = @transform_9, window_bounds = array<i64: 256, 512>}, {pipeline_mode = #tpu.pipeline_mode<synchronous>, transform_indices = @transform_10, window_bounds = array<i64: 1, 512>}, {pipeline_mode = #tpu.pipeline_mode<synchronous>, transform_indices = @transform_11, window_bounds = array<i64: 512, 192>}, {pipeline_mode = #tpu.pipeline_mode<synchronous>, transform_indices = @transform_12, window_bounds = array<i64: 1, 192>}, {transform_indices = @transform_13, window_bounds = array<i64: 1, 4, 192>}]} {
    %cst = arith.constant 0.000000e+00 : f32
    %0 = vector.broadcast %cst : f32 to vector<10x10x32xf32>
    %c0 = arith.constant 0 : index
    %c0_0 = arith.constant 0 : index
    %c0_1 = arith.constant 0 : index
    %1 = vector.load %arg15[%c0, %c0_0, %c0_1] : memref<10x10x32xf32, #tpu.memory_space<vmem>>, vector<10x10x32xf32>
    tpu.vector_store %arg15[%c0, %c0_0, %c0_1], %0 {strides = array<i32>} : memref<10x10x32xf32, #tpu.memory_space<vmem>>, vector<10x10x32xf32>,
    %cst_2 = arith.constant 0.000000e+00 : f32
    %2 = vector.broadcast %cst_2 : f32 to vector<6x6x64xf32>
    %c0_3 = arith.constant 0 : index
    %c0_4 = arith.constant 0 : index
    %c0_5 = arith.constant 0 : index
    %3 = vector.load %arg16[%c0_3, %c0_4, %c0_5] : memref<6x6x64xf32, #tpu.memory_space<vmem>>, vector<6x6x64xf32>
    tpu.vector_store %arg16[%c0_3, %c0_4, %c0_5], %2 {strides = array<i32>} : memref<6x6x64xf32, #tpu.memory_space<vmem>>, vector<6x6x64xf32>,
    %cst_6 = arith.constant 0.000000e+00 : f32
    %4 = vector.broadcast %cst_6 : f32 to vector<16x16x32xf32>
    %c0_7 = arith.constant 0 : index
    %c0_8 = arith.constant 0 : index
    %c0_9 = arith.constant 0 : index
    %c0_10 = arith.constant 0 : index
    %5 = vector.load %arg1[%c0_7, %c0_8, %c0_9, %c0_10] : memref<1x18x18x1xf32, #tpu.memory_space<vmem>>, vector<1x16x16x1xf32>
    %6 = vector.shape_cast %5 : vector<1x16x16x1xf32> to vector<16x16x1xf32>
    %c0_11 = arith.constant 0 : index
    %c0_12 = arith.constant 0 : index
    %7 = vector.load %arg2[%c0_11, %c0_12] : memref<9x32xf32, #tpu.memory_space<vmem>>, vector<1x32xf32>
    %8 = vector.shape_cast %7 : vector<1x32xf32> to vector<1x1x32xf32>
    %9 = vector.broadcast %6 : vector<16x16x1xf32> to vector<16x16x32xf32>
    %10 = vector.broadcast %8 : vector<1x1x32xf32> to vector<16x16x32xf32>
    %11 = arith.mulf %9, %10 : vector<16x16x32xf32>
    %12 = arith.addf %4, %11 : vector<16x16x32xf32>
    %c0_13 = arith.constant 0 : index
    %c0_14 = arith.constant 0 : index
    %c1 = arith.constant 1 : index
    %c0_15 = arith.constant 0 : index
    %13 = vector.load %arg1[%c0_13, %c0_14, %c1, %c0_15] : memref<1x18x18x1xf32, #tpu.memory_space<vmem>>, vector<1x16x16x1xf32>
    %14 = vector.shape_cast %13 : vector<1x16x16x1xf32> to vector<16x16x1xf32>
    %c1_16 = arith.constant 1 : index
    %c0_17 = arith.constant 0 : index
    %15 = vector.load %arg2[%c1_16, %c0_17] : memref<9x32xf32, #tpu.memory_space<vmem>>, vector<1x32xf32>
    %16 = vector.shape_cast %15 : vector<1x32xf32> to vector<1x1x32xf32>
    %17 = vector.broadcast %14 : vector<16x16x1xf32> to vector<16x16x32xf32>
    %18 = vector.broadcast %16 : vector<1x1x32xf32> to vector<16x16x32xf32>
    %19 = arith.mulf %17, %18 : vector<16x16x32xf32>
    %20 = arith.addf %12, %19 : vector<16x16x32xf32>
    %c0_18 = arith.constant 0 : index
    %c0_19 = arith.constant 0 : index
    %c2 = arith.constant 2 : index
    %c0_20 = arith.constant 0 : index
    %21 = vector.load %arg1[%c0_18, %c0_19, %c2, %c0_20] : memref<1x18x18x1xf32, #tpu.memory_space<vmem>>, vector<1x16x16x1xf32>
    %22 = vector.shape_cast %21 : vector<1x16x16x1xf32> to vector<16x16x1xf32>
    %c2_21 = arith.constant 2 : index
    %c0_22 = arith.constant 0 : index
    %23 = vector.load %arg2[%c2_21, %c0_22] : memref<9x32xf32, #tpu.memory_space<vmem>>, vector<1x32xf32>
    %24 = vector.shape_cast %23 : vector<1x32xf32> to vector<1x1x32xf32>
    %25 = vector.broadcast %22 : vector<16x16x1xf32> to vector<16x16x32xf32>
    %26 = vector.broadcast %24 : vector<1x1x32xf32> to vector<16x16x32xf32>
    %27 = arith.mulf %25, %26 : vector<16x16x32xf32>
    %28 = arith.addf %20, %27 : vector<16x16x32xf32>
    %c0_23 = arith.constant 0 : index
    %c1_24 = arith.constant 1 : index
    %c0_25 = arith.constant 0 : index
    %c0_26 = arith.constant 0 : index
    %29 = vector.load %arg1[%c0_23, %c1_24, %c0_25, %c0_26] : memref<1x18x18x1xf32, #tpu.memory_space<vmem>>, vector<1x16x16x1xf32>
    %30 = vector.shape_cast %29 : vector<1x16x16x1xf32> to vector<16x16x1xf32>
    %c3 = arith.constant 3 : index
    %c0_27 = arith.constant 0 : index
    %31 = vector.load %arg2[%c3, %c0_27] : memref<9x32xf32, #tpu.memory_space<vmem>>, vector<1x32xf32>
    %32 = vector.shape_cast %31 : vector<1x32xf32> to vector<1x1x32xf32>
    %33 = vector.broadcast %30 : vector<16x16x1xf32> to vector<16x16x32xf32>
    %34 = vector.broadcast %32 : vector<1x1x32xf32> to vector<16x16x32xf32>
    %35 = arith.mulf %33, %34 : vector<16x16x32xf32>
    %36 = arith.addf %28, %35 : vector<16x16x32xf32>
    %c0_28 = arith.constant 0 : index
    %c1_29 = arith.constant 1 : index
    %c1_30 = arith.constant 1 : index
    %c0_31 = arith.constant 0 : index
    %37 = vector.load %arg1[%c0_28, %c1_29, %c1_30, %c0_31] : memref<1x18x18x1xf32, #tpu.memory_space<vmem>>, vector<1x16x16x1xf32>
    %38 = vector.shape_cast %37 : vector<1x16x16x1xf32> to vector<16x16x1xf32>
    %c4 = arith.constant 4 : index
    %c0_32 = arith.constant 0 : index
    %39 = vector.load %arg2[%c4, %c0_32] : memref<9x32xf32, #tpu.memory_space<vmem>>, vector<1x32xf32>
    %40 = vector.shape_cast %39 : vector<1x32xf32> to vector<1x1x32xf32>
    %41 = vector.broadcast %38 : vector<16x16x1xf32> to vector<16x16x32xf32>
    %42 = vector.broadcast %40 : vector<1x1x32xf32> to vector<16x16x32xf32>
    %43 = arith.mulf %41, %42 : vector<16x16x32xf32>
    %44 = arith.addf %36, %43 : vector<16x16x32xf32>
    %c0_33 = arith.constant 0 : index
    %c1_34 = arith.constant 1 : index
    %c2_35 = arith.constant 2 : index
    %c0_36 = arith.constant 0 : index
    %45 = vector.load %arg1[%c0_33, %c1_34, %c2_35, %c0_36] : memref<1x18x18x1xf32, #tpu.memory_space<vmem>>, vector<1x16x16x1xf32>
    %46 = vector.shape_cast %45 : vector<1x16x16x1xf32> to vector<16x16x1xf32>
    %c5 = arith.constant 5 : index
    %c0_37 = arith.constant 0 : index
    %47 = vector.load %arg2[%c5, %c0_37] : memref<9x32xf32, #tpu.memory_space<vmem>>, vector<1x32xf32>
    %48 = vector.shape_cast %47 : vector<1x32xf32> to vector<1x1x32xf32>
    %49 = vector.broadcast %46 : vector<16x16x1xf32> to vector<16x16x32xf32>
    %50 = vector.broadcast %48 : vector<1x1x32xf32> to vector<16x16x32xf32>
    %51 = arith.mulf %49, %50 : vector<16x16x32xf32>
    %52 = arith.addf %44, %51 : vector<16x16x32xf32>
    %c0_38 = arith.constant 0 : index
    %c2_39 = arith.constant 2 : index
    %c0_40 = arith.constant 0 : index
    %c0_41 = arith.constant 0 : index
    %53 = vector.load %arg1[%c0_38, %c2_39, %c0_40, %c0_41] : memref<1x18x18x1xf32, #tpu.memory_space<vmem>>, vector<1x16x16x1xf32>
    %54 = vector.shape_cast %53 : vector<1x16x16x1xf32> to vector<16x16x1xf32>
    %c6 = arith.constant 6 : index
    %c0_42 = arith.constant 0 : index
    %55 = vector.load %arg2[%c6, %c0_42] : memref<9x32xf32, #tpu.memory_space<vmem>>, vector<1x32xf32>
    %56 = vector.shape_cast %55 : vector<1x32xf32> to vector<1x1x32xf32>
    %57 = vector.broadcast %54 : vector<16x16x1xf32> to vector<16x16x32xf32>
    %58 = vector.broadcast %56 : vector<1x1x32xf32> to vector<16x16x32xf32>
    %59 = arith.mulf %57, %58 : vector<16x16x32xf32>
    %60 = arith.addf %52, %59 : vector<16x16x32xf32>
    %c0_43 = arith.constant 0 : index
    %c2_44 = arith.constant 2 : index
    %c1_45 = arith.constant 1 : index
    %c0_46 = arith.constant 0 : index
    %61 = vector.load %arg1[%c0_43, %c2_44, %c1_45, %c0_46] : memref<1x18x18x1xf32, #tpu.memory_space<vmem>>, vector<1x16x16x1xf32>
    %62 = vector.shape_cast %61 : vector<1x16x16x1xf32> to vector<16x16x1xf32>
    %c7 = arith.constant 7 : index
    %c0_47 = arith.constant 0 : index
    %63 = vector.load %arg2[%c7, %c0_47] : memref<9x32xf32, #tpu.memory_space<vmem>>, vector<1x32xf32>
    %64 = vector.shape_cast %63 : vector<1x32xf32> to vector<1x1x32xf32>
    %65 = vector.broadcast %62 : vector<16x16x1xf32> to vector<16x16x32xf32>
    %66 = vector.broadcast %64 : vector<1x1x32xf32> to vector<16x16x32xf32>
    %67 = arith.mulf %65, %66 : vector<16x16x32xf32>
    %68 = arith.addf %60, %67 : vector<16x16x32xf32>
    %c0_48 = arith.constant 0 : index
    %c2_49 = arith.constant 2 : index
    %c2_50 = arith.constant 2 : index
    %c0_51 = arith.constant 0 : index
    %69 = vector.load %arg1[%c0_48, %c2_49, %c2_50, %c0_51] : memref<1x18x18x1xf32, #tpu.memory_space<vmem>>, vector<1x16x16x1xf32>
    %70 = vector.shape_cast %69 : vector<1x16x16x1xf32> to vector<16x16x1xf32>
    %c8 = arith.constant 8 : index
    %c0_52 = arith.constant 0 : index
    %71 = vector.load %arg2[%c8, %c0_52] : memref<9x32xf32, #tpu.memory_space<vmem>>, vector<1x32xf32>
    %72 = vector.shape_cast %71 : vector<1x32xf32> to vector<1x1x32xf32>
    %73 = vector.broadcast %70 : vector<16x16x1xf32> to vector<16x16x32xf32>
    %74 = vector.broadcast %72 : vector<1x1x32xf32> to vector<16x16x32xf32>
    %75 = arith.mulf %73, %74 : vector<16x16x32xf32>
    %76 = arith.addf %68, %75 : vector<16x16x32xf32>
    %77 = vector.shape_cast %76 : vector<16x16x32xf32> to vector<256x32xf32>
    %c0_53 = arith.constant 0 : index
    %c0_54 = arith.constant 0 : index
    %78 = vector.load %arg3[%c0_53, %c0_54] : memref<1x32xf32, #tpu.memory_space<vmem>>, vector<1x32xf32>
    %79 = vector.broadcast %78 : vector<1x32xf32> to vector<256x32xf32>
    %80 = arith.addf %77, %79 : vector<256x32xf32>
    %cst_55 = arith.constant 0.000000e+00 : f32
    %81 = vector.broadcast %cst_55 : f32 to vector<256x32xf32>
    %82 = arith.maximumf %80, %81 : vector<256x32xf32>
    %83 = vector.shape_cast %82 : vector<256x32xf32> to vector<8x2x8x2x32xf32>
    %cst_56 = arith.constant dense<0xFF800000> : vector<8x8x32xf32>
    %84 = vector.multi_reduction <maximumf>, %83, %cst_56 [1, 3] : vector<8x2x8x2x32xf32> to vector<8x8x32xf32>
    %c1_57 = arith.constant 1 : index
    %c1_58 = arith.constant 1 : index
    %c0_59 = arith.constant 0 : index
    %85 = vector.load %arg15[%c1_57, %c1_58, %c0_59] : memref<10x10x32xf32, #tpu.memory_space<vmem>>, vector<8x8x32xf32>
    tpu.vector_store %arg15[%c1_57, %c1_58, %c0_59], %84 {strides = array<i32>} : memref<10x10x32xf32, #tpu.memory_space<vmem>>, vector<8x8x32xf32>,
    %c0_60 = arith.constant 0 : index
    %c0_61 = arith.constant 0 : index
    %c0_62 = arith.constant 0 : index
    %86 = vector.load %arg15[%c0_60, %c0_61, %c0_62] : memref<10x10x32xf32, #tpu.memory_space<vmem>>, vector<8x8x32xf32>
    %c0_63 = arith.constant 0 : index
    %c1_64 = arith.constant 1 : index
    %c0_65 = arith.constant 0 : index
    %87 = vector.load %arg15[%c0_63, %c1_64, %c0_65] : memref<10x10x32xf32, #tpu.memory_space<vmem>>, vector<8x8x32xf32>
    %c0_66 = arith.constant 0 : index
    %c2_67 = arith.constant 2 : index
    %c0_68 = arith.constant 0 : index
    %88 = vector.load %arg15[%c0_66, %c2_67, %c0_68] : memref<10x10x32xf32, #tpu.memory_space<vmem>>, vector<8x8x32xf32>
    %c1_69 = arith.constant 1 : index
    %c0_70 = arith.constant 0 : index
    %c0_71 = arith.constant 0 : index
    %89 = vector.load %arg15[%c1_69, %c0_70, %c0_71] : memref<10x10x32xf32, #tpu.memory_space<vmem>>, vector<8x8x32xf32>
    %c1_72 = arith.constant 1 : index
    %c1_73 = arith.constant 1 : index
    %c0_74 = arith.constant 0 : index
    %90 = vector.load %arg15[%c1_72, %c1_73, %c0_74] : memref<10x10x32xf32, #tpu.memory_space<vmem>>, vector<8x8x32xf32>
    %c1_75 = arith.constant 1 : index
    %c2_76 = arith.constant 2 : index
    %c0_77 = arith.constant 0 : index
    %91 = vector.load %arg15[%c1_75, %c2_76, %c0_77] : memref<10x10x32xf32, #tpu.memory_space<vmem>>, vector<8x8x32xf32>
    %c2_78 = arith.constant 2 : index
    %c0_79 = arith.constant 0 : index
    %c0_80 = arith.constant 0 : index
    %92 = vector.load %arg15[%c2_78, %c0_79, %c0_80] : memref<10x10x32xf32, #tpu.memory_space<vmem>>, vector<8x8x32xf32>
    %c2_81 = arith.constant 2 : index
    %c1_82 = arith.constant 1 : index
    %c0_83 = arith.constant 0 : index
    %93 = vector.load %arg15[%c2_81, %c1_82, %c0_83] : memref<10x10x32xf32, #tpu.memory_space<vmem>>, vector<8x8x32xf32>
    %c2_84 = arith.constant 2 : index
    %c2_85 = arith.constant 2 : index
    %c0_86 = arith.constant 0 : index
    %94 = vector.load %arg15[%c2_84, %c2_85, %c0_86] : memref<10x10x32xf32, #tpu.memory_space<vmem>>, vector<8x8x32xf32>
    %95 = tpu.concatenate %86, %87, %88, %89, %90, %91, %92, %93, %94 in 2 : vector<8x8x32xf32>, vector<8x8x32xf32>, vector<8x8x32xf32>, vector<8x8x32xf32>, vector<8x8x32xf32>, vector<8x8x32xf32>, vector<8x8x32xf32>, vector<8x8x32xf32>, vector<8x8x32xf32> -> vector<8x8x288xf32>
    %96 = vector.shape_cast %95 : vector<8x8x288xf32> to vector<64x288xf32>
    %97 = arith.truncf %96 : vector<64x288xf32> to vector<64x288xbf16>
    %c0_87 = arith.constant 0 : index
    %c0_88 = arith.constant 0 : index
    %98 = vector.load %arg4[%c0_87, %c0_88] : memref<288x64xbf16, #tpu.memory_space<vmem>>, vector<288x64xbf16>
    %cst_89 = arith.constant dense<0.000000e+00> : vector<64x64xf32>
    %99 = tpu.matmul %97, %98, %cst_89 {dimension_numbers = #tpu.dot_dimension_numbers<[1], [0], [0], [1], [0, 0, 1, 1], [], []>} : vector<64x288xbf16>, vector<288x64xbf16>, vector<64x64xf32> -> vector<64x64xf32>
    %c0_90 = arith.constant 0 : index
    %c0_91 = arith.constant 0 : index
    %100 = vector.load %arg5[%c0_90, %c0_91] : memref<1x64xf32, #tpu.memory_space<vmem>>, vector<1x64xf32>
    %101 = vector.broadcast %100 : vector<1x64xf32> to vector<64x64xf32>
    %102 = arith.addf %99, %101 : vector<64x64xf32>
    %cst_92 = arith.constant 0.000000e+00 : f32
    %103 = vector.broadcast %cst_92 : f32 to vector<64x64xf32>
    %104 = arith.maximumf %102, %103 : vector<64x64xf32>
    %105 = vector.shape_cast %104 : vector<64x64xf32> to vector<4x2x4x2x64xf32>
    %cst_93 = arith.constant dense<0xFF800000> : vector<4x4x64xf32>
    %106 = vector.multi_reduction <maximumf>, %105, %cst_93 [1, 3] : vector<4x2x4x2x64xf32> to vector<4x4x64xf32>
    %c1_94 = arith.constant 1 : index
    %c1_95 = arith.constant 1 : index
    %c0_96 = arith.constant 0 : index
    %107 = vector.load %arg16[%c1_94, %c1_95, %c0_96] : memref<6x6x64xf32, #tpu.memory_space<vmem>>, vector<4x4x64xf32>
    tpu.vector_store %arg16[%c1_94, %c1_95, %c0_96], %106 {strides = array<i32>} : memref<6x6x64xf32, #tpu.memory_space<vmem>>, vector<4x4x64xf32>,
    %c0_97 = arith.constant 0 : index
    %c0_98 = arith.constant 0 : index
    %c0_99 = arith.constant 0 : index
    %108 = vector.load %arg16[%c0_97, %c0_98, %c0_99] : memref<6x6x64xf32, #tpu.memory_space<vmem>>, vector<4x4x64xf32>
    %c0_100 = arith.constant 0 : index
    %c1_101 = arith.constant 1 : index
    %c0_102 = arith.constant 0 : index
    %109 = vector.load %arg16[%c0_100, %c1_101, %c0_102] : memref<6x6x64xf32, #tpu.memory_space<vmem>>, vector<4x4x64xf32>
    %c0_103 = arith.constant 0 : index
    %c2_104 = arith.constant 2 : index
    %c0_105 = arith.constant 0 : index
    %110 = vector.load %arg16[%c0_103, %c2_104, %c0_105] : memref<6x6x64xf32, #tpu.memory_space<vmem>>, vector<4x4x64xf32>
    %c1_106 = arith.constant 1 : index
    %c0_107 = arith.constant 0 : index
    %c0_108 = arith.constant 0 : index
    %111 = vector.load %arg16[%c1_106, %c0_107, %c0_108] : memref<6x6x64xf32, #tpu.memory_space<vmem>>, vector<4x4x64xf32>
    %c1_109 = arith.constant 1 : index
    %c1_110 = arith.constant 1 : index
    %c0_111 = arith.constant 0 : index
    %112 = vector.load %arg16[%c1_109, %c1_110, %c0_111] : memref<6x6x64xf32, #tpu.memory_space<vmem>>, vector<4x4x64xf32>
    %c1_112 = arith.constant 1 : index
    %c2_113 = arith.constant 2 : index
    %c0_114 = arith.constant 0 : index
    %113 = vector.load %arg16[%c1_112, %c2_113, %c0_114] : memref<6x6x64xf32, #tpu.memory_space<vmem>>, vector<4x4x64xf32>
    %c2_115 = arith.constant 2 : index
    %c0_116 = arith.constant 0 : index
    %c0_117 = arith.constant 0 : index
    %114 = vector.load %arg16[%c2_115, %c0_116, %c0_117] : memref<6x6x64xf32, #tpu.memory_space<vmem>>, vector<4x4x64xf32>
    %c2_118 = arith.constant 2 : index
    %c1_119 = arith.constant 1 : index
    %c0_120 = arith.constant 0 : index
    %115 = vector.load %arg16[%c2_118, %c1_119, %c0_120] : memref<6x6x64xf32, #tpu.memory_space<vmem>>, vector<4x4x64xf32>
    %c2_121 = arith.constant 2 : index
    %c2_122 = arith.constant 2 : index
    %c0_123 = arith.constant 0 : index
    %116 = vector.load %arg16[%c2_121, %c2_122, %c0_123] : memref<6x6x64xf32, #tpu.memory_space<vmem>>, vector<4x4x64xf32>
    %117 = tpu.concatenate %108, %109, %110, %111, %112, %113, %114, %115, %116 in 2 : vector<4x4x64xf32>, vector<4x4x64xf32>, vector<4x4x64xf32>, vector<4x4x64xf32>, vector<4x4x64xf32>, vector<4x4x64xf32>, vector<4x4x64xf32>, vector<4x4x64xf32>, vector<4x4x64xf32> -> vector<4x4x576xf32>
    %118 = vector.shape_cast %117 : vector<4x4x576xf32> to vector<16x576xf32>
    %119 = arith.truncf %118 : vector<16x576xf32> to vector<16x576xbf16>
    %c0_124 = arith.constant 0 : index
    %c0_125 = arith.constant 0 : index
    %120 = vector.load %arg6[%c0_124, %c0_125] : memref<576x128xbf16, #tpu.memory_space<vmem>>, vector<576x128xbf16>
    %cst_126 = arith.constant dense<0.000000e+00> : vector<16x128xf32>
    %121 = tpu.matmul %119, %120, %cst_126 {dimension_numbers = #tpu.dot_dimension_numbers<[1], [0], [0], [1], [0, 0, 1, 1], [], []>} : vector<16x576xbf16>, vector<576x128xbf16>, vector<16x128xf32> -> vector<16x128xf32>
    %c0_127 = arith.constant 0 : index
    %c0_128 = arith.constant 0 : index
    %122 = vector.load %arg7[%c0_127, %c0_128] : memref<1x128xf32, #tpu.memory_space<vmem>>, vector<1x128xf32>
    %123 = vector.broadcast %122 : vector<1x128xf32> to vector<16x128xf32>
    %124 = arith.addf %121, %123 : vector<16x128xf32>
    %cst_129 = arith.constant 0.000000e+00 : f32
    %125 = vector.broadcast %cst_129 : f32 to vector<16x128xf32>
    %126 = arith.maximumf %124, %125 : vector<16x128xf32>
    %127 = vector.shape_cast %126 : vector<16x128xf32> to vector<2x2x2x2x128xf32>
    %cst_130 = arith.constant dense<0xFF800000> : vector<2x2x128xf32>
    %128 = vector.multi_reduction <maximumf>, %127, %cst_130 [1, 3] : vector<2x2x2x2x128xf32> to vector<2x2x128xf32>
    %129 = vector.shape_cast %128 : vector<2x2x128xf32> to vector<4x128xf32>
    %130 = arith.truncf %129 : vector<4x128xf32> to vector<4x128xbf16>
    %c0_131 = arith.constant 0 : index
    %c0_132 = arith.constant 0 : index
    %131 = vector.load %arg8[%c0_131, %c0_132] : memref<128x256xbf16, #tpu.memory_space<vmem>>, vector<128x256xbf16>
    %cst_133 = arith.constant dense<0.000000e+00> : vector<4x256xf32>
    %132 = tpu.matmul %130, %131, %cst_133 {dimension_numbers = #tpu.dot_dimension_numbers<[1], [0], [0], [1], [0, 0, 1, 1], [], []>} : vector<4x128xbf16>, vector<128x256xbf16>, vector<4x256xf32> -> vector<4x256xf32>
    %c0_134 = arith.constant 0 : index
    %c0_135 = arith.constant 0 : index
    %133 = vector.load %arg9[%c0_134, %c0_135] : memref<1x256xf32, #tpu.memory_space<vmem>>, vector<1x256xf32>
    %134 = vector.broadcast %133 : vector<1x256xf32> to vector<4x256xf32>
    %135 = arith.addf %132, %134 : vector<4x256xf32>
    %cst_136 = arith.constant 0.000000e+00 : f32
    %136 = vector.broadcast %cst_136 : f32 to vector<4x256xf32>
    %137 = arith.maximumf %135, %136 : vector<4x256xf32>
    %138 = arith.truncf %137 : vector<4x256xf32> to vector<4x256xbf16>
    %c0_137 = arith.constant 0 : index
    %c0_138 = arith.constant 0 : index
    %139 = vector.load %arg10[%c0_137, %c0_138] : memref<256x512xbf16, #tpu.memory_space<vmem>>, vector<256x512xbf16>
    %cst_139 = arith.constant dense<0.000000e+00> : vector<4x512xf32>
    %140 = tpu.matmul %138, %139, %cst_139 {dimension_numbers = #tpu.dot_dimension_numbers<[1], [0], [0], [1], [0, 0, 1, 1], [], []>} : vector<4x256xbf16>, vector<256x512xbf16>, vector<4x512xf32> -> vector<4x512xf32>
    %c0_140 = arith.constant 0 : index
    %c0_141 = arith.constant 0 : index
    %141 = vector.load %arg11[%c0_140, %c0_141] : memref<1x512xf32, #tpu.memory_space<vmem>>, vector<1x512xf32>
    %142 = vector.broadcast %141 : vector<1x512xf32> to vector<4x512xf32>
    %143 = arith.addf %140, %142 : vector<4x512xf32>
    %cst_142 = arith.constant 0.000000e+00 : f32
    %144 = vector.broadcast %cst_142 : f32 to vector<4x512xf32>
    %145 = arith.maximumf %143, %144 : vector<4x512xf32>
    %146 = arith.truncf %145 : vector<4x512xf32> to vector<4x512xbf16>
    %c0_143 = arith.constant 0 : index
    %c0_144 = arith.constant 0 : index
    %147 = vector.load %arg12[%c0_143, %c0_144] : memref<512x192xbf16, #tpu.memory_space<vmem>>, vector<512x192xbf16>
    %cst_145 = arith.constant dense<0.000000e+00> : vector<4x192xf32>
    %148 = tpu.matmul %146, %147, %cst_145 {dimension_numbers = #tpu.dot_dimension_numbers<[1], [0], [0], [1], [0, 0, 1, 1], [], []>} : vector<4x512xbf16>, vector<512x192xbf16>, vector<4x192xf32> -> vector<4x192xf32>
    %c0_146 = arith.constant 0 : index
    %c0_147 = arith.constant 0 : index
    %149 = vector.load %arg13[%c0_146, %c0_147] : memref<1x192xf32, #tpu.memory_space<vmem>>, vector<1x192xf32>
    %150 = vector.broadcast %149 : vector<1x192xf32> to vector<4x192xf32>
    %151 = arith.addf %148, %150 : vector<4x192xf32>
    %cst_148 = arith.constant 0.000000e+00 : f32
    %152 = vector.broadcast %cst_148 : f32 to vector<4x192xf32>
    %153 = arith.maximumf %151, %152 : vector<4x192xf32>
    %c0_149 = arith.constant 0 : index
    %c0_150 = arith.constant 0 : index
    %c0_151 = arith.constant 0 : index
    %154 = vector.load %arg14[%c0_149, %c0_150, %c0_151] : memref<1x4x192xf32, #tpu.memory_space<vmem>>, vector<1x4x192xf32>
    %155 = vector.shape_cast %154 : vector<1x4x192xf32> to vector<4x192xf32>
    %156 = vector.shape_cast %153 : vector<4x192xf32> to vector<1x4x192xf32>
    tpu.vector_store %arg14[%c0_149, %c0_150, %c0_151], %156 {strides = array<i32>} : memref<1x4x192xf32, #tpu.memory_space<vmem>>, vector<1x4x192xf32>,
    return
  }
  func.func @transform_0(%arg0: i32) -> (i32, i32, i32, i32) {
    %c0_i32 = arith.constant 0 : i32
    %c0_i32_0 = arith.constant 0 : i32
    %c0_i32_1 = arith.constant 0 : i32
    %c0_i32_2 = arith.constant 0 : i32
    return %arg0, %c0_i32, %c0_i32_0, %c0_i32_1 : i32, i32, i32, i32
  }
  func.func @transform_1(%arg0: i32) -> (i32, i32) {
    %c0_i32 = arith.constant 0 : i32
    %c0_i32_0 = arith.constant 0 : i32
    %c0_i32_1 = arith.constant 0 : i32
    return %c0_i32, %c0_i32_0 : i32, i32
  }
  func.func @transform_2(%arg0: i32) -> (i32, i32) {
    %c0_i32 = arith.constant 0 : i32
    %c0_i32_0 = arith.constant 0 : i32
    %c0_i32_1 = arith.constant 0 : i32
    return %c0_i32, %c0_i32_0 : i32, i32
  }
  func.func @transform_3(%arg0: i32) -> (i32, i32) {
    %c0_i32 = arith.constant 0 : i32
    %c0_i32_0 = arith.constant 0 : i32
    %c0_i32_1 = arith.constant 0 : i32
    return %c0_i32, %c0_i32_0 : i32, i32
  }
  func.func @transform_4(%arg0: i32) -> (i32, i32) {
    %c0_i32 = arith.constant 0 : i32
    %c0_i32_0 = arith.constant 0 : i32
    %c0_i32_1 = arith.constant 0 : i32
    return %c0_i32, %c0_i32_0 : i32, i32
  }
  func.func @transform_5(%arg0: i32) -> (i32, i32) {
    %c0_i32 = arith.constant 0 : i32
    %c0_i32_0 = arith.constant 0 : i32
    %c0_i32_1 = arith.constant 0 : i32
    return %c0_i32, %c0_i32_0 : i32, i32
  }
  func.func @transform_6(%arg0: i32) -> (i32, i32) {
    %c0_i32 = arith.constant 0 : i32
    %c0_i32_0 = arith.constant 0 : i32
    %c0_i32_1 = arith.constant 0 : i32
    return %c0_i32, %c0_i32_0 : i32, i32
  }
  func.func @transform_7(%arg0: i32) -> (i32, i32) {
    %c0_i32 = arith.constant 0 : i32
    %c0_i32_0 = arith.constant 0 : i32
    %c0_i32_1 = arith.constant 0 : i32
    return %c0_i32, %c0_i32_0 : i32, i32
  }
  func.func @transform_8(%arg0: i32) -> (i32, i32) {
    %c0_i32 = arith.constant 0 : i32
    %c0_i32_0 = arith.constant 0 : i32
    %c0_i32_1 = arith.constant 0 : i32
    return %c0_i32, %c0_i32_0 : i32, i32
  }
  func.func @transform_9(%arg0: i32) -> (i32, i32) {
    %c0_i32 = arith.constant 0 : i32
    %c0_i32_0 = arith.constant 0 : i32
    %c0_i32_1 = arith.constant 0 : i32
    return %c0_i32, %c0_i32_0 : i32, i32
  }
  func.func @transform_10(%arg0: i32) -> (i32, i32) {
    %c0_i32 = arith.constant 0 : i32
    %c0_i32_0 = arith.constant 0 : i32
    %c0_i32_1 = arith.constant 0 : i32
    return %c0_i32, %c0_i32_0 : i32, i32
  }
  func.func @transform_11(%arg0: i32) -> (i32, i32) {
    %c0_i32 = arith.constant 0 : i32
    %c0_i32_0 = arith.constant 0 : i32
    %c0_i32_1 = arith.constant 0 : i32
    return %c0_i32, %c0_i32_0 : i32, i32
  }
  func.func @transform_12(%arg0: i32) -> (i32, i32) {
    %c0_i32 = arith.constant 0 : i32
    %c0_i32_0 = arith.constant 0 : i32
    %c0_i32_1 = arith.constant 0 : i32
    return %c0_i32, %c0_i32_0 : i32, i32
  }
  func.func @transform_13(%arg0: i32) -> (i32, i32, i32) {
    %c0_i32 = arith.constant 0 : i32
    %c0_i32_0 = arith.constant 0 : i32
    %c0_i32_1 = arith.constant 0 : i32
    return %arg0, %c0_i32, %c0_i32_0 : i32, i32, i32
  }
}

</mosaic_0001>

<bundles_post_ra>
// kernel: mul.18
= control target key start
LH: loop header
LB: loop body
LE: loop exit
PB: predicated region body
PF: predicated region fallthrough
CT: control target
= control target key end

     0   :  { %vm19_vm0 = vcmask 261120   ;;  %s76_s0 = inlined_call_operand.vmem [shape: f32[32,2,2,3], index: 0, kind: input, shape index: {}]   ;;  %s77_s1 = inlined_call_operand.vmem [shape: f32[32,12], index: 1, kind: output, shape index: {}]  }
   0x1   :  { %v36_v0 = vld [vmem:[%s76_s0 + $0xc] sm:$0xf]  ;;  %v37_v1 = vld [vmem:[%s76_s0 + $0x8] sm:$0xf]  ;;  %v38_v2 = vld [vmem:[%s76_s0 + $0x4] sm:$0xf] }
   0x2   :  { %7 = vst [vmem:[#allocation0 + $0x8] sm:$0xf] %v36_v0  ;;  %v16_v3 = vld [vmem:[%s76_s0] sm:$0xf] }
   0x3   :  { %11 = vst [vmem:[#allocation0 + $0x18] sm:$0xf] %v37_v1 }
   0x4   :  { %15 = vst [vmem:[#allocation0] sm:$0xf] %v38_v2 }
   0x5   :  { %17 = vst [vmem:[#allocation0 + $0x10] sm:$0xf] %v16_v3 }
   0x9   :  { %v32_v4 = vld [vmem:[#allocation0 + $0x8] sm:$0x7]  }
   0xa   :  { %v27_v5 = vld [vmem:[#allocation0 + $0x18] sm:$0x7]   ;;  %41 = vst.msk [vmem:[%s77_s1 + $0x9] sm:$0x7] %vm19_vm0, %v32_v4  }
   0xb   :  { %v22_v6 = vld [vmem:[#allocation0] sm:$0x7]   ;;  %40 = vst.msk [vmem:[%s77_s1 + $0x6] sm:$0x7] %vm19_vm0, %v27_v5  }
   0xc   :  { %v18_v7 = vld [vmem:[#allocation0 + $0x10] sm:$0x7]   ;;  %39 = vst.msk [vmem:[%s77_s1 + $0x3] sm:$0x7] %vm19_vm0, %v22_v6  }
   0xd   :  { %20 = vst.msk [vmem:[%s77_s1] sm:$0x7] %vm19_vm0, %v18_v7  }

// kernel: tile.28
= control target key start
LH: loop header
LB: loop body
LE: loop exit
PB: predicated region body
PF: predicated region fallthrough
CT: control target
= control target key end

     0   :  { %s64_s0 = inlined_call_operand.vmem [shape: f32[3], index: 0, kind: input, shape index: {}]   ;;  %s65_s1 = inlined_call_operand.vmem [shape: f32[64,3], index: 1, kind: output, shape index: {}]  }
   0x1   :  { %v4_v0 = vld [vmem:[%s64_s0] ss:$0 sm:$0xff] }
   0x2   :  { %5 = vst [vmem:[%s65_s1] sm:$0xff] %v4_v0 }
   0x3   :  { %20 = vst [vmem:[%s65_s1 + $0x8] sm:$0xff] %v4_v0 }
   0x4   :  { %21 = vst [vmem:[%s65_s1 + $0x10] sm:$0xff] %v4_v0 }
   0x5   :  { %22 = vst [vmem:[%s65_s1 + $0x18] sm:$0xff] %v4_v0 }
   0x6   :  { %23 = vst [vmem:[%s65_s1 + $0x20] sm:$0xff] %v4_v0 }
   0x7   :  { %24 = vst [vmem:[%s65_s1 + $0x28] sm:$0xff] %v4_v0 }
   0x8   :  { %25 = vst [vmem:[%s65_s1 + $0x30] sm:$0xff] %v4_v0 }
   0x9   :  { %26 = vst [vmem:[%s65_s1 + $0x38] sm:$0xff] %v4_v0 }

// kernel: tile.29
= control target key start
LH: loop header
LB: loop body
LE: loop exit
PB: predicated region body
PF: predicated region fallthrough
CT: control target
= control target key end

     0   :  { %vm9_vm0 = vcmask 15360   ;;  %s551_s12 = smov 126   ;;  %s552_s13 = smov 120   ;;  %vm3_vm1 = vcmask 23552   ;;  %vm13_vm2 = vcmask 7168   ;;  %vm16_vm3 = vcmask 1048560   ;;  %s825_s0 = inlined_call_operand.vmem [shape: f32[64,3], index: 0, kind: input, shape index: {}]   ;;  %s826_s1 = inlined_call_operand.vmem [shape: f32[1,192], index: 1, kind: output, shape index: {}]  }
   0x1   :  { %v423_v0 = vld [vmem:[%s825_s0 + $0x2a] sm:$0x1]   ;;  %v426_v3 = vld [vmem:[%s825_s0 + $0x28] sm:$0x1]   ;;  %v428_v4 = vld [vmem:[%s825_s0 + $0x26] sm:$0x1]  }
   0x2   :  { %v424_v1 = vld [vmem:[%s825_s0 + $0x2a] sm:$0x1]   ;;  %26 = vrot.lane.b32.xlu1 %v426_v3, %s552_s13  ;;  %s553_s16 = smov 114   ;;  %v425_v5 = vld [vmem:[%s825_s0 + $0x29] sm:$0x1]   ;;  %s554_s21 = smov 123  }
   0x3   :  { %v10_v2 = vsel %vm9_vm0, %v424_v1, %v423_v0  ;;  %38 = vrot.lane.b32.xlu2 %v428_v4, %s553_s16  ;;  %v427_v6 = vld [vmem:[%s825_s0 + $0x27] sm:$0x1]   ;;  %s555_s22 = smov 117   ;;  %v429_v7 = vld [vmem:[%s825_s0 + $0x25] sm:$0x1]   ;;  %s556_s25 = smov 111  }
   0x4   :  { %11 = vrot.lane.b32.xlu0 %v10_v2, %s551_s12  ;;  %v430_v8 = vld [vmem:[%s825_s0 + $0x24] sm:$0x1]   ;;  %v431_v9 = vld [vmem:[%s825_s0 + $0x23] sm:$0x1]   ;;  %s557_s30 = smov 108   ;;  %s558_s2 = smov 105  }
   0x5   :  { %v432_v10 = vld [vmem:[%s825_s0 + $0x22] sm:$0x1]   ;;  %s559_s5 = smov 102   ;;  %v433_v11 = vld [vmem:[%s825_s0 + $0x21] sm:$0x1]   ;;  %s560_s10 = smov 99  }
   0x6   :  { %v434_v12 = vld [vmem:[%s825_s0 + $0x20] sm:$0x1]   ;;  %s561_s11 = smov 96   ;;  %v435_v13 = vld [vmem:[%s825_s0 + $0x1f] sm:$0x1]   ;;  %s562_s14 = smov 93  }
   0x7   :  { %v436_v14 = vld [vmem:[%s825_s0 + $0x1e] sm:$0x1]   ;;  %v437_v15 = vld [vmem:[%s825_s0 + $0x1d] sm:$0x1]   ;;  %s563_s19 = smov 90   ;;  %s564_s20 = smov 87  }
   0x8   :  { %v438_v16 = vld [vmem:[%s825_s0 + $0x1c] sm:$0x1]   ;;  %s565_s23 = smov 84   ;;  %v439_v17 = vld [vmem:[%s825_s0 + $0x1b] sm:$0x1]   ;;  %s566_s28 = smov 81  }
   0x9   :  { %v440_v18 = vld [vmem:[%s825_s0 + $0x1a] sm:$0x1]   ;;  %s567_s29 = smov 78   ;;  %v441_v19 = vld [vmem:[%s825_s0 + $0x19] sm:$0x1]   ;;  %s568_s3 = smov 75  }
   0xa   :  { %32 = vrot.lane.b32.xlu1 %v427_v6, %s555_s22  ;;  %v442_v20 = vld [vmem:[%s825_s0 + $0x18] sm:$0x1]   ;;  %v443_v21 = vld [vmem:[%s825_s0 + $0x17] sm:$0x1]   ;;  %s569_s8 = smov 72   ;;  %s570_s9 = smov 69  }
   0xb   :  { %44 = vrot.lane.b32.xlu2 %v429_v7, %s556_s25  ;;  %v444_v22 = vld [vmem:[%s825_s0 + $0x16] sm:$0x1]   ;;  %s571_s12 = smov 66   ;;  %v445_v23 = vld [vmem:[%s825_s0 + $0x15] sm:$0x1]   ;;  %s572_s17 = smov 63  }
   0xc   :  { %20 = vrot.lane.b32.xlu0 %v425_v5, %s554_s21  ;;  %v446_v24 = vld [vmem:[%s825_s0 + $0x3f] sm:$0x1]   ;;  %s573_s18 = smov 61   ;;  %v447_v25 = vld [vmem:[%s825_s0 + $0x14] sm:$0x1]   ;;  %s574_s21 = smov 60  }
   0xd   :  { %v448_v26 = vld [vmem:[%s825_s0 + $0x3e] sm:$0x1]   ;;  %v449_v27 = vld [vmem:[%s825_s0 + $0x13] sm:$0x1]   ;;  %s575_s26 = smov 58   ;;  %s576_s27 = smov 57  }
   0xe   :  { %v450_v28 = vld [vmem:[%s825_s0 + $0x3d] sm:$0x1]   ;;  %v451_v29 = vld [vmem:[%s825_s0 + $0x12] sm:$0x1]   ;;  %v452_v30 = vld [vmem:[%s825_s0 + $0x3c] sm:$0x1]  }
   0xf   :  { %s578_s6 = smov 54   ;;  %s579_s7 = smov 52   ;;  %v453_v31 = vld [vmem:[%s825_s0 + $0x11] sm:$0x1]   ;;  %v454_v32 = vld [vmem:[%s825_s0 + $0x3b] sm:$0x1]  }
  0x10   :  { %v455_v33 = vld [vmem:[%s825_s0 + $0x10] sm:$0x1]   ;;  %s581_s15 = smov 49   ;;  %s582_s16 = smov 48   ;;  %v456_v34 = vld [vmem:[%s825_s0 + $0x3a] sm:$0x1]  }
  0x11   :  { %v2_v35 = vld [vmem:[%s825_s0] sm:$0x1]   ;;  %v457_v36 = vld [vmem:[%s825_s0 + $0xf] sm:$0x1]   ;;  %v458_v37 = vld [vmem:[%s825_s0 + $0x39] sm:$0x1]  }
  0x12   :  { %56 = vrot.lane.b32.xlu1 %v431_v9, %s558_s2  ;;  %4 = vst.msk [vmem:[#allocation0] sm:$0x1] %vm3_vm1, %v2_v35   ;;  %v459_v38 = vld [vmem:[%s825_s0 + $0xe] sm:$0x1]   ;;  %v460_v39 = vld [vmem:[%s825_s0 + $0x38] sm:$0x1]  }
  0x13   :  { %62 = vrot.lane.b32.xlu2 %v432_v10, %s559_s5  ;;  %v461_v40 = vld [vmem:[%s825_s0 + $0xd] sm:$0x1]   ;;  %v462_v42 = vld [vmem:[%s825_s0 + $0x37] sm:$0x1]   ;;  %v463_v43 = vld [vmem:[%s825_s0 + $0xc] sm:$0x1]  }
  0x14   :  { %50 = vrot.lane.b32.xlu0 %v430_v8, %s557_s30  ;;  %s577_s30 = smov 55   ;;  %v464_v44 = vld [vmem:[%s825_s0 + $0x36] sm:$0x1]   ;;  %v465_v46 = vld [vmem:[%s825_s0 + $0xb] sm:$0x1]   ;;  %s593_s24 = smov 31  }
  0x15   :  { %v466_v47 = vld [vmem:[%s825_s0 + $0x35] sm:$0x1]   ;;  %v467_v48 = vld [vmem:[%s825_s0 + $0xa] sm:$0x1]   ;;  %s594_s25 = smov 30   ;;  %s596_s4 = smov 27  }
  0x16   :  { %v468_v50 = vld [vmem:[%s825_s0 + $0x34] sm:$0x1]   ;;  %v469_v53 = vld [vmem:[%s825_s0 + $0x9] sm:$0x1]   ;;  %v470_v54 = vld [vmem:[%s825_s0 + $0x33] sm:$0x1]  }
  0x17   :  { %s597_s5 = smov 25   ;;  %vm22_vm4 = vcmask 1032152   ;;  %v471_v56 = vld [vmem:[%s825_s0 + $0x8] sm:$0x1]   ;;  %vm28_vm5 = vcmask 1007552   ;;  %vm34_vm6 = vcmask 982952  }
  0x18   :  { %vm40_vm7 = vcmask 958352   ;;  %vm46_vm8 = vcmask 933752   ;;  %v472_v59 = vld [vmem:[%s825_s0 + $0x32] sm:$0x1]   ;;  %v473_v60 = vld [vmem:[%s825_s0 + $0x7] sm:$0x1]  }
  0x19   :  { %s599_s13 = smov 22   ;;  %vm52_vm9 = vcmask 909152   ;;  %v474_v62 = vld [vmem:[%s825_s0 + $0x31] sm:$0x1]   ;;  %vm58_vm10 = vcmask 884552   ;;  %vm64_vm11 = vcmask 859952  }
  0x1a   :  { %74 = vrot.lane.b32.xlu1 %v434_v12, %s561_s11  ;;  %v475_v1 = vld [vmem:[%s825_s0 + $0x6] sm:$0x1]   ;;  %v476_v2 = vld [vmem:[%s825_s0 + $0x30] sm:$0x1]   ;;  %s602_s22 = smov 18   ;;  %vm70_vm12 = vcmask 835352  }
  0x1b   :  { %80 = vrot.lane.b32.xlu2 %v435_v13, %s562_s14  ;;  %s600_s14 = smov 21   ;;  %v477_v4 = vld [vmem:[%s825_s0 + $0x5] sm:$0x1]   ;;  %vm76_vm13 = vcmask 810752   ;;  %vm82_vm14 = vcmask 786152   ;;  %s605_s2 = smov 13  }
  0x1c   :  { %68 = vrot.lane.b32.xlu0 %v433_v11, %s560_s10  ;;  %s580_s10 = smov 51   ;;  %v478_v7 = vld [vmem:[%s825_s0 + $0x2f] sm:$0x1]   ;;  %v479_v8 = vld [vmem:[%s825_s0 + $0x4] sm:$0x1]   ;;  %vm88_vm15 = vcmask 761552  }
  0x1d   :  { %v480_v10 = vld [vmem:[%s825_s0 + $0x2e] sm:$0x1]   ;;  %vm94_vm0 = vcmask 736952   ;;  %vm100_vm1 = vcmask 712352   ;;  %v481_v13 = vld [vmem:[%s825_s0 + $0x3] sm:$0x1]  }
  0x1e   :  { %s608_s11 = smov 9  }
  0x22   :  { %92 = vrot.lane.b32.xlu1 %v437_v15, %s564_s20  ;;  %s611_s20 = smov 4  }
  0x23   :  { %98 = vrot.lane.b32.xlu2 %v438_v16, %s565_s23  ;;  %s603_s23 = smov 16   ;;  %v483_v16 = vld [vmem:[%s825_s0 + $0x2] sm:$0x1]  }
  0x24   :  { %86 = vrot.lane.b32.xlu0 %v436_v14, %s563_s19  ;;  %s592_s19 = smov 33   ;;  %v482_v14 = vld [vmem:[%s825_s0 + $0x2d] sm:$0x1]  }
  0x2a   :  { %110 = vrot.lane.b32.xlu1 %v440_v18, %s567_s29 }
  0x2b   :  { %116 = vrot.lane.b32.xlu2 %v441_v19, %s568_s3  ;;  %s606_s3 = smov 12   ;;  %v484_v19 = vld [vmem:[%s825_s0 + $0x2c] sm:$0x1]  }
  0x2c   :  { %104 = vrot.lane.b32.xlu0 %v439_v17, %s566_s28  ;;  %s595_s28 = smov 28  }
  0x32   :  { %128 = vrot.lane.b32.xlu1 %v443_v21, %s570_s9 }
  0x33   :  { %134 = vrot.lane.b32.xlu2 %v444_v22, %s571_s12  ;;  %s609_s12 = smov 7   ;;  %v486_v22 = vld [vmem:[%s825_s0 + $0x2b] sm:$0x1]  }
  0x34   :  { %122 = vrot.lane.b32.xlu0 %v442_v20, %s569_s8  ;;  %s598_s8 = smov 24   ;;  %v485_v20 = vld [vmem:[%s825_s0 + $0x1] sm:$0x1]   ;;  %s613_s0 = smov 1  }
  0x3a   :  { %146 = vrot.lane.b32.xlu1 %v446_v24, %s573_s18 }
  0x3b   :  { %153 = vrot.lane.b32.xlu2 %v447_v25, %s574_s21  ;;  %s583_s21 = smov 46  }
  0x3c   :  { %140 = vrot.lane.b32.xlu0 %v445_v23, %s572_s17  ;;  %s601_s17 = smov 19  }
  0x42   :  { %166 = vrot.lane.b32.xlu1 %v449_v27, %s576_s27  ;;  %s585_s27 = smov 43  }
  0x43   :  { %172 = vrot.lane.b32.xlu2 %v450_v28, %s577_s30  ;;  %s586_s30 = smov 42  }
  0x44   :  { %159 = vrot.lane.b32.xlu0 %v448_v26, %s575_s26  ;;  %s584_s26 = smov 45  }
  0x4a   :  { %185 = vrot.lane.b32.xlu1 %v452_v30, %s579_s7  ;;  %s588_s7 = smov 39  }
  0x4b   :  { %192 = vrot.lane.b32.xlu2 %v453_v31, %s580_s10  ;;  %s589_s10 = smov 37  }
  0x4c   :  { %179 = vrot.lane.b32.xlu0 %v451_v29, %s578_s6  ;;  %s587_s6 = smov 40  }
  0x52   :  { %205 = vrot.lane.b32.xlu1 %v455_v33, %s582_s16  ;;  %s591_s16 = smov 34  }
  0x53   :  { %211 = vrot.lane.b32.xlu2 %v456_v34, %s583_s21  ;;  %s612_s21 = smov 3  }
  0x54   :  { %198 = vrot.lane.b32.xlu0 %v454_v32, %s581_s15  ;;  %s590_s15 = smov 36  }
  0x5a   :  { %224 = vrot.lane.b32.xlu1 %v458_v37, %s585_s27 }
  0x5b   :  { %231 = vrot.lane.b32.xlu2 %v459_v38, %s586_s30 }
  0x5c   :  { %218 = vrot.lane.b32.xlu0 %v457_v36, %s584_s26  ;;  %s604_s26 = smov 15  }
  0x5d   :  { %v39_v41 = vpop.permute.xlu2 %38  }
  0x62   :  { %244 = vrot.lane.b32.xlu1 %v461_v40, %s588_s7 }
  0x63   :  { %250 = vrot.lane.b32.xlu2 %v462_v42, %s589_s10 }
  0x64   :  { %237 = vrot.lane.b32.xlu0 %v460_v39, %s587_s6  ;;  %s607_s6 = smov 10  }
  0x65   :  { %v45_v45 = vpop.permute.xlu2 %44  }
  0x6a   :  { %263 = vrot.lane.b32.xlu1 %v464_v44, %s591_s16 }
  0x6b   :  { %270 = vrot.lane.b32.xlu2 %v465_v46, %s592_s19 }
  0x6c   :  { %257 = vrot.lane.b32.xlu0 %v463_v43, %s590_s15  ;;  %s610_s15 = smov 6  }
  0x6d   :  { %v63_v49 = vpop.permute.xlu2 %62  }
  0x72   :  { %283 = vrot.lane.b32.xlu1 %v467_v48, %s594_s25 }
  0x73   :  { %289 = vrot.lane.b32.xlu2 %v468_v50, %s595_s28 }
  0x74   :  { %276 = vrot.lane.b32.xlu0 %v466_v47, %s593_s24  ;;  %v27_v52 = vpop.permute.xlu1 %26  }
  0x75   :  { %v81_v55 = vpop.permute.xlu2 %80  }
  0x76   :  { %v12_v51 = vpop.permute.xlu0 %11  }
  0x77   :  { %15 = vst.msk [vmem:[#allocation0 + $0x8] sm:$0x1] %vm13_vm2, %v12_v51   ;;  %vm106_vm2 = vcmask 687752  }
  0x78   :  { %17 = vst.msk [vmem:[#allocation0] sm:$0x1] %vm16_vm3, %v12_v51   ;;  %vm112_vm3 = vcmask 663152  }
  0x7a   :  { %302 = vrot.lane.b32.xlu1 %v470_v54, %s597_s5 }
  0x7b   :  { %309 = vrot.lane.b32.xlu2 %v471_v56, %s598_s8 }
  0x7c   :  { %296 = vrot.lane.b32.xlu0 %v469_v53, %s596_s4  ;;  %v33_v58 = vpop.permute.xlu1 %32  }
  0x7d   :  { %v99_v61 = vpop.permute.xlu2 %98  }
  0x7e   :  { %v21_v57 = vpop.permute.xlu0 %20  }
  0x7f   :  { %23 = vst.msk [vmem:[#allocation0] sm:$0x1] %vm22_vm4, %v21_v57   ;;  %vm118_vm4 = vcmask 638552  }
  0x80   :  { %29 = vst.msk [vmem:[#allocation0] sm:$0x1] %vm28_vm5, %v27_v52   ;;  %vm124_vm5 = vcmask 613952  }
  0x81   :  { %35 = vst.msk [vmem:[#allocation0] sm:$0x1] %vm34_vm6, %v33_v58   ;;  %vm130_vm6 = vcmask 589352  }
  0x82   :  { %41 = vst.msk [vmem:[#allocation0] sm:$0x1] %vm40_vm7, %v39_v41   ;;  %322 = vrot.lane.b32.xlu1 %v473_v60, %s600_s14  ;;  %vm136_vm7 = vcmask 564752  }
  0x83   :  { %47 = vst.msk [vmem:[#allocation0] sm:$0x1] %vm46_vm8, %v45_v45   ;;  %328 = vrot.lane.b32.xlu2 %v474_v62, %s601_s17  ;;  %vm142_vm8 = vcmask 540152  }
  0x84   :  { %315 = vrot.lane.b32.xlu0 %v472_v59, %s599_s13  ;;  %v57_v0 = vpop.permute.xlu1 %56  }
  0x85   :  { %v117_v3 = vpop.permute.xlu2 %116  }
  0x86   :  { %v51_v63 = vpop.permute.xlu0 %50  }
  0x87   :  { %53 = vst.msk [vmem:[#allocation0] sm:$0x1] %vm52_vm9, %v51_v63   ;;  %vm155_vm9 = vcmask 515552  }
  0x88   :  { %59 = vst.msk [vmem:[#allocation0] sm:$0x1] %vm58_vm10, %v57_v0   ;;  %vm148_vm10 = vcmask 523752  }
  0x89   :  { %65 = vst.msk [vmem:[#allocation0] sm:$0x1] %vm64_vm11, %v63_v49   ;;  %vm161_vm11 = vcmask 499152  }
  0x8a   :  { %341 = vrot.lane.b32.xlu1 %v476_v2, %s603_s23 }
  0x8b   :  { %348 = vrot.lane.b32.xlu2 %v477_v4, %s604_s26 }
  0x8c   :  { %335 = vrot.lane.b32.xlu0 %v475_v1, %s602_s22  ;;  %v75_v6 = vpop.permute.xlu1 %74  }
  0x8d   :  { %v135_v9 = vpop.permute.xlu2 %134  }
  0x8e   :  { %v69_v5 = vpop.permute.xlu0 %68  }
  0x8f   :  { %71 = vst.msk [vmem:[#allocation0] sm:$0x1] %vm70_vm12, %v69_v5   ;;  %vm174_vm12 = vcmask 474552  }
  0x90   :  { %77 = vst.msk [vmem:[#allocation0] sm:$0x1] %vm76_vm13, %v75_v6   ;;  %vm168_vm13 = vcmask 490952  }
  0x91   :  { %83 = vst.msk [vmem:[#allocation0] sm:$0x1] %vm82_vm14, %v81_v55   ;;  %vm181_vm14 = vcmask 466352  }
  0x92   :  { %361 = vrot.lane.b32.xlu1 %v479_v8, %s606_s3 }
  0x93   :  { %367 = vrot.lane.b32.xlu2 %v480_v10, %s607_s6 }
  0x94   :  { %354 = vrot.lane.b32.xlu0 %v478_v7, %s605_s2  ;;  %v93_v12 = vpop.permute.xlu1 %92  }
  0x95   :  { %v154_v15 = vpop.permute.xlu2 %153  }
  0x96   :  { %v87_v11 = vpop.permute.xlu0 %86  }
  0x97   :  { %89 = vst.msk [vmem:[#allocation0] sm:$0x1] %vm88_vm15, %v87_v11   ;;  %vm194_vm15 = vcmask 441752  }
  0x98   :  { %95 = vst.msk [vmem:[#allocation0] sm:$0x1] %vm94_vm0, %v93_v12   ;;  %vm187_vm0 = vcmask 449952  }
  0x99   :  { %101 = vst.msk [vmem:[#allocation0] sm:$0x1] %vm100_vm1, %v99_v61   ;;  %vm200_vm1 = vcmask 425352  }
  0x9a   :  { %380 = vrot.lane.b32.xlu1 %v482_v14, %s609_s12 }
  0x9b   :  { %387 = vrot.lane.b32.xlu2 %v483_v16, %s610_s15 }
  0x9c   :  { %374 = vrot.lane.b32.xlu0 %v481_v13, %s608_s11  ;;  %v111_v18 = vpop.permute.xlu1 %110  }
  0x9d   :  { %v173_v21 = vpop.permute.xlu2 %172  }
  0x9e   :  { %v105_v17 = vpop.permute.xlu0 %104  }
  0x9f   :  { %107 = vst.msk [vmem:[#allocation0] sm:$0x1] %vm106_vm2, %v105_v17   ;;  %vm213_vm2 = vcmask 400752  }
  0xa0   :  { %113 = vst.msk [vmem:[#allocation0] sm:$0x1] %vm112_vm3, %v111_v18   ;;  %vm207_vm3 = vcmask 417152  }
  0xa1   :  { %119 = vst.msk [vmem:[#allocation0] sm:$0x1] %vm118_vm4, %v117_v3   ;;  %vm220_vm4 = vcmask 392552  }
  0xa2   :  { %400 = vrot.lane.b32.xlu1 %v485_v20, %s612_s21 }
  0xa3   :  { %406 = vrot.lane.b32.xlu2 %v486_v22, %s613_s0 }
  0xa4   :  { %393 = vrot.lane.b32.xlu0 %v484_v19, %s611_s20  ;;  %v129_v24 = vpop.permute.xlu1 %128  }
  0xa5   :  { %v193_v25 = vpop.permute.xlu2 %192  }
  0xa6   :  { %v123_v23 = vpop.permute.xlu0 %122  }
  0xa7   :  { %125 = vst.msk [vmem:[#allocation0] sm:$0x1] %vm124_vm5, %v123_v23   ;;  %vm233_vm5 = vcmask 367952  }
  0xa8   :  { %131 = vst.msk [vmem:[#allocation0] sm:$0x1] %vm130_vm6, %v129_v24   ;;  %vm226_vm6 = vcmask 376152  }
  0xa9   :  { %137 = vst.msk [vmem:[#allocation0] sm:$0x1] %vm136_vm7, %v135_v9   ;;  %vm239_vm7 = vcmask 351552  }
  0xac   :  { %v147_v27 = vpop.permute.xlu1 %146  }
  0xad   :  { %150 = vst.msk [vmem:[#allocation0 + $0x8] sm:$0x1] %vm148_vm10, %v147_v27   ;;  %v212_v28 = vpop.permute.xlu2 %211   ;;  %vm259_vm10 = vcmask 318752  }
  0xae   :  { %v141_v26 = vpop.permute.xlu0 %140  }
  0xaf   :  { %143 = vst.msk [vmem:[#allocation0] sm:$0x1] %vm142_vm8, %v141_v26   ;;  %vm252_vm8 = vcmask 326952  }
  0xb0   :  { %156 = vst.msk [vmem:[#allocation0] sm:$0x1] %vm155_vm9, %v154_v15   ;;  %vm246_vm9 = vcmask 343352  }
  0xb4   :  { %v167_v30 = vpop.permute.xlu1 %166  }
  0xb5   :  { %169 = vst.msk [vmem:[#allocation0] sm:$0x1] %vm168_vm13, %v167_v30   ;;  %v232_v31 = vpop.permute.xlu2 %231   ;;  %vm278_vm13 = vcmask 277752  }
  0xb6   :  { %v160_v29 = vpop.permute.xlu0 %159  }
  0xb7   :  { %163 = vst.msk [vmem:[#allocation0 + $0x8] sm:$0x1] %vm161_vm11, %v160_v29   ;;  %vm272_vm11 = vcmask 294152  }
  0xb8   :  { %176 = vst.msk [vmem:[#allocation0 + $0x8] sm:$0x1] %vm174_vm12, %v173_v21   ;;  %vm265_vm12 = vcmask 302352  }
  0xbc   :  { %v186_v33 = vpop.permute.xlu1 %185  }
  0xbd   :  { %189 = vst.msk [vmem:[#allocation0 + $0x8] sm:$0x1] %vm187_vm0, %v186_v33   ;;  %v251_v34 = vpop.permute.xlu2 %250   ;;  %vm298_vm0 = vcmask 244952  }
  0xbe   :  { %v180_v32 = vpop.permute.xlu0 %179  }
  0xbf   :  { %182 = vst.msk [vmem:[#allocation0] sm:$0x1] %vm181_vm14, %v180_v32   ;;  %vm291_vm14 = vcmask 253152  }
  0xc0   :  { %195 = vst.msk [vmem:[#allocation0] sm:$0x1] %vm194_vm15, %v193_v25   ;;  %vm285_vm15 = vcmask 269552  }
  0xc4   :  { %v206_v36 = vpop.permute.xlu1 %205  }
  0xc5   :  { %208 = vst.msk [vmem:[#allocation0] sm:$0x1] %vm207_vm3, %v206_v36   ;;  %v271_v37 = vpop.permute.xlu2 %270   ;;  %vm317_vm3 = vcmask 203952  }
  0xc6   :  { %v199_v35 = vpop.permute.xlu0 %198  }
  0xc7   :  { %202 = vst.msk [vmem:[#allocation0 + $0x8] sm:$0x1] %vm200_vm1, %v199_v35   ;;  %vm311_vm1 = vcmask 220352  }
  0xc8   :  { %215 = vst.msk [vmem:[#allocation0 + $0x8] sm:$0x1] %vm213_vm2, %v212_v28   ;;  %vm304_vm2 = vcmask 228552  }
  0xcc   :  { %v225_v39 = vpop.permute.xlu1 %224  }
  0xcd   :  { %228 = vst.msk [vmem:[#allocation0 + $0x8] sm:$0x1] %vm226_vm6, %v225_v39   ;;  %v290_v40 = vpop.permute.xlu2 %289   ;;  %vm337_vm6 = vcmask 171152  }
  0xce   :  { %v219_v38 = vpop.permute.xlu0 %218  }
  0xcf   :  { %221 = vst.msk [vmem:[#allocation0] sm:$0x1] %vm220_vm4, %v219_v38   ;;  %vm330_vm4 = vcmask 179352  }
  0xd0   :  { %234 = vst.msk [vmem:[#allocation0] sm:$0x1] %vm233_vm5, %v232_v31   ;;  %vm324_vm5 = vcmask 195752  }
  0xd4   :  { %v245_v42 = vpop.permute.xlu1 %244  }
  0xd5   :  { %247 = vst.msk [vmem:[#allocation0] sm:$0x1] %vm246_vm9, %v245_v42   ;;  %v310_v43 = vpop.permute.xlu2 %309   ;;  %vm356_vm9 = vcmask 130152  }
  0xd6   :  { %v238_v41 = vpop.permute.xlu0 %237  }
  0xd7   :  { %241 = vst.msk [vmem:[#allocation0 + $0x8] sm:$0x1] %vm239_vm7, %v238_v41   ;;  %vm350_vm7 = vcmask 146552  }
  0xd8   :  { %254 = vst.msk [vmem:[#allocation0 + $0x8] sm:$0x1] %vm252_vm8, %v251_v34   ;;  %vm343_vm8 = vcmask 154752  }
  0xdc   :  { %v264_v45 = vpop.permute.xlu1 %263  }
  0xdd   :  { %267 = vst.msk [vmem:[#allocation0 + $0x8] sm:$0x1] %vm265_vm12, %v264_v45   ;;  %v329_v46 = vpop.permute.xlu2 %328   ;;  %vm376_vm12 = vcmask 97352  }
  0xde   :  { %v258_v44 = vpop.permute.xlu0 %257  }
  0xdf   :  { %260 = vst.msk [vmem:[#allocation0] sm:$0x1] %vm259_vm10, %v258_v44   ;;  %vm369_vm10 = vcmask 105552  }
  0xe0   :  { %273 = vst.msk [vmem:[#allocation0] sm:$0x1] %vm272_vm11, %v271_v37   ;;  %vm363_vm11 = vcmask 121952  }
  0xe4   :  { %v284_v48 = vpop.permute.xlu1 %283  }
  0xe5   :  { %286 = vst.msk [vmem:[#allocation0] sm:$0x1] %vm285_vm15, %v284_v48   ;;  %v349_v49 = vpop.permute.xlu2 %348   ;;  %vm395_vm15 = vcmask 56352  }
  0xe6   :  { %v277_v47 = vpop.permute.xlu0 %276  }
  0xe7   :  { %280 = vst.msk [vmem:[#allocation0 + $0x8] sm:$0x1] %vm278_vm13, %v277_v47   ;;  %vm389_vm13 = vcmask 72752  }
  0xe8   :  { %293 = vst.msk [vmem:[#allocation0 + $0x8] sm:$0x1] %vm291_vm14, %v290_v40   ;;  %vm382_vm14 = vcmask 80952  }
  0xec   :  { %v303_v51 = vpop.permute.xlu1 %302  }
  0xed   :  { %306 = vst.msk [vmem:[#allocation0 + $0x8] sm:$0x1] %vm304_vm2, %v303_v51   ;;  %v368_v52 = vpop.permute.xlu2 %367  }
  0xee   :  { %v297_v50 = vpop.permute.xlu0 %296  }
  0xef   :  { %299 = vst.msk [vmem:[#allocation0] sm:$0x1] %vm298_vm0, %v297_v50   ;;  %vm408_vm0 = vcmask 31752  }
  0xf0   :  { %312 = vst.msk [vmem:[#allocation0] sm:$0x1] %vm311_vm1, %v310_v43   ;;  %vm402_vm1 = vcmask 48152  }
  0xf4   :  { %v323_v54 = vpop.permute.xlu1 %322  }
  0xf5   :  { %325 = vst.msk [vmem:[#allocation0] sm:$0x1] %vm324_vm5, %v323_v54   ;;  %v388_v55 = vpop.permute.xlu2 %387  }
  0xf6   :  { %v316_v53 = vpop.permute.xlu0 %315  }
  0xf7   :  { %319 = vst.msk [vmem:[#allocation0 + $0x8] sm:$0x1] %vm317_vm3, %v316_v53  }
  0xf8   :  { %332 = vst.msk [vmem:[#allocation0 + $0x8] sm:$0x1] %vm330_vm4, %v329_v46  }
  0xfc   :  { %v342_v57 = vpop.permute.xlu1 %341  }
  0xfd   :  { %345 = vst.msk [vmem:[#allocation0 + $0x8] sm:$0x1] %vm343_vm8, %v342_v57   ;;  %v407_v58 = vpop.permute.xlu2 %406  }
  0xfe   :  { %v336_v56 = vpop.permute.xlu0 %335  }
  0xff   :  { %338 = vst.msk [vmem:[#allocation0] sm:$0x1] %vm337_vm6, %v336_v56  }
 0x100   :  { %351 = vst.msk [vmem:[#allocation0] sm:$0x1] %vm350_vm7, %v349_v49  }
 0x104   :  { %v362_v60 = vpop.permute.xlu1 %361  }
 0x105   :  { %364 = vst.msk [vmem:[#allocation0] sm:$0x1] %vm363_vm11, %v362_v60  }
 0x106   :  { %v355_v59 = vpop.permute.xlu0 %354  }
 0x107   :  { %358 = vst.msk [vmem:[#allocation0 + $0x8] sm:$0x1] %vm356_vm9, %v355_v59  }
 0x108   :  { %371 = vst.msk [vmem:[#allocation0 + $0x8] sm:$0x1] %vm369_vm10, %v368_v52  }
 0x10c   :  { %v381_v62 = vpop.permute.xlu1 %380  }
 0x10d   :  { %384 = vst.msk [vmem:[#allocation0 + $0x8] sm:$0x1] %vm382_vm14, %v381_v62  }
 0x10e   :  { %v375_v61 = vpop.permute.xlu0 %374  }
 0x10f   :  { %377 = vst.msk [vmem:[#allocation0] sm:$0x1] %vm376_vm12, %v375_v61  }
 0x110   :  { %390 = vst.msk [vmem:[#allocation0] sm:$0x1] %vm389_vm13, %v388_v55  }
 0x114   :  { %v401_v0 = vpop.permute.xlu1 %400  }
 0x115   :  { %403 = vst.msk [vmem:[#allocation0] sm:$0x1] %vm402_vm1, %v401_v0  }
 0x116   :  { %v394_v63 = vpop.permute.xlu0 %393  }
 0x117   :  { %397 = vst.msk [vmem:[#allocation0 + $0x8] sm:$0x1] %vm395_vm15, %v394_v63  }
 0x118   :  { %410 = vst.msk [vmem:[#allocation0 + $0x8] sm:$0x1] %vm408_vm0, %v407_v58  }
 0x11c   :  { %v413_v2 = vld [vmem:[#allocation0] sm:$0x1] }
 0x11d   :  { %416 = vst [vmem:[%s826_s1] sm:$0x1] %v413_v2 }
 0x11f   :  { %v418_v1 = vld [vmem:[#allocation0 + $0x8] sm:$0x1] }
 0x120   :  { %487 = vst [vmem:[%s826_s1 + $0x1] sm:$0x1] %v418_v1 }

// kernel: tile.23
= control target key start
LH: loop header
LB: loop body
LE: loop exit
PB: predicated region body
PF: predicated region fallthrough
CT: control target
= control target key end

     0   :  { %s28_s0 = inlined_call_operand.vmem [shape: f32[32], index: 0, kind: input, shape index: {}]   ;;  %s29_s1 = inlined_call_operand.vmem [shape: f32[16,32], index: 1, kind: output, shape index: {}]  }
   0x1   :  { %v4_v0 = vld [vmem:[%s28_s0] ss:$0 sm:$0xff] }
   0x2   :  { %5 = vst [vmem:[%s29_s1] sm:$0xff] %v4_v0 }
   0x3   :  { %8 = vst [vmem:[%s29_s1 + $0x8] sm:$0xff] %v4_v0 }

// kernel: tile.24
= control target key start
LH: loop header
LB: loop body
LE: loop exit
PB: predicated region body
PF: predicated region fallthrough
CT: control target
= control target key end

     0   :  { %s56_s8 = smov 96   ;;  %s57_s11 = smov 32   ;;  %vm3_vm0 = vcmask 261120   ;;  %vm9_vm1 = vcmask 1048320   ;;  %vm15_vm2 = vcmask 785920   ;;  %vm21_vm3 = vcmask 523520   ;;  %s93_s0 = inlined_call_operand.vmem [shape: f32[16,32], index: 0, kind: input, shape index: {}]   ;;  %s94_s1 = inlined_call_operand.vmem [shape: f32[1,512], index: 1, kind: output, shape index: {}]  }
   0x1   :  { %v47_v0 = vld [vmem:[%s93_s0 + $0x3] ss:$4 sm:$0xf]   ;;  %v49_v1 = vld [vmem:[%s93_s0 + $0x1] ss:$4 sm:$0xf]  }
   0x2   :  { %7 = vrot.lane.b32.xlu0 %v47_v0, %s56_s8  ;;  %19 = vrot.lane.b32.xlu1 %v49_v1, %s57_s11  ;;  %v48_v2 = vld [vmem:[%s93_s0 + $0x2] ss:$4 sm:$0xf]   ;;  %s58_s14 = smov 64  }
   0x3   :  { %v2_v3 = vld [vmem:[%s93_s0] ss:$4 sm:$0xf]  }
   0x4   :  { %4 = vst.msk [vmem:[#allocation0] ss:$8 sm:$0xf] %vm3_vm0, %v2_v3  }
   0xa   :  { %13 = vrot.lane.b32.xlu0 %v48_v2, %s58_s14 }
  0x74   :  { %v8_v4 = vpop.permute.xlu0 %7   ;;  %v20_v5 = vpop.permute.xlu1 %19  }
  0x75   :  { %10 = vst.msk [vmem:[#allocation0] ss:$8 sm:$0xf] %vm9_vm1, %v8_v4  }
  0x7c   :  { %v14_v6 = vpop.permute.xlu0 %13  }
  0x7d   :  { %16 = vst.msk [vmem:[#allocation0] ss:$8 sm:$0xf] %vm15_vm2, %v14_v6  }
  0x7e   :  { %22 = vst.msk [vmem:[#allocation0] ss:$8 sm:$0xf] %vm21_vm3, %v20_v5  }
  0x85   :  { %v25_v7 = vld [vmem:[#allocation0] sm:$0x1]  ;;  %v30_v8 = vld [vmem:[#allocation0 + $0x8] sm:$0x1]  ;;  %v36_v9 = vld [vmem:[#allocation0 + $0x10] sm:$0x1] }
  0x86   :  { %28 = vst [vmem:[%s94_s1] sm:$0x1] %v25_v7  ;;  %v42_v10 = vld [vmem:[#allocation0 + $0x18] sm:$0x1] }
  0x87   :  { %50 = vst [vmem:[%s94_s1 + $0x1] sm:$0x1] %v30_v8 }
  0x88   :  { %51 = vst [vmem:[%s94_s1 + $0x2] sm:$0x1] %v36_v9 }
  0x89   :  { %52 = vst [vmem:[%s94_s1 + $0x3] sm:$0x1] %v42_v10 }

// kernel: tile.18
= control target key start
LH: loop header
LB: loop body
LE: loop exit
PB: predicated region body
PF: predicated region fallthrough
CT: control target
= control target key end

     0   :  { %s22_s0 = inlined_call_operand.vmem [shape: f32[64], index: 0, kind: input, shape index: {}]   ;;  %s23_s1 = inlined_call_operand.vmem [shape: f32[4,64], index: 1, kind: output, shape index: {}]  }
   0x1   :  { %v4_v0 = vld [vmem:[%s22_s0] ss:$0 sm:$0xff] }
   0x2   :  { %5 = vst [vmem:[%s23_s1] sm:$0xf] %v4_v0 }

// kernel: tile.19
= control target key start
LH: loop header
LB: loop body
LE: loop exit
PB: predicated region body
PF: predicated region fallthrough
CT: control target
= control target key end

     0   :  { %s6_s8 = smov 3  ;;  %vm8_vm0 = vcmask 523264   ;;  %s31_s9 = smov 64   ;;  %vm15_vm1 = vcmask 1048064   ;;  %s51_s0 = inlined_call_operand.vmem [shape: f32[4,64], index: 0, kind: input, shape index: {}]   ;;  %s52_s1 = inlined_call_operand.vmem [shape: f32[1,256], index: 1, kind: output, shape index: {}]  }
   0x1   :  { %v4_v0 = vld [vmem:[%s51_s0] sm:$0xf]  ;;  %s11_s0 = smov 3 }
   0x2   :  { %5 = vst [vmem:[#allocation1] sm:$0xf] %v4_v0 }
   0x9   :  { %v12_v1 = vld [vmem:[#allocation1 + $0x1] ss:$2 sm:%s11_s0]   ;;  %v7_v2 = vld [vmem:[#allocation1] ss:$2 sm:%s6_s8]  }
   0xa   :  { %13 = vrot.lane.b32.xlu0 %v12_v1, %s31_s9  ;;  %9 = vst.msk [vmem:[#allocation0] ss:$8 sm:$0x3] %vm8_vm0, %v7_v2  }
  0x7c   :  { %v14_v3 = vpop.permute.xlu0 %13  }
  0x7d   :  { %16 = vst.msk [vmem:[#allocation0] ss:$8 sm:$0x3] %vm15_vm1, %v14_v3  }
  0x84   :  { %v19_v4 = vld [vmem:[#allocation0] sm:$0x1]  ;;  %v24_v5 = vld [vmem:[#allocation0 + $0x8] sm:$0x1] }
  0x85   :  { %22 = vst [vmem:[%s52_s1] sm:$0x1] %v19_v4 }
  0x86   :  { %29 = vst [vmem:[%s52_s1 + $0x1] sm:$0x1] %v24_v5 }

// kernel: autoencoder_forward.1
= control target key start
LH: loop header
LB: loop body
LE: loop exit
PB: predicated region body
PF: predicated region fallthrough
CT: control target
= control target key end

     0   :  { %s7908_s25 = smov 0   ;;  %s11601_s0 = inlined_call_operand.vmem [shape: f32[2,18,18,1], index: 0, kind: input, shape index: {}]   ;;  %s11602_s1 = inlined_call_operand.vmem [shape: f32[9,32], index: 1, kind: input, shape index: {}]   ;;  %s11603_s2 = inlined_call_operand.vmem [shape: f32[1,32], index: 2, kind: input, shape index: {}]   ;;  %s11604_s3 = inlined_call_operand.vmem [shape: bf16[288,64], index: 3, kind: input, shape index: {}]   ;;  %s11605_s4 = inlined_call_operand.vmem [shape: f32[1,64], index: 4, kind: input, shape index: {}]   ;;  %s11606_s5 = inlined_call_operand.vmem [shape: bf16[576,128], index: 5, kind: input, shape index: {}]   ;;  %s11607_s6 = inlined_call_operand.vmem [shape: f32[1,128], index: 6, kind: input, shape index: {}]   ;;  %s11608_s7 = inlined_call_operand.vmem [shape: bf16[128,256], index: 7, kind: input, shape index: {}]   ;;  %s11609_s8 = inlined_call_operand.vmem [shape: f32[1,256], index: 8, kind: input, shape index: {}]   ;;  %s11610_s9 = inlined_call_operand.vmem [shape: bf16[256,512], index: 9, kind: input, shape index: {}]   ;;  %s11611_s10 = inlined_call_operand.vmem [shape: f32[1,512], index: 10, kind: input, shape index: {}]   ;;  %s11612_s11 = inlined_call_operand.vmem [shape: bf16[512,192], index: 11, kind: input, shape index: {}]   ;;  %s11613_s12 = inlined_call_operand.vmem [shape: f32[1,192], index: 12, kind: input, shape index: {}]   ;;  %s11614_s13 = inlined_call_operand.vmem [shape: f32[2,4,192], index: 13, kind: output, shape index: {}]  }
   0x1 LB: > { %s6458_s26 = sadd.s32 4294967295, %s7831_s25   ;;  %p6462_p0 = scmp.ge.s32.totalorder %s7831_s25, 1  ;;  %s7831_s25 = sphi %s7908_s25, %s23_s25  }
   0x2   : > { %p387_p1 = scmp.lt.s32.totalorder %s7831_s25, 3 }
   0x4   : > { %p388_p2 = pnand %p6462_p0, %p387_p1 }
   0x6   : > { %391 = sbr.rel (%p388_p2) target bundleno = 2014 (0x7de), region = 72 }
   0xb   : > { %p431_p3 = scmp.lt.s32.totalorder %s6458_s26, 1  ;;  %v7833_v0 = vmov 0   ;;  %vm444_vm0 = vcmask 254976   ;;  %vm3727_vm1 = vcmask 1041409   ;;  %vm3729_vm2 = vcmask 1042434   ;;  %s7836_s28 = smov 64  }
   0xc   : > { %7674 = vset.pattern.permute.xlu2 %v7833_v0  ;;  %7673 = vset.pattern.permute.xlu1 %v7833_v0  ;;  %vm3731_vm3 = vcmask 1043459   ;;  %vm442_vm4 = vcmask 261120   ;;  %vm3733_vm5 = vcmask 1044484   ;;  %vm3735_vm6 = vcmask 1045509   ;;  %s7837_s29 = smov 32  }
   0xd   : > { %7672 = vset.pattern.permute.xlu0 %v7833_v0  ;;  %s11980_s26 = smov (!%p431_p3, %s6458_s26), 1  ;;  %vm3737_vm7 = vcmask 1046534   ;;  %vm3739_vm8 = vcmask 1047559   ;;  %vm4080_vm9 = vcmask 523264   ;;  %vm4089_vm10 = vcmask 785408  }
   0xe   : > { %s7658_s27 = smul.u32 432, %s11980_s26  ;;  %vm464_vm11 = vcmask 521216   ;;  %vm4445_vm12 = vcmask 517120   ;;  %vm4623_vm13 = vcmask 519168   ;;  %vm4773_vm14 = vcmask 1043456   ;;  %s7457_s16 = sshll.u32 %s11980_s26, 3 }
   0xf   : > { %vm5207_vm15 = vcmask 1041408  }
  0x10   : > { %s7922_s30 = scalar_lea.vmem %s11601_s0, %s7658_s27 }
  0x11   : > { %v7925_v1 = vld [vmem:[%s7922_s30 + $0x30] sm:$0xff]  ;;  %v7928_v2 = vld [vmem:[%s7922_s30 + $0x18] sm:$0xff]  ;;  %v471_v3 = vld [vmem:[%s7922_s30] sm:$0xff] }
  0x12   : > { %526 = vperm.xlu2 %7674, %v7925_v1   ;;  %516 = vperm.xlu1 %7673, %v7928_v2   ;;  %v7934_v4 = vld [vmem:[%s7922_s30 + $0x38] sm:$0xff]  ;;  %v7937_v5 = vld [vmem:[%s7922_s30 + $0x20] sm:$0xff]  ;;  %v472_v6 = vld [vmem:[%s7922_s30 + $0x8] sm:$0xff] }
  0x13   : > { %506 = vperm.xlu0 %7672, %v471_v3   ;;  %v7943_v7 = vld [vmem:[%s7922_s30 + $0x60] sm:$0xff]  ;;  %v7946_v8 = vld [vmem:[%s7922_s30 + $0x50] sm:$0xff]  ;;  %v7949_v9 = vld [vmem:[%s7922_s30 + $0x48] sm:$0xff] }
  0x14   : > { %v7955_v10 = vld [vmem:[%s7922_s30 + $0x80] sm:$0xff]  ;;  %v7958_v11 = vld [vmem:[%s7922_s30 + $0x78] sm:$0xff]  ;;  %v7961_v12 = vld [vmem:[%s7922_s30 + $0x68] sm:$0xff] }
  0x15   : > { %v7967_v13 = vld [vmem:[%s7922_s30 + $0xa8] sm:$0xff]  ;;  %v7970_v14 = vld [vmem:[%s7922_s30 + $0x98] sm:$0xff]  ;;  %v7973_v15 = vld [vmem:[%s7922_s30 + $0x90] sm:$0xff] }
  0x16   : > { %v7979_v16 = vld [vmem:[%s7922_s30 + $0xc8] sm:$0xff]  ;;  %v7982_v17 = vld [vmem:[%s7922_s30 + $0xc0] sm:$0xff]  ;;  %v7985_v18 = vld [vmem:[%s7922_s30 + $0xb0] sm:$0xff] }
  0x17   : > { %v7991_v19 = vld [vmem:[%s7922_s30 + $0xf0] sm:$0xff]  ;;  %v7994_v20 = vld [vmem:[%s7922_s30 + $0xe0] sm:$0xff]  ;;  %v7997_v21 = vld [vmem:[%s7922_s30 + $0xd8] sm:$0xff] }
  0x18   : > { %v8003_v22 = vld [vmem:[%s7922_s30 + $0x110] sm:$0xff]  ;;  %v8006_v23 = vld [vmem:[%s7922_s30 + $0x108] sm:$0xff]  ;;  %v8009_v24 = vld [vmem:[%s7922_s30 + $0xf8] sm:$0xff] }
  0x19   : > { %v8015_v25 = vld [vmem:[%s7922_s30 + $0x138] sm:$0xff]  ;;  %v8018_v26 = vld [vmem:[%s7922_s30 + $0x128] sm:$0xff]  ;;  %v8021_v27 = vld [vmem:[%s7922_s30 + $0x120] sm:$0xff] }
  0x1a   : > { %531 = vperm.xlu2 %7674, %v7934_v4   ;;  %521 = vperm.xlu1 %7673, %v7937_v5   ;;  %v8027_v28 = vld [vmem:[%s7922_s30 + $0x158] sm:$0xff]  ;;  %v8030_v29 = vld [vmem:[%s7922_s30 + $0x150] sm:$0xff]  ;;  %v8033_v30 = vld [vmem:[%s7922_s30 + $0x140] sm:$0xff] }
  0x1b   : > { %511 = vperm.xlu0 %7672, %v472_v6   ;;  %v729_v31 = vld [vmem:[%s7922_s30 + $0x1] sm:$0xff]  ;;  %v8040_v32 = vld [vmem:[%s7922_s30 + $0x170] sm:$0xff]  ;;  %v8051_v35 = vld [vmem:[%s7922_s30 + $0x19] sm:$0xff] }
  0x1c   : > { %v8043_v33 = vld [vmem:[%s7922_s30 + $0x168] sm:$0xff]  ;;  %v8062_v39 = vld [vmem:[%s7922_s30 + $0x39] sm:$0xff]  ;;  %v8065_v40 = vld [vmem:[%s7922_s30 + $0x31] sm:$0xff] }
  0x1d   : > { %v8048_v34 = vld [vmem:[%s7922_s30 + $0x21] sm:$0xff]  ;;  %v730_v36 = vld [vmem:[%s7922_s30 + $0x9] sm:$0xff]  ;;  %v8079_v44 = vld [vmem:[%s7922_s30 + $0x51] sm:$0xff] }
  0x1e   : > { %v8059_v38 = vld [vmem:[%s7922_s30 + $0x49] sm:$0xff]  ;;  %v8076_v43 = vld [vmem:[%s7922_s30 + $0x61] sm:$0xff]  ;;  %v8087_v46 = vld [vmem:[%s7922_s30 + $0x91] sm:$0xff] }
  0x1f   : > { %v8073_v42 = vld [vmem:[%s7922_s30 + $0x69] sm:$0xff]  ;;  %v8090_v47 = vld [vmem:[%s7922_s30 + $0x81] sm:$0xff]  ;;  %v8093_v48 = vld [vmem:[%s7922_s30 + $0x79] sm:$0xff] }
  0x20   : > { %v8105_v52 = vld [vmem:[%s7922_s30 + $0xb1] sm:$0xff]  ;;  %v8108_v53 = vld [vmem:[%s7922_s30 + $0xa9] sm:$0xff]  ;;  %v8111_v54 = vld [vmem:[%s7922_s30 + $0x99] sm:$0xff] }
  0x21   : > { %v8123_v58 = vld [vmem:[%s7922_s30 + $0xd9] sm:$0xff]  ;;  %v8126_v59 = vld [vmem:[%s7922_s30 + $0xc9] sm:$0xff]  ;;  %v8129_v60 = vld [vmem:[%s7922_s30 + $0xc1] sm:$0xff] }
  0x22   : > { %546 = vperm.xlu2 %7674, %v7943_v7   ;;  %541 = vperm.xlu1 %7673, %v7946_v8   ;;  %v750_v0 = vld [vmem:[%s7922_s30 + $0xf9] sm:$0xff]  ;;  %v749_v3 = vld [vmem:[%s7922_s30 + $0xf1] sm:$0xff]  ;;  %v8143_v6 = vld [vmem:[%s7922_s30 + $0xe1] sm:$0xff] }
  0x23   : > { %536 = vperm.xlu0 %7672, %v7949_v9  }
  0x2a   : > { %561 = vperm.xlu2 %7674, %v7955_v10   ;;  %556 = vperm.xlu1 %7673, %v7958_v11  }
  0x2b   : > { %551 = vperm.xlu0 %7672, %v7961_v12  }
  0x32   : > { %576 = vperm.xlu2 %7674, %v7967_v13   ;;  %571 = vperm.xlu1 %7673, %v7970_v14  }
  0x33   : > { %566 = vperm.xlu0 %7672, %v7973_v15  }
  0x3a   : > { %591 = vperm.xlu2 %7674, %v7979_v16   ;;  %586 = vperm.xlu1 %7673, %v7982_v17  }
  0x3b   : > { %581 = vperm.xlu0 %7672, %v7985_v18  }
  0x42   : > { %606 = vperm.xlu2 %7674, %v7991_v19   ;;  %601 = vperm.xlu1 %7673, %v7994_v20  }
  0x43   : > { %596 = vperm.xlu0 %7672, %v7997_v21  }
  0x4a   : > { %621 = vperm.xlu2 %7674, %v8003_v22   ;;  %616 = vperm.xlu1 %7673, %v8006_v23  }
  0x4b   : > { %611 = vperm.xlu0 %7672, %v8009_v24  }
  0x52   : > { %636 = vperm.xlu2 %7674, %v8015_v25   ;;  %631 = vperm.xlu1 %7673, %v8018_v26  }
  0x53   : > { %626 = vperm.xlu0 %7672, %v8021_v27  }
  0x5a   : > { %651 = vperm.xlu2 %7674, %v8027_v28   ;;  %646 = vperm.xlu1 %7673, %v8030_v29  }
  0x5b   : > { %641 = vperm.xlu0 %7672, %v8033_v30  }
  0x62   : > { %764 = vperm.xlu2 %7674, %v729_v31   ;;  %661 = vperm.xlu1 %7673, %v8040_v32  }
  0x63   : > { %656 = vperm.xlu0 %7672, %v8043_v33  }
  0x6a   : > { %779 = vperm.xlu2 %7674, %v8048_v34   ;;  %774 = vperm.xlu1 %7673, %v8051_v35  }
  0x6b   : > { %769 = vperm.xlu0 %7672, %v730_v36  }
  0x6c   : > { %v8056_v37 = vpop.permute.xlu2 %526 }
  0x6d   : > { %11632 = vst [vmem:[#allocation4_spill] sm:$0xff] %v8056_v37  ;;  %v1003_v37 = vld [vmem:[%s7922_s30 + $0xc2] sm:$0xff] }
  0x72   : > { %794 = vperm.xlu2 %7674, %v8059_v38   ;;  %789 = vperm.xlu1 %7673, %v8062_v39  }
  0x73   : > { %784 = vperm.xlu0 %7672, %v8065_v40  }
  0x74   : > { %v8070_v41 = vpop.permute.xlu2 %531 }
  0x75   : > { %11633 = vst [vmem:[#allocation5_spill] sm:$0xff] %v8070_v41  ;;  %v8249_v41 = vld [vmem:[%s7922_s30 + $0x82] sm:$0xff] }
  0x76   : > { %11675 = vst [vmem:[#allocation47_spill] sm:$0xff] %v8249_v41 }
  0x7a   : > { %809 = vperm.xlu2 %7674, %v8073_v42   ;;  %804 = vperm.xlu1 %7673, %v8076_v43  }
  0x7b   : > { %799 = vperm.xlu0 %7672, %v8079_v44  }
  0x7c   : > { %v8084_v45 = vpop.permute.xlu2 %546 }
  0x7d   : > { %11634 = vst [vmem:[#allocation6_spill] sm:$0xff] %v8084_v45  ;;  %v8246_v45 = vld [vmem:[%s7922_s30 + $0x92] sm:$0xff] }
  0x7e   : > { %11674 = vst [vmem:[#allocation46_spill] sm:$0xff] %v8246_v45 }
  0x82   : > { %824 = vperm.xlu2 %7674, %v8087_v46   ;;  %819 = vperm.xlu1 %7673, %v8090_v47  }
  0x83   : > { %814 = vperm.xlu0 %7672, %v8093_v48  }
  0x84   : > { %v8098_v49 = vpop.permute.xlu2 %561  ;;  %v8100_v50 = vpop.permute.xlu1 %516 }
  0x85   : > { %11635 = vst [vmem:[#allocation7_spill] sm:$0xff] %v8098_v49  ;;  %v8102_v51 = vpop.permute.xlu0 %506  ;;  %v8243_v49 = vld [vmem:[%s7922_s30 + $0x9a] sm:$0xff] }
  0x86   : > { %11636 = vst [vmem:[#allocation8_spill] sm:$0xff] %v8100_v50  ;;  %v8231_v50 = vld [vmem:[%s7922_s30 + $0x62] sm:$0xff] }
  0x87   : > { %11637 = vst [vmem:[#allocation9_spill] sm:$0xff] %v8102_v51  ;;  %v8228_v51 = vld [vmem:[%s7922_s30 + $0x6a] sm:$0xff] }
  0x88   : > { %11669 = vst [vmem:[#allocation41_spill] sm:$0xff] %v8228_v51 }
  0x89   : > { %11673 = vst [vmem:[#allocation45_spill] sm:$0xff] %v8243_v49 }
  0x8a   : > { %839 = vperm.xlu2 %7674, %v8105_v52   ;;  %834 = vperm.xlu1 %7673, %v8108_v53  }
  0x8b   : > { %829 = vperm.xlu0 %7672, %v8111_v54  }
  0x8c   : > { %v8116_v55 = vpop.permute.xlu2 %576  ;;  %v8118_v56 = vpop.permute.xlu1 %521 }
  0x8d   : > { %11638 = vst [vmem:[#allocation10_spill] sm:$0xff] %v8116_v55  ;;  %v8120_v57 = vpop.permute.xlu0 %511  ;;  %v755_v55 = vld [vmem:[%s7922_s30 + $0x139] sm:$0xff] }
  0x8e   : > { %11639 = vst [vmem:[#allocation11_spill] sm:$0xff] %v8118_v56 }
  0x8f   : > { %11640 = vst [vmem:[#allocation12_spill] sm:$0xff] %v8120_v57  ;;  %v752_v57 = vld [vmem:[%s7922_s30 + $0x111] sm:$0xff] }
  0x92   : > { %854 = vperm.xlu2 %7674, %v8123_v58   ;;  %849 = vperm.xlu1 %7673, %v8126_v59  }
  0x93   : > { %844 = vperm.xlu0 %7672, %v8129_v60  }
  0x94   : > { %v8134_v61 = vpop.permute.xlu2 %591  ;;  %v8136_v62 = vpop.permute.xlu1 %541 }
  0x95   : > { %11641 = vst [vmem:[#allocation13_spill] sm:$0xff] %v8134_v61  ;;  %v8138_v63 = vpop.permute.xlu0 %536 }
  0x96   : > { %11642 = vst [vmem:[#allocation14_spill] sm:$0xff] %v8136_v62  ;;  %v753_v62 = vld [vmem:[%s7922_s30 + $0x121] sm:$0xff] }
  0x97   : > { %11643 = vst [vmem:[#allocation15_spill] sm:$0xff] %v8138_v63  ;;  %v751_v63 = vld [vmem:[%s7922_s30 + $0x109] sm:$0xff] }
  0x9a   : > { %869 = vperm.xlu2 %7674, %v750_v0   ;;  %864 = vperm.xlu1 %7673, %v749_v3  }
  0x9b   : > { %859 = vperm.xlu0 %7672, %v8143_v6  }
  0x9c   : > { %v8146_v31 = vpop.permute.xlu2 %606  ;;  %v8148_v36 = vpop.permute.xlu1 %556 }
  0x9d   : > { %11644 = vst [vmem:[#allocation16_spill] sm:$0xff] %v8146_v31  ;;  %v8150_v61 = vpop.permute.xlu0 %551  ;;  %v756_v31 = vld [vmem:[%s7922_s30 + $0x141] sm:$0xff] }
  0x9e   : > { %11645 = vst [vmem:[#allocation17_spill] sm:$0xff] %v8148_v36  ;;  %v754_v36 = vld [vmem:[%s7922_s30 + $0x129] sm:$0xff] }
  0x9f   : > { %11646 = vst [vmem:[#allocation18_spill] sm:$0xff] %v8150_v61  ;;  %v758_v61 = vld [vmem:[%s7922_s30 + $0x159] sm:$0xff] }
  0xa2   : > { %884 = vperm.xlu2 %7674, %v753_v62   ;;  %879 = vperm.xlu1 %7673, %v752_v57  }
  0xa3   : > { %874 = vperm.xlu0 %7672, %v751_v63  }
  0xa4   : > { %v8155_v0 = vpop.permute.xlu2 %621  ;;  %v8157_v3 = vpop.permute.xlu1 %571 }
  0xa5   : > { %11647 = vst [vmem:[#allocation19_spill] sm:$0xff] %v8155_v0  ;;  %v8159_v56 = vpop.permute.xlu0 %566  ;;  %v759_v0 = vld [vmem:[%s7922_s30 + $0x169] sm:$0xff] }
  0xa6   : > { %11648 = vst [vmem:[#allocation20_spill] sm:$0xff] %v8157_v3  ;;  %v757_v3 = vld [vmem:[%s7922_s30 + $0x151] sm:$0xff] }
  0xa7   : > { %11649 = vst [vmem:[#allocation21_spill] sm:$0xff] %v8159_v56  ;;  %v987_v56 = vld [vmem:[%s7922_s30 + $0x2] sm:$0xff] }
  0xaa   : > { %899 = vperm.xlu2 %7674, %v756_v31   ;;  %894 = vperm.xlu1 %7673, %v755_v55  }
  0xab   : > { %889 = vperm.xlu0 %7672, %v754_v36  }
  0xac   : > { %v8164_v62 = vpop.permute.xlu2 %636  ;;  %v8166_v57 = vpop.permute.xlu1 %586 }
  0xad   : > { %11650 = vst [vmem:[#allocation22_spill] sm:$0xff] %v8164_v62  ;;  %v8168_v63 = vpop.permute.xlu0 %581  ;;  %v988_v62 = vld [vmem:[%s7922_s30 + $0xa] sm:$0xff] }
  0xae   : > { %11651 = vst [vmem:[#allocation23_spill] sm:$0xff] %v8166_v57  ;;  %v760_v57 = vld [vmem:[%s7922_s30 + $0x171] sm:$0xff] }
  0xaf   : > { %11652 = vst [vmem:[#allocation24_spill] sm:$0xff] %v8168_v63  ;;  %v8213_v63 = vld [vmem:[%s7922_s30 + $0x3a] sm:$0xff] }
  0xb0   : > { %11664 = vst [vmem:[#allocation36_spill] sm:$0xff] %v8213_v63 }
  0xb2   : > { %914 = vperm.xlu2 %7674, %v759_v0   ;;  %909 = vperm.xlu1 %7673, %v758_v61  }
  0xb3   : > { %904 = vperm.xlu0 %7672, %v757_v3  }
  0xb4   : > { %v8173_v31 = vpop.permute.xlu2 %651  ;;  %v8175_v55 = vpop.permute.xlu1 %601 }
  0xb5   : > { %11653 = vst [vmem:[#allocation25_spill] sm:$0xff] %v8173_v31  ;;  %v8177_v36 = vpop.permute.xlu0 %596  ;;  %v8189_v31 = vld [vmem:[%s7922_s30 + $0x32] sm:$0xff] }
  0xb6   : > { %11654 = vst [vmem:[#allocation26_spill] sm:$0xff] %v8175_v55  ;;  %v8192_v55 = vld [vmem:[%s7922_s30 + $0x22] sm:$0xff] }
  0xb7   : > { %11655 = vst [vmem:[#allocation27_spill] sm:$0xff] %v8177_v36  ;;  %v8195_v36 = vld [vmem:[%s7922_s30 + $0x1a] sm:$0xff] }
  0xb8   : > { %11659 = vst [vmem:[#allocation31_spill] sm:$0xff] %v8192_v55 }
  0xba   : > { %1027 = vperm.xlu2 %7674, %v988_v62   ;;  %1022 = vperm.xlu1 %7673, %v987_v56  }
  0xbb   : > { %919 = vperm.xlu0 %7672, %v760_v57  }
  0xbc   : > { %v8182_v0 = vpop.permute.xlu2 %764  ;;  %v8184_v61 = vpop.permute.xlu1 %616 }
  0xbd   : > { %11656 = vst [vmem:[#allocation28_spill] sm:$0xff] %v8182_v0  ;;  %v8186_v3 = vpop.permute.xlu0 %611  ;;  %v8225_v0 = vld [vmem:[%s7922_s30 + $0x7a] sm:$0xff] }
  0xbe   : > { %11657 = vst [vmem:[#allocation29_spill] sm:$0xff] %v8184_v61  ;;  %v8210_v61 = vld [vmem:[%s7922_s30 + $0x4a] sm:$0xff] }
  0xbf   : > { %11658 = vst [vmem:[#allocation30_spill] sm:$0xff] %v8186_v3  ;;  %v8207_v3 = vld [vmem:[%s7922_s30 + $0x52] sm:$0xff] }
  0xc0   : > { %11663 = vst [vmem:[#allocation35_spill] sm:$0xff] %v8207_v3 }
  0xc1   : > { %11668 = vst [vmem:[#allocation40_spill] sm:$0xff] %v8225_v0 }
  0xc2   : > { %1042 = vperm.xlu2 %7674, %v8189_v31   ;;  %1037 = vperm.xlu1 %7673, %v8192_v55   ;;  %v1005_v55 = vld [vmem:[%s7922_s30 + $0xda] sm:$0xff] }
  0xc3   : > { %1032 = vperm.xlu0 %7672, %v8195_v36  }
  0xc4   : > { %v8200_v56 = vpop.permute.xlu2 %779  ;;  %v8202_v62 = vpop.permute.xlu1 %631 }
  0xc5   : > { %11660 = vst [vmem:[#allocation32_spill] sm:$0xff] %v8200_v56  ;;  %v8204_v57 = vpop.permute.xlu0 %626 }
  0xc6   : > { %11661 = vst [vmem:[#allocation33_spill] sm:$0xff] %v8202_v62 }
  0xc7   : > { %11662 = vst [vmem:[#allocation34_spill] sm:$0xff] %v8204_v57 }
  0xca   : > { %1057 = vperm.xlu2 %7674, %v8207_v3   ;;  %1052 = vperm.xlu1 %7673, %v8210_v61   ;;  %v1002_v3 = vld [vmem:[%s7922_s30 + $0xb2] sm:$0xff] }
  0xcb   : > { %1047 = vperm.xlu0 %7672, %v8213_v63  }
  0xcc   : > { %v8218_v56 = vpop.permute.xlu2 %794  ;;  %v8220_v62 = vpop.permute.xlu1 %646 }
  0xcd   : > { %11665 = vst [vmem:[#allocation37_spill] sm:$0xff] %v8218_v56  ;;  %v8222_v57 = vpop.permute.xlu0 %641 }
  0xce   : > { %11666 = vst [vmem:[#allocation38_spill] sm:$0xff] %v8220_v62 }
  0xcf   : > { %11667 = vst [vmem:[#allocation39_spill] sm:$0xff] %v8222_v57 }
  0xd2   : > { %1072 = vperm.xlu2 %7674, %v8225_v0   ;;  %1067 = vperm.xlu1 %7673, %v8228_v51   ;;  %v1001_v51 = vld [vmem:[%s7922_s30 + $0xaa] sm:$0xff]  ;;  %v1016_v0 = vld [vmem:[%s7922_s30 + $0x15a] sm:$0xff] }
  0xd3   : > { %1062 = vperm.xlu0 %7672, %v8231_v50  }
  0xd4   : > { %v8236_v56 = vpop.permute.xlu2 %809  ;;  %v8238_v62 = vpop.permute.xlu1 %661 }
  0xd5   : > { %11670 = vst [vmem:[#allocation42_spill] sm:$0xff] %v8236_v56  ;;  %v8240_v57 = vpop.permute.xlu0 %656 }
  0xd6   : > { %11671 = vst [vmem:[#allocation43_spill] sm:$0xff] %v8238_v62 }
  0xd7   : > { %11672 = vst [vmem:[#allocation44_spill] sm:$0xff] %v8240_v57 }
  0xda   : > { %1087 = vperm.xlu2 %7674, %v8243_v49   ;;  %1082 = vperm.xlu1 %7673, %v8246_v45  }
  0xdb   : > { %1077 = vperm.xlu0 %7672, %v8249_v41  }
  0xdc   : > { %v8254_v56 = vpop.permute.xlu2 %824  ;;  %v8256_v62 = vpop.permute.xlu1 %774 }
  0xdd   : > { %11676 = vst [vmem:[#allocation48_spill] sm:$0xff] %v8254_v56  ;;  %v8258_v57 = vpop.permute.xlu0 %769  ;;  %v1006_v56 = vld [vmem:[%s7922_s30 + $0xe2] sm:$0xff] }
  0xde   : > { %11677 = vst [vmem:[#allocation49_spill] sm:$0xff] %v8256_v62  ;;  %v1004_v62 = vld [vmem:[%s7922_s30 + $0xca] sm:$0xff] }
  0xdf   : > { %11678 = vst [vmem:[#allocation50_spill] sm:$0xff] %v8258_v57  ;;  %v1008_v57 = vld [vmem:[%s7922_s30 + $0xfa] sm:$0xff] }
  0xe2   : > { %1102 = vperm.xlu2 %7674, %v1003_v37   ;;  %1097 = vperm.xlu1 %7673, %v1002_v3  }
  0xe3   : > { %1092 = vperm.xlu0 %7672, %v1001_v51  }
  0xe4   : > { %v8263_v49 = vpop.permute.xlu2 %839  ;;  %v8265_v45 = vpop.permute.xlu1 %789 }
  0xe5   : > { %11679 = vst [vmem:[#allocation51_spill] sm:$0xff] %v8263_v49  ;;  %v8267_v41 = vpop.permute.xlu0 %784  ;;  %v1009_v49 = vld [vmem:[%s7922_s30 + $0x10a] sm:$0xff] }
  0xe6   : > { %11680 = vst [vmem:[#allocation52_spill] sm:$0xff] %v8265_v45  ;;  %v1007_v45 = vld [vmem:[%s7922_s30 + $0xf2] sm:$0xff] }
  0xe7   : > { %11681 = vst [vmem:[#allocation53_spill] sm:$0xff] %v8267_v41  ;;  %v1011_v41 = vld [vmem:[%s7922_s30 + $0x122] sm:$0xff] }
  0xea   : > { %1117 = vperm.xlu2 %7674, %v1006_v56   ;;  %1112 = vperm.xlu1 %7673, %v1005_v55  }
  0xeb   : > { %1107 = vperm.xlu0 %7672, %v1004_v62  }
  0xec   : > { %v8272_v37 = vpop.permute.xlu2 %854  ;;  %v8274_v3 = vpop.permute.xlu1 %804 }
  0xed   : > { %11682 = vst [vmem:[#allocation54_spill] sm:$0xff] %v8272_v37  ;;  %v8276_v51 = vpop.permute.xlu0 %799  ;;  %v1012_v37 = vld [vmem:[%s7922_s30 + $0x12a] sm:$0xff] }
  0xee   : > { %11683 = vst [vmem:[#allocation55_spill] sm:$0xff] %v8274_v3  ;;  %v1010_v3 = vld [vmem:[%s7922_s30 + $0x112] sm:$0xff] }
  0xef   : > { %11684 = vst [vmem:[#allocation56_spill] sm:$0xff] %v8276_v51  ;;  %v1014_v51 = vld [vmem:[%s7922_s30 + $0x142] sm:$0xff] }
  0xf2   : > { %1132 = vperm.xlu2 %7674, %v1009_v49   ;;  %1127 = vperm.xlu1 %7673, %v1008_v57  }
  0xf3   : > { %1122 = vperm.xlu0 %7672, %v1007_v45  }
  0xf4   : > { %v8281_v56 = vpop.permute.xlu2 %869  ;;  %v8283_v55 = vpop.permute.xlu1 %819 }
  0xf5   : > { %11685 = vst [vmem:[#allocation57_spill] sm:$0xff] %v8281_v56  ;;  %v8285_v62 = vpop.permute.xlu0 %814  ;;  %v1015_v56 = vld [vmem:[%s7922_s30 + $0x152] sm:$0xff] }
  0xf6   : > { %11686 = vst [vmem:[#allocation58_spill] sm:$0xff] %v8283_v55  ;;  %v1013_v55 = vld [vmem:[%s7922_s30 + $0x13a] sm:$0xff] }
  0xf7   : > { %11687 = vst [vmem:[#allocation59_spill] sm:$0xff] %v8285_v62 }
  0xfa   : > { %1147 = vperm.xlu2 %7674, %v1012_v37   ;;  %1142 = vperm.xlu1 %7673, %v1011_v41   ;;  %v1018_v41 = vld [vmem:[%s7922_s30 + $0x172] sm:$0xff] }
  0xfb   : > { %1137 = vperm.xlu0 %7672, %v1010_v3   ;;  %v1017_v3 = vld [vmem:[%s7922_s30 + $0x16a] sm:$0xff] }
  0xfc   : > { %v8290_v49 = vpop.permute.xlu2 %884  ;;  %v8292_v57 = vpop.permute.xlu1 %834 }
  0xfd   : > { %11688 = vst [vmem:[#allocation60_spill] sm:$0xff] %v8290_v49  ;;  %v8294_v45 = vpop.permute.xlu0 %829 }
  0xfe   : > { %11689 = vst [vmem:[#allocation61_spill] sm:$0xff] %v8292_v57 }
  0xff   : > { %11690 = vst [vmem:[#allocation62_spill] sm:$0xff] %v8294_v45 }
 0x102   : > { %1162 = vperm.xlu2 %7674, %v1015_v56   ;;  %1157 = vperm.xlu1 %7673, %v1014_v51  }
 0x103   : > { %1152 = vperm.xlu0 %7672, %v1013_v55  }
 0x104   : > { %v8299_v62 = vpop.permute.xlu2 %899  ;;  %v8301_v63 = vpop.permute.xlu1 %849 }
 0x105   : > { %11691 = vst [vmem:[#allocation63_spill] sm:$0xff] %v8299_v62  ;;  %v8303_v37 = vpop.permute.xlu0 %844 }
 0x10a   : > { %1177 = vperm.xlu2 %7674, %v1018_v41   ;;  %1172 = vperm.xlu1 %7673, %v1017_v3  }
 0x10b   : > { %1167 = vperm.xlu0 %7672, %v1016_v0  }
 0x10c   : > { %v8308_v57 = vpop.permute.xlu2 %914  ;;  %v8310_v45 = vpop.permute.xlu1 %864 }
 0x10d   : > { %11692 = vst [vmem:[#allocation64_spill] sm:$0xff] %v8308_v57  ;;  %v8312_v49 = vpop.permute.xlu0 %859 }
 0x112   : > { %1291 = vperm.xlu2 %7674, %v7925_v1   ;;  %1286 = vperm.xlu1 %7673, %v7937_v5  }
 0x113   : > { %1281 = vperm.xlu0 %7672, %v7928_v2  }
 0x114   : > { %v8317_v51 = vpop.permute.xlu2 %1027  ;;  %v8319_v56 = vpop.permute.xlu1 %879 }
 0x115   : > { %11693 = vst [vmem:[#allocation65_spill] sm:$0xff] %v8319_v56  ;;  %v8321_v55 = vpop.permute.xlu0 %874 }
 0x11a   : > { %1306 = vperm.xlu2 %7674, %v7946_v8   ;;  %1301 = vperm.xlu1 %7673, %v7949_v9  }
 0x11b   : > { %1296 = vperm.xlu0 %7672, %v7934_v4  }
 0x11c   : > { %v8326_v0 = vpop.permute.xlu2 %1042  ;;  %v8328_v41 = vpop.permute.xlu1 %894 }
 0x11d   : > { %v8330_v1 = vpop.permute.xlu0 %889 }
 0x11e   : > { %11694 = vst [vmem:[#allocation66_spill] sm:$0xff] %v8330_v1  ;;  %v11755_v1 = vld [vmem:[#allocation35_spill] sm:$0xff] }
 0x122   : > { %1321 = vperm.xlu2 %7674, %v7958_v11   ;;  %1316 = vperm.xlu1 %7673, %v7961_v12  }
 0x123   : > { %1311 = vperm.xlu0 %7672, %v7943_v7  }
 0x124   : > { %v8335_v2 = vpop.permute.xlu2 %1057  ;;  %v8337_v5 = vpop.permute.xlu1 %909 }
 0x125   : > { %11695 = vst [vmem:[#allocation67_spill] sm:$0xff] %v8337_v5  ;;  %v8339_v8 = vpop.permute.xlu0 %904  ;;  %v6596_v5 = vld [vmem:[%s7922_s30 + $0x49] sm:$0xff] }
 0x126   : > { %11696 = vst [vmem:[#allocation68_spill] sm:$0xff] %v8339_v8  ;;  %v6570_v8 = vld [vmem:[%s7922_s30 + $0x90] sm:$0xff] }
 0x12a   : > { %1336 = vperm.xlu2 %7674, %v7970_v14   ;;  %1331 = vperm.xlu1 %7673, %v7973_v15  }
 0x12b   : > { %1326 = vperm.xlu0 %7672, %v7955_v10  }
 0x12c   : > { %v8344_v4 = vpop.permute.xlu2 %1072  ;;  %v8346_v9 = vpop.permute.xlu1 %1022 }
 0x12d   : > { %v8348_v11 = vpop.permute.xlu0 %919 }
 0x12e   : > { %11697 = vst [vmem:[#allocation69_spill] sm:$0xff] %v8348_v11 }
 0x132   : > { %1351 = vperm.xlu2 %7674, %v7982_v17   ;;  %1346 = vperm.xlu1 %7673, %v7985_v18  }
 0x133   : > { %1341 = vperm.xlu0 %7672, %v7967_v13  }
 0x134   : > { %v8353_v7 = vpop.permute.xlu2 %1087  ;;  %v8355_v12 = vpop.permute.xlu1 %1037 }
 0x135   : > { %11698 = vst [vmem:[#allocation70_spill] sm:$0xff] %v8353_v7  ;;  %v8357_v14 = vpop.permute.xlu0 %1032 }
 0x13a   : > { %1366 = vperm.xlu2 %7674, %v7994_v20   ;;  %1361 = vperm.xlu1 %7673, %v7997_v21  }
 0x13b   : > { %1356 = vperm.xlu0 %7672, %v7979_v16  }
 0x13c   : > { %v8362_v10 = vpop.permute.xlu2 %1102  ;;  %v8364_v15 = vpop.permute.xlu1 %1052 }
 0x13d   : > { %11699 = vst [vmem:[#allocation71_spill] sm:$0xff] %v8362_v10  ;;  %v8366_v17 = vpop.permute.xlu0 %1047 }
 0x13e   : > { %11700 = vst [vmem:[#allocation72_spill] sm:$0xff] %v8364_v15 }
 0x13f   : > { %11701 = vst [vmem:[#allocation73_spill] sm:$0xff] %v8366_v17 }
 0x142   : > { %1381 = vperm.xlu2 %7674, %v8006_v23   ;;  %1376 = vperm.xlu1 %7673, %v8009_v24  }
 0x143   : > { %1371 = vperm.xlu0 %7672, %v7991_v19  }
 0x144   : > { %v8371_v13 = vpop.permute.xlu2 %1117  ;;  %v8373_v18 = vpop.permute.xlu1 %1067 }
 0x145   : > { %11702 = vst [vmem:[#allocation74_spill] sm:$0xff] %v8371_v13  ;;  %v8375_v20 = vpop.permute.xlu0 %1062  ;;  %v6605_v13 = vld [vmem:[%s7922_s30 + $0xb1] sm:$0xff] }
 0x146   : > { %11703 = vst [vmem:[#allocation75_spill] sm:$0xff] %v8373_v18 }
 0x147   : > { %11704 = vst [vmem:[#allocation76_spill] sm:$0xff] %v8375_v20 }
 0x14a   : > { %1396 = vperm.xlu2 %7674, %v8018_v26   ;;  %1391 = vperm.xlu1 %7673, %v8021_v27  }
 0x14b   : > { %1386 = vperm.xlu0 %7672, %v8003_v22  }
 0x14c   : > { %v8380_v16 = vpop.permute.xlu2 %1132  ;;  %v8382_v21 = vpop.permute.xlu1 %1082 }
 0x14d   : > { %11705 = vst [vmem:[#allocation77_spill] sm:$0xff] %v8380_v16  ;;  %v8384_v23 = vpop.permute.xlu0 %1077  ;;  %v6631_v16 = vld [vmem:[%s7922_s30 + $0x6a] sm:$0xff] }
 0x14e   : > { %11706 = vst [vmem:[#allocation78_spill] sm:$0xff] %v8382_v21  ;;  %v11835_v21 = vld [vmem:[#allocation54_spill] sm:$0xff] }
 0x14f   : > { %11707 = vst [vmem:[#allocation79_spill] sm:$0xff] %v8384_v23  ;;  %v11834_v23 = vld [vmem:[#allocation53_spill] sm:$0xff] }
 0x152   : > { %1411 = vperm.xlu2 %7674, %v8030_v29   ;;  %1406 = vperm.xlu1 %7673, %v8033_v30   ;;  %v6497_v30 = vld [vmem:[%s7922_s30 + $0x188] sm:$0xff] }
 0x153   : > { %1401 = vperm.xlu0 %7672, %v8015_v25   ;;  %v6496_v25 = vld [vmem:[%s7922_s30 + $0x180] sm:$0xff] }
 0x154   : > { %v8389_v19 = vpop.permute.xlu2 %1147  ;;  %v8391_v24 = vpop.permute.xlu1 %1097 }
 0x155   : > { %11708 = vst [vmem:[#allocation80_spill] sm:$0xff] %v8389_v19  ;;  %v8393_v26 = vpop.permute.xlu0 %1092 }
 0x156   : > { %11709 = vst [vmem:[#allocation81_spill] sm:$0xff] %v8391_v24  ;;  %v6633_v24 = vld [vmem:[%s7922_s30 + $0x82] sm:$0xff] }
 0x157   : > { %11710 = vst [vmem:[#allocation82_spill] sm:$0xff] %v8393_v26  ;;  %v11833_v26 = vld [vmem:[#allocation52_spill] sm:$0xff] }
 0x15a   : > { %1426 = vperm.xlu2 %7674, %v8040_v32   ;;  %1421 = vperm.xlu1 %7673, %v8043_v33  }
 0x15b   : > { %1416 = vperm.xlu0 %7672, %v8027_v28  }
 0x15c   : > { %v8398_v22 = vpop.permute.xlu2 %1162  ;;  %v8400_v27 = vpop.permute.xlu1 %1112 }
 0x15d   : > { %11711 = vst [vmem:[#allocation83_spill] sm:$0xff] %v8398_v22  ;;  %v8402_v29 = vpop.permute.xlu0 %1107 }
 0x15e   : > { %11712 = vst [vmem:[#allocation84_spill] sm:$0xff] %v8400_v27 }
 0x15f   : > { %11713 = vst [vmem:[#allocation85_spill] sm:$0xff] %v8402_v29  ;;  %v6627_v29 = vld [vmem:[%s7922_s30 + $0x3a] sm:$0xff] }
 0x162   : > { %1539 = vperm.xlu2 %7674, %v8051_v35   ;;  %1436 = vperm.xlu1 %7673, %v6497_v30  }
 0x163   : > { %1431 = vperm.xlu0 %7672, %v6496_v25   ;;  %v11738_v25 = vld [vmem:[#allocation40_spill] sm:$0xff] }
 0x164   : > { %v8407_v3 = vpop.permute.xlu2 %1177  ;;  %v8409_v11 = vpop.permute.xlu1 %1127 }
 0x165   : > { %11714 = vst [vmem:[#allocation86_spill] sm:$0xff] %v8407_v3  ;;  %v8411_v32 = vpop.permute.xlu0 %1122  ;;  %v11743_v3 = vld [vmem:[#allocation31_spill] sm:$0xff] }
 0x166   : > { %11715 = vst [vmem:[#allocation87_spill] sm:$0xff] %v8409_v11  ;;  %v6566_v11 = vld [vmem:[%s7922_s30 + $0x60] sm:$0xff] }
 0x167   : > { %11716 = vst [vmem:[#allocation88_spill] sm:$0xff] %v8411_v32  ;;  %v6603_v32 = vld [vmem:[%s7922_s30 + $0x99] sm:$0xff] }
 0x16a   : > { %1554 = vperm.xlu2 %7674, %v8062_v39   ;;  %1549 = vperm.xlu1 %7673, %v8065_v40  }
 0x16b   : > { %1544 = vperm.xlu0 %7672, %v8048_v34  }
 0x16c   : > { %v8416_v28 = vpop.permute.xlu2 %1291  ;;  %v8418_v33 = vpop.permute.xlu1 %1142 }
 0x16d   : > { %11717 = vst [vmem:[#allocation89_spill] sm:$0xff] %v8416_v28  ;;  %v8420_v22 = vpop.permute.xlu0 %1137 }
 0x16e   : > { %11718 = vst [vmem:[#allocation90_spill] sm:$0xff] %v8418_v33  ;;  %v6636_v33 = vld [vmem:[%s7922_s30 + $0xaa] sm:$0xff] }
 0x16f   : > { %11719 = vst [vmem:[#allocation91_spill] sm:$0xff] %v8420_v22 }
 0x172   : > { %1569 = vperm.xlu2 %7674, %v8076_v43   ;;  %1564 = vperm.xlu1 %7673, %v8079_v44  }
 0x173   : > { %1559 = vperm.xlu0 %7672, %v8059_v38  }
 0x174   : > { %v8425_v35 = vpop.permute.xlu2 %1306  ;;  %v8427_v30 = vpop.permute.xlu1 %1157 }
 0x175   : > { %11720 = vst [vmem:[#allocation92_spill] sm:$0xff] %v8425_v35  ;;  %v8429_v39 = vpop.permute.xlu0 %1152  ;;  %v6578_v35 = vld [vmem:[%s7922_s30 + $0xf0] sm:$0xff] }
 0x176   : > { %11721 = vst [vmem:[#allocation93_spill] sm:$0xff] %v8427_v30  ;;  %v11744_v30 = vld [vmem:[#allocation46_spill] sm:$0xff] }
 0x177   : > { %11722 = vst [vmem:[#allocation94_spill] sm:$0xff] %v8429_v39  ;;  %v6599_v39 = vld [vmem:[%s7922_s30 + $0x69] sm:$0xff] }
 0x17a   : > { %1584 = vperm.xlu2 %7674, %v8090_v47   ;;  %1579 = vperm.xlu1 %7673, %v8093_v48  }
 0x17b   : > { %1574 = vperm.xlu0 %7672, %v8073_v42  }
 0x17c   : > { %v8434_v34 = vpop.permute.xlu2 %1321  ;;  %v8436_v40 = vpop.permute.xlu1 %1172 }
 0x17d   : > { %11723 = vst [vmem:[#allocation95_spill] sm:$0xff] %v8434_v34  ;;  %v8438_v43 = vpop.permute.xlu0 %1167  ;;  %v6580_v34 = vld [vmem:[%s7922_s30 + $0x108] sm:$0xff] }
 0x17e   : > { %11724 = vst [vmem:[#allocation96_spill] sm:$0xff] %v8436_v40  ;;  %v11742_v40 = vld [vmem:[#allocation36_spill] sm:$0xff] }
 0x17f   : > { %11725 = vst [vmem:[#allocation97_spill] sm:$0xff] %v8438_v43 }
 0x182   : > { %1599 = vperm.xlu2 %7674, %v8108_v53   ;;  %1594 = vperm.xlu1 %7673, %v8111_v54  }
 0x183   : > { %1589 = vperm.xlu0 %7672, %v8087_v46  }
 0x184   : > { %v8443_v38 = vpop.permute.xlu2 %1336  ;;  %v8445_v44 = vpop.permute.xlu1 %1286 }
 0x185   : > { %11726 = vst [vmem:[#allocation98_spill] sm:$0xff] %v8443_v38  ;;  %v8447_v47 = vpop.permute.xlu0 %1281 }
 0x186   : > { %11727 = vst [vmem:[#allocation99_spill] sm:$0xff] %v8445_v44 }
 0x187   : > { %11728 = vst [vmem:[#allocation100_spill] sm:$0xff] %v8447_v47  ;;  %v11831_v47 = vld [vmem:[#allocation50_spill] sm:$0xff] }
 0x18a   : > { %1614 = vperm.xlu2 %7674, %v8126_v59   ;;  %1609 = vperm.xlu1 %7673, %v8129_v60  }
 0x18b   : > { %1604 = vperm.xlu0 %7672, %v8105_v52  }
 0x18c   : > { %v8452_v42 = vpop.permute.xlu2 %1351  ;;  %v8454_v48 = vpop.permute.xlu1 %1301 }
 0x18d   : > { %11729 = vst [vmem:[#allocation101_spill] sm:$0xff] %v8452_v42  ;;  %v8456_v53 = vpop.permute.xlu0 %1296 }
 0x18e   : > { %11730 = vst [vmem:[#allocation102_spill] sm:$0xff] %v8454_v48  ;;  %v11818_v48 = vld [vmem:[#allocation22_spill] sm:$0xff] }
 0x18f   : > { %11731 = vst [vmem:[#allocation103_spill] sm:$0xff] %v8456_v53 }
 0x192   : > { %1797 = vperm.xlu2 %7674, %v8195_v36   ;;  %1624 = vperm.xlu1 %7673, %v8143_v6   ;;  %v6562_v36 = vld [vmem:[%s7922_s30 + $0x30] sm:$0xff] }
 0x193   : > { %1619 = vperm.xlu0 %7672, %v8123_v58   ;;  %v6564_v58 = vld [vmem:[%s7922_s30 + $0x48] sm:$0xff] }
 0x194   : > { %v8461_v46 = vpop.permute.xlu2 %1366  ;;  %v8463_v54 = vpop.permute.xlu1 %1316 }
 0x195   : > { %11732 = vst [vmem:[#allocation104_spill] sm:$0xff] %v8461_v46  ;;  %v8465_v59 = vpop.permute.xlu0 %1311  ;;  %v6601_v46 = vld [vmem:[%s7922_s30 + $0x81] sm:$0xff] }
 0x196   : > { %11733 = vst [vmem:[#allocation105_spill] sm:$0xff] %v8463_v54  ;;  %v11810_v54 = vld [vmem:[#allocation28_spill] sm:$0xff] }
 0x197   : > { %11734 = vst [vmem:[#allocation106_spill] sm:$0xff] %v8465_v59 }
 0x19a   : > { %1827 = vperm.xlu2 %7674, %v8231_v50   ;;  %1817 = vperm.xlu1 %7673, %v8210_v61  }
 0x19b   : > { %1807 = vperm.xlu0 %7672, %v8189_v31  }
 0x19c   : > { %v8470_v52 = vpop.permute.xlu2 %1381  ;;  %v8472_v60 = vpop.permute.xlu1 %1331 }
 0x19d   : > { %11735 = vst [vmem:[#allocation107_spill] sm:$0xff] %v8470_v52  ;;  %v8474_v6 = vpop.permute.xlu0 %1326  ;;  %v6571_v52 = vld [vmem:[%s7922_s30 + $0x98] sm:$0xff] }
 0x19e   : > { %11736 = vst [vmem:[#allocation108_spill] sm:$0xff] %v8472_v60 }
 0x19f   : > { %11737 = vst [vmem:[#allocation109_spill] sm:$0xff] %v8474_v6 }
 0x1a2   : > { %1837 = vperm.xlu2 %7674, %v11738_v25   ;;  %2066 = vperm.xlu1 %7673, %v6564_v58  }
 0x1a3   : > { %2056 = vperm.xlu0 %7672, %v6562_v36   ;;  %v6594_v36 = vld [vmem:[%s7922_s30 + $0x31] sm:$0xff] }
 0x1a4   : > { %v8479_v50 = vpop.permute.xlu2 %1396  ;;  %v8481_v43 = vpop.permute.xlu1 %1346 }
 0x1a5   : > { %11739 = vst [vmem:[#allocation40_spill] sm:$0xff] %v8479_v50  ;;  %v8483_v31 = vpop.permute.xlu0 %1341  ;;  %v6568_v50 = vld [vmem:[%s7922_s30 + $0x78] sm:$0xff] }
 0x1a6   : > { %11740 = vst [vmem:[#allocation110_spill] sm:$0xff] %v8481_v43  ;;  %v6573_v43 = vld [vmem:[%s7922_s30 + $0xb0] sm:$0xff] }
 0x1a7   : > { %11741 = vst [vmem:[#allocation111_spill] sm:$0xff] %v8483_v31 }
 0x1aa   : > { %1812 = vperm.xlu2 %7674, %v11742_v40   ;;  %1802 = vperm.xlu1 %7673, %v11743_v3  }
 0x1ab   : > { %1847 = vperm.xlu0 %7672, %v11744_v30   ;;  %v6572_v30 = vld [vmem:[%s7922_s30 + $0xa8] sm:$0xff] }
 0x1ac   : > { %v8488_v22 = vpop.permute.xlu2 %1411  ;;  %v8490_v25 = vpop.permute.xlu1 %1361 }
 0x1ad   : > { %11745 = vst [vmem:[#allocation36_spill] sm:$0xff] %v8488_v22  ;;  %v8492_v58 = vpop.permute.xlu0 %1356  ;;  %v6597_v22 = vld [vmem:[%s7922_s30 + $0x51] sm:$0xff] }
 0x1ae   : > { %11746 = vst [vmem:[#allocation31_spill] sm:$0xff] %v8490_v25  ;;  %v6629_v25 = vld [vmem:[%s7922_s30 + $0x52] sm:$0xff] }
 0x1af   : > { %11747 = vst [vmem:[#allocation46_spill] sm:$0xff] %v8492_v58  ;;  %v6630_v58 = vld [vmem:[%s7922_s30 + $0x62] sm:$0xff] }
 0x1b2   : > { %2314 = vperm.xlu2 %7674, %v6594_v36   ;;  %2086 = vperm.xlu1 %7673, %v6568_v50   ;;  %v6563_v50 = vld [vmem:[%s7922_s30 + $0x38] sm:$0xff] }
 0x1b3   : > { %2076 = vperm.xlu0 %7672, %v6566_v11  }
 0x1b4   : > { %v8497_v40 = vpop.permute.xlu2 %1426  ;;  %v8499_v19 = vpop.permute.xlu1 %1376 }
 0x1b5   : > { %11748 = vst [vmem:[#allocation112_spill] sm:$0xff] %v8497_v40  ;;  %v8501_v3 = vpop.permute.xlu0 %1371  ;;  %v11754_v40 = vld [vmem:[#allocation41_spill] sm:$0xff] }
 0x1b6   : > { %11749 = vst [vmem:[#allocation113_spill] sm:$0xff] %v8499_v19  ;;  %v6569_v19 = vld [vmem:[%s7922_s30 + $0x80] sm:$0xff] }
 0x1b7   : > { %11750 = vst [vmem:[#allocation114_spill] sm:$0xff] %v8501_v3  ;;  %v11762_v3 = vld [vmem:[#allocation47_spill] sm:$0xff] }
 0x1ba   : > { %2106 = vperm.xlu2 %7674, %v6572_v30   ;;  %2096 = vperm.xlu1 %7673, %v6570_v8   ;;  %v6598_v8 = vld [vmem:[%s7922_s30 + $0x61] sm:$0xff] }
 0x1bb   : > { %2324 = vperm.xlu0 %7672, %v6596_v5   ;;  %v6600_v5 = vld [vmem:[%s7922_s30 + $0x79] sm:$0xff] }
 0x1bc   : > { %v8506_v56 = vpop.permute.xlu2 %1539  ;;  %v8508_v36 = vpop.permute.xlu1 %1391 }
 0x1bd   : > { %11751 = vst [vmem:[#allocation115_spill] sm:$0xff] %v8506_v56  ;;  %v8510_v11 = vpop.permute.xlu0 %1386 }
 0x1be   : > { %11752 = vst [vmem:[#allocation116_spill] sm:$0xff] %v8508_v36  ;;  %v6565_v36 = vld [vmem:[%s7922_s30 + $0x50] sm:$0xff] }
 0x1bf   : > { %11753 = vst [vmem:[#allocation117_spill] sm:$0xff] %v8510_v11 }
 0x1c2   : > { %2061 = vperm.xlu2 %7674, %v6563_v50   ;;  %1832 = vperm.xlu1 %7673, %v11754_v40  }
 0x1c3   : > { %1822 = vperm.xlu0 %7672, %v11755_v1   ;;  %v6626_v1 = vld [vmem:[%s7922_s30 + $0x32] sm:$0xff] }
 0x1c4   : > { %v8515_v57 = vpop.permute.xlu2 %1554  ;;  %v8517_v62 = vpop.permute.xlu1 %1406 }
 0x1c5   : > { %11756 = vst [vmem:[#allocation41_spill] sm:$0xff] %v8515_v57  ;;  %v8519_v30 = vpop.permute.xlu0 %1401  ;;  %v11804_v57 = vld [vmem:[#allocation10_spill] sm:$0xff] }
 0x1c6   : > { %11757 = vst [vmem:[#allocation35_spill] sm:$0xff] %v8517_v62 }
 0x1c7   : > { %11758 = vst [vmem:[#allocation118_spill] sm:$0xff] %v8519_v30  ;;  %v6602_v30 = vld [vmem:[%s7922_s30 + $0x91] sm:$0xff] }
 0x1ca   : > { %2344 = vperm.xlu2 %7674, %v6600_v5   ;;  %2334 = vperm.xlu1 %7673, %v6598_v8   ;;  %v6604_v8 = vld [vmem:[%s7922_s30 + $0xa9] sm:$0xff] }
 0x1cb   : > { %2071 = vperm.xlu0 %7672, %v6565_v36  }
 0x1cc   : > { %v8524_v11 = vpop.permute.xlu2 %1569  ;;  %v8526_v50 = vpop.permute.xlu1 %1421 }
 0x1cd   : > { %11759 = vst [vmem:[#allocation119_spill] sm:$0xff] %v8524_v11  ;;  %v8528_v40 = vpop.permute.xlu0 %1416  ;;  %v11807_v11 = vld [vmem:[#allocation13_spill] sm:$0xff] }
 0x1ce   : > { %11760 = vst [vmem:[#allocation120_spill] sm:$0xff] %v8526_v50  ;;  %v11766_v50 = vld [vmem:[#allocation45_spill] sm:$0xff] }
 0x1cf   : > { %11761 = vst [vmem:[#allocation121_spill] sm:$0xff] %v8528_v40 }
 0x1d2   : > { %1842 = vperm.xlu2 %7674, %v11762_v3   ;;  %2582 = vperm.xlu1 %7673, %v8210_v61  }
 0x1d3   : > { %2572 = vperm.xlu0 %7672, %v6626_v1   ;;  %v6595_v1 = vld [vmem:[%s7922_s30 + $0x39] sm:$0xff] }
 0x1d4   : > { %v8533_v62 = vpop.permute.xlu2 %1584  ;;  %v8535_v5 = vpop.permute.xlu1 %1436 }
 0x1d5   : > { %11763 = vst [vmem:[#allocation47_spill] sm:$0xff] %v8533_v62  ;;  %v8537_v36 = vpop.permute.xlu0 %1431 }
 0x1d6   : > { %11764 = vst [vmem:[#allocation122_spill] sm:$0xff] %v8535_v5  ;;  %v6567_v5 = vld [vmem:[%s7922_s30 + $0x68] sm:$0xff] }
 0x1d7   : > { %11765 = vst [vmem:[#allocation123_spill] sm:$0xff] %v8537_v36  ;;  %v6632_v36 = vld [vmem:[%s7922_s30 + $0x7a] sm:$0xff] }
 0x1da   : > { %2364 = vperm.xlu2 %7674, %v6604_v8   ;;  %2354 = vperm.xlu1 %7673, %v6602_v30  }
 0x1db   : > { %1852 = vperm.xlu0 %7672, %v11766_v50  }
 0x1dc   : > { %v8542_v3 = vpop.permute.xlu2 %1599  ;;  %v8544_v40 = vpop.permute.xlu1 %1549 }
 0x1dd   : > { %11767 = vst [vmem:[#allocation45_spill] sm:$0xff] %v8542_v3  ;;  %v8546_v61 = vpop.permute.xlu0 %1544 }
 0x1de   : > { %11768 = vst [vmem:[#allocation124_spill] sm:$0xff] %v8544_v40 }
 0x1df   : > { %11769 = vst [vmem:[#allocation125_spill] sm:$0xff] %v8546_v61  ;;  %v11802_v61 = vld [vmem:[#allocation8_spill] sm:$0xff] }
 0x1e2   : > { %2319 = vperm.xlu2 %7674, %v6595_v1   ;;  %2091 = vperm.xlu1 %7673, %v6569_v19  }
 0x1e3   : > { %2081 = vperm.xlu0 %7672, %v6567_v5  }
 0x1e4   : > { %v8551_v8 = vpop.permute.xlu2 %1614  ;;  %v8553_v30 = vpop.permute.xlu1 %1564 }
 0x1e5   : > { %11770 = vst [vmem:[#allocation126_spill] sm:$0xff] %v8551_v8  ;;  %v8555_v50 = vpop.permute.xlu0 %1559  ;;  %v6634_v8 = vld [vmem:[%s7922_s30 + $0x92] sm:$0xff] }
 0x1e6   : > { %11771 = vst [vmem:[#allocation127_spill] sm:$0xff] %v8553_v30  ;;  %v11801_v30 = vld [vmem:[#allocation7_spill] sm:$0xff] }
 0x1e7   : > { %11772 = vst [vmem:[#allocation128_spill] sm:$0xff] %v8555_v50 }
 0x1ea   : > { %2602 = vperm.xlu2 %7674, %v6632_v36   ;;  %2592 = vperm.xlu1 %7673, %v6630_v58  }
 0x1eb   : > { %2329 = vperm.xlu0 %7672, %v6597_v22  }
 0x1ec   : > { %v8560_v1 = vpop.permute.xlu2 %1797  ;;  %v8562_v19 = vpop.permute.xlu1 %1579 }
 0x1ed   : > { %11773 = vst [vmem:[#allocation129_spill] sm:$0xff] %v8560_v1  ;;  %v8564_v5 = vpop.permute.xlu0 %1574 }
 0x1ee   : > { %11774 = vst [vmem:[#allocation130_spill] sm:$0xff] %v8562_v19  ;;  %v11800_v19 = vld [vmem:[#allocation6_spill] sm:$0xff] }
 0x1ef   : > { %11775 = vst [vmem:[#allocation131_spill] sm:$0xff] %v8564_v5  ;;  %v11797_v5 = vld [vmem:[#allocation4_spill] sm:$0xff] }
 0x1f2   : > { %2612 = vperm.xlu2 %7674, %v6634_v8   ;;  %2111 = vperm.xlu1 %7673, %v6573_v43  }
 0x1f3   : > { %2101 = vperm.xlu0 %7672, %v6571_v52  }
 0x1f4   : > { %v8569_v36 = vpop.permute.xlu2 %1827  ;;  %v8571_v58 = vpop.permute.xlu1 %1594 }
 0x1f5   : > { %11776 = vst [vmem:[#allocation132_spill] sm:$0xff] %v8569_v36  ;;  %v8573_v22 = vpop.permute.xlu0 %1589  ;;  %v11803_v36 = vld [vmem:[#allocation9_spill] sm:$0xff] }
 0x1f6   : > { %11777 = vst [vmem:[#allocation133_spill] sm:$0xff] %v8571_v58  ;;  %v6576_v58 = vld [vmem:[%s7922_s30 + $0xd8] sm:$0xff] }
 0x1f7   : > { %11778 = vst [vmem:[#allocation134_spill] sm:$0xff] %v8573_v22  ;;  %v8637_v22 = vld [vmem:[%s11602_s1 + $0x1] ss:$0 sm:$0xff] }
 0x1fa   : > { %2349 = vperm.xlu2 %7674, %v6601_v46   ;;  %2339 = vperm.xlu1 %7673, %v6599_v39  }
 0x1fb   : > { %2622 = vperm.xlu0 %7672, %v6636_v33  }
 0x1fc   : > { %v8578_v8 = vpop.permute.xlu2 %1837  ;;  %v8580_v43 = vpop.permute.xlu1 %1609 }
 0x1fd   : > { %11779 = vst [vmem:[#allocation135_spill] sm:$0xff] %v8578_v8  ;;  %v8582_v52 = vpop.permute.xlu0 %1604 }
 0x1fe   : > { %11780 = vst [vmem:[#allocation136_spill] sm:$0xff] %v8580_v43 }
 0x1ff   : > { %11781 = vst [vmem:[#allocation137_spill] sm:$0xff] %v8582_v52 }
 0x202   : > { %2359 = vperm.xlu2 %7674, %v6603_v32   ;;  %2587 = vperm.xlu1 %7673, %v6629_v25  }
 0x203   : > { %2577 = vperm.xlu0 %7672, %v6627_v29   ;;  %v8603_v29 = vld [vmem:[%s7922_s30 + $0xf1] sm:$0xff] }
 0x204   : > { %v8587_v46 = vpop.permute.xlu2 %1812  ;;  %v8589_v39 = vpop.permute.xlu1 %1624  ;;  %11788 = vst [vmem:[#allocation144_spill] sm:$0xff] %v8603_v29 }
 0x205   : > { %11782 = vst [vmem:[#allocation138_spill] sm:$0xff] %v8587_v46  ;;  %v8591_v27 = vpop.permute.xlu0 %1619  ;;  %v8606_v46 = vld [vmem:[%s7922_s30 + $0xb2] sm:$0xff] }
 0x206   : > { %11783 = vst [vmem:[#allocation139_spill] sm:$0xff] %v8589_v39  ;;  %v6635_v39 = vld [vmem:[%s7922_s30 + $0x9a] sm:$0xff] }
 0x207   : > { %11784 = vst [vmem:[#allocation140_spill] sm:$0xff] %v8591_v27  ;;  %v8618_v27 = vld [vmem:[%s7922_s30 + $0xda] sm:$0xff] }
 0x208   : > { %11792 = vst [vmem:[#allocation148_spill] sm:$0xff] %v8618_v27 }
 0x20a   : > { %2607 = vperm.xlu2 %7674, %v6633_v24   ;;  %2597 = vperm.xlu1 %7673, %v6631_v16  }
 0x20b   : > { %2369 = vperm.xlu0 %7672, %v6605_v13  }
 0x20c   : > { %v8596_v52 = vpop.permute.xlu2 %2314  ;;  %v8598_v32 = vpop.permute.xlu1 %1817 }
 0x20d   : > { %11785 = vst [vmem:[#allocation141_spill] sm:$0xff] %v8596_v52  ;;  %v8600_v25 = vpop.permute.xlu0 %1807 }
 0x20e   : > { %11786 = vst [vmem:[#allocation142_spill] sm:$0xff] %v8598_v32  ;;  %v8621_v32 = vld [vmem:[%s7922_s30 + $0xc2] sm:$0xff] }
 0x20f   : > { %11787 = vst [vmem:[#allocation143_spill] sm:$0xff] %v8600_v25  ;;  %v11824_v25 = vld [vmem:[#allocation29_spill] sm:$0xff] }
 0x210   : > { %11793 = vst [vmem:[#allocation149_spill] sm:$0xff] %v8621_v32 }
 0x212   : > { %1629 = vperm.xlu2 %7674, %v8603_v29   ;;  %2627 = vperm.xlu1 %7673, %v8606_v46   ;;  %v11806_v29 = vld [vmem:[#allocation12_spill] sm:$0xff] }
 0x213   : > { %2617 = vperm.xlu0 %7672, %v6635_v39   ;;  %v7795_v39 = vld [vmem:[%s11602_s1] ss:$0 sm:$0xff] }
 0x214   : > { %v8611_v16 = vpop.permute.xlu2 %2106  ;;  %v8613_v13 = vpop.permute.xlu1 %2066  ;;  %v8651_v50 = vmul.f32 %v7795_v39, %v11800_v19  ;;  %v667_v3 = vmul.f32 %v7795_v39, %v11802_v61  ;;  %v665_v62 = vmul.f32 %v7795_v39, %v11803_v36  ;;  %v8659_v31 = vmul.f32 %v7795_v39, %v11804_v57  ;;  %v11808_v19 = vld [vmem:[#allocation14_spill] sm:$0xff]  ;;  %v11811_v57 = vld [vmem:[#allocation16_spill] sm:$0xff] }
 0x215   : > { %11789 = vst [vmem:[#allocation145_spill] sm:$0xff] %v8611_v16  ;;  %v8615_v24 = vpop.permute.xlu0 %2056  ;;  %v8664_v6 = vmul.f32 %v7795_v39, %v11807_v11  ;;  %v672_v60 = vmul.f32 %v7795_v39, %v11808_v19  ;;  %v923_v61 = vmul.f32 %v8637_v22, %v11810_v54  ;;  %v8672_v36 = vmul.f32 %v7795_v39, %v11811_v57  ;;  %v11819_v57 = vld [vmem:[#allocation23_spill] sm:$0xff] }
 0x216   : > { %11790 = vst [vmem:[#allocation146_spill] sm:$0xff] %v8613_v13  ;;  %v8688_v42 = vmul.f32 %v7795_v39, %v11819_v57  ;;  %v11826_v57 = vld [vmem:[#allocation37_spill] sm:$0xff] }
 0x217   : > { %11791 = vst [vmem:[#allocation147_spill] sm:$0xff] %v8615_v24  ;;  %v8702_v1 = vadd.f32 %v923_v61, %v665_v62  ;;  %v929_v40 = vmul.f32 %v8637_v22, %v11826_v57  ;;  %v924_v62 = vmul.f32 %v8637_v22, %v11831_v47  ;;  %v11832_v61 = vld [vmem:[#allocation51_spill] sm:$0xff]  ;;  %v8720_v57 = vld [vmem:[%s7922_s30 + $0xf9] sm:$0xff] }
 0x218   : > { %v11837_v47 = vld [vmem:[#allocation56_spill] sm:$0xff] }
 0x219   : > { %v930_v18 = vmul.f32 %v8637_v22, %v11837_v47  ;;  %v11841_v47 = vld [vmem:[#allocation60_spill] sm:$0xff] }
 0x21a   : > { %1877 = vperm.xlu2 %7674, %v8618_v27   ;;  %1867 = vperm.xlu1 %7673, %v8621_v32   ;;  %v6574_v27 = vld [vmem:[%s7922_s30 + $0xc0] sm:$0xff]  ;;  %v8642_v32 = vmul.f32 %v7795_v39, %v11797_v5  ;;  %v11805_v5 = vld [vmem:[#allocation11_spill] sm:$0xff] }
 0x21b   : > { %1857 = vperm.xlu0 %7672, %v6636_v33   ;;  %v11798_v33 = vld [vmem:[#allocation5_spill] sm:$0xff]  ;;  %v668_v52 = vmul.f32 %v7795_v39, %v11805_v5 }
 0x21c   : > { %v8625_v43 = vpop.permute.xlu2 %2061  ;;  %v8627_v8 = vpop.permute.xlu1 %1802  ;;  %v11812_v5 = vld [vmem:[#allocation17_spill] sm:$0xff] }
 0x21d   : > { %11794 = vst [vmem:[#allocation150_spill] sm:$0xff] %v8625_v43  ;;  %v8632_v16 = vpop.permute.xlu0 %1847  ;;  %v8645_v43 = vmul.f32 %v7795_v39, %v11798_v33  ;;  %v666_v33 = vmul.f32 %v7795_v39, %v11806_v29  ;;  %v675_v53 = vmul.f32 %v7795_v39, %v11812_v5  ;;  %v11813_v29 = vld [vmem:[#allocation18_spill] sm:$0xff]  ;;  %v11820_v5 = vld [vmem:[#allocation24_spill] sm:$0xff] }
 0x21e   : > { %11795 = vst [vmem:[#allocation151_spill] sm:$0xff] %v8627_v8  ;;  %v8648_v8 = vld [vmem:[%s7922_s30 + $0xf2] sm:$0xff]  ;;  %v680_v24 = vmul.f32 %v7795_v39, %v11820_v5  ;;  %v11827_v5 = vld [vmem:[#allocation42_spill] sm:$0xff] }
 0x21f   : > { %11796 = vst [vmem:[#allocation152_spill] sm:$0xff] %v8632_v16  ;;  %v8654_v16 = vmul.f32 %v7795_v39, %v11801_v30  ;;  %v11809_v30 = vld [vmem:[#allocation15_spill] sm:$0xff]  ;;  %v932_v56 = vmul.f32 %v8637_v22, %v11827_v5  ;;  %v928_v5 = vmul.f32 %v8637_v22, %v11833_v26 }
 0x220   : > { %11799 = vst [vmem:[#allocation4_spill] sm:$0xff] %v8648_v8  ;;  %v671_v59 = vmul.f32 %v7795_v39, %v11809_v30  ;;  %v11817_v30 = vld [vmem:[#allocation21_spill] sm:$0xff] }
 0x221   : > { %v677_v54 = vmul.f32 %v7795_v39, %v11817_v30  ;;  %v11825_v30 = vld [vmem:[#allocation32_spill] sm:$0xff] }
 0x222   : > { %2126 = vperm.xlu2 %7674, %v6576_v58   ;;  %2116 = vperm.xlu1 %7673, %v6574_v27   ;;  %v674_v58 = vmul.f32 %v7795_v39, %v11813_v29  ;;  %v11814_v27 = vld [vmem:[#allocation20_spill] sm:$0xff]  ;;  %v8736_v26 = vadd.f32 %v929_v40, %v671_v59 }
 0x223   : > { %1887 = vperm.xlu0 %7672, %v8648_v8   ;;  %v8677_v13 = vmul.f32 %v7795_v39, %v11814_v27  ;;  %v8685_v8 = vmul.f32 %v7795_v39, %v11818_v48  ;;  %v11822_v27 = vld [vmem:[#allocation26_spill] sm:$0xff]  ;;  %v926_v48 = vmul.f32 %v8637_v22, %v11825_v30  ;;  %v938_v30 = vmul.f32 %v8637_v22, %v11832_v61 }
 0x224   : > { %v8679_v11 = vpop.permute.xlu2 %2344  ;;  %v8681_v19 = vpop.permute.xlu1 %2086  ;;  %v8694_v44 = vmul.f32 %v7795_v39, %v11822_v27  ;;  %v11838_v61 = vld [vmem:[#allocation58_spill] sm:$0xff]  ;;  %v8738_v15 = vadd.f32 %v932_v56, %v674_v58  ;;  %v8754_v56 = vld [vmem:[%s11602_s1 + $0x2] ss:$0 sm:$0xff]  ;;  %v962_v58 = vadd.f32 %v930_v18, %v672_v60 }
 0x225   : > { %11815 = vst [vmem:[#allocation5_spill] sm:$0xff] %v8679_v11  ;;  %v8691_v29 = vpop.permute.xlu0 %2076  ;;  %v11823_v11 = vld [vmem:[#allocation27_spill] sm:$0xff]  ;;  %v8730_v20 = vadd.f32 %v926_v48, %v668_v52  ;;  %v934_v17 = vmul.f32 %v8637_v22, %v11838_v61  ;;  %v956_v48 = vadd.f32 %v924_v62, %v666_v33  ;;  %v6606_v18 = vld [vmem:[%s7922_s30 + $0xc1] sm:$0xff] }
 0x226   : > { %11816 = vst [vmem:[#allocation6_spill] sm:$0xff] %v8681_v19  ;;  %v683_v38 = vmul.f32 %v7795_v39, %v11823_v11  ;;  %v8698_v19 = vmul.f32 %v7795_v39, %v11824_v25  ;;  %v11829_v11 = vld [vmem:[#allocation34_spill] sm:$0xff]  ;;  %v11830_v25 = vld [vmem:[#allocation49_spill] sm:$0xff] }
 0x227   : > { %11821 = vst [vmem:[#allocation7_spill] sm:$0xff] %v8691_v29  ;;  %v11828_v29 = vld [vmem:[#allocation48_spill] sm:$0xff]  ;;  %v689_v28 = vmul.f32 %v7795_v39, %v11829_v11  ;;  %v925_v10 = vmul.f32 %v8637_v22, %v11830_v25  ;;  %v941_v39 = vmul.f32 %v8637_v22, %v11835_v21  ;;  %v11836_v11 = vld [vmem:[#allocation55_spill] sm:$0xff] }
 0x228   : > { %v935_v27 = vmul.f32 %v8637_v22, %v11828_v29  ;;  %v927_v29 = vmul.f32 %v8637_v22, %v11834_v23  ;;  %v931_v25 = vmul.f32 %v8637_v22, %v11836_v11  ;;  %v11839_v21 = vld [vmem:[#allocation59_spill] sm:$0xff]  ;;  %v8747_v11 = vadd.f32 %v938_v30, %v680_v24  ;;  %v11844_v30 = vld [vmem:[#allocation62_spill] sm:$0xff] }
 0x229   : > { %v933_v7 = vmul.f32 %v8637_v22, %v11839_v21  ;;  %v8745_v52 = vadd.f32 %v925_v10, %v667_v3  ;;  %v8761_v10 = vadd.f32 %v928_v5, %v8645_v43  ;;  %v8764_v3 = vadd.f32 %v941_v39, %v683_v38  ;;  %v8786_v60 = vld [vmem:[%s7922_s30 + $0xca] sm:$0xff]  ;;  %v11853_v21 = vld [vmem:[#allocation73_spill] sm:$0xff] }
 0x22a   : > { %2146 = vperm.xlu2 %7674, %v6580_v34   ;;  %2136 = vperm.xlu1 %7673, %v6578_v35   ;;  %v8740_v23 = vadd.f32 %v935_v27, %v677_v54  ;;  %11840 = vst [vmem:[#allocation8_spill] sm:$0xff] %v8747_v11  ;;  %v947_v34 = vmul.f32 %v8637_v22, %v11841_v47  ;;  %v11843_v27 = vld [vmem:[#allocation61_spill] sm:$0xff]  ;;  %v11851_v39 = vld [vmem:[#allocation70_spill] sm:$0xff]  ;;  %v11904_v11 = vld [vmem:[#allocation4_spill] sm:$0xff] }
 0x22b   : > { %1634 = vperm.xlu0 %7672, %v8720_v57   ;;  %v959_v40 = vadd.f32 %v927_v29, %v8642_v32  ;;  %11842 = vst [vmem:[#allocation9_spill] sm:$0xff] %v8764_v3  ;;  %v8767_v24 = vadd.f32 %v931_v25, %v8651_v50  ;;  %v8772_v54 = vadd.f32 %v934_v17, %v8654_v16  ;;  %v8865_v47 = vld [vmem:[%s11602_s1 + $0x4] ss:$0 sm:$0xff] }
 0x22c   : > { %v8756_v35 = vpop.permute.xlu2 %1842  ;;  %v8758_v59 = vpop.permute.xlu1 %2096  ;;  %v937_v62 = vmul.f32 %v8637_v22, %v11843_v27  ;;  %v936_v43 = vmul.f32 %v8637_v22, %v11844_v30  ;;  %v965_v5 = vadd.f32 %v933_v7, %v675_v53  ;;  %v940_v38 = vmul.f32 %v8637_v22, %v8301_v63 }
 0x22d   : > { %v8769_v33 = vpop.permute.xlu0 %2324  ;;  %v939_v50 = vmul.f32 %v8637_v22, %v8303_v37  ;;  %v943_v32 = vmul.f32 %v8637_v22, %v8310_v45  ;;  %v8788_v17 = vadd.f32 %v947_v34, %v689_v28  ;;  %v942_v16 = vmul.f32 %v8637_v22, %v8312_v49 }
 0x22e   : > { %v1182_v7 = vmul.f32 %v8754_v56, %v8317_v51  ;;  %v945_v63 = vmul.f32 %v8637_v22, %v8321_v55  ;;  %v1185_v37 = vmul.f32 %v8754_v56, %v8326_v0  ;;  %v949_v45 = vmul.f32 %v8637_v22, %v8328_v41 }
 0x22f   : > { %11845 = vst [vmem:[#allocation10_spill] sm:$0xff] %v8788_v17  ;;  %v1188_v53 = vmul.f32 %v8754_v56, %v8335_v2  ;;  %v1191_v28 = vmul.f32 %v8754_v56, %v8344_v4  ;;  %v969_v49 = vadd.f32 %v937_v62, %v8659_v31  ;;  %v8806_v29 = vadd.f32 %v936_v43, %v8677_v13  ;;  %v11856_v62 = vld [vmem:[#allocation78_spill] sm:$0xff]  ;;  %v8877_v43 = vld [vmem:[%s7922_s30 + $0xfa] sm:$0xff] }
 0x230   : > { %v1181_v51 = vmul.f32 %v8754_v56, %v8346_v9  ;;  %v8812_v55 = vadd.f32 %v940_v38, %v8664_v6  ;;  %v8815_v0 = vadd.f32 %v939_v50, %v8688_v42  ;;  %v8818_v41 = vadd.f32 %v943_v32, %v8672_v36  ;;  %v8849_v36 = vld [vmem:[%s11602_s1 + $0x3] ss:$0 sm:$0xff]  ;;  %v11857_v50 = vld [vmem:[#allocation79_spill] sm:$0xff] }
 0x231   : > { %v1184_v2 = vmul.f32 %v8754_v56, %v8355_v12  ;;  %v8824_v4 = vadd.f32 %v942_v16, %v8694_v44  ;;  %v8826_v9 = vadd.f32 %v1182_v7, %v956_v48  ;;  %v8829_v31 = vadd.f32 %v945_v63, %v8698_v19  ;;  %v11859_v16 = vld [vmem:[#allocation100_spill] sm:$0xff]  ;;  %v8892_v63 = vld [vmem:[%s11602_s1 + $0x5] ss:$0 sm:$0xff] }
 0x232   : > { %2374 = vperm.xlu2 %7674, %v6606_v18   ;;  %1872 = vperm.xlu1 %7673, %v8786_v60   ;;  %11846 = vst [vmem:[#allocation11_spill] sm:$0xff] %v8812_v55  ;;  %v1183_v42 = vmul.f32 %v8754_v56, %v8357_v14  ;;  %v8837_v13 = vadd.f32 %v1185_v37, %v959_v40  ;;  %v6608_v37 = vld [vmem:[%s7922_s30 + $0xd9] sm:$0xff] }
 0x233   : > { %11847 = vst [vmem:[#allocation12_spill] sm:$0xff] %v8818_v41  ;;  %1862 = vperm.xlu0 %7672, %v8606_v46   ;;  %v8840_v12 = vadd.f32 %v949_v45, %v8685_v8  ;;  %v8842_v44 = vadd.f32 %v1188_v53, %v962_v58  ;;  %v8844_v46 = vadd.f32 %v1191_v28, %v965_v5  ;;  %v11852_v8 = vld [vmem:[#allocation72_spill] sm:$0xff]  ;;  %v8880_v5 = vld [vmem:[%s7922_s30 + $0xe2] sm:$0xff]  ;;  %v11860_v45 = vld [vmem:[#allocation71_spill] sm:$0xff] }
 0x234   : > { %11848 = vst [vmem:[#allocation13_spill] sm:$0xff] %v8824_v4  ;;  %v8833_v6 = vpop.permute.xlu2 %2364  ;;  %v8835_v22 = vpop.permute.xlu1 %1832  ;;  %v1213_v19 = vadd.f32 %v1181_v51, %v8702_v1  ;;  %v8856_v25 = vmul.f32 %v8754_v56, %v11851_v39  ;;  %v1187_v61 = vmul.f32 %v8754_v56, %v11852_v8  ;;  %v1186_v48 = vmul.f32 %v8754_v56, %v11853_v21  ;;  %v11854_v1 = vld [vmem:[#allocation75_spill] sm:$0xff]  ;;  %v11855_v58 = vld [vmem:[#allocation76_spill] sm:$0xff]  ;;  %v11879_v17 = vld [vmem:[#allocation109_spill] sm:$0xff] }
 0x235   : > { %11849 = vst [vmem:[#allocation14_spill] sm:$0xff] %v8829_v31  ;;  %v8851_v14 = vpop.permute.xlu0 %1822  ;;  %v8868_v34 = vadd.f32 %v1184_v2, %v8730_v20  ;;  %v1190_v40 = vmul.f32 %v8754_v56, %v11854_v1  ;;  %v1189_v27 = vmul.f32 %v8754_v56, %v11855_v58  ;;  %v1193_v30 = vmul.f32 %v8754_v56, %v11856_v62  ;;  %v11858_v20 = vld [vmem:[#allocation82_spill] sm:$0xff]  ;;  %v11863_v51 = vld [vmem:[#allocation92_spill] sm:$0xff]  ;;  %v11865_v1 = vld [vmem:[#allocation115_spill] sm:$0xff] }
 0x236   : > { %11850 = vst [vmem:[#allocation15_spill] sm:$0xff] %v8840_v12  ;;  %v1215_v38 = vadd.f32 %v1183_v42, %v8745_v52  ;;  %v1192_v32 = vmul.f32 %v8754_v56, %v11857_v50  ;;  %v1195_v18 = vmul.f32 %v8754_v56, %v11858_v20  ;;  %v1440_v7 = vmul.f32 %v8849_v36, %v11859_v16  ;;  %v11862_v52 = vld [vmem:[#allocation89_spill] sm:$0xff]  ;;  %v11864_v42 = vld [vmem:[#allocation95_spill] sm:$0xff] }
 0x237   : > { %v8897_v53 = vmul.f32 %v8754_v56, %v11860_v45  ;;  %v1442_v28 = vmul.f32 %v8849_v36, %v11862_v52  ;;  %v1445_v2 = vmul.f32 %v8849_v36, %v11863_v51  ;;  %v1448_v39 = vmul.f32 %v8849_v36, %v11864_v42  ;;  %v8912_v56 = vld [vmem:[%s11602_s1 + $0x6] ss:$0 sm:$0xff] }
 0x238   : > { %v1219_v8 = vadd.f32 %v1187_v61, %v8736_v26  ;;  %v1218_v21 = vadd.f32 %v1186_v48, %v8761_v10  ;;  %v1698_v58 = vmul.f32 %v8865_v47, %v11865_v1  ;;  %v1222_v62 = vadd.f32 %v1190_v40, %v8738_v15  ;;  %v11866_v10 = vld [vmem:[#allocation124_spill] sm:$0xff]  ;;  %v11867_v45 = vld [vmem:[#allocation129_spill] sm:$0xff] }
 0x239   : > { %11861 = vst [vmem:[#allocation28_spill] sm:$0xff] %v8897_v53  ;;  %v1221_v50 = vadd.f32 %v1189_v27, %v8767_v24  ;;  %v8919_v26 = vadd.f32 %v1193_v30, %v8740_v23  ;;  %v1700_v61 = vmul.f32 %v8865_v47, %v11866_v10  ;;  %v1224_v48 = vadd.f32 %v1192_v32, %v8772_v54  ;;  %v11868_v27 = vld [vmem:[#allocation143_spill] sm:$0xff]  ;;  %v8951_v1 = vld [vmem:[%s11602_s1 + $0x7] ss:$0 sm:$0xff] }
 0x23a   : > { %1892 = vperm.xlu2 %7674, %v8877_v43   ;;  %1882 = vperm.xlu1 %7673, %v8880_v5   ;;  %v1227_v20 = vadd.f32 %v1195_v18, %v969_v49  ;;  %v1472_v16 = vadd.f32 %v1440_v7, %v1213_v19  ;;  %v1956_v52 = vmul.f32 %v8892_v63, %v11867_v45  ;;  %v11869_v49 = vld [vmem:[#allocation98_spill] sm:$0xff]  ;;  %v11870_v32 = vld [vmem:[#allocation99_spill] sm:$0xff] }
 0x23b   : > { %2384 = vperm.xlu0 %7672, %v6608_v37   ;;  %v1474_v24 = vadd.f32 %v1442_v28, %v1215_v38  ;;  %v8930_v23 = vadd.f32 %v1445_v2, %v1218_v21  ;;  %v8932_v40 = vadd.f32 %v1448_v39, %v1221_v50  ;;  %v1958_v30 = vmul.f32 %v8892_v63, %v11868_v27  ;;  %v11871_v37 = vld [vmem:[#allocation147_spill] sm:$0xff]  ;;  %v11872_v38 = vld [vmem:[#allocation101_spill] sm:$0xff]  ;;  %v11873_v2 = vld [vmem:[#allocation102_spill] sm:$0xff] }
 0x23c   : > { %v8926_v51 = vpop.permute.xlu2 %2319  ;;  %v8928_v15 = vpop.permute.xlu1 %2334  ;;  %v1451_v19 = vmul.f32 %v8849_v36, %v11869_v49  ;;  %v1441_v18 = vmul.f32 %v8849_v36, %v11870_v32  ;;  %v1730_v7 = vadd.f32 %v1698_v58, %v1472_v16  ;;  %v2215_v42 = vmul.f32 %v8912_v56, %v11871_v37  ;;  %v11874_v50 = vld [vmem:[#allocation146_spill] sm:$0xff]  ;;  %v11875_v16 = vld [vmem:[#allocation103_spill] sm:$0xff]  ;;  %v11876_v49 = vld [vmem:[#allocation105_spill] sm:$0xff] }
 0x23d   : > { %v8936_v54 = vpop.permute.xlu0 %2071  ;;  %v1454_v28 = vmul.f32 %v8849_v36, %v11872_v38  ;;  %v1444_v39 = vmul.f32 %v8849_v36, %v11873_v2  ;;  %v1732_v21 = vadd.f32 %v1700_v61, %v1474_v24  ;;  %v2217_v10 = vmul.f32 %v8912_v56, %v11874_v50  ;;  %v6575_v45 = vld [vmem:[%s7922_s30 + $0xc8] sm:$0xff]  ;;  %v11878_v38 = vld [vmem:[#allocation108_spill] sm:$0xff] }
 0x23e   : > { %v8957_v58 = vld [vmem:[%s7922_s30 + $0x109] sm:$0xff]  ;;  %v1443_v27 = vmul.f32 %v8849_v36, %v11875_v16  ;;  %v1447_v32 = vmul.f32 %v8849_v36, %v11876_v49  ;;  %v1988_v24 = vadd.f32 %v1956_v52, %v1730_v7  ;;  %v1450_v2 = vmul.f32 %v8849_v36, %v11878_v38  ;;  %v8974_v16 = vld [vmem:[%s11602_s1 + $0x8] ss:$0 sm:$0xff]  ;;  %v11881_v38 = vld [vmem:[#allocation144_spill] sm:$0xff] }
 0x23f   : > { %v11877_v37 = vld [vmem:[#allocation106_spill] sm:$0xff]  ;;  %v1449_v12 = vmul.f32 %v8849_v36, %v11879_v17  ;;  %v1990_v50 = vadd.f32 %v1958_v30, %v1732_v21  ;;  %v2475_v41 = vmul.f32 %v8951_v1, %v8769_v33  ;;  %v8976_v49 = vadd.f32 %v1451_v19, %v1224_v48  ;;  %v11880_v30 = vld [vmem:[#allocation119_spill] sm:$0xff] }
 0x240   : > { %v1446_v61 = vmul.f32 %v8849_v36, %v11877_v37  ;;  %v1473_v37 = vadd.f32 %v1441_v18, %v8826_v9  ;;  %v2247_v52 = vadd.f32 %v2215_v42, %v1988_v24  ;;  %v8980_v7 = vadd.f32 %v1454_v28, %v1227_v20  ;;  %v11882_v9 = vld [vmem:[#allocation141_spill] sm:$0xff]  ;;  %v11886_v24 = vld [vmem:[#allocation132_spill] sm:$0xff] }
 0x241   : > { %v1476_v17 = vadd.f32 %v1444_v39, %v8837_v13  ;;  %v1704_v33 = vmul.f32 %v8865_v47, %v11880_v30  ;;  %v2249_v21 = vadd.f32 %v2217_v10, %v1990_v50  ;;  %v1475_v55 = vadd.f32 %v1443_v27, %v8868_v34  ;;  %v8996_v39 = vld [vmem:[%s11603_s2] ss:$0 sm:$0xff] }
 0x242   : > { %2121 = vperm.xlu2 %7674, %v6575_v45   ;;  %2404 = vperm.xlu1 %7673, %v8957_v58   ;;  %v1479_v48 = vadd.f32 %v1447_v32, %v8842_v44  ;;  %v1478_v19 = vadd.f32 %v1446_v61, %v1219_v8  ;;  %v2473_v18 = vmul.f32 %v8951_v1, %v11882_v9  ;;  %v11883_v8 = vld [vmem:[#allocation111_spill] sm:$0xff]  ;;  %v11884_v27 = vld [vmem:[#allocation41_spill] sm:$0xff] }
 0x243   : > { %2394 = vperm.xlu0 %7672, %v11881_v38   ;;  %v8991_v20 = vadd.f32 %v1450_v2, %v8844_v46  ;;  %v1481_v13 = vadd.f32 %v1449_v12, %v1222_v62  ;;  %v2507_v28 = vadd.f32 %v2475_v41, %v2249_v21  ;;  %v1452_v10 = vmul.f32 %v8849_v36, %v11883_v8  ;;  %v11885_v41 = vld [vmem:[#allocation47_spill] sm:$0xff]  ;;  %v11887_v30 = vld [vmem:[#allocation45_spill] sm:$0xff] }
 0x244   : > { %v2603_v42 = vpop.permute.xlu2 %2602  ;;  %v2583_v45 = vpop.permute.xlu1 %2582  ;;  %v1701_v32 = vmul.f32 %v8865_v47, %v11884_v27  ;;  %v2505_v61 = vadd.f32 %v2473_v18, %v2247_v52  ;;  %v1736_v12 = vadd.f32 %v1704_v33, %v1478_v19  ;;  %v1707_v62 = vmul.f32 %v8865_v47, %v11885_v41  ;;  %v11888_v38 = vld [vmem:[#allocation125_spill] sm:$0xff]  ;;  %v11889_v9 = vld [vmem:[#allocation127_spill] sm:$0xff]  ;;  %v11891_v19 = vld [vmem:[#allocation130_spill] sm:$0xff] }
 0x245   : > { %v2733_v34 = vmul.f32 %v8974_v16, %v2583_v45  ;;  %v2573_v44 = vpop.permute.xlu0 %2572  ;;  %v1962_v2 = vmul.f32 %v8892_v63, %v11886_v24  ;;  %v1710_v21 = vmul.f32 %v8865_v47, %v11887_v30  ;;  %v1699_v36 = vmul.f32 %v8865_v47, %v11888_v38  ;;  %v6577_v18 = vld [vmem:[%s7922_s30 + $0xe0] sm:$0xff]  ;;  %v11892_v27 = vld [vmem:[#allocation6_spill] sm:$0xff]  ;;  %v11893_v24 = vld [vmem:[#allocation131_spill] sm:$0xff] }
 0x246   : > { %v2731_v46 = vmul.f32 %v8974_v16, %v2573_v44  ;;  %v1703_v45 = vmul.f32 %v8865_v47, %v11889_v9  ;;  %v11890_v44 = vld [vmem:[#allocation128_spill] sm:$0xff]  ;;  %v1706_v8 = vmul.f32 %v8865_v47, %v11891_v19  ;;  %v1484_v41 = vadd.f32 %v1452_v10, %v8919_v26  ;;  %v11896_v26 = vld [vmem:[#allocation133_spill] sm:$0xff] }
 0x247   : > { %v2765_v50 = vadd.f32 %v2733_v34, %v2507_v28  ;;  %v1702_v33 = vmul.f32 %v8865_v47, %v11890_v44  ;;  %v2221_v28 = vmul.f32 %v8912_v56, %v11892_v27  ;;  %v1705_v30 = vmul.f32 %v8865_v47, %v11893_v24 }
 0x248   : > { %v2763_v52 = vadd.f32 %v2731_v46, %v2505_v61  ;;  %v11894_v61 = vld [vmem:[#allocation148_spill] sm:$0xff]  ;;  %v11895_v46 = vld [vmem:[#allocation149_spill] sm:$0xff]  ;;  %v1733_v9 = vadd.f32 %v1701_v32, %v1475_v55  ;;  %v9028_v44 = vadd.f32 %v1707_v62, %v1481_v13  ;;  %v1994_v19 = vadd.f32 %v1962_v2, %v1736_v12  ;;  %v11897_v2 = vld [vmem:[#allocation134_spill] sm:$0xff] }
 0x249   : > { %v2801_v34 = vadd.f32 %v8996_v39, %v2765_v50  ;;  %v9032_v27 = vadd.f32 %v1710_v21, %v1484_v41  ;;  %v1731_v50 = vadd.f32 %v1699_v36, %v1473_v37  ;;  %v1709_v10 = vmul.f32 %v8865_v47, %v11896_v26  ;;  %v11898_v36 = vld [vmem:[#allocation135_spill] sm:$0xff]  ;;  %v11899_v41 = vld [vmem:[#allocation5_spill] sm:$0xff] }
 0x24a   : > { %v2799_v38 = vadd.f32 %v8996_v39, %v2763_v52  ;;  %2642 = vperm.xlu2 %7674, %v11894_v61   ;;  %2632 = vperm.xlu1 %7673, %v11895_v46   ;;  %v9041_v55 = vadd.f32 %v1703_v45, %v8930_v23  ;;  %v1734_v13 = vadd.f32 %v1702_v33, %v1476_v17  ;;  %v6581_v45 = vld [vmem:[%s7922_s30 + $0x110] sm:$0xff]  ;;  %v11901_v46 = vld [vmem:[#allocation138_spill] sm:$0xff] }
 0x24b   : > { %v9030_v3 = vmax.f32 %v2801_v34, 0.0  ;;  %2131 = vperm.xlu0 %7672, %v6577_v18   ;;  %v1738_v32 = vadd.f32 %v1706_v8, %v8932_v40  ;;  %v2253_v12 = vadd.f32 %v2221_v28, %v1994_v19  ;;  %v9046_v37 = vadd.f32 %v1705_v30, %v1479_v48  ;;  %v11900_v48 = vld [vmem:[#allocation136_spill] sm:$0xff] }
 0x24c   : > { %v2831_v24 = vmax.f32 %v2799_v38, 0.0  ;;  %v9036_v52 = vpop.permute.xlu2 %2612  ;;  %v9038_v61 = vpop.permute.xlu1 %2354  ;;  %v1708_v21 = vmul.f32 %v8865_v47, %v11897_v2  ;;  %v1964_v18 = vmul.f32 %v8892_v63, %v11898_v36  ;;  %v2479_v23 = vmul.f32 %v8951_v1, %v11899_v41  ;;  %v6579_v38 = vld [vmem:[%s7922_s30 + $0xf8] sm:$0xff]  ;;  %v11902_v36 = vld [vmem:[#allocation151_spill] sm:$0xff] }
 0x24d   : > { %v9044_v62 = vpop.permute.xlu0 %1852  ;;  %v2901_v34 = vrot.slane %v9030_v3, 2  ;;  %v2737_v40 = vmul.f32 %v8974_v16, %v2603_v42  ;;  %v9058_v33 = vadd.f32 %v1709_v10, %v8976_v49  ;;  %v1712_v8 = vmul.f32 %v8865_v47, %v11900_v48  ;;  %v11903_v49 = vld [vmem:[#allocation152_spill] sm:$0xff] }
 0x24e   : > { %v2895_v17 = vrot.slane %v2831_v24, 2  ;;  %v2902_v28 = vrot.slane %v9030_v3, 4  ;;  %v2896_v30 = vrot.slane %v2831_v24, 4  ;;  %v1959_v19 = vmul.f32 %v8892_v63, %v11901_v46 }
 0x24f   : > { %v2511_v26 = vadd.f32 %v2479_v23, %v2253_v12  ;;  %v3097_v2 = vsel %vm444_vm0, %v2901_v34, -inf  ;;  %v1957_v41 = vmul.f32 %v8892_v63, %v11902_v36  ;;  %v1966_v10 = vmul.f32 %v8892_v63, %v11903_v49 }
 0x250   : > { %v3096_v42 = vsel %vm444_vm0, %v2895_v17, -inf  ;;  %v3088_v47 = vsel %vm444_vm0, %v9030_v3, -inf  ;;  %v3087_v48 = vsel %vm444_vm0, %v2831_v24, -inf  ;;  %v1740_v12 = vadd.f32 %v1708_v21, %v8991_v20 }
 0x251   : > { %v1996_v23 = vadd.f32 %v1964_v18, %v1738_v32  ;;  %v2769_v34 = vadd.f32 %v2737_v40, %v2511_v26  ;;  %v2903_v17 = vrot.slane %v9030_v3, 6  ;;  %v3106_v46 = vsel %vm444_vm0, %v2902_v28, -inf  ;;  %v11905_v32 = vld [vmem:[#allocation142_spill] sm:$0xff]  ;;  %v11908_v26 = vld [vmem:[#allocation7_spill] sm:$0xff] }
 0x252   : > { %2652 = vperm.xlu2 %7674, %v11904_v11   ;;  %2151 = vperm.xlu1 %7673, %v6581_v45   ;;  %v2897_v36 = vrot.slane %v2831_v24, 6  ;;  %v3098_v31 = vmax.f32 %v3096_v42, %v3097_v2  ;;  %v3105_v49 = vsel %vm444_vm0, %v2896_v30, -inf  ;;  %v9083_v11 = vadd.f32 %v1712_v8, %v8980_v7  ;;  %v11906_v24 = vld [vmem:[#allocation145_spill] sm:$0xff]  ;;  %v11907_v45 = vld [vmem:[#allocation150_spill] sm:$0xff] }
 0x253   : > { %2141 = vperm.xlu0 %7672, %v6579_v38   ;;  %v1991_v20 = vadd.f32 %v1959_v19, %v1733_v9  ;;  %v1960_v21 = vmul.f32 %v8892_v63, %v11905_v32  ;;  %v3089_v3 = vmax.f32 %v3087_v48, %v3088_v47  ;;  %v2225_v40 = vmul.f32 %v8912_v56, %v11906_v24  ;;  %v6609_v2 = vld [vmem:[%s7922_s30 + $0xe1] sm:$0xff]  ;;  %v6607_v42 = vld [vmem:[%s7922_s30 + $0xc9] sm:$0xff] }
 0x254   : > { %v9080_v4 = vpop.permute.xlu2 %2349  ;;  %v2092_v53 = vpop.permute.xlu1 %2091  ;;  %v2216_v28 = vmul.f32 %v8912_v56, %v11907_v45  ;;  %v1989_v30 = vadd.f32 %v1957_v41, %v1731_v50  ;;  %v1998_v38 = vadd.f32 %v1966_v10, %v1740_v12  ;;  %v2219_v7 = vmul.f32 %v8912_v56, %v11908_v26  ;;  %v9105_v41 = vld [vmem:[%s7922_s30 + $0x10a] sm:$0xff] }
 0x255   : > { %v9087_v18 = vpop.permute.xlu0 %2081  ;;  %v1965_v9 = vmul.f32 %v8892_v63, %v8756_v35  ;;  %v2223_v8 = vmul.f32 %v8912_v56, %v8758_v59  ;;  %v3107_v19 = vmax.f32 %v3105_v49, %v3106_v46  ;;  %v2805_v47 = vadd.f32 %v8996_v39, %v2769_v34 }
 0x256   : > { %v3115_v48 = vsel %vm444_vm0, %v2903_v17, -inf  ;;  %v3099_v32 = vrot.slane %v3098_v31, 4  ;;  %v3114_v50 = vsel %vm444_vm0, %v2897_v36, -inf  ;;  %v1992_v10 = vadd.f32 %v1960_v21, %v1734_v13 }
 0x257   : > { %v2483_v12 = vmul.f32 %v8951_v1, %v8833_v6  ;;  %v3090_v35 = vrot.slane %v3089_v3, 4  ;;  %v2481_v59 = vmul.f32 %v8951_v1, %v9038_v61  ;;  %v2257_v46 = vadd.f32 %v2225_v40, %v1998_v38 }
 0x258   : > { %v2248_v49 = vadd.f32 %v2216_v28, %v1989_v30  ;;  %v2477_v34 = vmul.f32 %v8951_v1, %v8928_v15  ;;  %v2255_v17 = vadd.f32 %v2223_v8, %v1996_v23  ;;  %v1963_v36 = vmul.f32 %v8892_v63, %v8835_v22 }
 0x259   : > { %v3108_v24 = vrot.slane %v3107_v19, 4  ;;  %v3116_v13 = vmax.f32 %v3114_v50, %v3115_v48  ;;  %v2251_v6 = vadd.f32 %v2219_v7, %v1992_v10  ;;  %v9117_v21 = vadd.f32 %v1965_v9, %v9028_v44 }
 0x25a   : > { %2389 = vperm.xlu2 %7674, %v6609_v2   ;;  %2379 = vperm.xlu1 %7673, %v6607_v42   ;;  %v9119_v61 = vmax.f32 %v2805_v47, 0.0  ;;  %v3100_v40 = vmax.f32 %v3098_v31, %v3099_v32  ;;  %v9123_v28 = vadd.f32 %v2483_v12, %v2257_v46  ;;  %v1961_v22 = vmul.f32 %v8892_v63, %v8851_v14 }
 0x25b   : > { %2662 = vperm.xlu0 %7672, %v9105_v41   ;;  %v3091_v23 = vmax.f32 %v3089_v3, %v3090_v35  ;;  %v2513_v30 = vadd.f32 %v2481_v59, %v2255_v17  ;;  %v2474_v44 = vmul.f32 %v8951_v1, %v8926_v51  ;;  %v2509_v26 = vadd.f32 %v2477_v34, %v2251_v6  ;;  %v9138_v3 = vld [vmem:[%s7922_s30 + $0x111] sm:$0xff] }
 0x25c   : > { %v9121_v45 = vpop.permute.xlu2 %2359  ;;  %v2593_v15 = vpop.permute.xlu1 %2592  ;;  %v2218_v31 = vmul.f32 %v8912_v56, %v8936_v54  ;;  %v1995_v9 = vadd.f32 %v1963_v36, %v9046_v37  ;;  %v3109_v8 = vmax.f32 %v3107_v19, %v3108_v24  ;;  %v3117_v2 = vrot.slane %v3116_v13, 4 }
 0x25d   : > { %v9127_v38 = vpop.permute.xlu0 %2329  ;;  %v2735_v7 = vmul.f32 %v8974_v16, %v2593_v15  ;;  %v2739_v14 = vmul.f32 %v8974_v16, %v9036_v52  ;;  %v2913_v42 = vrot.slane %v9119_v61, 2  ;;  %v2914_v47 = vrot.slane %v9119_v61, 4 }
 0x25e   : > { %v3101_v51 = vrot.slane %v3100_v40, 2  ;;  %v9143_v32 = vadd.f32 %v1961_v22, %v9041_v55  ;;  %v3092_v54 = vrot.slane %v3091_v23, 2  ;;  %v2222_v37 = vmul.f32 %v8912_v56, %v2092_v53 }
 0x25f   : > { %v2767_v48 = vadd.f32 %v2735_v7, %v2509_v26  ;;  %v2771_v50 = vadd.f32 %v2739_v14, %v2513_v30  ;;  %v9146_v19 = vadd.f32 %v2474_v44, %v2248_v49  ;;  %v9148_v10 = vadd.f32 %v2218_v31, %v1991_v20  ;;  %v9168_v31 = vld [vmem:[%s7922_s30 + $0x112] sm:$0xff] }
 0x260   : > { %v2915_v12 = vrot.slane %v9119_v61, 6  ;;  %v3160_v55 = vsel %vm444_vm0, %v9119_v61, -inf  ;;  %v3110_v35 = vrot.slane %v3109_v8, 2  ;;  %v3118_v59 = vmax.f32 %v3116_v13, %v3117_v2 }
 0x261   : > { %v2803_v52 = vadd.f32 %v8996_v39, %v2767_v48  ;;  %v3169_v53 = vsel %vm444_vm0, %v2913_v42, -inf  ;;  %v3178_v20 = vsel %vm444_vm0, %v2914_v47, -inf  ;;  %v3102_v46 = vmax.f32 %v3100_v40, %v3101_v51 }
 0x262   : > { %2637 = vperm.xlu2 %7674, %v8786_v60   ;;  %2409 = vperm.xlu1 %7673, %v9138_v3   ;;  %v3093_v17 = vmax.f32 %v3091_v23, %v3092_v54  ;;  %v2807_v36 = vadd.f32 %v8996_v39, %v2771_v50  ;;  %v1967_v24 = vmul.f32 %v8892_v63, %v9044_v62  ;;  %v3119_v30 = vrot.slane %v3118_v59, 2 }
 0x263   : > { %2399 = vperm.xlu0 %7672, %v8720_v57   ;;  %v2835_v49 = vmax.f32 %v2803_v52, 0.0  ;;  %v2254_v13 = vadd.f32 %v2222_v37, %v1995_v9  ;;  %v3111_v40 = vmax.f32 %v3109_v8, %v3110_v35  ;;  %v2480_v44 = vmul.f32 %v8951_v1, %v9080_v4 }
 0x264   : > { %v2608_v34 = vpop.permute.xlu2 %2607  ;;  %v9159_v60 = vpop.permute.xlu1 %2111  ;;  %v3103_v23 = vrot.slane %v3102_v46, 1  ;;  %v2220_v9 = vmul.f32 %v8912_v56, %v9087_v18  ;;  %v3094_v42 = vrot.slane %v3093_v17, 1  ;;  %v9175_v47 = vmax.f32 %v2807_v36, 0.0 }
 0x265   : > { %v2102_v6 = vpop.permute.xlu0 %2101  ;;  %v2907_v57 = vrot.slane %v2835_v49, 2  ;;  %v2908_v61 = vrot.slane %v2835_v49, 4  ;;  %v2909_v15 = vrot.slane %v2835_v49, 6  ;;  %v3159_v22 = vsel %vm444_vm0, %v2835_v49, -inf }
 0x266   : > { %v3161_v26 = vmax.f32 %v3159_v22, %v3160_v55  ;;  %v2738_v62 = vmul.f32 %v8974_v16, %v2608_v34  ;;  %v2512_v51 = vadd.f32 %v2480_v44, %v2254_v13  ;;  %v3112_v48 = vrot.slane %v3111_v40, 1  ;;  %v9197_v22 = vld [vmem:[%s7922_s30 + $0x121] sm:$0xff] }
 0x267   : > { %v3168_v7 = vsel %vm444_vm0, %v2907_v57, -inf  ;;  %v3177_v63 = vsel %vm444_vm0, %v2908_v61, -inf  ;;  %v3186_v4 = vsel %vm444_vm0, %v2909_v15, -inf  ;;  %v3120_v54 = vmax.f32 %v3118_v59, %v3119_v30  ;;  %v9194_v15 = vld [vmem:[%s7922_s30 + $0x139] sm:$0xff] }
 0x268   : > { %v3162_v2 = vrot.slane %v3161_v26, 4  ;;  %v3170_v8 = vmax.f32 %v3168_v7, %v3169_v53  ;;  %v3179_v14 = vmax.f32 %v3177_v63, %v3178_v20  ;;  %v3187_v18 = vsel %vm444_vm0, %v2915_v12, -inf }
 0x269   : > { %v3104_v52 = vmax.f32 %v3102_v46, %v3103_v23  ;;  %v1999_v55 = vadd.f32 %v1967_v24, %v9058_v33  ;;  %v2770_v35 = vadd.f32 %v2738_v62, %v2512_v51  ;;  %v3188_v34 = vmax.f32 %v3186_v4, %v3187_v18 }
 0x26a   : > { %2667 = vperm.xlu2 %7674, %v9168_v31   ;;  %2657 = vperm.xlu1 %7673, %v8877_v43   ;;  %v3171_v50 = vrot.slane %v3170_v8, 4  ;;  %v3180_v37 = vrot.slane %v3179_v14, 4  ;;  %v3163_v43 = vmax.f32 %v3161_v26, %v3162_v2  ;;  %v3095_v13 = vmax.f32 %v3093_v17, %v3094_v42 }
 0x26b   : > { %2647 = vperm.xlu0 %7672, %v8880_v5   ;;  %v2919_v5 = vrot.slane %v9175_v47, 2  ;;  %v2920_v12 = vrot.slane %v9175_v47, 4  ;;  %v9190_v33 = vadd.f32 %v2220_v9, %v9143_v32  ;;  %v3113_v46 = vmax.f32 %v3111_v40, %v3112_v48 }
 0x26c   : > { %v9183_v53 = vpop.permute.xlu2 %1629  ;;  %v9185_v20 = vpop.permute.xlu1 %2339  ;;  %v3172_v49 = vmax.f32 %v3170_v8, %v3171_v50  ;;  %v3181_v59 = vmax.f32 %v3179_v14, %v3180_v37  ;;  %v3121_v24 = vrot.slane %v3120_v54, 1  ;;  %v2921_v57 = vrot.slane %v9175_v47, 6 }
 0x26d   : > { %v2623_v36 = vpop.permute.xlu0 %2622  ;;  %v3728_v30 = vsel %vm3727_vm1, %v3104_v52, %v3095_v13  ;;  %v2482_v17 = vmul.f32 %v8951_v1, %v9121_v45  ;;  %v2806_v44 = vadd.f32 %v8996_v39, %v2770_v35  ;;  %v2224_v26 = vmul.f32 %v8912_v56, %v2102_v6 }
 0x26e   : > { %v3173_v61 = vrot.slane %v3172_v49, 2  ;;  %v3164_v32 = vrot.slane %v3163_v43, 2  ;;  %v3182_v23 = vrot.slane %v3181_v59, 2  ;;  %v3189_v40 = vrot.slane %v3188_v34, 4 }
 0x26f   : > { %v2476_v7 = vmul.f32 %v8951_v1, %v9127_v38  ;;  %v3231_v62 = vsel %vm444_vm0, %v9175_v47, -inf  ;;  %v2741_v9 = vmul.f32 %v8974_v16, %v2623_v36  ;;  %v3122_v45 = vmax.f32 %v3120_v54, %v3121_v24 }
 0x270   : > { %v3174_v63 = vmax.f32 %v3172_v49, %v3173_v61  ;;  %v3730_v6 = vsel %vm3729_vm2, %v3113_v46, %v3728_v30  ;;  %v2226_v2 = vmul.f32 %v8912_v56, %v9159_v60  ;;  %v3240_v8 = vsel %vm444_vm0, %v2919_v5, -inf }
 0x271   : > { %v9216_v38 = vmax.f32 %v2806_v44, 0.0  ;;  %v2256_v14 = vadd.f32 %v2224_v26, %v9117_v21  ;;  %v2773_v42 = vadd.f32 %v2741_v9, %v9123_v28  ;;  %v3165_v51 = vmax.f32 %v3163_v43, %v3164_v32 }
 0x272   : > { %1659 = vperm.xlu2 %7674, %v9194_v15   ;;  %1649 = vperm.xlu1 %7673, %v9197_v22   ;;  %v3183_v48 = vmax.f32 %v3181_v59, %v3182_v23  ;;  %v3190_v54 = vmax.f32 %v3188_v34, %v3189_v40  ;;  %v3249_v50 = vsel %vm444_vm0, %v2920_v12, -inf  ;;  %v11627_v56 = vmov 0.0  }
 0x273   : > { %1639 = vperm.xlu0 %7672, %v8957_v58   ;;  %446 = vst.msk [vmem:[#allocation2 + $0x10] sm:$0xff] %vm442_vm4, %v11627_v56  ;;  %v3175_v60 = vrot.slane %v3174_v63, 1  ;;  %v2508_v21 = vadd.f32 %v2476_v7, %v9148_v10  ;;  %v2809_v28 = vadd.f32 %v8996_v39, %v2773_v42  ;;  %v9230_v18 = vadd.f32 %v2226_v2, %v1999_v55  ;;  %v9242_v10 = vld [vmem:[%s7922_s30 + $0x122] sm:$0xff]  ;;  %v9248_v55 = vld [vmem:[%s7922_s30 + $0x151] sm:$0xff] }
 0x274   : > { %v9220_v47 = vpop.permute.xlu2 %1877  ;;  %v2588_v4 = vpop.permute.xlu1 %2587  ;;  %447 = vst.msk [vmem:[#allocation2 + $0x18] sm:$0x3] %vm444_vm0, %v11627_v56  ;;  %v9233_v52 = vsel %vm444_vm0, %v2921_v57, -inf  ;;  %v9236_v35 = vsel %vm3731_vm3, %v3122_v45, %v3730_v6  ;;  %v2916_v49 = vrot.slane %v9216_v38, 2  ;;  %v9250_v36 = vadd.f32 %v2482_v17, %v2256_v14 }
 0x275   : > { %v2578_v58 = vpop.permute.xlu0 %2577  ;;  %v2734_v37 = vmul.f32 %v8974_v16, %v2588_v4  ;;  %443 = vst.msk [vmem:[#allocation2] sm:$0xff] %vm442_vm4, %v11627_v56  ;;  %v2841_v59 = vmax.f32 %v2809_v28, 0.0  ;;  %v3166_v13 = vrot.slane %v3165_v51, 1  ;;  %v3184_v5 = vrot.slane %v3183_v48, 1 }
 0x276   : > { %v2732_v43 = vmul.f32 %v8974_v16, %v2578_v58  ;;  %445 = vst.msk [vmem:[#allocation2 + $0x8] sm:$0x3] %vm444_vm0, %v11627_v56  ;;  %v3191_v12 = vrot.slane %v3190_v54, 2  ;;  %v3176_v24 = vmax.f32 %v3174_v63, %v3175_v60  ;;  %v2917_v32 = vrot.slane %v9216_v38, 4 }
 0x277   : > { %v2766_v34 = vadd.f32 %v2734_v37, %v2508_v21  ;;  %448 = vst.msk [vmem:[#allocation2 + $0x20] sm:$0xff] %vm442_vm4, %v11627_v56  ;;  %v2925_v57 = vrot.slane %v2841_v59, 2  ;;  %v2926_v61 = vrot.slane %v2841_v59, 4  ;;  %v3232_v30 = vsel %vm444_vm0, %v2841_v59, -inf }
 0x278   : > { %v2764_v46 = vadd.f32 %v2732_v43, %v9146_v19  ;;  %449 = vst.msk [vmem:[#allocation2 + $0x28] sm:$0x3] %vm444_vm0, %v11627_v56  ;;  %v2927_v17 = vrot.slane %v2841_v59, 6  ;;  %v3233_v44 = vmax.f32 %v3231_v62, %v3232_v30  ;;  %v2918_v23 = vrot.slane %v9216_v38, 6 }
 0x279   : > { %v2802_v26 = vadd.f32 %v8996_v39, %v2766_v34  ;;  %450 = vst.msk [vmem:[#allocation2 + $0x30] sm:$0xff] %vm442_vm4, %v11627_v56  ;;  %v3241_v40 = vsel %vm444_vm0, %v2925_v57, -inf  ;;  %v3250_v7 = vsel %vm444_vm0, %v2926_v61, -inf  ;;  %v3167_v62 = vmax.f32 %v3165_v51, %v3166_v13 }
 0x27a   : > { %1907 = vperm.xlu2 %7674, %v9242_v10   ;;  %1897 = vperm.xlu1 %7673, %v9105_v41   ;;  %v2800_v19 = vadd.f32 %v8996_v39, %v2764_v46  ;;  %451 = vst.msk [vmem:[#allocation2 + $0x38] sm:$0x3] %vm444_vm0, %v11627_v56  ;;  %v9275_v9 = vsel %vm444_vm0, %v9216_v38, -inf  ;;  %v2478_v45 = vmul.f32 %v8951_v1, %v9185_v20  ;;  %v3234_v51 = vrot.slane %v3233_v44, 4  ;;  %v9290_v20 = vld [vmem:[%s7922_s30 + $0x152] sm:$0xff] }
 0x27b   : > { %1669 = vperm.xlu0 %7672, %v9248_v55   ;;  %v3242_v6 = vmax.f32 %v3240_v8, %v3241_v40  ;;  %452 = vst.msk [vmem:[#allocation2 + $0x40] sm:$0xff] %vm442_vm4, %v11627_v56  ;;  %v3185_v14 = vmax.f32 %v3183_v48, %v3184_v5  ;;  %v3192_v42 = vmax.f32 %v3190_v54, %v3191_v12  ;;  %v2834_v4 = vmax.f32 %v2802_v26, 0.0  ;;  %v9293_v8 = vld [vmem:[%s7922_s30 + $0x13a] sm:$0xff] }
 0x27c   : > { %v9271_v41 = vpop.permute.xlu2 %2126  ;;  %v2598_v63 = vpop.permute.xlu1 %2597  ;;  %v2832_v58 = vmax.f32 %v2800_v19, 0.0  ;;  %453 = vst.msk [vmem:[#allocation2 + $0x48] sm:$0x3] %vm444_vm0, %v11627_v56  ;;  %v3741_v38 = vsel %vm3727_vm1, %v3176_v24, %v3167_v62  ;;  %v3251_v60 = vmax.f32 %v3249_v50, %v3250_v7  ;;  %v3259_v21 = vsel %vm444_vm0, %v2927_v17, -inf }
 0x27d   : > { %v9281_v2 = vpop.permute.xlu0 %2369  ;;  %454 = vst.msk [vmem:[#allocation2 + $0x50] sm:$0xff] %vm442_vm4, %v11627_v56  ;;  %v9296_v48 = vsel %vm444_vm0, %v2916_v49, -inf  ;;  %v9299_v54 = vsel %vm444_vm0, %v2917_v32, -inf  ;;  %v9302_v28 = vsel %vm444_vm0, %v2918_v23, -inf  ;;  %v2904_v37 = vrot.slane %v2834_v4, 2 }
 0x27e   : > { %455 = vst.msk [vmem:[#allocation2 + $0x58] sm:$0x3] %vm444_vm0, %v11627_v56  ;;  %v2510_v50 = vadd.f32 %v2478_v45, %v9190_v33  ;;  %v3243_v43 = vrot.slane %v3242_v6, 4  ;;  %v2905_v59 = vrot.slane %v2834_v4, 4  ;;  %v2906_v34 = vrot.slane %v2834_v4, 6 }
 0x27f   : > { %456 = vst.msk [vmem:[#allocation2 + $0x60] sm:$0xff] %vm442_vm4, %v11627_v56  ;;  %v3193_v49 = vrot.slane %v3192_v42, 1  ;;  %v3742_v13 = vsel %vm3729_vm2, %v3185_v14, %v3741_v38  ;;  %v3260_v5 = vmax.f32 %v9233_v52, %v3259_v21  ;;  %v2898_v12 = vrot.slane %v2832_v58, 2 }
 0x280   : > { %457 = vst.msk [vmem:[#allocation2 + $0x68] sm:$0x3] %vm444_vm0, %v11627_v56  ;;  %v3235_v33 = vmax.f32 %v3233_v44, %v3234_v51  ;;  %v3252_v46 = vrot.slane %v3251_v60, 4  ;;  %v3124_v24 = vsel %vm444_vm0, %v2834_v4, -inf  ;;  %v3133_v57 = vsel %vm444_vm0, %v2904_v37, -inf  ;;  %v6582_v51 = vld [vmem:[%s7922_s30 + $0x120] sm:$0xff] }
 0x281   : > { %458 = vst.msk [vmem:[#allocation2 + $0x70] sm:$0xff] %vm442_vm4, %v11627_v56  ;;  %v2899_v52 = vrot.slane %v2832_v58, 4  ;;  %v2900_v61 = vrot.slane %v2832_v58, 6  ;;  %v3123_v30 = vsel %vm444_vm0, %v2832_v58, -inf  ;;  %v3132_v17 = vsel %vm444_vm0, %v2898_v12, -inf }
 0x282   : > { %1644 = vperm.xlu2 %7674, %v9138_v3   ;;  %1927 = vperm.xlu1 %7673, %v9290_v20   ;;  %459 = vst.msk [vmem:[#allocation2 + $0x78] sm:$0x3] %vm444_vm0, %v11627_v56  ;;  %v3244_v26 = vmax.f32 %v3242_v6, %v3243_v43  ;;  %v3142_v19 = vsel %vm444_vm0, %v2905_v59, -inf  ;;  %v3151_v32 = vsel %vm444_vm0, %v2906_v34, -inf  ;;  %v2736_v23 = vmul.f32 %v8974_v16, %v2598_v63  ;;  %v6584_v63 = vld [vmem:[%s7922_s30 + $0x138] sm:$0xff]  ;;  %v9346_v34 = vld [vmem:[%s7922_s30 + $0x129] sm:$0xff] }
 0x283   : > { %1917 = vperm.xlu0 %7672, %v9293_v8   ;;  %460 = vst.msk [vmem:[#allocation2 + $0x80] sm:$0xff] %vm442_vm4, %v11627_v56  ;;  %v3125_v7 = vmax.f32 %v3123_v30, %v3124_v24  ;;  %v3134_v62 = vmax.f32 %v3132_v17, %v3133_v57  ;;  %v3141_v45 = vsel %vm444_vm0, %v2899_v52, -inf  ;;  %v3150_v6 = vsel %vm444_vm0, %v2900_v61, -inf }
 0x284   : > { %v9324_v3 = vpop.permute.xlu2 %2146  ;;  %v2628_v44 = vpop.permute.xlu1 %2627  ;;  %461 = vst.msk [vmem:[#allocation2 + $0x88] sm:$0x3] %vm444_vm0, %v11627_v56  ;;  %v3194_v14 = vmax.f32 %v3192_v42, %v3193_v49  ;;  %v3236_v4 = vrot.slane %v3235_v33, 2  ;;  %v9337_v58 = vmax.f32 %v3251_v60, %v3252_v46  ;;  %v3261_v38 = vrot.slane %v3260_v5, 4 }
 0x285   : > { %v9331_v40 = vpop.permute.xlu0 %2617  ;;  %462 = vst.msk [vmem:[#allocation2 + $0x90] sm:$0xff] %vm442_vm4, %v11627_v56  ;;  %v3126_v21 = vrot.slane %v3125_v7, 4  ;;  %v3135_v37 = vrot.slane %v3134_v62, 4  ;;  %v3143_v43 = vmax.f32 %v3141_v45, %v3142_v19  ;;  %v3152_v59 = vmax.f32 %v3150_v6, %v3151_v32 }
 0x286   : > { %463 = vst.msk [vmem:[#allocation2 + $0x98] sm:$0x3] %vm444_vm0, %v11627_v56  ;;  %v3245_v12 = vrot.slane %v3244_v26, 2  ;;  %v2768_v42 = vadd.f32 %v2736_v23, %v2510_v50  ;;  %v9349_v60 = vsel %vm3731_vm3, %v3194_v14, %v3742_v13  ;;  %v9351_v52 = vmax.f32 %v3235_v33, %v3236_v4  ;;  %v11936_v56 = vld [vmem:[#allocation114_spill] sm:$0xff] }
 0x287   : > { %v3127_v49 = vmax.f32 %v3125_v7, %v3126_v21  ;;  %v3136_v46 = vmax.f32 %v3134_v62, %v3135_v37  ;;  %v3144_v24 = vrot.slane %v3143_v43, 4  ;;  %v3153_v57 = vrot.slane %v3152_v59, 4  ;;  %v6586_v37 = vld [vmem:[%s7922_s30 + $0x150] sm:$0xff] }
 0x288   : > { %v9353_v61 = vmax.f32 %v3260_v5, %v3261_v38  ;;  %v2804_v30 = vadd.f32 %v8996_v39, %v2768_v42  ;;  %v2484_v50 = vmul.f32 %v8951_v1, %v9281_v2  ;;  %v3254_v13 = vrot.slane %v9337_v58, 2  ;;  %v9376_v42 = vld [vmem:[%s7922_s30 + $0x141] sm:$0xff] }
 0x289   : > { %v3128_v17 = vrot.slane %v3127_v49, 2  ;;  %v3137_v19 = vrot.slane %v3136_v46, 2  ;;  %v3145_v32 = vmax.f32 %v3143_v43, %v3144_v24  ;;  %v9364_v33 = vmax.f32 %v3244_v26, %v3245_v12  ;;  %v9372_v43 = vld [vmem:[%s7922_s30 + $0x159] sm:$0xff] }
 0x28a   : > { %2166 = vperm.xlu2 %7674, %v6584_v63   ;;  %2156 = vperm.xlu1 %7673, %v6582_v51   ;;  %v3154_v7 = vmax.f32 %v3152_v59, %v3153_v57  ;;  %v2836_v62 = vmax.f32 %v2804_v30, 0.0  ;;  %v2516_v1 = vadd.f32 %v2484_v50, %v9230_v18  ;;  %v2742_v4 = vmul.f32 %v8974_v16, %v2628_v44 }
 0x28b   : > { %1654 = vperm.xlu0 %7672, %v9346_v34   ;;  %v3129_v45 = vmax.f32 %v3127_v49, %v3128_v17  ;;  %v3138_v6 = vmax.f32 %v3136_v46, %v3137_v19  ;;  %v3146_v14 = vrot.slane %v3145_v32, 2 }
 0x28c   : > { %v9360_v23 = vpop.permute.xlu2 %2374  ;;  %v9362_v5 = vpop.permute.xlu1 %1867  ;;  %v3155_v38 = vrot.slane %v3154_v7, 2  ;;  %v2910_v63 = vrot.slane %v2836_v62, 2  ;;  %v2911_v51 = vrot.slane %v2836_v62, 4  ;;  %v2912_v21 = vrot.slane %v2836_v62, 6 }
 0x28d   : > { %v9367_v2 = vpop.permute.xlu0 %1857  ;;  %v3130_v26 = vrot.slane %v3129_v45, 1  ;;  %v3139_v59 = vrot.slane %v3138_v6, 1  ;;  %v3147_v12 = vmax.f32 %v3145_v32, %v3146_v14  ;;  %v3195_v18 = vsel %vm444_vm0, %v2836_v62, -inf }
 0x28e   : > { %v3156_v24 = vmax.f32 %v3154_v7, %v3155_v38  ;;  %v3197_v49 = vmax.f32 %v3195_v18, %v9275_v9  ;;  %v3204_v46 = vsel %vm444_vm0, %v2910_v63, -inf  ;;  %v3213_v44 = vsel %vm444_vm0, %v2911_v51, -inf }
 0x28f   : > { %v3131_v57 = vmax.f32 %v3129_v45, %v3130_v26  ;;  %v3140_v30 = vmax.f32 %v3138_v6, %v3139_v59  ;;  %v3148_v50 = vrot.slane %v3147_v12, 1  ;;  %v3206_v17 = vmax.f32 %v3204_v46, %v9296_v48  ;;  %v7475_v26 = vld [vmem:[%s11604_s3 + $0x88] sm:$0xff] }
 0x290   : > { %v3157_v19 = vrot.slane %v3156_v24, 1  ;;  %v3198_v32 = vrot.slane %v3197_v49, 4  ;;  %v3215_v62 = vmax.f32 %v3213_v44, %v9299_v54  ;;  %v3222_v7 = vsel %vm444_vm0, %v2912_v21, -inf  ;;  %v9404_v44 = vld [vmem:[%s7922_s30 + $0x12a] sm:$0xff]  ;;  %4358 = vmatpush.bf16.msra.mxu2 %v7475_v26  ;;  %7656 = vmatpush.bf16.msra.mxu3 %v7475_v26 }
 0x291   : > { %v3149_v9 = vmax.f32 %v3147_v12, %v3148_v50  ;;  %v3734_v14 = vsel %vm3733_vm5, %v3131_v57, %v9236_v35  ;;  %v3207_v45 = vrot.slane %v3206_v17, 4  ;;  %v3224_v6 = vmax.f32 %v3222_v7, %v9302_v28  ;;  %11909 = vst [vmem:[#allocation16_spill] sm:$0xff] %v9404_v44  ;;  %v7474_v57 = vld [vmem:[%s11604_s3 + $0x80] sm:$0xff] }
 0x292   : > { %2176 = vperm.xlu2 %7674, %v6586_v37   ;;  %1674 = vperm.xlu1 %7673, %v9372_v43   ;;  %v3158_v63 = vmax.f32 %v3156_v24, %v3157_v19  ;;  %v3736_v51 = vsel %vm3735_vm6, %v3140_v30, %v3734_v14  ;;  %v3199_v54 = vmax.f32 %v3197_v49, %v3198_v32  ;;  %v3216_v37 = vrot.slane %v3215_v62, 4 }
 0x293   : > { %1664 = vperm.xlu0 %7672, %v9376_v42   ;;  %v3738_v35 = vsel %vm3737_vm7, %v3149_v9, %v3736_v51  ;;  %v3208_v59 = vmax.f32 %v3206_v17, %v3207_v45  ;;  %v3225_v28 = vrot.slane %v3224_v6, 4  ;;  %v2774_v12 = vadd.f32 %v2742_v4, %v2516_v1  ;;  %v6588_v17 = vld [vmem:[%s7922_s30 + $0x168] sm:$0xff] }
 0x294   : > { %v9389_v38 = vpop.permute.xlu2 %1892  ;;  %v9391_v48 = vpop.permute.xlu1 %2116  ;;  %v3740_v18 = vsel %vm3739_vm8, %v3158_v63, %v3738_v35  ;;  %v3200_v46 = vrot.slane %v3199_v54, 2  ;;  %v3217_v24 = vmax.f32 %v3215_v62, %v3216_v37  ;;  %v2740_v49 = vmul.f32 %v8974_v16, %v9331_v40  ;;  %4359 = vmatpush.bf16.msra.mxu2 %v7474_v57  ;;  %7657 = vmatpush.bf16.msra.mxu3 %v7474_v57 }
 0x295   : > { %v9394_v21 = vpop.permute.xlu0 %1887  ;;  %v3263_v30 = vrot.slane %v9353_v61, 2  ;;  %3799 = vst.msk [vmem:[#allocation2 + $0x11] sm:$0xff] %vm442_vm4, %v3740_v18  ;;  %v3209_v1 = vrot.slane %v3208_v59, 2  ;;  %v3226_v4 = vmax.f32 %v3224_v6, %v3225_v28  ;;  %v2810_v50 = vadd.f32 %v8996_v39, %v2774_v12  ;;  %v9431_v28 = vld [vmem:[%s11602_s1 + $0x5] ss:$0 sm:$0xff] }
 0x296   : > { %v3238_v19 = vrot.slane %v9351_v52, 1  ;;  %v3201_v16 = vmax.f32 %v3199_v54, %v3200_v46  ;;  %v3218_v40 = vrot.slane %v3217_v24, 2  ;;  %v2772_v32 = vadd.f32 %v2740_v49, %v9250_v36 }
 0x297   : > { %v9418_v62 = vmax.f32 %v9337_v58, %v3254_v13  ;;  %v3210_v7 = vmax.f32 %v3208_v59, %v3209_v1  ;;  %v3227_v9 = vrot.slane %v3226_v4, 2  ;;  %v2842_v14 = vmax.f32 %v2810_v50, 0.0 }
 0x298   : > { %v3247_v45 = vrot.slane %v9364_v33, 1  ;;  %v3202_v6 = vrot.slane %v3201_v16, 1  ;;  %v3219_v63 = vmax.f32 %v3217_v24, %v3218_v40  ;;  %v2808_v51 = vadd.f32 %v8996_v39, %v2772_v32 }
 0x299   : > { %v3211_v36 = vrot.slane %v3210_v7, 1  ;;  %v3228_v54 = vmax.f32 %v3226_v4, %v3227_v9  ;;  %v2928_v37 = vrot.slane %v2842_v14, 2  ;;  %v2929_v58 = vrot.slane %v2842_v14, 4 }
 0x29a   : > { %1912 = vperm.xlu2 %7674, %v9404_v44   ;;  %1902 = vperm.xlu1 %7673, %v9168_v31   ;;  %v3203_v35 = vmax.f32 %v3201_v16, %v3202_v6  ;;  %v3220_v31 = vrot.slane %v3219_v63, 1  ;;  %v2930_v59 = vrot.slane %v2842_v14, 6  ;;  %v1970_v39 = vmul.f32 %v9431_v28, %v9362_v5 }
 0x29b   : > { %2186 = vperm.xlu0 %7672, %v6588_v17   ;;  %v3212_v18 = vmax.f32 %v3210_v7, %v3211_v36  ;;  %v3229_v46 = vrot.slane %v3228_v54, 1  ;;  %v3268_v24 = vsel %vm444_vm0, %v2842_v14, -inf  ;;  %v1968_v49 = vmul.f32 %v9431_v28, %v9367_v2  ;;  %v9444_v17 = vld [vmem:[%s7922_s30 + $0x142] sm:$0xff] }
 0x29c   : > { %v9424_v13 = vpop.permute.xlu2 %2121  ;;  %v9426_v26 = vpop.permute.xlu1 %2136  ;;  %v3221_v57 = vmax.f32 %v3219_v63, %v3220_v31  ;;  %v3744_v1 = vsel %vm3733_vm5, %v3203_v35, %v9349_v60  ;;  %v3277_v4 = vsel %vm444_vm0, %v2928_v37, -inf  ;;  %v2840_v50 = vmax.f32 %v2808_v51, 0.0  ;;  %v9456_v51 = vld [vmem:[%s11602_s1 + $0x6] ss:$0 sm:$0xff] }
 0x29d   : > { %v9435_v12 = vpop.permute.xlu0 %1634  ;;  %v3230_v16 = vmax.f32 %v3228_v54, %v3229_v46  ;;  %v3745_v5 = vsel %vm3735_vm6, %v3212_v18, %v3744_v1  ;;  %v3286_v40 = vsel %vm444_vm0, %v2929_v58, -inf  ;;  %v3295_v32 = vsel %vm444_vm0, %v2930_v59, -inf }
 0x29e   : > { %v3746_v7 = vsel %vm3737_vm7, %v3221_v57, %v3745_v5  ;;  %v2922_v9 = vrot.slane %v2840_v50, 2  ;;  %v2923_v2 = vrot.slane %v2840_v50, 4  ;;  %v2924_v14 = vrot.slane %v2840_v50, 6 }
 0x29f   : > { %v3747_v6 = vsel %vm3739_vm8, %v3230_v16, %v3746_v7  ;;  %v3267_v60 = vsel %vm444_vm0, %v2840_v50, -inf  ;;  %v2000_v63 = vadd.f32 %v1968_v49, %v9032_v27  ;;  %v2227_v36 = vmul.f32 %v9456_v51, %v9391_v48 }
 0x2a0   : > { %3800 = vst.msk [vmem:[#allocation2 + $0x21] sm:$0xff] %vm442_vm4, %v3747_v6  ;;  %v3269_v54 = vmax.f32 %v3267_v60, %v3268_v24  ;;  %v3276_v37 = vsel %vm444_vm0, %v2922_v9, -inf  ;;  %v3285_v58 = vsel %vm444_vm0, %v2923_v2, -inf  ;;  %v3294_v27 = vsel %vm444_vm0, %v2924_v14, -inf  ;;  %v9498_v9 = vld [vmem:[%s7922_s30 + $0x15a] sm:$0xff] }
 0x2a1   : > { %v3278_v35 = vmax.f32 %v3276_v37, %v3277_v4  ;;  %v3287_v31 = vmax.f32 %v3285_v58, %v3286_v40  ;;  %v3296_v59 = vmax.f32 %v3294_v27, %v3295_v32  ;;  %v9467_v18 = vadd.f32 %v2227_v36, %v2000_v63  ;;  %v11910_v40 = vld [vmem:[#allocation28_spill] sm:$0xff]  ;;  %v11914_v63 = vld [vmem:[#allocation77_spill] sm:$0xff] }
 0x2a2   : > { %1922 = vperm.xlu2 %7674, %v9444_v17   ;;  %2424 = vperm.xlu1 %7673, %v9194_v15   ;;  %v3256_v46 = vrot.slane %v9418_v62, 1  ;;  %v3264_v24 = vmax.f32 %v9353_v61, %v3263_v30  ;;  %v3270_v49 = vrot.slane %v3269_v54, 4  ;;  %v3248_v1 = vmax.f32 %v9364_v33, %v3247_v45  ;;  %v11916_v27 = vld [vmem:[#allocation84_spill] sm:$0xff] }
 0x2a3   : > { %2414 = vperm.xlu0 %7672, %v9197_v22   ;;  %v2002_v22 = vadd.f32 %v1970_v39, %v9083_v11  ;;  %v3279_v4 = vrot.slane %v3278_v35, 4  ;;  %v3288_v50 = vrot.slane %v3287_v31, 4  ;;  %v3297_v16 = vrot.slane %v3296_v59, 4  ;;  %v9492_v11 = vld [vmem:[%s7922_s30 + $0x169] sm:$0xff] }
 0x2a4   : > { %v9469_v48 = vpop.permute.xlu2 %2642  ;;  %v9471_v15 = vpop.permute.xlu1 %1872  ;;  %v9483_v5 = vadd.f32 %v8856_v25, %v8806_v29  ;;  %v9487_v32 = vadd.f32 %v11910_v40, %v8815_v0  ;;  %v2229_v61 = vmul.f32 %v9456_v51, %v9271_v41  ;;  %v3271_v30 = vmax.f32 %v3269_v54, %v3270_v49  ;;  %11911 = vst [vmem:[#allocation17_spill] sm:$0xff] %v9492_v11  ;;  %v11915_v54 = vld [vmem:[#allocation81_spill] sm:$0xff] }
 0x2a5   : > { %v9478_v57 = vpop.permute.xlu0 %1862  ;;  %v3239_v33 = vmax.f32 %v9351_v52, %v3238_v19  ;;  %v3280_v45 = vmax.f32 %v3278_v35, %v3279_v4  ;;  %v3289_v39 = vmax.f32 %v3287_v31, %v3288_v50  ;;  %v3298_v7 = vmax.f32 %v3296_v59, %v3297_v16  ;;  %v9507_v52 = vld [vmem:[%s11602_s1 + $0x2] ss:$0 sm:$0xff]  ;;  %v11913_v19 = vld [vmem:[#allocation74_spill] sm:$0xff] }
 0x2a6   : > { %v3257_v29 = vmax.f32 %v9418_v62, %v3256_v46  ;;  %v3265_v25 = vrot.slane %v3264_v24, 1  ;;  %v3272_v0 = vrot.slane %v3271_v30, 2  ;;  %v2261_v2 = vadd.f32 %v2229_v61, %v2002_v22  ;;  %11912 = vst [vmem:[#allocation18_spill] sm:$0xff] %v9507_v52  ;;  %v11917_v22 = vld [vmem:[#allocation85_spill] sm:$0xff] }
 0x2a7   : > { %v3748_v14 = vsel %vm3727_vm1, %v3248_v1, %v3239_v33  ;;  %v3281_v41 = vrot.slane %v3280_v45, 2  ;;  %v3290_v6 = vrot.slane %v3289_v39, 2  ;;  %v3299_v60 = vrot.slane %v3298_v7, 2 }
 0x2a8   : > { %v1200_v62 = vmul.f32 %v9507_v52, %v11913_v19  ;;  %v1203_v36 = vmul.f32 %v9507_v52, %v11914_v63  ;;  %v1196_v37 = vmul.f32 %v9507_v52, %v11915_v54  ;;  %v3273_v58 = vmax.f32 %v3271_v30, %v3272_v0  ;;  %v11921_v19 = vld [vmem:[#allocation31_spill] sm:$0xff] }
 0x2a9   : > { %v3282_v35 = vmax.f32 %v3280_v45, %v3281_v41  ;;  %v3291_v31 = vmax.f32 %v3289_v39, %v3290_v6  ;;  %v3300_v59 = vmax.f32 %v3298_v7, %v3299_v60  ;;  %v1198_v1 = vmul.f32 %v9507_v52, %v11917_v22  ;;  %v9528_v45 = vld [vmem:[%s11602_s1 + $0x7] ss:$0 sm:$0xff]  ;;  %v11919_v41 = vld [vmem:[#allocation14_spill] sm:$0xff]  ;;  %v9542_v60 = vld [vmem:[%s11602_s1 + $0x3] ss:$0 sm:$0xff] }
 0x2aa   : > { %2444 = vperm.xlu2 %7674, %v9492_v11   ;;  %2434 = vperm.xlu1 %7673, %v9248_v55   ;;  %v1199_v55 = vmul.f32 %v9507_v52, %v11916_v27  ;;  %v3266_v4 = vmax.f32 %v3264_v24, %v3265_v25  ;;  %v3749_v50 = vsel %vm3729_vm2, %v3257_v29, %v3748_v14  ;;  %v3274_v16 = vrot.slane %v3273_v58, 1  ;;  %v11918_v7 = vld [vmem:[#allocation13_spill] sm:$0xff]  ;;  %v11920_v29 = vld [vmem:[#allocation8_spill] sm:$0xff]  ;;  %v6583_v22 = vld [vmem:[%s7922_s30 + $0x128] sm:$0xff] }
 0x2ab   : > { %1932 = vperm.xlu0 %7672, %v9498_v9   ;;  %v3283_v61 = vrot.slane %v3282_v35, 1  ;;  %v3292_v30 = vrot.slane %v3291_v31, 1  ;;  %v3301_v33 = vrot.slane %v3300_v59, 1  ;;  %v9532_v0 = vadd.f32 %v1200_v62, %v11918_v7  ;;  %v6585_v6 = vld [vmem:[%s7922_s30 + $0x140] sm:$0xff]  ;;  %v11923_v7 = vld [vmem:[#allocation11_spill] sm:$0xff]  ;;  %v11937_v11 = vld [vmem:[#allocation10_spill] sm:$0xff] }
 0x2ac   : > { %v9518_v46 = vpop.permute.xlu2 %2652  ;;  %v9520_v49 = vpop.permute.xlu1 %1882  ;;  %v9535_v24 = vadd.f32 %v1203_v36, %v11919_v41  ;;  %v1228_v25 = vadd.f32 %v1196_v37, %v11920_v29  ;;  %v3275_v14 = vmax.f32 %v3273_v58, %v3274_v16  ;;  %v1456_v63 = vmul.f32 %v9542_v60, %v11921_v19  ;;  %v9553_v37 = vld [vmem:[%s11602_s1 + $0x4] ss:$0 sm:$0xff]  ;;  %v11924_v58 = vld [vmem:[#allocation140_spill] sm:$0xff] }
 0x2ad   : > { %v2385_v40 = vpop.permute.xlu0 %2384  ;;  %v3750_v54 = vsel %vm3731_vm3, %v3266_v4, %v3749_v50  ;;  %v3284_v27 = vmax.f32 %v3282_v35, %v3283_v61  ;;  %v3293_v62 = vmax.f32 %v3291_v31, %v3292_v30  ;;  %v1230_v41 = vadd.f32 %v1198_v1, %v11923_v7  ;;  %v11926_v1 = vld [vmem:[#allocation90_spill] sm:$0xff] }
 0x2ae   : > { %v2487_v39 = vmul.f32 %v9528_v45, %v2385_v40  ;;  %v11922_v40 = vld [vmem:[#allocation9_spill] sm:$0xff]  ;;  %v1714_v16 = vmul.f32 %v9553_v37, %v11924_v58  ;;  %v3751_v29 = vsel %vm3733_vm5, %v3275_v14, %v3750_v54  ;;  %v3302_v19 = vmax.f32 %v3300_v59, %v3301_v33  ;;  %v11927_v61 = vld [vmem:[#allocation94_spill] sm:$0xff]  ;;  %v11928_v54 = vld [vmem:[#allocation104_spill] sm:$0xff] }
 0x2af   : > { %v1231_v36 = vadd.f32 %v1199_v55, %v11922_v40  ;;  %v3752_v4 = vsel %vm3735_vm6, %v3284_v27, %v3751_v29  ;;  %v11925_v55 = vld [vmem:[#allocation88_spill] sm:$0xff]  ;;  %v1205_v50 = vmul.f32 %v9507_v52, %v11926_v1  ;;  %v1207_v30 = vmul.f32 %v9507_v52, %v11927_v61  ;;  %v9574_v33 = vld [vmem:[%s11602_s1 + $0x8] ss:$0 sm:$0xff] }
 0x2b0   : > { %v2519_v35 = vadd.f32 %v2487_v39, %v2261_v2  ;;  %v1201_v31 = vmul.f32 %v9507_v52, %v11925_v55  ;;  %v3753_v40 = vsel %vm3737_vm7, %v3293_v62, %v3752_v4  ;;  %v1488_v59 = vadd.f32 %v1456_v63, %v9487_v32  ;;  %v11930_v27 = vld [vmem:[#allocation110_spill] sm:$0xff]  ;;  %v11933_v1 = vld [vmem:[#allocation12_spill] sm:$0xff] }
 0x2b1   : > { %v1972_v2 = vmul.f32 %v9431_v28, %v9220_v47  ;;  %v2745_v39 = vmul.f32 %v9574_v33, %v9469_v48  ;;  %v1457_v32 = vmul.f32 %v9542_v60, %v11928_v54  ;;  %v11929_v47 = vld [vmem:[#allocation107_spill] sm:$0xff]  ;;  %v1453_v62 = vmul.f32 %v9542_v60, %v11930_v27  ;;  %v11932_v58 = vld [vmem:[#allocation46_spill] sm:$0xff]  ;;  %v6587_v52 = vld [vmem:[%s7922_s30 + $0x158] sm:$0xff] }
 0x2b2   : > { %2672 = vperm.xlu2 %7674, %v9242_v10   ;;  %2171 = vperm.xlu1 %7673, %v6585_v6   ;;  %v3754_v10 = vsel %vm3739_vm8, %v3302_v19, %v3753_v40  ;;  %v1460_v63 = vmul.f32 %v9542_v60, %v11929_v47  ;;  %v1455_v29 = vmul.f32 %v9542_v60, %v11932_v58  ;;  %v11934_v40 = vld [vmem:[#allocation15_spill] sm:$0xff]  ;;  %v11935_v47 = vld [vmem:[#allocation113_spill] sm:$0xff] }
 0x2b3   : > { %2161 = vperm.xlu0 %7672, %v6583_v22   ;;  %v11931_v22 = vld [vmem:[#allocation36_spill] sm:$0xff]  ;;  %3801 = vst.msk [vmem:[#allocation2 + $0x31] sm:$0xff] %vm442_vm4, %v3754_v10  ;;  %v1746_v19 = vadd.f32 %v1714_v16, %v1488_v59  ;;  %v2231_v4 = vmul.f32 %v9456_v51, %v9426_v26  ;;  %v2777_v55 = vadd.f32 %v2745_v39, %v2519_v35  ;;  %v6589_v10 = vld [vmem:[%s7922_s30 + $0x170] sm:$0xff] }
 0x2b4   : > { %v9578_v14 = vpop.permute.xlu2 %2389  ;;  %v9580_v6 = vpop.permute.xlu1 %2404  ;;  %v1466_v7 = vmul.f32 %v9542_v60, %v11931_v22  ;;  %v1233_v61 = vadd.f32 %v1201_v31, %v11933_v1  ;;  %v1239_v54 = vadd.f32 %v1207_v30, %v11934_v40  ;;  %v1459_v27 = vmul.f32 %v9542_v60, %v11935_v47  ;;  %v11938_v16 = vld [vmem:[#allocation116_spill] sm:$0xff] }
 0x2b5   : > { %v2395_v48 = vpop.permute.xlu0 %2394  ;;  %v1458_v22 = vmul.f32 %v9542_v60, %v11936_v56  ;;  %v9604_v44 = vadd.f32 %v1205_v50, %v11937_v11  ;;  %v1462_v59 = vmul.f32 %v9542_v60, %v11938_v16  ;;  %v2004_v26 = vadd.f32 %v1972_v2, %v1746_v19  ;;  %v9617_v11 = vld [vmem:[%s11603_s2] ss:$0 sm:$0xff]  ;;  %v11941_v19 = vld [vmem:[#allocation139_spill] sm:$0xff] }
 0x2b6   : > { %v2489_v35 = vmul.f32 %v9528_v45, %v2395_v48  ;;  %v1489_v31 = vadd.f32 %v1457_v32, %v1230_v41  ;;  %v9609_v39 = vadd.f32 %v1460_v63, %v1233_v61  ;;  %v1485_v30 = vadd.f32 %v1453_v62, %v9483_v5  ;;  %v11939_v32 = vld [vmem:[#allocation126_spill] sm:$0xff]  ;;  %v11940_v62 = vld [vmem:[#allocation137_spill] sm:$0xff] }
 0x2b7   : > { %v9612_v58 = vadd.f32 %v1466_v7, %v1239_v54  ;;  %v1487_v1 = vadd.f32 %v1455_v29, %v1228_v25  ;;  %v2263_v56 = vadd.f32 %v2231_v4, %v2004_v26  ;;  %v2813_v50 = vadd.f32 %v9617_v11, %v2777_v55  ;;  %v9633_v48 = vld [vmem:[#allocation2 + $0x22] sm:$0xff] }
 0x2b8   : > { %v1491_v2 = vadd.f32 %v1459_v27, %v9532_v0  ;;  %v1490_v41 = vadd.f32 %v1458_v22, %v1231_v36  ;;  %v1713_v63 = vmul.f32 %v9553_v37, %v11939_v32  ;;  %v2485_v5 = vmul.f32 %v9528_v45, %v9360_v23  ;;  %v11942_v61 = vld [vmem:[#allocation118_spill] sm:$0xff] }
 0x2b9   : > { %v9627_v25 = vadd.f32 %v1462_v59, %v9535_v24  ;;  %v1711_v7 = vmul.f32 %v9553_v37, %v11940_v62  ;;  %v2521_v36 = vadd.f32 %v2489_v35, %v2263_v56  ;;  %v9649_v40 = vmul.f32 %v9542_v60, %v11942_v61  ;;  %v9661_v59 = vld [vmem:[%s7922_s30 + $0x16a] sm:$0xff] }
 0x2ba   : > { %2191 = vperm.xlu2 %7674, %v6589_v10   ;;  %2181 = vperm.xlu1 %7673, %v6587_v52   ;;  %v1716_v52 = vmul.f32 %v9553_v37, %v9183_v53  ;;  %v9635_v0 = vld [vmem:[#allocation2 + $0x32] sm:$0xff]  ;;  %v2517_v4 = vadd.f32 %v2485_v5, %v9467_v18  ;;  %v1974_v54 = vmul.f32 %v9431_v28, %v9394_v21  ;;  %v2845_v27 = vmax.f32 %v2813_v50, 0.0 }
 0x2bb   : > { %2682 = vperm.xlu0 %7672, %v9293_v8   ;;  %v1715_v8 = vmul.f32 %v9553_v37, %v11941_v19  ;;  %v4124_v24 = vpack.c.bf16 %v9635_v0, %v9633_v48  ;;  %v2747_v47 = vmul.f32 %v9574_v33, %v9518_v46  ;;  %v1745_v22 = vadd.f32 %v1713_v63, %v1487_v1 }
 0x2bc   : > { %v9637_v29 = vpop.permute.xlu2 %2637  ;;  %v2633_v23 = vpop.permute.xlu1 %2632  ;;  %v1717_v10 = vmul.f32 %v9553_v37, %v9435_v12  ;;  %v1971_v18 = vmul.f32 %v9431_v28, %v9471_v15  ;;  %v1743_v26 = vadd.f32 %v1711_v7, %v1485_v30  ;;  %v1748_v35 = vadd.f32 %v1716_v52, %v1490_v41 }
 0x2bd   : > { %v2743_v55 = vmul.f32 %v9574_v33, %v2633_v23  ;;  %v9645_v53 = vpop.permute.xlu0 %2131  ;;  %6730 = vmatmul.msk.bf16.vlgmr.msra.gmra.mxu2 %vm442_vm4, %v4124_v24  ;;  %v1969_v21 = vmul.f32 %v9431_v28, %v9478_v57  ;;  %v2779_v56 = vadd.f32 %v2747_v47, %v2521_v36  ;;  %v1747_v46 = vadd.f32 %v1715_v8, %v1489_v31  ;;  %v9693_v47 = vld [vmem:[%s7922_s30 + $0x171] sm:$0xff] }
 0x2be   : > { %v2233_v1 = vmul.f32 %v9456_v51, %v9324_v3  ;;  %v1975_v12 = vmul.f32 %v9431_v28, %v9389_v38  ;;  %v2006_v50 = vadd.f32 %v1974_v54, %v1748_v35  ;;  %v2228_v32 = vmul.f32 %v9456_v51, %v9424_v13 }
 0x2bf   : > { %v2775_v16 = vadd.f32 %v2743_v55, %v2517_v4  ;;  %v2937_v63 = vrot.slane %v2845_v27, 2  ;;  %v2938_v30 = vrot.slane %v2845_v27, 4  ;;  %v1749_v57 = vadd.f32 %v1717_v10, %v1491_v2 }
 0x2c0   : > { %v2003_v31 = vadd.f32 %v1971_v18, %v1745_v22  ;;  %v2939_v41 = vrot.slane %v2845_v27, 6  ;;  %v2001_v3 = vadd.f32 %v1969_v21, %v1743_v26  ;;  %v1973_v38 = vmul.f32 %v9431_v28, %v9520_v49 }
 0x2c1   : > { %v2811_v15 = vadd.f32 %v9617_v11, %v2775_v16  ;;  %v2815_v62 = vadd.f32 %v9617_v11, %v2779_v56  ;;  %v3304_v13 = vsel %vm444_vm0, %v2845_v27, -inf  ;;  %v3313_v49 = vsel %vm444_vm0, %v2937_v63, -inf }
 0x2c2   : > { %2419 = vperm.xlu2 %7674, %v9346_v34   ;;  %2702 = vperm.xlu1 %7673, %v9661_v59   ;;  %v3322_v24 = vsel %vm444_vm0, %v2938_v30, -inf  ;;  %v3331_v54 = vsel %vm444_vm0, %v2939_v41, -inf  ;;  %v9695_v26 = vadd.f32 %v1975_v12, %v1749_v57  ;;  %v2260_v35 = vadd.f32 %v2228_v32, %v2001_v3 }
 0x2c3   : > { %v2843_v5 = vmax.f32 %v2811_v15, 0.0  ;;  %2692 = vperm.xlu0 %7672, %v9290_v20   ;;  %v2491_v20 = vmul.f32 %v9528_v45, %v9580_v6  ;;  %v2265_v6 = vadd.f32 %v2233_v1, %v2006_v50  ;;  %v2847_v16 = vmax.f32 %v2815_v62, 0.0 }
 0x2c4   : > { %v9679_v7 = vpop.permute.xlu2 %2667  ;;  %v9681_v34 = vpop.permute.xlu1 %2151  ;;  %v2005_v30 = vadd.f32 %v1973_v38, %v1747_v46  ;;  %v2488_v41 = vmul.f32 %v9528_v45, %v9578_v14  ;;  %v2230_v1 = vmul.f32 %v9456_v51, %v9645_v53 }
 0x2c5   : > { %v2931_v52 = vrot.slane %v2843_v5, 2  ;;  %v2932_v2 = vrot.slane %v2843_v5, 4  ;;  %v2933_v36 = vrot.slane %v2843_v5, 6  ;;  %v3303_v23 = vsel %vm444_vm0, %v2843_v5, -inf  ;;  %v2142_v19 = vpop.permute.xlu0 %2141 }
 0x2c6   : > { %v3305_v8 = vmax.f32 %v3303_v23, %v3304_v13  ;;  %v2523_v5 = vadd.f32 %v2491_v20, %v2265_v6  ;;  %v2943_v13 = vrot.slane %v2847_v16, 2  ;;  %v2945_v23 = vrot.slane %v2847_v16, 6 }
 0x2c7   : > { %v3312_v4 = vsel %vm444_vm0, %v2931_v52, -inf  ;;  %v3321_v55 = vsel %vm444_vm0, %v2932_v2, -inf  ;;  %v3330_v61 = vsel %vm444_vm0, %v2933_v36, -inf  ;;  %v2944_v52 = vrot.slane %v2847_v16, 4 }
 0x2c8   : > { %v3306_v27 = vrot.slane %v3305_v8, 4  ;;  %v3314_v22 = vmax.f32 %v3312_v4, %v3313_v49  ;;  %v3323_v10 = vmax.f32 %v3321_v55, %v3322_v24  ;;  %v3332_v18 = vmax.f32 %v3330_v61, %v3331_v54 }
 0x2c9   : > { %v3375_v54 = vsel %vm444_vm0, %v2847_v16, -inf  ;;  %v2234_v6 = vmul.f32 %v9456_v51, %v9681_v34 }
 0x2ca   : > { %v3307_v21 = vmax.f32 %v3305_v8, %v3306_v27  ;;  %v3315_v56 = vrot.slane %v3314_v22, 4  ;;  %v3324_v15 = vrot.slane %v3323_v10, 4  ;;  %v3333_v63 = vrot.slane %v3332_v18, 4  ;;  %2449 = vperm.xlu2 %7674, %v9693_v47   ;;  %2439 = vperm.xlu1 %7673, %v9372_v43  }
 0x2cb   : > { %2429 = vperm.xlu0 %7672, %v9376_v42   ;;  %v2744_v43 = vmul.f32 %v9574_v33, %v9637_v29  ;;  %v2262_v42 = vadd.f32 %v2230_v1, %v2003_v31  ;;  %v3384_v29 = vsel %vm444_vm0, %v2943_v13, -inf  ;;  %v2232_v31 = vmul.f32 %v9456_v51, %v2142_v19 }
 0x2cc   : > { %v3308_v12 = vrot.slane %v3307_v21, 2  ;;  %v3316_v50 = vmax.f32 %v3314_v22, %v3315_v56  ;;  %v3325_v32 = vmax.f32 %v3323_v10, %v3324_v15  ;;  %v3334_v57 = vmax.f32 %v3332_v18, %v3333_v63  ;;  %v1660_v3 = vpop.permute.xlu2 %1659  ;;  %v2380_v62 = vpop.permute.xlu1 %2379  ;;  %v11943_v56 = vld [vmem:[#allocation16_spill] sm:$0xff] }
 0x2cd   : > { %v2486_v46 = vmul.f32 %v9528_v45, %v2380_v62  ;;  %v2663_v14 = vpop.permute.xlu0 %2662  ;;  %v3402_v1 = vsel %vm444_vm0, %v2945_v23, -inf  ;;  %v2750_v13 = vmul.f32 %v9574_v33, %v9679_v7 }
 0x2ce   : > { %v3309_v38 = vmax.f32 %v3307_v21, %v3308_v12  ;;  %v3317_v2 = vrot.slane %v3316_v50, 2  ;;  %v3326_v36 = vrot.slane %v3325_v32, 2  ;;  %v3335_v53 = vrot.slane %v3334_v57, 2 }
 0x2cf   : > { %v2518_v20 = vadd.f32 %v2486_v46, %v2260_v35  ;;  %v2749_v8 = vmul.f32 %v9574_v33, %v2663_v14  ;;  %v3393_v21 = vsel %vm444_vm0, %v2944_v52, -inf  ;;  %v2266_v52 = vadd.f32 %v2234_v6, %v9695_v26 }
 0x2d0   : > { %v3310_v49 = vrot.slane %v3309_v38, 1  ;;  %v3318_v24 = vmax.f32 %v3316_v50, %v3317_v2  ;;  %v3327_v4 = vmax.f32 %v3325_v32, %v3326_v36  ;;  %v3336_v55 = vmax.f32 %v3334_v57, %v3335_v53  ;;  %v9733_v2 = vld [vmem:[%s7922_s30 + $0x181] sm:$0xff] }
 0x2d1   : > { %v2776_v61 = vadd.f32 %v2744_v43, %v2518_v20  ;;  %v2781_v27 = vadd.f32 %v2749_v8, %v2523_v5  ;;  %v2520_v32 = vadd.f32 %v2488_v41, %v2262_v42  ;;  %v2264_v46 = vadd.f32 %v2232_v31, %v2005_v30  ;;  %v9739_v42 = vld [vmem:[%s7922_s30 + $0x172] sm:$0xff] }
 0x2d2   : > { %v3319_v22 = vrot.slane %v3318_v24, 1  ;;  %v3328_v10 = vrot.slane %v3327_v4, 1  ;;  %v3337_v18 = vrot.slane %v3336_v55, 1  ;;  %2697 = vperm.xlu2 %7674, %v9498_v9   ;;  %2687 = vperm.xlu1 %7673, %v9444_v17   ;;  %v3311_v15 = vmax.f32 %v3309_v38, %v3310_v49 }
 0x2d3   : > { %v2812_v35 = vadd.f32 %v9617_v11, %v2776_v61  ;;  %v2817_v16 = vadd.f32 %v9617_v11, %v2781_v27  ;;  %2677 = vperm.xlu0 %7672, %v11943_v56   ;;  %v9729_v14 = vmul.f32 %v9553_v37, %v1660_v3 }
 0x2d4   : > { %v3320_v63 = vmax.f32 %v3318_v24, %v3319_v22  ;;  %v3329_v5 = vmax.f32 %v3327_v4, %v3328_v10  ;;  %v1908_v34 = vpop.permute.xlu2 %1907  ;;  %v2410_v9 = vpop.permute.xlu1 %2409  ;;  %v3338_v57 = vmax.f32 %v3336_v55, %v3337_v18  ;;  %v11944_v4 = vld [vmem:[#allocation17_spill] sm:$0xff] }
 0x2d5   : > { %v9720_v12 = vmax.f32 %v2812_v35, 0.0  ;;  %v2849_v17 = vmax.f32 %v2817_v16, 0.0  ;;  %v2492_v19 = vmul.f32 %v9528_v45, %v2410_v9  ;;  %v2400_v50 = vpop.permute.xlu0 %2399  ;;  %v9744_v30 = vmul.f32 %v9431_v28, %v1908_v34 }
 0x2d6   : > { %v3755_v62 = vsel %vm3727_vm1, %v3320_v63, %v3311_v15  ;;  %v2490_v38 = vmul.f32 %v9528_v45, %v2400_v50 }
 0x2d7   : > { %v3756_v43 = vsel %vm3729_vm2, %v3329_v5, %v3755_v62  ;;  %v2949_v36 = vrot.slane %v2849_v17, 2  ;;  %v2950_v53 = vrot.slane %v2849_v17, 4  ;;  %v2951_v23 = vrot.slane %v2849_v17, 6 }
 0x2d8   : > { %v9736_v41 = vsel %vm3731_vm3, %v3338_v57, %v3756_v43  ;;  %v2934_v7 = vrot.slane %v9720_v12, 2  ;;  %v3376_v26 = vsel %vm444_vm0, %v2849_v17, -inf  ;;  %v2524_v3 = vadd.f32 %v2492_v19, %v2266_v52  ;;  %v9764_v57 = vld [vmem:[%s7922_s30 + $0x182] sm:$0xff] }
 0x2d9   : > { %v3377_v20 = vmax.f32 %v3375_v54, %v3376_v26  ;;  %v3385_v8 = vsel %vm444_vm0, %v2949_v36, -inf  ;;  %v3394_v49 = vsel %vm444_vm0, %v2950_v53, -inf  ;;  %v3403_v24 = vsel %vm444_vm0, %v2951_v23, -inf }
 0x2da   : > { %1689 = vperm.xlu2 %7674, %v9733_v2   ;;  %1679 = vperm.xlu1 %7673, %v11944_v4   ;;  %v3386_v55 = vmax.f32 %v3384_v29, %v3385_v8  ;;  %v3395_v61 = vmax.f32 %v3393_v21, %v3394_v49  ;;  %v3404_v27 = vmax.f32 %v3402_v1, %v3403_v24  ;;  %v2935_v10 = vrot.slane %v9720_v12, 4 }
 0x2db   : > { %v2782_v22 = vadd.f32 %v2750_v13, %v2524_v3  ;;  %2707 = vperm.xlu0 %7672, %v9739_v42   ;;  %v2936_v54 = vrot.slane %v9720_v12, 6  ;;  %v3378_v18 = vrot.slane %v3377_v20, 4  ;;  %v2522_v6 = vadd.f32 %v2490_v38, %v2264_v46 }
 0x2dc   : > { %v9754_v31 = vpop.permute.xlu2 %1644  ;;  %v2658_v35 = vpop.permute.xlu1 %2657  ;;  %v3387_v16 = vrot.slane %v3386_v55, 4  ;;  %v3396_v56 = vrot.slane %v3395_v61, 4  ;;  %v3405_v15 = vrot.slane %v3404_v27, 4  ;;  %v9760_v1 = vsel %vm444_vm0, %v9720_v12, -inf }
 0x2dd   : > { %v2818_v29 = vadd.f32 %v9617_v11, %v2782_v22  ;;  %v2648_v21 = vpop.permute.xlu0 %2647  ;;  %v3379_v63 = vmax.f32 %v3377_v20, %v3378_v18  ;;  %v2748_v5 = vmul.f32 %v9574_v33, %v2658_v35  ;;  %v9767_v52 = vsel %vm444_vm0, %v2934_v7, -inf }
 0x2de   : > { %v2746_v34 = vmul.f32 %v9574_v33, %v2648_v21  ;;  %v3388_v9 = vmax.f32 %v3386_v55, %v3387_v16  ;;  %v3397_v17 = vmax.f32 %v3395_v61, %v3396_v56  ;;  %v3406_v19 = vmax.f32 %v3404_v27, %v3405_v15 }
 0x2df   : > { %v2850_v50 = vmax.f32 %v2818_v29, 0.0  ;;  %v3380_v62 = vrot.slane %v3379_v63, 2  ;;  %v2780_v13 = vadd.f32 %v2748_v5, %v2522_v6 }
 0x2e0   : > { %v2778_v43 = vadd.f32 %v2746_v34, %v2520_v32  ;;  %v3389_v46 = vrot.slane %v3388_v9, 2  ;;  %v3398_v38 = vrot.slane %v3397_v17, 2  ;;  %v3407_v36 = vrot.slane %v3406_v19, 2 }
 0x2e1   : > { %v2952_v53 = vrot.slane %v2850_v50, 2  ;;  %v3381_v23 = vmax.f32 %v3379_v63, %v3380_v62  ;;  %v2953_v26 = vrot.slane %v2850_v50, 4  ;;  %v2954_v3 = vrot.slane %v2850_v50, 6 }
 0x2e2   : > { %v2816_v20 = vadd.f32 %v9617_v11, %v2780_v13  ;;  %1684 = vperm.xlu2 %7674, %v9693_v47   ;;  %1947 = vperm.xlu1 %7673, %v9764_v57   ;;  %v3390_v8 = vmax.f32 %v3388_v9, %v3389_v46  ;;  %v3399_v49 = vmax.f32 %v3397_v17, %v3398_v38  ;;  %v3412_v7 = vsel %vm444_vm0, %v2850_v50, -inf  ;;  %v6592_v9 = vld [vmem:[%s7922_s30 + $0x198] sm:$0xff]  ;;  %v6590_v17 = vld [vmem:[%s7922_s30 + $0x180] sm:$0xff]  ;;  %v9786_v46 = vld [vmem:[%s7922_s30 + $0x189] sm:$0xff] }
 0x2e3   : > { %v3408_v24 = vmax.f32 %v3406_v19, %v3407_v36  ;;  %1937 = vperm.xlu0 %7672, %v9661_v59   ;;  %v3382_v32 = vrot.slane %v3381_v23, 1  ;;  %v3421_v55 = vsel %vm444_vm0, %v2952_v53, -inf  ;;  %v3430_v61 = vsel %vm444_vm0, %v2953_v26, -inf }
 0x2e4   : > { %v2848_v4 = vmax.f32 %v2816_v20, 0.0  ;;  %v9776_v27 = vpop.permute.xlu2 %2166  ;;  %v1650_v47 = vpop.permute.xlu1 %1649  ;;  %v3391_v22 = vrot.slane %v3390_v8, 1  ;;  %v3400_v18 = vrot.slane %v3399_v49, 1  ;;  %v3439_v35 = vsel %vm444_vm0, %v2954_v3, -inf }
 0x2e5   : > { %v3409_v6 = vrot.slane %v3408_v24, 1  ;;  %v1640_v16 = vpop.permute.xlu0 %1639  ;;  %v3383_v56 = vmax.f32 %v3381_v23, %v3382_v32  ;;  %v3357_v20 = vsel %vm444_vm0, %v2935_v10, -inf }
 0x2e6   : > { %v2946_v59 = vrot.slane %v2848_v4, 2  ;;  %v2947_v15 = vrot.slane %v2848_v4, 4  ;;  %v2948_v29 = vrot.slane %v2848_v4, 6  ;;  %v3392_v21 = vmax.f32 %v3390_v8, %v3391_v22 }
 0x2e7   : > { %v3401_v63 = vmax.f32 %v3399_v49, %v3400_v18  ;;  %v3410_v5 = vmax.f32 %v3408_v24, %v3409_v6  ;;  %v3411_v34 = vsel %vm444_vm0, %v2848_v4, -inf  ;;  %v2814_v8 = vadd.f32 %v9617_v11, %v2778_v43 }
 0x2e8   : > { %v3413_v19 = vmax.f32 %v3411_v34, %v3412_v7  ;;  %v3420_v50 = vsel %vm444_vm0, %v2946_v59, -inf  ;;  %v3429_v62 = vsel %vm444_vm0, %v2947_v15, -inf  ;;  %v3438_v13 = vsel %vm444_vm0, %v2948_v29, -inf  ;;  %v9809_v34 = vld [vmem:[%s7922_s30 + $0x18a] sm:$0xff] }
 0x2e9   : > { %v3762_v38 = vsel %vm3727_vm1, %v3392_v21, %v3383_v56  ;;  %v3422_v36 = vmax.f32 %v3420_v50, %v3421_v55  ;;  %v3431_v53 = vmax.f32 %v3429_v62, %v3430_v61  ;;  %v3440_v23 = vmax.f32 %v3438_v13, %v3439_v35 }
 0x2ea   : > { %v3763_v26 = vsel %vm3729_vm2, %v3401_v63, %v3762_v38  ;;  %v3414_v3 = vrot.slane %v3413_v19, 4  ;;  %2206 = vperm.xlu2 %7674, %v6592_v9   ;;  %2196 = vperm.xlu1 %7673, %v6590_v17   ;;  %v3366_v55 = vsel %vm444_vm0, %v2936_v54, -inf  ;;  %v2846_v61 = vmax.f32 %v2814_v8, 0.0 }
 0x2eb   : > { %v3764_v49 = vsel %vm3731_vm3, %v3410_v5, %v3763_v26  ;;  %v3423_v24 = vrot.slane %v3422_v36, 4  ;;  %v3432_v7 = vrot.slane %v3431_v53, 4  ;;  %v3441_v32 = vrot.slane %v3440_v23, 4  ;;  %1694 = vperm.xlu0 %7672, %v9786_v46  }
 0x2ec   : > { %v3415_v4 = vmax.f32 %v3413_v19, %v3414_v3  ;;  %v1720_v22 = vmul.f32 %v9553_v37, %v1650_v47  ;;  %v9800_v10 = vpop.permute.xlu2 %2176  ;;  %v9802_v43 = vpop.permute.xlu1 %1897  ;;  %v1718_v56 = vmul.f32 %v9553_v37, %v1640_v16  ;;  %v2940_v29 = vrot.slane %v2846_v61, 2 }
 0x2ed   : > { %v3424_v18 = vmax.f32 %v3422_v36, %v3423_v24  ;;  %v3433_v6 = vmax.f32 %v3431_v53, %v3432_v7  ;;  %v3442_v35 = vmax.f32 %v3440_v23, %v3441_v32  ;;  %v9805_v59 = vpop.permute.xlu0 %1669  ;;  %v2941_v12 = vrot.slane %v2846_v61, 4 }
 0x2ee   : > { %v3416_v15 = vrot.slane %v3415_v4, 2  ;;  %v2942_v21 = vrot.slane %v2846_v61, 6  ;;  %v3340_v47 = vsel %vm444_vm0, %v2846_v61, -inf  ;;  %v3349_v19 = vsel %vm444_vm0, %v2940_v29, -inf }
 0x2ef   : > { %v3425_v54 = vrot.slane %v3424_v18, 2  ;;  %v3434_v63 = vrot.slane %v3433_v6, 2  ;;  %v3443_v5 = vrot.slane %v3442_v35, 2  ;;  %v3341_v17 = vmax.f32 %v9760_v1, %v3340_v47  ;;  %v6593_v47 = vld [vmem:[%s7922_s30 + $0x1a0] sm:$0xff] }
 0x2f0   : > { %v3417_v9 = vmax.f32 %v3415_v4, %v3416_v15  ;;  %v3358_v16 = vsel %vm444_vm0, %v2941_v12, -inf  ;;  %v3350_v38 = vmax.f32 %v9767_v52, %v3349_v19  ;;  %v3367_v26 = vsel %vm444_vm0, %v2942_v21, -inf }
 0x2f1   : > { %v3426_v50 = vmax.f32 %v3424_v18, %v3425_v54  ;;  %v3435_v62 = vmax.f32 %v3433_v6, %v3434_v63  ;;  %v3444_v13 = vmax.f32 %v3442_v35, %v3443_v5  ;;  %v3342_v53 = vrot.slane %v3341_v17, 4 }
 0x2f2   : > { %v3418_v36 = vrot.slane %v3417_v9, 1  ;;  %v3359_v23 = vmax.f32 %v3357_v20, %v3358_v16  ;;  %2454 = vperm.xlu2 %7674, %v9733_v2   ;;  %1952 = vperm.xlu1 %7673, %v9809_v34   ;;  %v3351_v24 = vrot.slane %v3350_v38, 4  ;;  %v3368_v61 = vmax.f32 %v3366_v55, %v3367_v26 }
 0x2f3   : > { %v3427_v3 = vrot.slane %v3426_v50, 1  ;;  %v3436_v1 = vrot.slane %v3435_v62, 1  ;;  %v3445_v8 = vrot.slane %v3444_v13, 1  ;;  %1942 = vperm.xlu0 %7672, %v9739_v42   ;;  %v3343_v32 = vmax.f32 %v3341_v17, %v3342_v53 }
 0x2f4   : > { %v3419_v7 = vmax.f32 %v3417_v9, %v3418_v36  ;;  %v3360_v4 = vrot.slane %v3359_v23, 4  ;;  %v9819_v52 = vpop.permute.xlu2 %1912  ;;  %v1928_v20 = vpop.permute.xlu1 %1927  ;;  %v3352_v35 = vmax.f32 %v3350_v38, %v3351_v24  ;;  %v3369_v42 = vrot.slane %v3368_v61, 4  ;;  %v6591_v9 = vld [vmem:[%s7922_s30 + $0x188] sm:$0xff] }
 0x2f5   : > { %v3428_v18 = vmax.f32 %v3426_v50, %v3427_v3  ;;  %v3437_v6 = vmax.f32 %v3435_v62, %v3436_v1  ;;  %v3446_v2 = vmax.f32 %v3444_v13, %v3445_v8  ;;  %v1918_v15 = vpop.permute.xlu0 %1917  ;;  %v3344_v12 = vrot.slane %v3343_v32, 2  ;;  %v6624_v62 = vld [vmem:[%s7922_s30 + $0x199] sm:$0xff] }
 0x2f6   : > { %v3765_v29 = vsel %vm3733_vm5, %v3419_v7, %v3764_v49  ;;  %v3361_v21 = vmax.f32 %v3359_v23, %v3360_v4  ;;  %v3353_v63 = vrot.slane %v3352_v35, 2  ;;  %v1752_v55 = vadd.f32 %v1720_v22, %v9627_v25 }
 0x2f7   : > { %v3766_v54 = vsel %vm3735_vm6, %v3428_v18, %v3765_v29  ;;  %v1750_v5 = vadd.f32 %v1718_v56, %v9609_v39  ;;  %v3345_v19 = vmax.f32 %v3343_v32, %v3344_v12  ;;  %v3370_v50 = vmax.f32 %v3368_v61, %v3369_v42  ;;  %v6657_v42 = vld [vmem:[%s7922_s30 + $0x1a2] sm:$0xff] }
 0x2f8   : > { %v3767_v17 = vsel %vm3737_vm7, %v3437_v6, %v3766_v54  ;;  %v3362_v16 = vrot.slane %v3361_v21, 2  ;;  %v3354_v13 = vmax.f32 %v3352_v35, %v3353_v63  ;;  %v9831_v38 = vadd.f32 %v9744_v30, %v1752_v55  ;;  %v6656_v35 = vld [vmem:[%s7922_s30 + $0x19a] sm:$0xff] }
 0x2f9   : > { %v3768_v49 = vsel %vm3739_vm8, %v3446_v2, %v3767_v17  ;;  %v1976_v36 = vmul.f32 %v9431_v28, %v9802_v43  ;;  %v3346_v39 = vrot.slane %v3345_v19, 1  ;;  %v3371_v22 = vrot.slane %v3370_v50, 2  ;;  %v6625_v63 = vld [vmem:[%s7922_s30 + $0x1a1] sm:$0xff]  ;;  %v3823_v17 = vld [vmem:[#allocation2 + $0x2] sm:$0xff]  ;;  %s7835_s30 = smov 96  }
 0x2fa   : > { %3803 = vst.msk [vmem:[#allocation2 + $0x51] sm:$0xff] %vm442_vm4, %v3768_v49  ;;  %v3363_v25 = vmax.f32 %v3361_v21, %v3362_v16  ;;  %v1724_v56 = vmul.f32 %v9553_v37, %v9805_v59  ;;  %2211 = vperm.xlu2 %7674, %v6593_v47   ;;  %2201 = vperm.xlu1 %7673, %v6591_v9   ;;  %v3355_v23 = vrot.slane %v3354_v13, 1  ;;  %v3832_v9 = vld [vmem:[#allocation2 + $0x20] sm:$0xff] }
 0x2fb   : > { %v1496_v53 = vadd.f32 %v9649_v40, %v9604_v44  ;;  %v2008_v26 = vadd.f32 %v1976_v36, %v1750_v5  ;;  %v1982_v30 = vmul.f32 %v9431_v28, %v1928_v20  ;;  %2464 = vperm.xlu0 %7672, %v6624_v62   ;;  %v3347_v3 = vmax.f32 %v3345_v19, %v3346_v39  ;;  %v3824_v19 = vld [vmem:[#allocation2 + $0x12] sm:$0xff]  ;;  %v3815_v16 = vld [vmem:[#allocation2 + $0x1] sm:$0xff] }
 0x2fc   : > { %v3364_v43 = vrot.slane %v3363_v25, 1  ;;  %v3372_v1 = vmax.f32 %v3370_v50, %v3371_v22  ;;  %v1756_v8 = vadd.f32 %v1724_v56, %v9612_v58  ;;  %v9842_v24 = vpop.permute.xlu2 %1922  ;;  %v2157_v7 = vpop.permute.xlu1 %2156  ;;  %v3356_v32 = vmax.f32 %v3354_v13, %v3355_v23  ;;  %v3816_v50 = vld [vmem:[#allocation2 + $0x11] sm:$0xff] }
 0x2fd   : > { %v1754_v59 = vadd.f32 %v9729_v14, %v1496_v53  ;;  %v1980_v4 = vmul.f32 %v9431_v28, %v1918_v15  ;;  %v2235_v44 = vmul.f32 %v9456_v51, %v2157_v7  ;;  %v9847_v40 = vpop.permute.xlu0 %1654  ;;  %v3758_v18 = vsel %vm3733_vm5, %v3347_v3, %v9736_v41  ;;  %v3831_v62 = vld [vmem:[#allocation2 + $0x10] sm:$0xff]  ;;  %v3864_v53 = vld [vmem:[#allocation2 + $0x21] sm:$0xff] }
 0x2fe   : > { %v3365_v61 = vmax.f32 %v3363_v25, %v3364_v43  ;;  %v3373_v20 = vrot.slane %v3372_v1, 1  ;;  %v9851_v6 = vadd.f32 %v1982_v30, %v1756_v8  ;;  %v3759_v58 = vsel %vm3735_vm6, %v3356_v32, %v3758_v18  ;;  %v3865_v22 = vld [vmem:[#allocation2 + $0x31] sm:$0xff]  ;;  %v11945_v32 = vld [vmem:[#allocation19_spill] sm:$0xff] }
 0x2ff   : > { %v2239_v14 = vmul.f32 %v9456_v51, %v9800_v10  ;;  %v2012_v2 = vadd.f32 %v1980_v4, %v1754_v59  ;;  %v9856_v28 = vadd.f32 %v2235_v44, %v2008_v26  ;;  %v7685_v49 = vpack.i.bf16 %v3832_v9, %v3831_v62  ;;  %v3857_v56 = vld [vmem:[#allocation2 + $0x30] sm:$0xff]  ;;  %v7815_v59 = vld [vmem:[%s11602_s1] ss:$0 sm:$0xff]  ;;  %v11946_v44 = vld [vmem:[#allocation30_spill] sm:$0xff] }
 0x300   : > { %v3374_v15 = vmax.f32 %v3372_v1, %v3373_v20  ;;  %v3760_v29 = vsel %vm3737_vm7, %v3365_v61, %v3759_v58  ;;  %v7680_v13 = vpack.i.bf16 %v3824_v19, %v3823_v17  ;;  %v7700_v23 = vpack.i.bf16 %v3865_v22, %v3864_v53  ;;  %v7816_v20 = vld [vmem:[%s11602_s1 + $0x1] ss:$0 sm:$0xff]  ;;  %v11957_v22 = vld [vmem:[#allocation18_spill] sm:$0xff] }
 0x301   : > { %v9860_v12 = vadd.f32 %v2239_v14, %v2012_v2  ;;  %v9873_v54 = vld [vmem:[#allocation2 + $0x52] sm:$0xff]  ;;  %v7695_v26 = vpack.i.bf16 %v3857_v56, %v3832_v9  ;;  %v7690_v30 = vpack.i.bf16 %v9633_v48, %v3824_v19  ;;  %v688_v4 = vmul.f32 %v7815_v59, %v11945_v32  ;;  %v11952_v19 = vld [vmem:[#allocation67_spill] sm:$0xff] }
 0x302   : > { %v3761_v41 = vsel %vm3739_vm8, %v3374_v15, %v3760_v29  ;;  %2459 = vperm.xlu2 %7674, %v9786_v46   ;;  %2722 = vperm.xlu1 %7673, %v6656_v35   ;;  %v686_v61 = vmul.f32 %v7815_v59, %v11946_v44  ;;  %v11947_v18 = vld [vmem:[#allocation57_spill] sm:$0xff]  ;;  %v7710_v14 = vpack.i.bf16 %v9635_v0, %v9633_v48  ;;  %v11948_v35 = vld [vmem:[#allocation63_spill] sm:$0xff]  ;;  %v11949_v29 = vld [vmem:[#allocation64_spill] sm:$0xff] }
 0x303   : > { %3802 = vst.msk [vmem:[#allocation2 + $0x41] sm:$0xff] %vm442_vm4, %v3761_v41  ;;  %2712 = vperm.xlu0 %7672, %v9764_v57   ;;  %v944_v58 = vmul.f32 %v7816_v20, %v11947_v18  ;;  %v950_v15 = vmul.f32 %v7816_v20, %v11948_v35  ;;  %v953_v41 = vmul.f32 %v7816_v20, %v11949_v29  ;;  %v11951_v9 = vld [vmem:[#allocation65_spill] sm:$0xff]  ;;  %v11960_v32 = vld [vmem:[#allocation43_spill] sm:$0xff]  ;;  %v11961_v18 = vld [vmem:[#allocation44_spill] sm:$0xff] }
 0x304   : > { %v9866_v51 = vpop.permute.xlu2 %2444  ;;  %v9868_v10 = vpop.permute.xlu1 %1674  ;;  %v946_v17 = vmul.f32 %v7816_v20, %v11951_v9  ;;  %v11954_v48 = vld [vmem:[#allocation33_spill] sm:$0xff]  ;;  %v696_v44 = vmul.f32 %v7815_v59, %v11960_v32 }
 0x305   : > { %v9870_v21 = vpop.permute.xlu0 %1664  ;;  %v976_v29 = vadd.f32 %v944_v58, %v686_v61  ;;  %v9952_v61 = vld [vmem:[%s11602_s1 + $0x2] ss:$0 sm:$0xff]  ;;  %v11963_v58 = vld [vmem:[#allocation87_spill] sm:$0xff] }
 0x30a   : > { %v9876_v55 = vld [vmem:[#allocation2 + $0x42] sm:$0xff]  ;;  %2727 = vperm.xlu2 %7674, %v6657_v42   ;;  %2717 = vperm.xlu1 %7673, %v9809_v34   ;;  %v7675_v34 = vpack.i.bf16 %v3816_v50, %v3815_v16  ;;  %v952_v16 = vmul.f32 %v7816_v20, %v11952_v19  ;;  %v11953_v50 = vld [vmem:[#allocation68_spill] sm:$0xff] }
 0x30b   : > { %v4127_v46 = vpack.c.bf16 %v9873_v54, %v9876_v55  ;;  %2469 = vperm.xlu0 %7672, %v6625_v63   ;;  %v3834_v7 = vld [vmem:[#allocation2 + $0x40] sm:$0xff]  ;;  %v951_v62 = vmul.f32 %v7816_v20, %v11953_v50 }
 0x30c   : > { %v2673_v57 = vpop.permute.xlu2 %2672  ;;  %v9881_v5 = vpop.permute.xlu1 %1902  ;;  %v7715_v2 = vpack.i.bf16 %v3834_v7, %v3857_v56  ;;  %v11950_v42 = vld [vmem:[#allocation66_spill] sm:$0xff] }
 0x30d   : > { %6731 = vmatmul.msk.bf16.gmra.mxu2 %vm442_vm4, %v4127_v46  ;;  %v9884_v47 = vpop.permute.xlu0 %2186  ;;  %v948_v63 = vmul.f32 %v7816_v20, %v11950_v42  ;;  %v2751_v53 = vmul.f32 %v9574_v33, %v2673_v57  ;;  %v9940_v57 = vld [vmem:[#allocation2 + $0x50] sm:$0xff] }
 0x312   : > { %7686 = vrot.lane.b32.xlu2 %v7685_v49, %s7835_s30  ;;  %7681 = vrot.lane.b32.xlu1 %v7680_v13, %s7836_s28  ;;  %v690_v49 = vmul.f32 %v7815_v59, %v11954_v48  ;;  %v11955_v13 = vld [vmem:[#allocation39_spill] sm:$0xff]  ;;  %v3867_v48 = vld [vmem:[#allocation2 + $0x51] sm:$0xff] }
 0x313   : > { %7676 = vrot.lane.b32.xlu0 %v7675_v34, %s7837_s29  ;;  %v692_v34 = vmul.f32 %v7815_v59, %v11955_v13 }
 0x314   : > { %v9889_v36 = vpop.permute.xlu2 %2191  ;;  %v9891_v39 = vpop.permute.xlu1 %2424  ;;  %v980_v9 = vadd.f32 %v948_v63, %v690_v49  ;;  %v11964_v63 = vld [vmem:[#allocation91_spill] sm:$0xff]  ;;  %v11967_v49 = vld [vmem:[#allocation117_spill] sm:$0xff] }
 0x315   : > { %v2415_v25 = vpop.permute.xlu0 %2414  ;;  %v982_v42 = vadd.f32 %v950_v15, %v692_v34  ;;  %v1202_v15 = vmul.f32 %v9952_v61, %v11963_v58  ;;  %v1461_v34 = vmul.f32 %v9542_v60, %v11967_v49 }
 0x316   : > { %v2493_v1 = vmul.f32 %v9528_v45, %v2415_v25  ;;  %v11956_v25 = vld [vmem:[#allocation80_spill] sm:$0xff] }
 0x317   : > { %v1206_v56 = vmul.f32 %v11957_v22, %v11956_v25  ;;  %v978_v25 = vadd.f32 %v946_v17, %v688_v4  ;;  %v11966_v17 = vld [vmem:[#allocation40_spill] sm:$0xff] }
 0x318   : > { %v2525_v46 = vadd.f32 %v2493_v1, %v9856_v28  ;;  %v11958_v28 = vld [vmem:[#allocation25_spill] sm:$0xff] }
 0x319   : > { %v1238_v32 = vadd.f32 %v1206_v56, %v980_v9  ;;  %v11968_v56 = vld [vmem:[#allocation35_spill] sm:$0xff]  ;;  %v9975_v9 = vld [vmem:[%s11602_s1 + $0x6] ss:$0 sm:$0xff] }
 0x31a   : > { %7701 = vrot.lane.b32.xlu2 %v7700_v23, %s7835_s30  ;;  %7696 = vrot.lane.b32.xlu1 %v7695_v26, %s7836_s28  ;;  %v694_v26 = vmul.f32 %v7815_v59, %v11958_v28  ;;  %v2783_v19 = vadd.f32 %v2751_v53, %v2525_v46  ;;  %v11962_v28 = vld [vmem:[#allocation69_spill] sm:$0xff]  ;;  %v1465_v53 = vmul.f32 %v9542_v60, %v11968_v56 }
 0x31b   : > { %7691 = vrot.lane.b32.xlu0 %v7690_v30, %s7837_s29  ;;  %v11959_v30 = vld [vmem:[#allocation38_spill] sm:$0xff]  ;;  %v11965_v46 = vld [vmem:[#allocation93_spill] sm:$0xff] }
 0x31c   : > { %v9897_v3 = vpop.permute.xlu2 %2419  ;;  %v9899_v43 = vpop.permute.xlu1 %2434  ;;  %v693_v1 = vmul.f32 %v7815_v59, %v11959_v30  ;;  %v9944_v22 = vadd.f32 %v952_v16, %v694_v26  ;;  %v954_v30 = vmul.f32 %v7816_v20, %v11962_v28  ;;  %v1208_v4 = vmul.f32 %v9952_v61, %v11965_v46 }
 0x31d   : > { %v9902_v8 = vpop.permute.xlu0 %1932  ;;  %v1463_v16 = vmul.f32 %v9542_v60, %v11966_v17  ;;  %v7725_v20 = vpack.i.bf16 %v9940_v57, %v3834_v7  ;;  %v2819_v26 = vadd.f32 %v9617_v11, %v2783_v19  ;;  %v2237_v7 = vmul.f32 %v9975_v9, %v9776_v27 }
 0x31e   : > { %v1234_v19 = vadd.f32 %v1202_v15, %v976_v29  ;;  %v9988_v28 = vadd.f32 %v954_v30, %v696_v44  ;;  %v1240_v27 = vadd.f32 %v1208_v4, %v982_v42  ;;  %v10012_v4 = vld [vmem:[%s11602_s1 + $0x5] ss:$0 sm:$0xff] }
 0x31f   : > { %v1977_v17 = vmul.f32 %v10012_v4, %v9881_v5  ;;  %v11970_v5 = vld [vmem:[#allocation83_spill] sm:$0xff] }
 0x320   : > { %v1493_v15 = vadd.f32 %v1461_v34, %v1234_v19 }
 0x322   : > { %7711 = vrot.lane.b32.xlu1 %v7710_v14, %s7836_s28  ;;  %7716 = vrot.lane.b32.xlu2 %v7715_v2, %s7835_s30  ;;  %v695_v14 = vmul.f32 %v7815_v59, %v11961_v18  ;;  %v9946_v59 = vadd.f32 %v951_v62, %v693_v1  ;;  %v7720_v1 = vpack.i.bf16 %v9876_v55, %v9635_v0  ;;  %v11969_v18 = vld [vmem:[#allocation121_spill] sm:$0xff] }
 0x323   : > { %7706 = vrot.lane.b32.xlu0 %v7700_v23, %s7837_s29  ;;  %v3866_v23 = vld [vmem:[#allocation2 + $0x41] sm:$0xff] }
 0x324   : > { %v9934_v2 = vpop.permute.xlu2 %2449  ;;  %v9936_v35 = vpop.permute.xlu1 %2171  ;;  %v9942_v13 = vadd.f32 %v953_v41, %v695_v14  ;;  %v1204_v41 = vmul.f32 %v9952_v61, %v11964_v63  ;;  %v7730_v62 = vpack.i.bf16 %v3867_v48, %v3866_v23  ;;  %v1467_v14 = vmul.f32 %v9542_v60, %v11969_v18 }
 0x325   : > { %v9938_v50 = vpop.permute.xlu0 %2161  ;;  %v2495_v23 = vmul.f32 %v9528_v45, %v9891_v39  ;;  %v1721_v60 = vmul.f32 %v9553_v37, %v9847_v40  ;;  %v1723_v48 = vmul.f32 %v9553_v37, %v9870_v21  ;;  %v2241_v45 = vmul.f32 %v9975_v9, %v9884_v47  ;;  %v10000_v21 = vld [vmem:[%s11602_s1 + $0x4] ss:$0 sm:$0xff] }
 0x326   : > { %v1236_v0 = vadd.f32 %v1204_v41, %v978_v25  ;;  %v2269_v39 = vadd.f32 %v2237_v7, %v9831_v38  ;;  %v1497_v40 = vadd.f32 %v1465_v53, %v1238_v32  ;;  %v2851_v63 = vmax.f32 %v2819_v26, 0.0 }
 0x327   : > { %v1499_v37 = vadd.f32 %v1467_v14, %v1240_v27  ;;  %v1719_v47 = vmul.f32 %v10000_v21, %v9754_v31  ;;  %v1725_v30 = vmul.f32 %v10000_v21, %v9868_v10  ;;  %v7740_v32 = vpack.i.bf16 %v9873_v54, %v9876_v55 }
 0x328   : > { %v1495_v25 = vadd.f32 %v1463_v16, %v1236_v0  ;;  %v2527_v44 = vadd.f32 %v2495_v23, %v2269_v39  ;;  %v1755_v46 = vadd.f32 %v1723_v48, %v1497_v40  ;;  %v2273_v31 = vadd.f32 %v2241_v45, %v9851_v6  ;;  %v10052_v48 = vld [vmem:[%s11602_s1 + $0x8] ss:$0 sm:$0xff] }
 0x329   : > { %v1979_v55 = vmul.f32 %v10012_v4, %v9819_v52  ;;  %v2955_v49 = vrot.slane %v2851_v63, 2  ;;  %v2956_v34 = vrot.slane %v2851_v63, 4  ;;  %v10030_v6 = vmul.f32 %v9952_v61, %v11970_v5 }
 0x32a   : > { %7726 = vrot.lane.b32.xlu1 %v7725_v20, %s7836_s28  ;;  %7731 = vrot.lane.b32.xlu2 %v7730_v62, %s7835_s30  ;;  %v1753_v42 = vadd.f32 %v1721_v60, %v1495_v25  ;;  %v1981_v20 = vmul.f32 %v10012_v4, %v9842_v24  ;;  %v1751_v56 = vadd.f32 %v1719_v47, %v1493_v15  ;;  %v2957_v52 = vrot.slane %v2851_v63, 6 }
 0x32b   : > { %7721 = vrot.lane.b32.xlu0 %v7720_v1, %s7837_s29  ;;  %v3456_v0 = vsel %vm444_vm0, %v2955_v49, -inf  ;;  %v3465_v60 = vsel %vm444_vm0, %v2956_v34, -inf }
 0x32c   : > { %v9993_v58 = vpop.permute.xlu2 %2697  ;;  %v9995_v29 = vpop.permute.xlu1 %2181  ;;  %v10038_v1 = vadd.f32 %v1979_v55, %v1753_v42  ;;  %v10040_v24 = vadd.f32 %v1981_v20, %v1755_v46  ;;  %v2009_v18 = vadd.f32 %v1977_v17, %v1751_v56  ;;  %v3474_v15 = vsel %vm444_vm0, %v2957_v52, -inf }
 0x32d   : > { %v2683_v41 = vpop.permute.xlu0 %2682 }
 0x32e   : > { %v2753_v38 = vmul.f32 %v9574_v33, %v2683_v41  ;;  %v10020_v33 = vld [vmem:[%s11602_s1 + $0x7] ss:$0 sm:$0xff] }
 0x32f   : > { %v2497_v10 = vmul.f32 %v10020_v33, %v9899_v43  ;;  %v2499_v53 = vmul.f32 %v10020_v33, %v9866_v51  ;;  %v10036_v43 = vadd.f32 %v1725_v30, %v1499_v37  ;;  %v2236_v37 = vmul.f32 %v9975_v9, %v9938_v50  ;;  %v10074_v50 = vld [vmem:[%s11603_s2] ss:$0 sm:$0xff] }
 0x330   : > { %v2785_v16 = vadd.f32 %v2753_v38, %v2527_v44  ;;  %v10065_v17 = vmul.f32 %v10020_v33, %v9897_v3  ;;  %v2238_v3 = vmul.f32 %v9975_v9, %v9936_v35 }
 0x331   : > { %v2529_v14 = vadd.f32 %v2497_v10, %v9860_v12  ;;  %v2531_v19 = vadd.f32 %v2499_v53, %v2273_v31  ;;  %v10069_v31 = vmul.f32 %v10012_v4, %v9902_v8  ;;  %v10079_v5 = vadd.f32 %v2236_v37, %v2009_v18 }
 0x332   : > { %v2821_v26 = vadd.f32 %v9617_v11, %v2785_v16  ;;  %7741 = vrot.lane.b32.xlu1 %v7740_v32, %s7836_s28  ;;  %v3447_v11 = vsel %vm444_vm0, %v2851_v63, -inf }
 0x333   : > { %7736 = vrot.lane.b32.xlu0 %v7730_v62, %s7837_s29 }
 0x334   : > { %v2853_v7 = vmax.f32 %v2821_v26, 0.0  ;;  %v10044_v23 = vpop.permute.xlu2 %1689  ;;  %v2703_v51 = vpop.permute.xlu1 %2702 }
 0x335   : > { %v2757_v62 = vmul.f32 %v10052_v48, %v2703_v51  ;;  %v2693_v27 = vpop.permute.xlu0 %2692 }
 0x336   : > { %v2961_v12 = vrot.slane %v2853_v7, 2  ;;  %v2962_v45 = vrot.slane %v2853_v7, 4  ;;  %v2963_v39 = vrot.slane %v2853_v7, 6  ;;  %v3448_v25 = vsel %vm444_vm0, %v2853_v7, -inf }
 0x337   : > { %v3449_v40 = vmax.f32 %v3447_v11, %v3448_v25  ;;  %v2789_v63 = vadd.f32 %v2757_v62, %v2531_v19  ;;  %v2755_v41 = vmul.f32 %v10052_v48, %v2693_v27  ;;  %v2240_v11 = vmul.f32 %v9975_v9, %v9995_v29 }
 0x338   : > { %v3457_v47 = vsel %vm444_vm0, %v2961_v12, -inf  ;;  %v3466_v44 = vsel %vm444_vm0, %v2962_v45, -inf  ;;  %v3475_v38 = vsel %vm444_vm0, %v2963_v39, -inf }
 0x339   : > { %v3450_v42 = vrot.slane %v3449_v40, 4  ;;  %v3458_v30 = vmax.f32 %v3456_v0, %v3457_v47  ;;  %v3467_v46 = vmax.f32 %v3465_v60, %v3466_v44  ;;  %v3476_v32 = vmax.f32 %v3474_v15, %v3475_v38 }
 0x33a   : > { %v2825_v10 = vadd.f32 %v10074_v50, %v2789_v63  ;;  %v2787_v16 = vadd.f32 %v2755_v41, %v2529_v14 }
 0x33b   : > { %v3451_v55 = vmax.f32 %v3449_v40, %v3450_v42  ;;  %v3459_v20 = vrot.slane %v3458_v30, 4  ;;  %v3468_v49 = vrot.slane %v3467_v46, 4  ;;  %v3477_v34 = vrot.slane %v3476_v32, 4 }
 0x33c   : > { %v2857_v56 = vmax.f32 %v2825_v10, 0.0  ;;  %v2823_v8 = vadd.f32 %v10074_v50, %v2787_v16  ;;  %v10082_v53 = vpop.permute.xlu2 %1684  ;;  %v2440_v26 = vpop.permute.xlu1 %2439 }
 0x33d   : > { %v3452_v52 = vrot.slane %v3451_v55, 2  ;;  %v3460_v7 = vmax.f32 %v3458_v30, %v3459_v20  ;;  %v3469_v51 = vmax.f32 %v3467_v46, %v3468_v49  ;;  %v3478_v19 = vmax.f32 %v3476_v32, %v3477_v34  ;;  %v2430_v14 = vpop.permute.xlu0 %2429 }
 0x33e   : > { %v2973_v0 = vrot.slane %v2857_v56, 2  ;;  %v2974_v60 = vrot.slane %v2857_v56, 4  ;;  %v2975_v62 = vrot.slane %v2857_v56, 6  ;;  %v3520_v45 = vsel %vm444_vm0, %v2857_v56, -inf }
 0x33f   : > { %v3453_v35 = vmax.f32 %v3451_v55, %v3452_v52  ;;  %v3461_v18 = vrot.slane %v3460_v7, 2  ;;  %v3470_v27 = vrot.slane %v3469_v51, 2  ;;  %v3479_v12 = vrot.slane %v3478_v19, 2 }
 0x340   : > { %v3529_v39 = vsel %vm444_vm0, %v2973_v0, -inf  ;;  %v3538_v25 = vsel %vm444_vm0, %v2974_v60, -inf  ;;  %v2855_v15 = vmax.f32 %v2823_v8, 0.0  ;;  %v3547_v32 = vsel %vm444_vm0, %v2975_v62, -inf }
 0x341   : > { %v3454_v40 = vrot.slane %v3453_v35, 1  ;;  %v3462_v63 = vmax.f32 %v3460_v7, %v3461_v18  ;;  %v3471_v41 = vmax.f32 %v3469_v51, %v3470_v27  ;;  %v3480_v37 = vmax.f32 %v3478_v19, %v3479_v12 }
 0x342   : > { %v2967_v47 = vrot.slane %v2855_v15, 2  ;;  %v2968_v29 = vrot.slane %v2855_v15, 4  ;;  %v2969_v44 = vrot.slane %v2855_v15, 6  ;;  %v3519_v38 = vsel %vm444_vm0, %v2855_v15, -inf }
 0x343   : > { %v3463_v42 = vrot.slane %v3462_v63, 1  ;;  %v3472_v30 = vrot.slane %v3471_v41, 1  ;;  %v3481_v46 = vrot.slane %v3480_v37, 1  ;;  %v3521_v10 = vmax.f32 %v3519_v38, %v3520_v45 }
 0x344   : > { %v3528_v16 = vsel %vm444_vm0, %v2967_v47, -inf  ;;  %v3537_v55 = vsel %vm444_vm0, %v2968_v29, -inf  ;;  %v3546_v20 = vsel %vm444_vm0, %v2969_v44, -inf  ;;  %v10094_v49 = vpop.permute.xlu2 %2206  ;;  %v2688_v34 = vpop.permute.xlu1 %2687  ;;  %v3455_v56 = vmax.f32 %v3453_v35, %v3454_v40 }
 0x345   : > { %v3464_v8 = vmax.f32 %v3462_v63, %v3463_v42  ;;  %v3473_v52 = vmax.f32 %v3471_v41, %v3472_v30  ;;  %v3530_v7 = vmax.f32 %v3528_v16, %v3529_v39  ;;  %v2678_v51 = vpop.permute.xlu0 %2677  ;;  %v3482_v19 = vmax.f32 %v3480_v37, %v3481_v46 }
 0x346   : > { %v3522_v0 = vrot.slane %v3521_v10, 4  ;;  %v3539_v60 = vmax.f32 %v3537_v55, %v3538_v25  ;;  %v3548_v18 = vmax.f32 %v3546_v20, %v3547_v32  ;;  %v2498_v12 = vmul.f32 %v10020_v33, %v2440_v26 }
 0x347   : > { %v3769_v62 = vsel %vm3727_vm1, %v3464_v8, %v3455_v56  ;;  %v3531_v27 = vrot.slane %v3530_v7, 4  ;;  %v2496_v45 = vmul.f32 %v10020_v33, %v2430_v14  ;;  %v2270_v40 = vadd.f32 %v2238_v3, %v10038_v1 }
 0x348   : > { %v3770_v15 = vsel %vm3729_vm2, %v3473_v52, %v3769_v62  ;;  %v3523_v47 = vmax.f32 %v3521_v10, %v3522_v0  ;;  %v3540_v29 = vrot.slane %v3539_v60, 4  ;;  %v3549_v35 = vrot.slane %v3548_v18, 4  ;;  %v11972_v62 = vld [vmem:[#allocation96_spill] sm:$0xff] }
 0x349   : > { %v2272_v39 = vadd.f32 %v2240_v11, %v10040_v24  ;;  %v10103_v63 = vsel %vm3731_vm3, %v3482_v19, %v3770_v15  ;;  %v3532_v25 = vmax.f32 %v3530_v7, %v3531_v27  ;;  %v2526_v26 = vadd.f32 %v10065_v17, %v10079_v5 }
 0x34a   : > { %v3524_v41 = vrot.slane %v3523_v47, 2  ;;  %v3541_v37 = vmax.f32 %v3539_v60, %v3540_v29  ;;  %v3550_v44 = vmax.f32 %v3548_v18, %v3549_v35  ;;  %v2528_v42 = vadd.f32 %v2496_v45, %v2270_v40  ;;  %v11971_v60 = vld [vmem:[#allocation86_spill] sm:$0xff] }
 0x34b   : > { %v3533_v14 = vrot.slane %v3532_v25, 2  ;;  %v2530_v38 = vadd.f32 %v2498_v12, %v2272_v39  ;;  %v2754_v30 = vmul.f32 %v10052_v48, %v2688_v34  ;;  %v2752_v24 = vmul.f32 %v10052_v48, %v2678_v51 }
 0x34c   : > { %v3525_v46 = vmax.f32 %v3523_v47, %v3524_v41  ;;  %v3542_v32 = vrot.slane %v3541_v37, 2  ;;  %v3551_v1 = vrot.slane %v3550_v44, 2  ;;  %v10109_v3 = vpop.permute.xlu2 %2454  ;;  %v10111_v11 = vpop.permute.xlu1 %1679  ;;  %v2015_v10 = vadd.f32 %v10069_v31, %v10036_v43 }
 0x34d   : > { %v2756_v17 = vmul.f32 %v10052_v48, %v9993_v58  ;;  %v3534_v5 = vmax.f32 %v3532_v25, %v3533_v14  ;;  %v2786_v16 = vadd.f32 %v2754_v30, %v2528_v42  ;;  %v2708_v55 = vpop.permute.xlu0 %2707  ;;  %v2784_v8 = vadd.f32 %v2752_v24, %v2526_v26 }
 0x34e   : > { %v3526_v20 = vrot.slane %v3525_v46, 1  ;;  %v3543_v34 = vmax.f32 %v3541_v37, %v3542_v32  ;;  %v3552_v56 = vmax.f32 %v3550_v44, %v3551_v1  ;;  %v10119_v52 = vadd.f32 %v10030_v6, %v9946_v59 }
 0x34f   : > { %v3535_v7 = vrot.slane %v3534_v5, 1  ;;  %v2788_v51 = vadd.f32 %v2756_v17, %v2530_v38  ;;  %v2822_v19 = vadd.f32 %v10074_v50, %v2786_v16  ;;  %v2242_v43 = vmul.f32 %v9975_v9, %v9889_v36 }
 0x350   : > { %v3544_v31 = vrot.slane %v3543_v34, 1  ;;  %v3553_v58 = vrot.slane %v3552_v56, 1  ;;  %v2820_v0 = vadd.f32 %v10074_v50, %v2784_v8  ;;  %v1212_v18 = vmul.f32 %v9952_v61, %v11971_v60 }
 0x351   : > { %v1211_v27 = vmul.f32 %v9952_v61, %v11972_v62  ;;  %v3527_v12 = vmax.f32 %v3525_v46, %v3526_v20  ;;  %v3536_v59 = vmax.f32 %v3534_v5, %v3535_v7  ;;  %v2274_v6 = vadd.f32 %v2242_v43, %v2015_v10  ;;  %v7465_v46 = vld [vmem:[%s11604_s3 + $0x38] sm:$0xff] }
 0x352   : > { %v3545_v45 = vmax.f32 %v3543_v34, %v3544_v31  ;;  %v2854_v15 = vmax.f32 %v2822_v19, 0.0  ;;  %v2852_v47 = vmax.f32 %v2820_v0, 0.0  ;;  %v2500_v29 = vmul.f32 %v10020_v33, %v9934_v2  ;;  %4294 = vmatpush.bf16.msra.mxu0 %v7465_v46  ;;  %v7464_v34 = vld [vmem:[%s11604_s3 + $0x30] sm:$0xff]  ;;  %v11973_v19 = vld [vmem:[#allocation97_spill] sm:$0xff] }
 0x353   : > { %v3554_v36 = vmax.f32 %v3552_v56, %v3553_v58  ;;  %v3776_v35 = vsel %vm3727_vm1, %v3536_v59, %v3527_v12  ;;  %v2824_v40 = vadd.f32 %v10074_v50, %v2788_v51  ;;  %v1210_v43 = vmul.f32 %v9952_v61, %v11973_v19 }
 0x354   : > { %v3777_v39 = vsel %vm3729_vm2, %v3545_v45, %v3776_v35  ;;  %v2964_v25 = vrot.slane %v2854_v15, 2  ;;  %v2965_v41 = vrot.slane %v2854_v15, 4  ;;  %v2966_v37 = vrot.slane %v2854_v15, 6  ;;  %v10134_v44 = vpop.permute.xlu2 %2211  ;;  %v10136_v26 = vpop.permute.xlu1 %1947 }
 0x355   : > { %v10139_v14 = vsel %vm3731_vm3, %v3554_v36, %v3777_v39  ;;  %v3484_v38 = vsel %vm444_vm0, %v2854_v15, -inf  ;;  %v2958_v2 = vrot.slane %v2852_v47, 2  ;;  %v2959_v42 = vrot.slane %v2852_v47, 4  ;;  %v10142_v30 = vpop.permute.xlu0 %1937 }
 0x356   : > { %v3493_v32 = vsel %vm444_vm0, %v2964_v25, -inf  ;;  %v3502_v1 = vsel %vm444_vm0, %v2965_v41, -inf  ;;  %v3511_v24 = vsel %vm444_vm0, %v2966_v37, -inf  ;;  %v2960_v10 = vrot.slane %v2852_v47, 6  ;;  %4295 = vmatpush.bf16.msra.mxu0 %v7464_v34 }
 0x357   : > { %v10150_v17 = vmax.f32 %v2824_v40, 0.0  ;;  %v3483_v5 = vsel %vm444_vm0, %v2852_v47, -inf  ;;  %v3492_v16 = vsel %vm444_vm0, %v2958_v2, -inf  ;;  %v3501_v20 = vsel %vm444_vm0, %v2959_v42, -inf }
 0x358   : > { %v3485_v56 = vmax.f32 %v3483_v5, %v3484_v38  ;;  %v3494_v8 = vmax.f32 %v3492_v16, %v3493_v32  ;;  %v3503_v7 = vmax.f32 %v3501_v20, %v3502_v1  ;;  %v3510_v51 = vsel %vm444_vm0, %v2960_v10, -inf }
 0x359   : > { %v2532_v31 = vadd.f32 %v2500_v29, %v2274_v6  ;;  %v3512_v58 = vmax.f32 %v3510_v51, %v3511_v24  ;;  %v2758_v0 = vmul.f32 %v10052_v48, %v2708_v55  ;;  %v10163_v60 = vadd.f32 %v1212_v18, %v9988_v28 }
 0x35a   : > { %v3486_v62 = vrot.slane %v3485_v56, 4  ;;  %v3495_v12 = vrot.slane %v3494_v8, 4  ;;  %v3504_v59 = vrot.slane %v3503_v7, 4  ;;  %v10166_v45 = vadd.f32 %v1211_v27, %v9942_v13  ;;  %v10180_v13 = vld [vmem:[%s11602_s1 + $0x3] ss:$0 sm:$0xff]  ;;  %v11974_v27 = vld [vmem:[#allocation120_spill] sm:$0xff] }
 0x35b   : > { %v2970_v15 = vrot.slane %v10150_v17, 2  ;;  %v3513_v47 = vrot.slane %v3512_v58, 4  ;;  %v2790_v36 = vadd.f32 %v2758_v0, %v2532_v31  ;;  %v2971_v61 = vrot.slane %v10150_v17, 4 }
 0x35c   : > { %v3487_v6 = vmax.f32 %v3485_v56, %v3486_v62  ;;  %v3496_v29 = vmax.f32 %v3494_v8, %v3495_v12  ;;  %v3505_v35 = vmax.f32 %v3503_v7, %v3504_v59  ;;  %v10170_v55 = vpop.permute.xlu2 %2459  ;;  %v10172_v28 = vpop.permute.xlu1 %2196  ;;  %v10175_v18 = vadd.f32 %v1210_v43, %v9944_v22 }
 0x35d   : > { %v1468_v40 = vmul.f32 %v10180_v13, %v11974_v27  ;;  %v3514_v39 = vmax.f32 %v3512_v58, %v3513_v47  ;;  %v2826_v25 = vadd.f32 %v10074_v50, %v2790_v36  ;;  %v10185_v41 = vpop.permute.xlu0 %1694  ;;  %v2972_v37 = vrot.slane %v10150_v17, 6  ;;  %v11975_v27 = vld [vmem:[#allocation123_spill] sm:$0xff] }
 0x35e   : > { %v3488_v38 = vrot.slane %v3487_v6, 2  ;;  %v3497_v2 = vrot.slane %v3496_v29, 2  ;;  %v3506_v42 = vrot.slane %v3505_v35, 2  ;;  %v3555_v46 = vsel %vm444_vm0, %v10150_v17, -inf }
 0x35f   : > { %v3515_v22 = vrot.slane %v3514_v39, 2  ;;  %v3564_v32 = vsel %vm444_vm0, %v2970_v15, -inf  ;;  %v2858_v1 = vmax.f32 %v2826_v25, 0.0  ;;  %v3573_v16 = vsel %vm444_vm0, %v2971_v61, -inf }
 0x360   : > { %v3489_v24 = vmax.f32 %v3487_v6, %v3488_v38  ;;  %v3498_v10 = vmax.f32 %v3496_v29, %v3497_v2  ;;  %v3507_v5 = vmax.f32 %v3505_v35, %v3506_v42  ;;  %v3582_v36 = vsel %vm444_vm0, %v2972_v37, -inf }
 0x361   : > { %v3516_v20 = vmax.f32 %v3514_v39, %v3515_v22  ;;  %v2976_v34 = vrot.slane %v2858_v1, 2  ;;  %v2977_v56 = vrot.slane %v2858_v1, 4  ;;  %v2978_v8 = vrot.slane %v2858_v1, 6 }
 0x362   : > { %v3490_v7 = vrot.slane %v3489_v24, 1  ;;  %v3499_v51 = vrot.slane %v3498_v10, 1  ;;  %v3508_v19 = vrot.slane %v3507_v5, 1  ;;  %v3556_v43 = vsel %vm444_vm0, %v2858_v1, -inf }
 0x363   : > { %v3517_v31 = vrot.slane %v3516_v20, 1  ;;  %v3557_v58 = vmax.f32 %v3555_v46, %v3556_v43  ;;  %v3565_v17 = vsel %vm444_vm0, %v2976_v34, -inf  ;;  %v3574_v0 = vsel %vm444_vm0, %v2977_v56, -inf }
 0x364   : > { %v3491_v62 = vmax.f32 %v3489_v24, %v3490_v7  ;;  %v3500_v12 = vmax.f32 %v3498_v10, %v3499_v51  ;;  %v3509_v59 = vmax.f32 %v3507_v5, %v3508_v19  ;;  %v3566_v15 = vmax.f32 %v3564_v32, %v3565_v17  ;;  %v10195_v47 = vpop.permute.xlu1 %1952  ;;  %v10205_v42 = vpop.permute.xlu2 %2727 }
 0x365   : > { %v3558_v61 = vrot.slane %v3557_v58, 4  ;;  %v3575_v6 = vmax.f32 %v3573_v16, %v3574_v0  ;;  %v3583_v29 = vsel %vm444_vm0, %v2978_v8, -inf  ;;  %v10199_v35 = vpop.permute.xlu0 %1942  ;;  %v1470_v39 = vmul.f32 %v10180_v13, %v11975_v27  ;;  %v11976_v0 = vld [vmem:[#allocation112_spill] sm:$0xff] }
 0x366   : > { %v3772_v25 = vsel %vm3733_vm5, %v3491_v62, %v10103_v63  ;;  %v3567_v38 = vrot.slane %v3566_v15, 4  ;;  %v3584_v2 = vmax.f32 %v3582_v36, %v3583_v29  ;;  %v3518_v22 = vmax.f32 %v3516_v20, %v3517_v31  ;;  %v7463_v31 = vld [vmem:[%s11604_s3 + $0x28] sm:$0xff] }
 0x367   : > { %v3773_v46 = vsel %vm3735_vm6, %v3500_v12, %v3772_v25  ;;  %v3559_v37 = vmax.f32 %v3557_v58, %v3558_v61  ;;  %v3576_v32 = vrot.slane %v3575_v6, 4  ;;  %v1726_v24 = vmul.f32 %v10000_v21, %v10111_v11  ;;  %4296 = vmatpush.bf16.msra.mxu0 %v7463_v31  ;;  %v11977_v36 = vld [vmem:[#allocation122_spill] sm:$0xff] }
 0x368   : > { %v3774_v1 = vsel %vm3737_vm7, %v3509_v59, %v3773_v46  ;;  %v3568_v10 = vmax.f32 %v3566_v15, %v3567_v38  ;;  %v3585_v5 = vrot.slane %v3584_v2, 4  ;;  %v1728_v16 = vmul.f32 %v10000_v21, %v10044_v23 }
 0x369   : > { %v3775_v63 = vsel %vm3739_vm8, %v3518_v22, %v3774_v1  ;;  %v3560_v34 = vrot.slane %v3559_v37, 2  ;;  %v3577_v56 = vmax.f32 %v3575_v6, %v3576_v32  ;;  %v1500_v20 = vadd.f32 %v1468_v40, %v10119_v52  ;;  %v7473_v52 = vld [vmem:[%s11604_s3 + $0x78] sm:$0xff]  ;;  %v7472_v22 = vld [vmem:[%s11604_s3 + $0x70] sm:$0xff] }
 0x36a   : > { %3804 = vst.msk [vmem:[#allocation2 + $0x61] sm:$0xff] %vm442_vm4, %v3775_v63  ;;  %v3569_v8 = vrot.slane %v3568_v10, 2  ;;  %v3586_v7 = vmax.f32 %v3584_v2, %v3585_v5  ;;  %v1984_v51 = vmul.f32 %v10012_v4, %v10142_v30  ;;  %v1502_v11 = vadd.f32 %v1470_v39, %v10166_v45  ;;  %4323 = vmatpush.bf16.msra.mxu1 %v7473_v52  ;;  %v7462_v2 = vld [vmem:[%s11604_s3 + $0x20] sm:$0xff] }
 0x36b   : > { %v3561_v19 = vmax.f32 %v3559_v37, %v3560_v34  ;;  %v3578_v43 = vrot.slane %v3577_v56, 2  ;;  %v1986_v23 = vmul.f32 %v10012_v4, %v10136_v26  ;;  %v1758_v40 = vadd.f32 %v1726_v24, %v1500_v20  ;;  %4297 = vmatpush.bf16.msra.mxu0 %v7462_v2 }
 0x36c   : > { %v3570_v58 = vmax.f32 %v3568_v10, %v3569_v8  ;;  %v3587_v17 = vrot.slane %v3586_v7, 2  ;;  %v2243_v30 = vmul.f32 %v9975_v9, %v10172_v28  ;;  %v2202_v45 = vpop.permute.xlu1 %2201  ;;  %v1469_v62 = vmul.f32 %v10180_v13, %v11976_v0  ;;  %v10243_v1 = vpop.permute.xlu2 %7686 }
 0x36d   : > { %v1760_v12 = vadd.f32 %v1728_v16, %v1502_v11  ;;  %v3562_v26 = vrot.slane %v3561_v19, 1  ;;  %v3579_v59 = vmax.f32 %v3577_v56, %v3578_v43  ;;  %v2465_v15 = vpop.permute.xlu0 %2464  ;;  %v1471_v61 = vmul.f32 %v10180_v13, %v11977_v36  ;;  %v7471_v11 = vld [vmem:[%s11604_s3 + $0x68] sm:$0xff] }
 0x36e   : > { %v3571_v6 = vrot.slane %v3570_v58, 1  ;;  %v3588_v29 = vmax.f32 %v3586_v7, %v3587_v17  ;;  %v2016_v27 = vadd.f32 %v1984_v51, %v1758_v40  ;;  %v2245_v39 = vmul.f32 %v9975_v9, %v10094_v49  ;;  %4324 = vmatpush.bf16.msra.mxu1 %v7472_v22  ;;  %v7461_v51 = vld [vmem:[%s11604_s3 + $0x18] sm:$0xff] }
 0x36f   : > { %v3563_v28 = vmax.f32 %v3561_v19, %v3562_v26  ;;  %v3580_v25 = vrot.slane %v3579_v59, 1  ;;  %v2018_v38 = vadd.f32 %v1986_v23, %v1760_v12  ;;  %v1729_v32 = vmul.f32 %v10000_v21, %v10185_v41  ;;  %4298 = vmatpush.bf16.msra.mxu0 %v7461_v51 }
 0x370   : > { %v3572_v46 = vmax.f32 %v3570_v58, %v3571_v6  ;;  %v3589_v37 = vrot.slane %v3588_v29, 1  ;;  %v2275_v13 = vadd.f32 %v2243_v30, %v2016_v27  ;;  %v2503_v16 = vmul.f32 %v10020_v33, %v2465_v15  ;;  %v7470_v58 = vld [vmem:[%s11604_s3 + $0x60] sm:$0xff]  ;;  %v7469_v6 = vld [vmem:[%s11604_s3 + $0x58] sm:$0xff] }
 0x371   : > { %v3581_v49 = vmax.f32 %v3579_v59, %v3580_v25  ;;  %v3779_v24 = vsel %vm3733_vm5, %v3563_v28, %v10139_v14  ;;  %v10247_v10 = vld [vmem:[#allocation2 + $0x62] sm:$0xff]  ;;  %v1503_v20 = vadd.f32 %v1471_v61, %v10163_v60  ;;  %v1727_v14 = vmul.f32 %v10000_v21, %v10082_v53 }
 0x372   : > { %v10249_v5 = vld [vmem:[#allocation2 + $0x60] sm:$0xff]  ;;  %v3590_v63 = vmax.f32 %v3588_v29, %v3589_v37  ;;  %v3780_v34 = vsel %vm3735_vm6, %v3572_v46, %v3779_v24  ;;  %v7750_v41 = vpack.i.bf16 %v10247_v10, %v9873_v54  ;;  %v2277_v7 = vadd.f32 %v2245_v39, %v2018_v38  ;;  %4325 = vmatpush.bf16.msra.mxu1 %v7471_v11 }
 0x373   : > { %v7745_v56 = vpack.i.bf16 %v10249_v5, %v9940_v57  ;;  %v3781_v8 = vsel %vm3737_vm7, %v3581_v49, %v3780_v34  ;;  %v2501_v54 = vmul.f32 %v10020_v33, %v10109_v3  ;;  %v1987_v60 = vmul.f32 %v10012_v4, %v10195_v47  ;;  %v10295_v36 = vld [vmem:[#allocation2 + $0x61] sm:$0xff] }
 0x374   : > { %v3782_v57 = vsel %vm3739_vm8, %v3590_v63, %v3781_v8  ;;  %7751 = vrot.lane.b32.xlu0 %v7750_v41, %s7837_s29  ;;  %v2723_v21 = vpop.permute.xlu1 %2722  ;;  %v1501_v53 = vadd.f32 %v1469_v62, %v10175_v18  ;;  %v2535_v19 = vadd.f32 %v2503_v16, %v2277_v7  ;;  %v1761_v3 = vadd.f32 %v1729_v32, %v1503_v20  ;;  %v7460_v18 = vld [vmem:[%s11604_s3 + $0x10] sm:$0xff]  ;;  %v10290_v26 = vpop.permute.xlu2 %7701  ;;  %v7458_v41 = vld [vmem:[%s11604_s3] sm:$0xff] }
 0x375   : > { %7746 = vrot.lane.b32.xlu2 %v7745_v56, %s7835_s30  ;;  %3805 = vst.msk [vmem:[#allocation2 + $0x71] sm:$0xff] %vm442_vm4, %v3782_v57  ;;  %v2761_v43 = vmul.f32 %v10052_v48, %v2723_v21  ;;  %v2713_v23 = vpop.permute.xlu0 %2712  ;;  %v1985_v31 = vmul.f32 %v10012_v4, %v10199_v35  ;;  %v2533_v47 = vadd.f32 %v2501_v54, %v2275_v13  ;;  %v7468_v56 = vld [vmem:[%s11604_s3 + $0x50] sm:$0xff] }
 0x376   : > { %v2759_v52 = vmul.f32 %v10052_v48, %v2713_v23  ;;  %v1759_v17 = vadd.f32 %v1727_v14, %v1501_v53  ;;  %v2019_v30 = vadd.f32 %v1987_v60, %v1761_v3  ;;  %v2244_v0 = vmul.f32 %v9975_v9, %v2202_v45  ;;  %4299 = vmatpush.bf16.msra.mxu0 %v7460_v18  ;;  %v7459_v45 = vld [vmem:[%s11604_s3 + $0x8] sm:$0xff] }
 0x377   : > { %v2793_v40 = vadd.f32 %v2761_v43, %v2535_v19  ;;  %4326 = vmatpush.bf16.msra.mxu1 %v7470_v58  ;;  %v2246_v4 = vmul.f32 %v9975_v9, %v10134_v44  ;;  %v2502_v15 = vmul.f32 %v10020_v33, %v10170_v55  ;;  %v10305_v9 = vmul.f32 %v10052_v48, %v10205_v42 }
 0x378   : > { %v2791_v62 = vadd.f32 %v2759_v52, %v2533_v47  ;;  %v2017_v35 = vadd.f32 %v1985_v31, %v1759_v17  ;;  %v7689_v43 = vunpack.i.h.bf16 %v10243_v1  ;;  %v7688_v23 = vunpack.i.l.bf16 %v10243_v1  ;;  %v7467_v47 = vld [vmem:[%s11604_s3 + $0x48] sm:$0xff] }
 0x379   : > { %v2829_v12 = vadd.f32 %v10074_v50, %v2793_v40  ;;  %v2278_v25 = vadd.f32 %v2246_v4, %v2019_v30  ;;  %v7466_v4 = vld [vmem:[%s11604_s3 + $0x40] sm:$0xff] }
 0x37a   : > { %v2827_v59 = vadd.f32 %v10074_v50, %v2791_v62  ;;  %v2276_v44 = vadd.f32 %v2244_v0, %v2017_v35  ;;  %4300 = vmatpush.bf16.msra.mxu0 %v7459_v45  ;;  %v7703_v45 = vunpack.i.l.bf16 %v10290_v26 }
 0x37b   : > { %v2861_v61 = vmax.f32 %v2829_v12, 0.0  ;;  %4327 = vmatpush.bf16.msra.mxu1 %v7469_v6 }
 0x37c   : > { %v10307_v29 = vld [vmem:[#allocation2 + $0x72] sm:$0xff]  ;;  %v2859_v39 = vmax.f32 %v2827_v59, 0.0  ;;  %v2718_v28 = vpop.permute.xlu1 %2717  ;;  %v2534_v57 = vadd.f32 %v2502_v15, %v2276_v44  ;;  %v10344_v17 = vpop.permute.xlu2 %7716 }
 0x37d   : > { %v10309_v27 = vld [vmem:[#allocation2 + $0x71] sm:$0xff]  ;;  %v4130_v38 = vpack.c.bf16 %v10307_v29, %v10247_v10  ;;  %v2985_v22 = vrot.slane %v2861_v61, 2  ;;  %v2470_v46 = vpop.permute.xlu0 %2469  ;;  %v2986_v37 = vrot.slane %v2861_v61, 4  ;;  %v2987_v13 = vrot.slane %v2861_v61, 6 }
 0x37e   : > { %v10311_v55 = vld [vmem:[#allocation2 + $0x70] sm:$0xff]  ;;  %v7760_v2 = vpack.i.bf16 %v10309_v27, %v10295_v36  ;;  %v3592_v32 = vsel %vm444_vm0, %v2861_v61, -inf  ;;  %v2979_v49 = vrot.slane %v2859_v39, 2  ;;  %v2980_v16 = vrot.slane %v2859_v39, 4  ;;  %4301 = vmatpush.bf16.msra.mxu0 %v7458_v41 }
 0x37f   : > { %v7755_v42 = vpack.i.bf16 %v10311_v55, %v10249_v5  ;;  %6732 = vmatmul.msk.bf16.vlgmr.msra.gmra.mxu3 %vm442_vm4, %v4130_v38  ;;  %v3601_v24 = vsel %vm444_vm0, %v2985_v22, -inf  ;;  %v2981_v63 = vrot.slane %v2859_v39, 6  ;;  %v3591_v34 = vsel %vm444_vm0, %v2859_v39, -inf  ;;  %4328 = vmatpush.bf16.msra.mxu1 %v7468_v56 }
 0x380   : > { %7761 = vrot.lane.b32.xlu2 %v7760_v2, %s7835_s30  ;;  %7766 = vrot.lane.b32.xlu0 %v7760_v2, %s7837_s29  ;;  %v3610_v20 = vsel %vm444_vm0, %v2986_v37, -inf  ;;  %v3619_v14 = vsel %vm444_vm0, %v2987_v13, -inf  ;;  %v3593_v8 = vmax.f32 %v3591_v34, %v3592_v32  ;;  %v3600_v7 = vsel %vm444_vm0, %v2979_v49, -inf }
 0x381   : > { %7756 = vrot.lane.b32.xlu1 %v7755_v42, %s7836_s28  ;;  %v3602_v51 = vmax.f32 %v3600_v7, %v3601_v24  ;;  %v3609_v11 = vsel %vm444_vm0, %v2980_v16, -inf  ;;  %v3618_v54 = vsel %vm444_vm0, %v2981_v63, -inf  ;;  %v2760_v19 = vmul.f32 %v10052_v48, %v2718_v28 }
 0x382   : > { %v3594_v60 = vrot.slane %v3593_v8, 4  ;;  %v3611_v21 = vmax.f32 %v3609_v11, %v3610_v20  ;;  %v3620_v53 = vmax.f32 %v3618_v54, %v3619_v14  ;;  %v2504_v31 = vmul.f32 %v10020_v33, %v2470_v46  ;;  %v3807_v11 = vld [vmem:[#allocation2] sm:$0xff] }
 0x383   : > { %v3603_v3 = vrot.slane %v3602_v51, 4  ;;  %v2792_v58 = vadd.f32 %v2760_v19, %v2534_v57  ;;  %v7704_v48 = vunpack.i.h.bf16 %v10290_v26  ;;  %v7770_v62 = vpack.i.bf16 %v10307_v29, %v10247_v10  ;;  %4329 = vmatpush.bf16.msra.mxu1 %v7467_v47 }
 0x384   : > { %v3595_v52 = vmax.f32 %v3593_v8, %v3594_v60  ;;  %v3612_v40 = vrot.slane %v3611_v21, 4  ;;  %v3621_v18 = vrot.slane %v3620_v53, 4  ;;  %v10346_v30 = vpop.permute.xlu1 %7681  ;;  %v2536_v12 = vadd.f32 %v2504_v31, %v2278_v25 }
 0x385   : > { %v3604_v0 = vmax.f32 %v3602_v51, %v3603_v3  ;;  %v7677_v33 = vpop.permute.xlu0 %7676  ;;  %v2828_v61 = vadd.f32 %v10074_v50, %v2792_v58  ;;  %v7719_v44 = vunpack.i.h.bf16 %v10344_v17  ;;  %v7684_v22 = vunpack.i.h.bf16 %v10346_v30 }
 0x386   : > { %v3596_v35 = vrot.slane %v3595_v52, 2  ;;  %v3613_v59 = vmax.f32 %v3611_v21, %v3612_v40  ;;  %v3622_v15 = vmax.f32 %v3620_v53, %v3621_v18  ;;  %v2794_v39 = vadd.f32 %v10305_v9, %v2536_v12 }
 0x387   : > { %v3605_v6 = vrot.slane %v3604_v0, 2  ;;  %v2860_v38 = vmax.f32 %v2828_v61, 0.0  ;;  %v7683_v46 = vunpack.i.l.bf16 %v10346_v30  ;;  %4330 = vmatpush.bf16.msra.mxu1 %v7466_v4  ;;  %v7679_v63 = vunpack.i.h.bf16 %v7677_v33 }
 0x388   : > { %v3597_v10 = vmax.f32 %v3595_v52, %v3596_v35  ;;  %v3614_v28 = vrot.slane %v3613_v59, 2  ;;  %v3623_v25 = vrot.slane %v3622_v15, 2  ;;  %v2830_v42 = vadd.f32 %v10074_v50, %v2794_v39  ;;  %v3808_v52 = vld [vmem:[#allocation2 + $0x10] sm:$0xff] }
 0x389   : > { %7771 = vrot.lane.b32.xlu1 %v7770_v62, %s7836_s28  ;;  %v3606_v2 = vmax.f32 %v3604_v0, %v3605_v6  ;;  %v2982_v49 = vrot.slane %v2860_v38, 2  ;;  %v2983_v9 = vrot.slane %v2860_v38, 4  ;;  %v2984_v16 = vrot.slane %v2860_v38, 6 }
 0x38a   : > { %v3598_v37 = vrot.slane %v3597_v10, 1  ;;  %v3615_v13 = vmax.f32 %v3613_v59, %v3614_v28  ;;  %v3624_v32 = vmax.f32 %v3622_v15, %v3623_v25  ;;  %v3627_v56 = vsel %vm444_vm0, %v2860_v38, -inf  ;;  %v3840_v38 = vld [vmem:[#allocation2 + $0x21] sm:$0xff] }
 0x38b   : > { %v3607_v24 = vrot.slane %v3606_v2, 1  ;;  %v7678_v20 = vunpack.i.l.bf16 %v7677_v33  ;;  %v3636_v7 = vsel %vm444_vm0, %v2982_v49, -inf  ;;  %v2862_v51 = vmax.f32 %v2830_v42, 0.0 }
 0x38c   : > { %v3616_v34 = vrot.slane %v3615_v13, 1  ;;  %v3625_v41 = vrot.slane %v3624_v32, 1  ;;  %v10363_v14 = vpop.permute.xlu1 %7696  ;;  %v3599_v50 = vmax.f32 %v3597_v10, %v3598_v37  ;;  %v3645_v21 = vsel %vm444_vm0, %v2983_v9, -inf }
 0x38d   : > { %v3608_v8 = vmax.f32 %v3606_v2, %v3607_v24  ;;  %v7692_v54 = vpop.permute.xlu0 %7691  ;;  %v3654_v53 = vsel %vm444_vm0, %v2984_v16, -inf  ;;  %v2988_v3 = vrot.slane %v2862_v51, 2  ;;  %v2989_v31 = vrot.slane %v2862_v51, 4 }
 0x38e   : > { %v3617_v57 = vmax.f32 %v3615_v13, %v3616_v34  ;;  %v10366_v60 = vmax.f32 %v3624_v32, %v3625_v41  ;;  %v2990_v47 = vrot.slane %v2862_v51, 6  ;;  %v3628_v18 = vsel %vm444_vm0, %v2862_v51, -inf  ;;  %v3839_v32 = vld [vmem:[#allocation2 + $0x11] sm:$0xff] }
 0x38f   : > { %v3783_v19 = vsel %vm3727_vm1, %v3608_v8, %v3599_v50  ;;  %v4073_v58 = vsel %vm442_vm4, %v3808_v52, %v7679_v63  ;;  %v4072_v30 = vsel %vm442_vm4, %v3807_v11, %v7678_v20  ;;  %v3629_v0 = vmax.f32 %v3627_v56, %v3628_v18  ;;  %v3809_v18 = vld [vmem:[#allocation2 + $0x20] sm:$0xff] }
 0x390   : > { %v10372_v40 = vsel %vm3729_vm2, %v3617_v57, %v3783_v19  ;;  %v3637_v62 = vsel %vm444_vm0, %v2988_v3, -inf  ;;  %v3646_v12 = vsel %vm444_vm0, %v2989_v31, -inf  ;;  %v7699_v33 = vunpack.i.h.bf16 %v10363_v14 }
 0x391   : > { %v3638_v4 = vmax.f32 %v3636_v7, %v3637_v62  ;;  %v3647_v35 = vmax.f32 %v3645_v21, %v3646_v12  ;;  %v3655_v59 = vsel %vm444_vm0, %v2990_v47, -inf  ;;  %v7694_v15 = vunpack.i.h.bf16 %v7692_v54 }
 0x392   : > { %v3630_v61 = vrot.slane %v3629_v0, 4  ;;  %v3656_v6 = vmax.f32 %v3654_v53, %v3655_v59  ;;  %v7693_v39 = vunpack.i.l.bf16 %v7692_v54  ;;  %v7698_v25 = vunpack.i.l.bf16 %v10363_v14  ;;  %v3810_v53 = vld [vmem:[#allocation2 + $0x30] sm:$0xff] }
 0x393   : > { %v3639_v10 = vrot.slane %v3638_v4, 4  ;;  %v3648_v28 = vrot.slane %v3647_v35, 4  ;;  %v4081_v2 = vsel %vm4080_vm9, %v4072_v30, %v7683_v46  ;;  %v4099_v49 = vsel %vm442_vm4, %v3840_v38, %v7694_v15  ;;  %v3842_v38 = vld [vmem:[#allocation2 + $0x41] sm:$0xff] }
 0x394   : > { %v7712_v42 = vpop.permute.xlu1 %7711  ;;  %v3631_v37 = vmax.f32 %v3629_v0, %v3630_v61  ;;  %v3657_v13 = vrot.slane %v3656_v6, 4  ;;  %v4082_v24 = vsel %vm4080_vm9, %v4073_v58, %v7684_v22  ;;  %v4098_v34 = vsel %vm442_vm4, %v3839_v32, %v7693_v39 }
 0x395   : > { %v7707_v9 = vpop.permute.xlu0 %7706  ;;  %v3640_v16 = vmax.f32 %v3638_v4, %v3639_v10  ;;  %v3649_v63 = vmax.f32 %v3647_v35, %v3648_v28  ;;  %v4090_v46 = vsel %vm4089_vm10, %v4081_v2, %v7688_v23  ;;  %v4091_v20 = vsel %vm4089_vm10, %v4082_v24, %v7689_v43 }
 0x396   : > { %v3632_v41 = vrot.slane %v3631_v37, 2  ;;  %v3658_v56 = vmax.f32 %v3656_v6, %v3657_v13  ;;  %v4122_v8 = vpack.c.bf16 %v4091_v20, %v4090_v46  ;;  %v7714_v22 = vunpack.i.h.bf16 %v7712_v42 }
 0x397   : > { %v3641_v14 = vrot.slane %v3640_v16, 2  ;;  %v3650_v50 = vrot.slane %v3649_v63, 2  ;;  %v7709_v11 = vunpack.i.h.bf16 %v7707_v9  ;;  %v7708_v54 = vunpack.i.l.bf16 %v7707_v9 }
 0x398   : > { %v3633_v7 = vmax.f32 %v3631_v37, %v3632_v41  ;;  %v3659_v51 = vrot.slane %v3658_v56, 2  ;;  %4302 = vmatmul.bf16.vlgmr.msra.gmra.mxu0 %v4122_v8  ;;  %v4106_v19 = vsel %vm4080_vm9, %v4098_v34, %v7698_v25  ;;  %v4107_v23 = vsel %vm4080_vm9, %v4099_v49, %v7699_v33  ;;  %v3841_v25 = vld [vmem:[#allocation2 + $0x31] sm:$0xff]  ;;  %v7732_v49 = vpop.permute.xlu2 %7731 }
 0x399   : > { %v3642_v57 = vmax.f32 %v3640_v16, %v3641_v14  ;;  %v3651_v21 = vmax.f32 %v3649_v63, %v3650_v50  ;;  %v7713_v31 = vunpack.i.l.bf16 %v7712_v42  ;;  %v4075_v43 = vsel %vm442_vm4, %v3810_v53, %v7709_v11  ;;  %v3879_v14 = vld [vmem:[#allocation2 + $0x92] sm:$0xff] }
 0x39a   : > { %v3634_v3 = vrot.slane %v3633_v7, 1  ;;  %v3660_v1 = vmax.f32 %v3658_v56, %v3659_v51  ;;  %v4114_v58 = vsel %vm4089_vm10, %v4106_v19, %v7703_v45  ;;  %v4115_v30 = vsel %vm4089_vm10, %v4107_v23, %v7704_v48  ;;  %v3863_v50 = vld [vmem:[#allocation2 + $0x90] sm:$0xff] }
 0x39b   : > { %v3643_v47 = vrot.slane %v3642_v57, 1  ;;  %v3652_v52 = vrot.slane %v3651_v21, 1  ;;  %v4074_v33 = vsel %vm442_vm4, %v3809_v18, %v7708_v54  ;;  %v4123_v4 = vpack.c.bf16 %v4115_v30, %v4114_v58 }
 0x39c   : > { %v7727_v0 = vpop.permute.xlu1 %7726  ;;  %v3635_v62 = vmax.f32 %v3633_v7, %v3634_v3  ;;  %v3661_v12 = vrot.slane %v3660_v1, 1  ;;  %v3785_v59 = vsel %vm3731_vm3, %v10366_v60, %v10372_v40  ;;  %v4083_v2 = vsel %vm4080_vm9, %v4074_v33, %v7713_v31  ;;  %v3811_v31 = vld [vmem:[#allocation2 + $0x40] sm:$0xff] }
 0x39d   : > { %v7722_v35 = vpop.permute.xlu0 %7721  ;;  %v3644_v15 = vmax.f32 %v3642_v57, %v3643_v47  ;;  %v3653_v61 = vmax.f32 %v3651_v21, %v3652_v52  ;;  %4331 = vmatmul.bf16.vlgmr.msra.gmra.mxu1 %v4123_v4  ;;  %v7729_v26 = vunpack.i.h.bf16 %v7727_v0  ;;  %v7728_v39 = vunpack.i.l.bf16 %v7727_v0  ;;  %v3871_v57 = vld [vmem:[#allocation2 + $0x91] sm:$0xff] }
 0x39e   : > { %v7724_v6 = vunpack.i.h.bf16 %v7722_v35  ;;  %v3786_v45 = vsel %vm3733_vm5, %v3635_v62, %v3785_v59  ;;  %v7723_v48 = vunpack.i.l.bf16 %v7722_v35  ;;  %v3662_v10 = vmax.f32 %v3660_v1, %v3661_v12 }
 0x39f   : > { %v3787_v28 = vsel %vm3735_vm6, %v3644_v15, %v3786_v45  ;;  %v4084_v42 = vsel %vm4080_vm9, %v4075_v43, %v7714_v22  ;;  %v7718_v60 = vunpack.i.l.bf16 %v10344_v17  ;;  %v7734_v34 = vunpack.i.h.bf16 %v7732_v49  ;;  %v3812_v43 = vld [vmem:[#allocation2 + $0x50] sm:$0xff] }
 0x3a0   : > { %v3788_v40 = vsel %vm3737_vm7, %v3653_v61, %v3787_v28  ;;  %v4101_v37 = vsel %vm442_vm4, %v3842_v38, %v7724_v6  ;;  %v4100_v13 = vsel %vm442_vm4, %v3841_v25, %v7723_v48  ;;  %v4093_v9 = vsel %vm4089_vm10, %v4084_v42, %v7719_v44  ;;  %v3843_v45 = vld [vmem:[#allocation2 + $0x51] sm:$0xff] }
 0x3a1   : > { %v3789_v32 = vsel %vm3739_vm8, %v3662_v10, %v3788_v40  ;;  %v4092_v24 = vsel %vm4089_vm10, %v4083_v2, %v7718_v60  ;;  %v4108_v16 = vsel %vm4080_vm9, %v4100_v13, %v7728_v39  ;;  %v4109_v63 = vsel %vm4080_vm9, %v4101_v37, %v7729_v26 }
 0x3a2   : > { %3806 = vst.msk [vmem:[#allocation2 + $0x81] sm:$0xff] %vm442_vm4, %v3789_v32  ;;  %v7733_v41 = vunpack.i.l.bf16 %v7732_v49  ;;  %v4125_v56 = vpack.c.bf16 %v4093_v9, %v4092_v24  ;;  %v4117_v20 = vsel %vm4089_vm10, %v4109_v63, %v7734_v34  ;;  %vm6400_vm0 = vcmask 523268  }
 0x3a4   : > { %v4116_v46 = vsel %vm4089_vm10, %v4108_v16, %v7733_v41 }
 0x3a5   : > { %v4126_v8 = vpack.c.bf16 %v4117_v20, %v4116_v46  ;;  %v7737_v53 = vpop.permute.xlu0 %7736 }
 0x3a6   : > { %v7739_v19 = vunpack.i.h.bf16 %v7737_v53  ;;  %v7738_v23 = vunpack.i.l.bf16 %v7737_v53 }
 0x3a8   : > { %4307 = vmatmul.bf16.gmra.mxu0 %v4125_v56  ;;  %v4077_v47 = vsel %vm442_vm4, %v3812_v43, %v7739_v19  ;;  %v4076_v52 = vsel %vm442_vm4, %v3811_v31, %v7738_v23  ;;  %v11978_v56 = vmov 0.0  }
 0x3a9   : > { %v3878_v22 = vld [vmem:[#allocation2 + $0x82] sm:$0xff]  ;;  %466 = vst.msk [vmem:[#allocation3 + $0x8] sm:$0x3f] %vm464_vm11, %v11978_v56 }
 0x3aa   : > { %v3862_v7 = vld [vmem:[#allocation2 + $0x80] sm:$0xff]  ;;  %v4133_v17 = vpack.c.bf16 %v3879_v14, %v3878_v22  ;;  %v7780_v44 = vpack.i.bf16 %v3878_v22, %v10307_v29  ;;  %v7742_v29 = vpop.permute.xlu1 %7741  ;;  %465 = vst.msk [vmem:[#allocation3] sm:$0x3f] %vm464_vm11, %v11978_v56  ;;  %v4361_v22 = vpop.f32.mrf.mxu2 }
 0x3ab   : > { %v7785_v51 = vpack.i.bf16 %v3863_v50, %v3862_v7  ;;  %v7775_v11 = vpack.i.bf16 %v3862_v7, %v10311_v55  ;;  %v10429_v54 = vld [vmem:[#allocation2 + $0x81] sm:$0xff]  ;;  %v7744_v3 = vunpack.i.h.bf16 %v7742_v29  ;;  %v7743_v1 = vunpack.i.l.bf16 %v7742_v29  ;;  %467 = vst.msk [vmem:[#allocation3 + $0x10] sm:$0x3f] %vm464_vm11, %v11978_v56 }
 0x3ac   : > { %6733 = vmatmul.msk.bf16.gmra.mxu3 %vm442_vm4, %v4133_v17  ;;  %7781 = vrot.lane.b32.xlu0 %v7780_v44, %s7837_s29  ;;  %v7790_v21 = vpack.i.bf16 %v3871_v57, %v10429_v54  ;;  %468 = vst.msk [vmem:[#allocation3 + $0x18] sm:$0x3f] %vm464_vm11, %v11978_v56  ;;  %s440_s29 = scalar_lea.vmem %s11614_s13, %s7457_s16 }
 0x3ad   : > { %7786 = vrot.lane.b32.xlu1 %v7785_v51, %s7836_s28  ;;  %7776 = vrot.lane.b32.xlu2 %v7775_v11, %s7835_s30  ;;  %v4085_v0 = vsel %vm4080_vm9, %v4076_v52, %v7743_v1  ;;  %v4086_v62 = vsel %vm4080_vm9, %v4077_v47, %v7744_v3  ;;  %469 = vst.msk [vmem:[#allocation3 + $0x20] sm:$0x3f] %vm464_vm11, %v11978_v56 }
 0x3ae   : > { %4336 = vmatmul.bf16.gmra.mxu1 %v4126_v8  ;;  %470 = vst.msk [vmem:[#allocation3 + $0x28] sm:$0x3f] %vm464_vm11, %v11978_v56 }
 0x3b2   : > { %v4363_v31 = vpop.f32.mrf.mxu2 }
 0x3b5   : > { %7791 = vrot.lane.b32.xlu2 %v7790_v21, %s7835_s30 }
 0x3cf   : > { %v7747_v18 = vpop.permute.xlu2 %7746 }
 0x3d0   : > { %v7749_v58 = vunpack.i.h.bf16 %v7747_v18  ;;  %v7748_v30 = vunpack.i.l.bf16 %v7747_v18 }
 0x3d2   : > { %v4094_v12 = vsel %vm4089_vm10, %v4085_v0, %v7748_v30  ;;  %v4095_v33 = vsel %vm4089_vm10, %v4086_v62, %v7749_v58 }
 0x3d3   : > { %v4128_v4 = vpack.c.bf16 %v4095_v33, %v4094_v12 }
 0x3d5   : > { %4312 = vmatmul.bf16.gmra.mxu0 %v4128_v4 }
 0x3da   : > { %v7762_v61 = vpop.permute.xlu2 %7761 }
 0x3db   : > { %v7764_v48 = vunpack.i.h.bf16 %v7762_v61  ;;  %v7763_v10 = vunpack.i.l.bf16 %v7762_v61 }
 0x3e6   : > { %v7752_v35 = vpop.permute.xlu0 %7751 }
 0x3e7   : > { %v7754_v59 = vunpack.i.h.bf16 %v7752_v35  ;;  %v7753_v15 = vunpack.i.l.bf16 %v7752_v35 }
 0x3e9   : > { %v4103_v28 = vsel %vm442_vm4, %v10295_v36, %v7754_v59  ;;  %v4102_v25 = vsel %vm442_vm4, %v3843_v45, %v7753_v15 }
 0x3f2   : > { %v7767_v37 = vpop.permute.xlu0 %7766 }
 0x3f3   : > { %v7757_v6 = vpop.permute.xlu1 %7756  ;;  %v7769_v32 = vunpack.i.h.bf16 %v7767_v37  ;;  %v7768_v49 = vunpack.i.l.bf16 %v7767_v37 }
 0x3f4   : > { %v7759_v26 = vunpack.i.h.bf16 %v7757_v6  ;;  %v7758_v39 = vunpack.i.l.bf16 %v7757_v6 }
 0x3f5   : > { %v4079_v36 = vsel %vm442_vm4, %v10311_v55, %v7769_v32  ;;  %v4078_v63 = vsel %vm442_vm4, %v10249_v5, %v7768_v49  ;;  %v10469_v55 = vld [vmem:[%s11605_s4] ss:$0 sm:$0xff] }
 0x3f6   : > { %v4110_v38 = vsel %vm4080_vm9, %v4102_v25, %v7758_v39  ;;  %v4111_v2 = vsel %vm4080_vm9, %v4103_v28, %v7759_v26  ;;  %v4366_v25 = vpop.f32.mrf.mxu2 }
 0x3f7   : > { %v4118_v42 = vsel %vm4089_vm10, %v4110_v38, %v7763_v10  ;;  %v4119_v60 = vsel %vm4089_vm10, %v4111_v2, %v7764_v48 }
 0x3f8   : > { %v4129_v40 = vpack.c.bf16 %v4119_v60, %v4118_v42 }
 0x3fa   : > { %4341 = vmatmul.bf16.gmra.mxu1 %v4129_v40 }
 0x3fb   : > { %v7772_v13 = vpop.permute.xlu1 %7771 }
 0x3fc   : > { %v7774_v24 = vunpack.i.h.bf16 %v7772_v13  ;;  %v7773_v9 = vunpack.i.l.bf16 %v7772_v13 }
 0x3fe   : > { %v4087_v46 = vsel %vm4080_vm9, %v4078_v63, %v7773_v9  ;;  %v4088_v20 = vsel %vm4080_vm9, %v4079_v36, %v7774_v24 }
 0x407   : > { %v7777_v16 = vpop.permute.xlu2 %7776 }
 0x408   : > { %v7779_v34 = vunpack.i.h.bf16 %v7777_v16  ;;  %v7778_v41 = vunpack.i.l.bf16 %v7777_v16 }
 0x40a   : > { %v4096_v14 = vsel %vm4089_vm10, %v4087_v46, %v7778_v41  ;;  %v4097_v50 = vsel %vm4089_vm10, %v4088_v20, %v7779_v34 }
 0x40b   : > { %v4131_v5 = vpack.c.bf16 %v4097_v50, %v4096_v14 }
 0x40d   : > { %4317 = vmatmul.bf16.gmra.mxu0 %v4131_v5 }
 0x40f   : > { %v7792_v19 = vpop.permute.xlu2 %7791 }
 0x410   : > { %v7794_v58 = vunpack.i.h.bf16 %v7792_v19  ;;  %v7793_v30 = vunpack.i.l.bf16 %v7792_v19  ;;  %v4368_v19 = vpop.f32.mrf.mxu2 }
 0x415   : > { %v4303_v8 = vpop.f32.mrf.mxu0 }
 0x416   : > { %v4304_v7 = vadd.f32 %v10469_v55, %v4303_v8 }
 0x41a   : > { %v4332_v17 = vpop.f32.mrf.mxu1 }
 0x41b   : > { %v4333_v51 = vadd.f32 %v4332_v17, %v4304_v7 }
 0x41d   : > { %v4305_v44 = vpop.f32.mrf.mxu0  ;;  %v4362_v57 = vadd.f32 %v4361_v22, %v4333_v51 }
 0x41e   : > { %v7782_v21 = vpop.permute.xlu0 %7781  ;;  %v4306_v1 = vadd.f32 %v10469_v55, %v4305_v44 }
 0x41f   : > { %v7787_v11 = vpop.permute.xlu1 %7786  ;;  %v7784_v53 = vunpack.i.h.bf16 %v7782_v21  ;;  %v7783_v29 = vunpack.i.l.bf16 %v7782_v21  ;;  %v4381_v43 = vmax.f32 %v4362_v57, 0.0 }
 0x420   : > { %v7789_v23 = vunpack.i.h.bf16 %v7787_v11  ;;  %v7788_v3 = vunpack.i.l.bf16 %v7787_v11 }
 0x421   : > { %v4105_v47 = vsel %vm442_vm4, %v10429_v54, %v7784_v53  ;;  %v4104_v52 = vsel %vm442_vm4, %v10309_v27, %v7783_v29  ;;  %v4397_v15 = vrot.slane %v4381_v43, 2  ;;  %v4398_v54 = vrot.slane %v4381_v43, 4 }
 0x422   : > { %v4334_v18 = vpop.f32.mrf.mxu1  ;;  %v4112_v62 = vsel %vm4080_vm9, %v4104_v52, %v7788_v3  ;;  %v4113_v12 = vsel %vm4080_vm9, %v4105_v47, %v7789_v23  ;;  %v4399_v61 = vrot.slane %v4381_v43, 6  ;;  %v4446_v45 = vsel %vm4445_vm12, %v4381_v43, -inf }
 0x423   : > { %v4335_v0 = vadd.f32 %v4334_v18, %v4306_v1  ;;  %v4120_v35 = vsel %vm4089_vm10, %v4112_v62, %v7793_v30  ;;  %v4121_v59 = vsel %vm4089_vm10, %v4113_v12, %v7794_v58  ;;  %v4455_v38 = vsel %vm4445_vm12, %v4397_v15, -inf }
 0x424   : > { %v4132_v6 = vpack.c.bf16 %v4121_v59, %v4120_v35  ;;  %v4464_v2 = vsel %vm4445_vm12, %v4398_v54, -inf  ;;  %v4473_v42 = vsel %vm4445_vm12, %v4399_v61, -inf }
 0x425   : > { %v4308_v33 = vpop.f32.mrf.mxu0  ;;  %v4364_v4 = vadd.f32 %v4363_v31, %v4335_v0 }
 0x426   : > { %v4309_v26 = vadd.f32 %v10469_v55, %v4308_v33  ;;  %4346 = vmatmul.bf16.gmra.mxu1 %v4132_v6 }
 0x427   : > { %v4382_v27 = vmax.f32 %v4364_v4, 0.0 }
 0x429   : > { %v4400_v39 = vrot.slane %v4382_v27, 2  ;;  %v4401_v48 = vrot.slane %v4382_v27, 4  ;;  %v4402_v10 = vrot.slane %v4382_v27, 6  ;;  %v4447_v28 = vsel %vm4445_vm12, %v4382_v27, -inf }
 0x42a   : > { %v4448_v60 = vmax.f32 %v4446_v45, %v4447_v28 }
 0x42b   : > { %v4337_v40 = vpop.f32.mrf.mxu1  ;;  %v4456_v37 = vsel %vm4445_vm12, %v4400_v39, -inf  ;;  %v4465_v13 = vsel %vm4445_vm12, %v4401_v48, -inf  ;;  %v4474_v32 = vsel %vm4445_vm12, %v4402_v10, -inf }
 0x42c   : > { %v4338_v49 = vadd.f32 %v4337_v40, %v4309_v26  ;;  %v4449_v24 = vrot.slane %v4448_v60, 4  ;;  %v4457_v9 = vmax.f32 %v4455_v38, %v4456_v37  ;;  %v4466_v16 = vmax.f32 %v4464_v2, %v4465_v13 }
 0x42d   : > { %v4475_v36 = vmax.f32 %v4473_v42, %v4474_v32  ;;  %v4310_v20 = vpop.f32.mrf.mxu0 }
 0x42e   : > { %v4367_v63 = vadd.f32 %v4366_v25, %v4338_v49  ;;  %v4450_v34 = vmax.f32 %v4448_v60, %v4449_v24  ;;  %v4458_v41 = vrot.slane %v4457_v9, 4  ;;  %v4467_v56 = vrot.slane %v4466_v16, 4 }
 0x42f   : > { %v4476_v46 = vrot.slane %v4475_v36, 4  ;;  %v4311_v7 = vadd.f32 %v10469_v55, %v4310_v20 }
 0x430   : > { %v4383_v14 = vmax.f32 %v4367_v63, 0.0  ;;  %v4451_v50 = vrot.slane %v4450_v34, 2  ;;  %v4459_v5 = vmax.f32 %v4457_v9, %v4458_v41  ;;  %v4468_v8 = vmax.f32 %v4466_v16, %v4467_v56 }
 0x431   : > { %v4477_v22 = vmax.f32 %v4475_v36, %v4476_v46 }
 0x432   : > { %v4452_v17 = vmax.f32 %v4450_v34, %v4451_v50  ;;  %v4460_v51 = vrot.slane %v4459_v5, 2  ;;  %v4469_v44 = vrot.slane %v4468_v8, 2  ;;  %v4403_v21 = vrot.slane %v4383_v14, 2 }
 0x433   : > { %v4478_v11 = vrot.slane %v4477_v22, 2  ;;  %v4339_v57 = vpop.f32.mrf.mxu1  ;;  %v4404_v53 = vrot.slane %v4383_v14, 4  ;;  %v4405_v58 = vrot.slane %v4383_v14, 6  ;;  %v4482_v30 = vsel %vm4445_vm12, %v4383_v14, -inf }
 0x434   : > { %v4340_v29 = vadd.f32 %v4339_v57, %v4311_v7  ;;  %v4453_v23 = vrot.slane %v4452_v17, 1  ;;  %v4461_v3 = vmax.f32 %v4459_v5, %v4460_v51  ;;  %v4470_v1 = vmax.f32 %v4468_v8, %v4469_v44 }
 0x435   : > { %v4479_v31 = vmax.f32 %v4477_v22, %v4478_v11  ;;  %v4491_v0 = vsel %vm4445_vm12, %v4403_v21, -inf  ;;  %v4500_v35 = vsel %vm4445_vm12, %v4404_v53, -inf  ;;  %v4509_v45 = vsel %vm4445_vm12, %v4405_v58, -inf }
 0x436   : > { %v4369_v43 = vadd.f32 %v4368_v19, %v4340_v29  ;;  %v4462_v47 = vrot.slane %v4461_v3, 1  ;;  %v4471_v52 = vrot.slane %v4470_v1, 1  ;;  %v4454_v12 = vmax.f32 %v4452_v17, %v4453_v23  ;;  %v4632_v19 = vld [vmem:[#allocation3 + $0x1] sm:$0xf] }
 0x437   : > { %v4480_v18 = vrot.slane %v4479_v31, 1 }
 0x438   : > { %v4384_v62 = vmax.f32 %v4369_v43, 0.0  ;;  %v4463_v33 = vmax.f32 %v4461_v3, %v4462_v47  ;;  %v4472_v4 = vmax.f32 %v4470_v1, %v4471_v52  ;;  %v4371_v1 = vpop.f32.mrf.mxu3 }
 0x439   : > { %v4481_v6 = vmax.f32 %v4479_v31, %v4480_v18 }
 0x43a   : > { %v4406_v59 = vrot.slane %v4384_v62, 2  ;;  %v4407_v15 = vrot.slane %v4384_v62, 4  ;;  %v4408_v54 = vrot.slane %v4384_v62, 6  ;;  %v4483_v61 = vsel %vm4445_vm12, %v4384_v62, -inf }
 0x43b   : > { %v4606_v27 = vsel %vm3727_vm1, %v4463_v33, %v4454_v12  ;;  %v4484_v26 = vmax.f32 %v4482_v30, %v4483_v61 }
 0x43c   : > { %v4607_v39 = vsel %vm3729_vm2, %v4472_v4, %v4606_v27  ;;  %v4492_v48 = vsel %vm4445_vm12, %v4406_v59, -inf  ;;  %v4501_v10 = vsel %vm4445_vm12, %v4407_v15, -inf  ;;  %v4510_v28 = vsel %vm4445_vm12, %v4408_v54, -inf }
 0x43d   : > { %v4608_v25 = vsel %vm3731_vm3, %v4481_v6, %v4607_v39  ;;  %v4485_v38 = vrot.slane %v4484_v26, 4  ;;  %v4493_v2 = vmax.f32 %v4491_v0, %v4492_v48  ;;  %v4502_v42 = vmax.f32 %v4500_v35, %v4501_v10 }
 0x43e   : > { %4624 = vst.msk [vmem:[#allocation3 + $0x9] sm:$0xf] %vm4623_vm13, %v4608_v25  ;;  %v4511_v60 = vmax.f32 %v4509_v45, %v4510_v28 }
 0x43f   : > { %v4486_v40 = vmax.f32 %v4484_v26, %v4485_v38  ;;  %v4494_v37 = vrot.slane %v4493_v2, 4  ;;  %v4503_v13 = vrot.slane %v4502_v42, 4 }
 0x440   : > { %v4512_v32 = vrot.slane %v4511_v60, 4  ;;  %v4373_v62 = vpop.f32.mrf.mxu3 }
 0x441   : > { %v4487_v49 = vrot.slane %v4486_v40, 2  ;;  %v4495_v24 = vmax.f32 %v4493_v2, %v4494_v37  ;;  %v4504_v9 = vmax.f32 %v4502_v42, %v4503_v13 }
 0x442   : > { %v4513_v16 = vmax.f32 %v4511_v60, %v4512_v32 }
 0x443   : > { %v4488_v36 = vmax.f32 %v4486_v40, %v4487_v49  ;;  %v4496_v63 = vrot.slane %v4495_v24, 2  ;;  %v4505_v34 = vrot.slane %v4504_v9, 2 }
 0x444   : > { %v4514_v41 = vrot.slane %v4513_v16, 2 }
 0x445   : > { %v4489_v56 = vrot.slane %v4488_v36, 1  ;;  %v4497_v46 = vmax.f32 %v4495_v24, %v4496_v63  ;;  %v4506_v20 = vmax.f32 %v4504_v9, %v4505_v34  ;;  %v4640_v14 = vld [vmem:[#allocation3 + $0x8] sm:$0xf] }
 0x446   : > { %v4515_v50 = vmax.f32 %v4513_v16, %v4514_v41  ;;  %4685 = vrot.lane.b32.xlu0 %v4640_v14, %s7836_s28 }
 0x447   : > { %v4498_v5 = vrot.slane %v4497_v46, 1  ;;  %v4507_v8 = vrot.slane %v4506_v20, 1  ;;  %v4490_v7 = vmax.f32 %v4488_v36, %v4489_v56 }
 0x448   : > { %v4516_v22 = vrot.slane %v4515_v50, 1 }
 0x449   : > { %v4499_v17 = vmax.f32 %v4497_v46, %v4498_v5  ;;  %v4508_v51 = vmax.f32 %v4506_v20, %v4507_v8 }
 0x44a   : > { %v4517_v44 = vmax.f32 %v4515_v50, %v4516_v22 }
 0x44b   : > { %v4609_v11 = vsel %vm3727_vm1, %v4499_v17, %v4490_v7 }
 0x44c   : > { %v4610_v57 = vsel %vm3729_vm2, %v4508_v51, %v4609_v11 }
 0x44d   : > { %v4611_v21 = vsel %vm3731_vm3, %v4517_v44, %v4610_v57 }
 0x44e   : > { %4625 = vst.msk [vmem:[#allocation3 + $0x11] sm:$0xf] %vm4623_vm13, %v4611_v21 }
 0x452   : > { %v4313_v23 = vpop.f32.mrf.mxu0 }
 0x453   : > { %v4314_v3 = vadd.f32 %v10469_v55, %v4313_v23 }
 0x455   : > { %v4641_v53 = vld [vmem:[#allocation3 + $0x10] sm:$0xf] }
 0x456   : > { %4687 = vrot.lane.b32.xlu1 %v4641_v53, %s7836_s28  ;;  %v4661_v29 = vld [vmem:[#allocation3 + $0x12] sm:$0xf] }
 0x457   : > { %4790 = vst [vmem:[#allocation1 + $0x20] ss:$2 sm:$0xff] %v4661_v29 }
 0x45a   : > { %v4315_v47 = vpop.f32.mrf.mxu0 }
 0x45b   : > { %v4316_v18 = vadd.f32 %v10469_v55, %v4315_v47  ;;  %v4633_v47 = vld [vmem:[#allocation3 + $0x9] sm:$0xf] }
 0x45e   : > { %4669 = vrot.lane.b32.xlu1 %v4632_v19, %s7836_s28 }
 0x477   : > { %v4342_v31 = vpop.f32.mrf.mxu1 }
 0x478   : > { %v4343_v43 = vadd.f32 %v4342_v31, %v4314_v3  ;;  %v4376_v3 = vpop.f32.mrf.mxu3 }
 0x47a   : > { %v4372_v52 = vadd.f32 %v4371_v1, %v4343_v43  ;;  %v4648_v43 = vld [vmem:[#allocation3 + $0xa] sm:$0xf] }
 0x47c   : > { %v4385_v58 = vmax.f32 %v4372_v52, 0.0 }
 0x47e   : > { %v4409_v33 = vrot.slane %v4385_v58, 2  ;;  %v4410_v4 = vrot.slane %v4385_v58, 4  ;;  %v4411_v35 = vrot.slane %v4385_v58, 6  ;;  %v4518_v15 = vsel %vm4445_vm12, %v4385_v58, -inf }
 0x47f   : > { %v4344_v30 = vpop.f32.mrf.mxu1 }
 0x480   : > { %v4345_v0 = vadd.f32 %v4344_v30, %v4316_v18  ;;  %v4527_v45 = vsel %vm4445_vm12, %v4409_v33, -inf  ;;  %v4536_v26 = vsel %vm4445_vm12, %v4410_v4, -inf  ;;  %v4545_v48 = vsel %vm4445_vm12, %v4411_v35, -inf  ;;  %v4378_v33 = vpop.f32.mrf.mxu3 }
 0x482   : > { %v4374_v12 = vadd.f32 %v4373_v62, %v4345_v0 }
 0x484   : > { %v4386_v59 = vmax.f32 %v4374_v12, 0.0  ;;  %v4657_v12 = vld [vmem:[#allocation3 + $0x11] sm:$0xf] }
 0x486   : > { %v4412_v54 = vrot.slane %v4386_v59, 2  ;;  %v4413_v61 = vrot.slane %v4386_v59, 4  ;;  %v4414_v6 = vrot.slane %v4386_v59, 6  ;;  %v4519_v27 = vsel %vm4445_vm12, %v4386_v59, -inf }
 0x487   : > { %v4520_v39 = vmax.f32 %v4518_v15, %v4519_v27 }
 0x488   : > { %v4528_v10 = vsel %vm4445_vm12, %v4412_v54, -inf  ;;  %v4537_v28 = vsel %vm4445_vm12, %v4413_v61, -inf  ;;  %v4546_v25 = vsel %vm4445_vm12, %v4414_v6, -inf }
 0x489   : > { %v4521_v38 = vrot.slane %v4520_v39, 4  ;;  %v4529_v2 = vmax.f32 %v4527_v45, %v4528_v10  ;;  %v4538_v42 = vmax.f32 %v4536_v26, %v4537_v28  ;;  %v4547_v60 = vmax.f32 %v4545_v48, %v4546_v25 }
 0x48a   : > { %v4318_v29 = vpop.f32.mrf.mxu0 }
 0x48b   : > { %v4522_v40 = vmax.f32 %v4520_v39, %v4521_v38  ;;  %v4530_v37 = vrot.slane %v4529_v2, 4  ;;  %v4539_v13 = vrot.slane %v4538_v42, 4  ;;  %v4548_v32 = vrot.slane %v4547_v60, 4 }
 0x48c   : > { %v4319_v23 = vadd.f32 %v10469_v55, %v4318_v29 }
 0x48d   : > { %v4523_v49 = vrot.slane %v4522_v40, 2  ;;  %v4531_v24 = vmax.f32 %v4529_v2, %v4530_v37  ;;  %v4540_v9 = vmax.f32 %v4538_v42, %v4539_v13  ;;  %v4549_v16 = vmax.f32 %v4547_v60, %v4548_v32  ;;  %v4649_v2 = vld [vmem:[#allocation3 + $0x12] sm:$0xf] }
 0x48f   : > { %v4524_v36 = vmax.f32 %v4522_v40, %v4523_v49  ;;  %v4532_v63 = vrot.slane %v4531_v24, 2  ;;  %v4541_v34 = vrot.slane %v4540_v9, 2  ;;  %v4550_v41 = vrot.slane %v4549_v16, 2 }
 0x491   : > { %v4525_v56 = vrot.slane %v4524_v36, 1  ;;  %v4533_v46 = vmax.f32 %v4531_v24, %v4532_v63  ;;  %v4542_v20 = vmax.f32 %v4540_v9, %v4541_v34  ;;  %v4551_v14 = vmax.f32 %v4549_v16, %v4550_v41 }
 0x492   : > { %v4320_v52 = vpop.f32.mrf.mxu0 }
 0x493   : > { %v4534_v50 = vrot.slane %v4533_v46, 1  ;;  %v4543_v5 = vrot.slane %v4542_v20, 1  ;;  %v4552_v8 = vrot.slane %v4551_v14, 1  ;;  %v4526_v22 = vmax.f32 %v4524_v36, %v4525_v56 }
 0x494   : > { %v4321_v58 = vadd.f32 %v10469_v55, %v4320_v52 }
 0x495   : > { %v4535_v7 = vmax.f32 %v4533_v46, %v4534_v50  ;;  %v4544_v17 = vmax.f32 %v4542_v20, %v4543_v5  ;;  %v4553_v51 = vmax.f32 %v4551_v14, %v4552_v8 }
 0x497   : > { %v4612_v44 = vsel %vm3727_vm1, %v4535_v7, %v4526_v22 }
 0x498   : > { %v4613_v11 = vsel %vm3729_vm2, %v4544_v17, %v4612_v44 }
 0x499   : > { %v4614_v57 = vsel %vm3731_vm3, %v4553_v51, %v4613_v11 }
 0x49a   : > { %4626 = vst.msk [vmem:[#allocation3 + $0x19] sm:$0xf] %vm4623_vm13, %v4614_v57 }
 0x4a1   : > { %v4642_v21 = vld [vmem:[#allocation3 + $0x18] sm:$0xf] }
 0x4a2   : > { %v4635_v53 = vld [vmem:[#allocation3 + $0x19] sm:$0xf]  ;;  %4689 = vrot.lane.b32.xlu2 %v4642_v21, %s7836_s28 }
 0x4a3   : > { %4675 = vrot.lane.b32.xlu1 %v4635_v53, %s7836_s28  ;;  %v4662_v19 = vld [vmem:[#allocation3 + $0x1a] sm:$0xf]  ;;  %v4347_v1 = vpop.f32.mrf.mxu1 }
 0x4a4   : > { %4792 = vst [vmem:[#allocation1 + $0x21] ss:$2 sm:$0xff] %v4662_v19  ;;  %v4348_v31 = vadd.f32 %v4347_v1, %v4319_v23  ;;  %v4650_v20 = vld [vmem:[#allocation3 + $0x1a] sm:$0xf]  ;;  %v4660_v23 = vld [vmem:[#allocation3 + $0x29] sm:$0xf] }
 0x4a6   : > { %v4377_v18 = vadd.f32 %v4376_v3, %v4348_v31  ;;  %v4636_v3 = vld [vmem:[#allocation3 + $0x2] sm:$0xf] }
 0x4a8   : > { %v4387_v30 = vmax.f32 %v4377_v18, 0.0 }
 0x4aa   : > { %4671 = vrot.lane.b32.xlu2 %v4633_v47, %s7836_s28  ;;  %v4415_v35 = vrot.slane %v4387_v30, 2  ;;  %v4416_v59 = vrot.slane %v4387_v30, 4  ;;  %v4417_v15 = vrot.slane %v4387_v30, 6  ;;  %v4554_v61 = vsel %vm4445_vm12, %v4387_v30, -inf }
 0x4ab   : > { %4701 = vrot.lane.b32.xlu1 %v4648_v43, %s7836_s28  ;;  %v4349_v0 = vpop.f32.mrf.mxu1  ;;  %v4628_v43 = vld [vmem:[#allocation3] sm:$0xf] }
 0x4ac   : > { %v4350_v62 = vadd.f32 %v4349_v0, %v4321_v58  ;;  %v4563_v55 = vsel %vm4445_vm12, %v4415_v35, -inf  ;;  %v4572_v39 = vsel %vm4445_vm12, %v4416_v59, -inf  ;;  %v4581_v10 = vsel %vm4445_vm12, %v4417_v15, -inf  ;;  %v4634_v0 = vld [vmem:[#allocation3 + $0x11] sm:$0xf] }
 0x4ad   : > { %v7483_v35 = vld [vmem:[%s11606_s5 + $0x38] sm:$0xff]  ;;  %v4637_v59 = vld [vmem:[#allocation3 + $0xa] sm:$0xf] }
 0x4ae   : > { %v4379_v4 = vadd.f32 %v4378_v33, %v4350_v62  ;;  %v4658_v62 = vld [vmem:[#allocation3 + $0x19] sm:$0xf]  ;;  %v7507_v15 = vld [vmem:[%s11606_s5 + $0xf8] sm:$0xff]  ;;  %5121 = vmatpush.bf16.msrb.mxu3 %v7483_v35 }
 0x4af   : > { %5163 = vmatpush.bf16.msrb.mxu0 %v7507_v15 }
 0x4b0   : > { %v4388_v54 = vmax.f32 %v4379_v4, 0.0 }
 0x4b2   : > { %4717 = vrot.lane.b32.xlu2 %v4657_v12, %s7836_s28  ;;  %v4418_v6 = vrot.slane %v4388_v54, 2  ;;  %v4419_v27 = vrot.slane %v4388_v54, 4  ;;  %v4420_v45 = vrot.slane %v4388_v54, 6  ;;  %v4555_v26 = vsel %vm4445_vm12, %v4388_v54, -inf }
 0x4b3   : > { %v4556_v48 = vmax.f32 %v4554_v61, %v4555_v26  ;;  %4723 = vrot.lane.b32.xlu1 %v4660_v23, %s7836_s28  ;;  %v7482_v61 = vld [vmem:[%s11606_s5 + $0x30] sm:$0xff]  ;;  %v4638_v23 = vld [vmem:[#allocation3 + $0x12] sm:$0xf] }
 0x4b4   : > { %v4564_v28 = vsel %vm4445_vm12, %v4418_v6, -inf  ;;  %v4573_v25 = vsel %vm4445_vm12, %v4419_v27, -inf  ;;  %v4582_v38 = vsel %vm4445_vm12, %v4420_v45, -inf  ;;  %v4629_v45 = vld [vmem:[#allocation3 + $0x8] sm:$0xf]  ;;  %5122 = vmatpush.bf16.msrb.mxu3 %v7482_v61 }
 0x4b5   : > { %v4557_v42 = vrot.slane %v4556_v48, 4  ;;  %v4565_v60 = vmax.f32 %v4563_v55, %v4564_v28  ;;  %v4574_v40 = vmax.f32 %v4572_v39, %v4573_v25  ;;  %v4583_v37 = vmax.f32 %v4581_v10, %v4582_v38  ;;  %v7481_v55 = vld [vmem:[%s11606_s5 + $0x28] sm:$0xff]  ;;  %v7479_v10 = vld [vmem:[%s11606_s5 + $0x18] sm:$0xff]  ;;  %v7478_v28 = vld [vmem:[%s11606_s5 + $0x10] sm:$0xff] }
 0x4b7   : > { %v4558_v13 = vmax.f32 %v4556_v48, %v4557_v42  ;;  %v4566_v32 = vrot.slane %v4565_v60, 4  ;;  %v4575_v49 = vrot.slane %v4574_v40, 4  ;;  %v4584_v24 = vrot.slane %v4583_v37, 4  ;;  %v7480_v48 = vld [vmem:[%s11606_s5 + $0x20] sm:$0xff] }
 0x4b8   : > { %v4686_v1 = vpop.permute.xlu0 %4685  ;;  %5123 = vmatpush.bf16.msrb.mxu3 %v7481_v55 }
 0x4b9   : > { %v4559_v9 = vrot.slane %v4558_v13, 2  ;;  %v4567_v16 = vmax.f32 %v4565_v60, %v4566_v32  ;;  %v4576_v36 = vmax.f32 %v4574_v40, %v4575_v49  ;;  %v4585_v63 = vmax.f32 %v4583_v37, %v4584_v24  ;;  %v4644_v37 = vld [vmem:[#allocation3 + $0x9] sm:$0xf]  ;;  %v7477_v49 = vld [vmem:[%s11606_s5 + $0x8] sm:$0xff] }
 0x4ba   : > { %4703 = vrot.lane.b32.xlu2 %v4649_v2, %s7836_s28  ;;  %v4733_v31 = vsel %vm4080_vm9, %v4636_v3, %v4686_v1  ;;  %v4653_v2 = vld [vmem:[#allocation3 + $0x10] sm:$0xf]  ;;  %v7506_v24 = vld [vmem:[%s11606_s5 + $0xf0] sm:$0xff]  ;;  %v7484_v1 = vld [vmem:[%s11606_s5 + $0x40] sm:$0xff] }
 0x4bb   : > { %v4560_v34 = vmax.f32 %v4558_v13, %v4559_v9  ;;  %v4568_v41 = vrot.slane %v4567_v16, 2  ;;  %v4577_v56 = vrot.slane %v4576_v36, 2  ;;  %v4586_v46 = vrot.slane %v4585_v63, 2  ;;  %5164 = vmatpush.bf16.msrb.mxu0 %v7506_v24  ;;  %v7476_v9 = vld [vmem:[%s11606_s5] sm:$0xff] }
 0x4bc   : > { %v4765_v47 = vrot.slane %v4733_v31, 4  ;;  %5124 = vmatpush.bf16.msrb.mxu3 %v7480_v48 }
 0x4bd   : > { %v4561_v14 = vrot.slane %v4560_v34, 1  ;;  %v4569_v50 = vmax.f32 %v4567_v16, %v4568_v41  ;;  %v4578_v5 = vmax.f32 %v4576_v36, %v4577_v56  ;;  %v4587_v8 = vmax.f32 %v4585_v63, %v4586_v46  ;;  %v7491_v16 = vld [vmem:[%s11606_s5 + $0x78] sm:$0xff]  ;;  %v7505_v36 = vld [vmem:[%s11606_s5 + $0xe8] sm:$0xff]  ;;  %v7490_v63 = vld [vmem:[%s11606_s5 + $0x70] sm:$0xff] }
 0x4be   : > { %v7489_v41 = vld [vmem:[%s11606_s5 + $0x68] sm:$0xff]  ;;  %v7504_v56 = vld [vmem:[%s11606_s5 + $0xe0] sm:$0xff] }
 0x4bf   : > { %v4570_v22 = vrot.slane %v4569_v50, 1  ;;  %v4579_v7 = vrot.slane %v4578_v5, 1  ;;  %v4588_v17 = vrot.slane %v4587_v8, 1  ;;  %v4562_v51 = vmax.f32 %v4560_v34, %v4561_v14  ;;  %v7499_v34 = vld [vmem:[%s11606_s5 + $0xb8] sm:$0xff]  ;;  %5165 = vmatpush.bf16.msrb.mxu0 %v7505_v36  ;;  %v7488_v46 = vld [vmem:[%s11606_s5 + $0x60] sm:$0xff]  ;;  %v7497_v14 = vld [vmem:[%s11606_s5 + $0xa8] sm:$0xff] }
 0x4c0   : > { %5125 = vmatpush.bf16.msrb.mxu3 %v7479_v10  ;;  %5149 = vmatpush.bf16.msrb.mxu2 %v7499_v34  ;;  %v7508_v34 = vld [vmem:[%s11606_s5 + $0x100] sm:$0xff] }
 0x4c1   : > { %v4571_v44 = vmax.f32 %v4569_v50, %v4570_v22  ;;  %v4580_v11 = vmax.f32 %v4578_v5, %v4579_v7  ;;  %v4589_v57 = vmax.f32 %v4587_v8, %v4588_v17  ;;  %v7487_v50 = vld [vmem:[%s11606_s5 + $0x58] sm:$0xff]  ;;  %v7486_v8 = vld [vmem:[%s11606_s5 + $0x50] sm:$0xff]  ;;  %v7496_v22 = vld [vmem:[%s11606_s5 + $0xa0] sm:$0xff] }
 0x4c2   : > { %4705 = vrot.lane.b32.xlu2 %v4650_v20, %s7836_s28  ;;  %v7498_v20 = vld [vmem:[%s11606_s5 + $0xb0] sm:$0xff]  ;;  %v7503_v5 = vld [vmem:[%s11606_s5 + $0xd8] sm:$0xff]  ;;  %v4639_v17 = vld [vmem:[#allocation3 + $0x1a] sm:$0xf] }
 0x4c3   : > { %v4615_v21 = vsel %vm3727_vm1, %v4571_v44, %v4562_v51  ;;  %5166 = vmatpush.bf16.msrb.mxu0 %v7504_v56  ;;  %v7495_v7 = vld [vmem:[%s11606_s5 + $0x98] sm:$0xff]  ;;  %v7485_v44 = vld [vmem:[%s11606_s5 + $0x48] sm:$0xff] }
 0x4c4   : > { %v4616_v53 = vsel %vm3729_vm2, %v4580_v11, %v4615_v21  ;;  %5126 = vmatpush.bf16.msrb.mxu3 %v7478_v28  ;;  %5150 = vmatpush.bf16.msrb.mxu2 %v7498_v20 }
 0x4c5   : > { %v4617_v29 = vsel %vm3731_vm3, %v4589_v57, %v4616_v53  ;;  %v4631_v57 = vld [vmem:[#allocation3 + $0x18] sm:$0xf] }
 0x4c6   : > { %4627 = vst.msk [vmem:[#allocation3 + $0x21] sm:$0xf] %vm4623_vm13, %v4617_v29  ;;  %v7502_v29 = vld [vmem:[%s11606_s5 + $0xd0] sm:$0xff] }
 0x4c7   : > { %5167 = vmatpush.bf16.msrb.mxu0 %v7503_v5 }
 0x4c8   : > { %v4688_v19 = vpop.permute.xlu1 %4687  ;;  %5127 = vmatpush.bf16.msrb.mxu3 %v7477_v49  ;;  %5151 = vmatpush.bf16.msrb.mxu2 %v7497_v14  ;;  %v4664_v49 = vld [vmem:[#allocation3 + $0x2a] sm:$0xf] }
 0x4c9   : > { %v4734_v54 = vsel %vm4080_vm9, %v4637_v59, %v4688_v19  ;;  %v7494_v19 = vld [vmem:[%s11606_s5 + $0x90] sm:$0xff]  ;;  %v4645_v59 = vld [vmem:[#allocation3 + $0x11] sm:$0xf] }
 0x4ca   : > { %v4767_v6 = vrot.slane %v4734_v54, 4 }
 0x4cb   : > { %5168 = vmatpush.bf16.msrb.mxu0 %v7502_v29  ;;  %v7525_v29 = vld [vmem:[%s11608_s7 + $0x64] sm:$0xf0] }
 0x4cc   : > { %5128 = vmatpush.bf16.msrb.mxu3 %v7476_v9  ;;  %5152 = vmatpush.bf16.msrb.mxu2 %v7496_v22 }
 0x4cd   : > { %v4643_v18 = vld [vmem:[#allocation3 + $0x20] sm:$0xf] }
 0x4ce   : > { %4691 = vrot.lane.b32.xlu0 %v4643_v18, %s7836_s28  ;;  %v4659_v12 = vld [vmem:[#allocation3 + $0x21] sm:$0xf]  ;;  %v4630_v18 = vld [vmem:[#allocation3 + $0x10] sm:$0xf] }
 0x4cf   : > { %v4651_v33 = vld [vmem:[#allocation3 + $0x22] sm:$0xf] }
 0x4d0   : > { %v4670_v52 = vpop.permute.xlu1 %4669  ;;  %5135 = vmatpush.bf16.msra.mxu3 %v7491_v16  ;;  %5153 = vmatpush.bf16.msrb.mxu2 %v7495_v7  ;;  %v4655_v10 = vld [vmem:[#allocation3 + $0x20] sm:$0xf] }
 0x4d1   : > { %v4729_v58 = vsel %vm4080_vm9, %v4628_v43, %v4670_v52  ;;  %v7501_v43 = vld [vmem:[%s11606_s5 + $0xc8] sm:$0xff] }
 0x4d2   : > { %v4774_v30 = vsel %vm4773_vm14, %v4729_v58, %v4765_v47  ;;  %v7493_v47 = vld [vmem:[%s11606_s5 + $0x88] sm:$0xff]  ;;  %5169 = vmatpush.bf16.msrb.mxu0 %v7501_v43 }
 0x4d3   : > { %4782 = vst [vmem:[#allocation1] ss:$2 sm:$0xff] %v4774_v30  ;;  %v4663_v36 = vld [vmem:[#allocation3 + $0x22] sm:$0xf] }
 0x4d4   : > { %5136 = vmatpush.bf16.msra.mxu3 %v7490_v63  ;;  %5154 = vmatpush.bf16.msrb.mxu2 %v7494_v19 }
 0x4d6   : > { %4673 = vrot.lane.b32.xlu0 %v4634_v0, %s7836_s28  ;;  %v7500_v0 = vld [vmem:[%s11606_s5 + $0xc0] sm:$0xff] }
 0x4d7   : > { %5170 = vmatpush.bf16.msrb.mxu0 %v7500_v0 }
 0x4d8   : > { %5137 = vmatpush.bf16.msra.mxu3 %v7489_v41  ;;  %5155 = vmatpush.bf16.msrb.mxu2 %v7493_v47  ;;  %v4647_v41 = vld [vmem:[#allocation3 + $0x21] sm:$0xf] }
 0x4dc   : > { %5138 = vmatpush.bf16.msra.mxu3 %v7488_v46 }
 0x4de   : > { %4719 = vrot.lane.b32.xlu0 %v4658_v62, %s7836_s28 }
 0x4e0   : > { %5139 = vmatpush.bf16.msra.mxu3 %v7487_v50 }
 0x4e4   : > { %5140 = vmatpush.bf16.msra.mxu3 %v7486_v8 }
 0x4e6   : > { %4721 = vrot.lane.b32.xlu0 %v4659_v12, %s7836_s28  ;;  %v7492_v12 = vld [vmem:[%s11606_s5 + $0x80] sm:$0xff] }
 0x4e7   : > { %5156 = vmatpush.bf16.msrb.mxu2 %v7492_v12 }
 0x4e8   : > { %5141 = vmatpush.bf16.msra.mxu3 %v7485_v44 }
 0x4ec   : > { %5142 = vmatpush.bf16.msra.mxu3 %v7484_v1 }
 0x4ee   : > { %4707 = vrot.lane.b32.xlu0 %v4651_v33, %s7836_s28 }
 0x4fc   : > { %v10554_v4 = vpop.permute.xlu2 %4689 }
 0x4fd   : > { %v4735_v31 = vsel %vm4080_vm9, %v4638_v23, %v10554_v4  ;;  %v4654_v4 = vld [vmem:[#allocation3 + $0x18] sm:$0xf]  ;;  %v6921_v23 = vld [vmem:[%s11608_s7 + $0x50] sm:$0xf] }
 0x4fe   : > { %v4769_v52 = vrot.slane %v4735_v31, 4 }
 0x504   : > { %v4672_v27 = vpop.permute.xlu2 %4671 }
 0x505   : > { %v4730_v26 = vsel %vm4080_vm9, %v4629_v45, %v4672_v27  ;;  %v7511_v27 = vld [vmem:[%s11606_s5 + $0x118] sm:$0xff] }
 0x506   : > { %v4776_v39 = vsel %vm4773_vm14, %v4730_v26, %v4767_v6 }
 0x507   : > { %4784 = vst [vmem:[#allocation1 + $0x1] ss:$2 sm:$0xff] %v4776_v39  ;;  %v7510_v39 = vld [vmem:[%s11606_s5 + $0x110] sm:$0xff] }
 0x50c   : > { %v4718_v38 = vpop.permute.xlu2 %4717 }
 0x50d   : > { %v4741_v42 = vsel %vm4080_vm9, %v4653_v2, %v4718_v38 }
 0x50e   : > { %v4766_v60 = vrot.slane %v4741_v42, 4  ;;  %v4797_v54 = vld.sshfl [vmem:[#allocation1] sm:$0xff pattern:$0x75316420] }
 0x50f   : > { %v4646_v42 = vld [vmem:[#allocation3 + $0x19] sm:$0xf] }
 0x514   : > { %v4704_v33 = vpop.permute.xlu2 %4703 }
 0x515   : > { %v4676_v25 = vpop.permute.xlu1 %4675  ;;  %v4738_v45 = vsel %vm4080_vm9, %v4645_v59, %v4704_v33  ;;  %v7524_v33 = vld [vmem:[%s11608_s7 + $0x64] sm:$0xf]  ;;  %v6905_v59 = vld [vmem:[%s11608_s7 + $0x30] sm:$0xf] }
 0x516   : > { %v4732_v53 = vsel %vm4080_vm9, %v4631_v57, %v4676_v25  ;;  %v4656_v25 = vld [vmem:[#allocation3 + $0x28] sm:$0xf]  ;;  %v7527_v57 = vld [vmem:[%s11608_s7 + $0x74] sm:$0xf0] }
 0x51c   : > { %v4706_v48 = vpop.permute.xlu2 %4705 }
 0x51d   : > { %v4702_v40 = vpop.permute.xlu1 %4701 }
 0x51e   : > { %v4737_v13 = vsel %vm4080_vm9, %v4644_v37, %v4702_v40  ;;  %v7509_v40 = vld [vmem:[%s11606_s5 + $0x108] sm:$0xff]  ;;  %v4739_v37 = vsel %vm4080_vm9, %v4646_v42, %v4706_v48  ;;  %v7515_v42 = vld [vmem:[%s11608_s7 + $0x14] sm:$0xf0] }
 0x51f   : > { %v4775_v32 = vsel %vm4773_vm14, %v4737_v13, %v4766_v60  ;;  %v7517_v48 = vld [vmem:[%s11608_s7 + $0x24] sm:$0xf0] }
 0x520   : > { %4786 = vst [vmem:[#allocation1 + $0x10] ss:$2 sm:$0xff] %v4775_v32  ;;  %v4798_v32 = vld.sshfl [vmem:[#allocation1 + $0x8] sm:$0xff pattern:$0x75316420] }
 0x525   : > { %v4724_v38 = vpop.permute.xlu1 %4723 }
 0x526   : > { %v4744_v13 = vsel %vm4080_vm9, %v4656_v25, %v4724_v38  ;;  %v6915_v25 = vld [vmem:[%s11608_s7 + $0x48] sm:$0xf0] }
 0x527   : > { %v4772_v63 = vrot.slane %v4744_v13, 4  ;;  %v7518_v13 = vld [vmem:[%s11608_s7 + $0x34] sm:$0xf] }
 0x540   : > { %v4692_v51 = vpop.permute.xlu0 %4691 }
 0x541   : > { %v4736_v11 = vsel %vm4080_vm9, %v4639_v17, %v4692_v51  ;;  %v4801_v51 = vld.sshfl [vmem:[#allocation1 + $0x20] sm:$0xff pattern:$0x75316420] }
 0x542   : > { %v4771_v21 = vrot.slane %v4736_v11, 4  ;;  %v6937_v11 = vld [vmem:[%s11608_s7 + $0x70] sm:$0xf] }
 0x544   : > { %v4780_v3 = vsel %vm4773_vm14, %v4732_v53, %v4771_v21  ;;  %v6938_v21 = vor.u32 %v7527_v57, %v6937_v11  ;;  %v6929_v53 = vld [vmem:[%s11608_s7 + $0x60] sm:$0xf] }
 0x545   : > { %4796 = vst [vmem:[#allocation1 + $0x31] ss:$2 sm:$0xff] %v4780_v3  ;;  %v6930_v19 = vor.u32 %v7525_v29, %v6929_v53  ;;  %v7523_v3 = vld [vmem:[%s11608_s7 + $0x54] sm:$0xf0]  ;;  %v10784_v29 = vld [vmem:[%s11608_s7 + $0x4] sm:$0xf] }
 0x546   : > { %5363 = vmatpush.bf16.msrb.mxu1 %v6938_v21  ;;  %v6922_v1 = vor.u32 %v7523_v3, %v6921_v23  ;;  %v6891_v21 = vld [vmem:[%s11608_s7 + $0x18] sm:$0xf0]  ;;  %v7057_v23 = vld [vmem:[%s11610_s9 + $0xe0] sm:$0xf]  ;;  %v7558_v3 = vld [vmem:[%s11610_s9 + $0xec] sm:$0xf0] }
 0x548   : > { %v4674_v58 = vpop.permute.xlu0 %4673 }
 0x549   : > { %v4731_v30 = vsel %vm4080_vm9, %v4630_v18, %v4674_v58  ;;  %v6939_v18 = vld [vmem:[%s11608_s7 + $0x78] sm:$0xf0]  ;;  %v6913_v58 = vld [vmem:[%s11608_s7 + $0x40] sm:$0xf] }
 0x54a   : > { %v4778_v62 = vsel %vm4773_vm14, %v4731_v30, %v4769_v52  ;;  %5364 = vmatpush.bf16.msrb.mxu1 %v6930_v19  ;;  %v7526_v52 = vld [vmem:[%s11608_s7 + $0x74] sm:$0xf]  ;;  %v7521_v30 = vld [vmem:[%s11608_s7 + $0x44] sm:$0xf0]  ;;  %v10789_v19 = vld [vmem:[%s11608_s7 + $0x8] sm:$0xf0] }
 0x54b   : > { %4794 = vst [vmem:[#allocation1 + $0x30] ss:$2 sm:$0xff] %v4778_v62  ;;  %v6942_v0 = vor.u32 %v7526_v52, %v6939_v18  ;;  %v7806_v62 = vld [vmem:[%s11607_s6] ss:$0 sm:$0xff]  ;;  %v6914_v12 = vor.u32 %v7521_v30, %v6913_v58  ;;  %v7058_v52 = vor.u32 %v7558_v3, %v7057_v23  ;;  %v7059_v18 = vld [vmem:[%s11610_s9 + $0xf0] sm:$0xf0] }
 0x54c   : > { %v7582_v23 = vld [vmem:[%s11610_s9 + $0x1ac] sm:$0xf0]  ;;  %v7580_v3 = vld [vmem:[%s11610_s9 + $0x1a4] sm:$0xf] }
 0x54d   : > { %5376 = vmatpush.bf16.msra.mxu2 %v6942_v0 }
 0x54e   : > { %5365 = vmatpush.bf16.msrb.mxu1 %v6922_v1  ;;  %v7556_v1 = vld [vmem:[%s11610_s9 + $0xe4] sm:$0xf] }
 0x550   : > { %v4720_v35 = vpop.permute.xlu0 %4719 }
 0x551   : > { %v4742_v15 = vsel %vm4080_vm9, %v4654_v4, %v4720_v35  ;;  %v6931_v4 = vld [vmem:[%s11608_s7 + $0x68] sm:$0xf0] }
 0x552   : > { %v4768_v61 = vrot.slane %v4742_v15, 4  ;;  %v4802_v6 = vld.sshfl [vmem:[#allocation1 + $0x30] sm:$0xff pattern:$0x75316420]  ;;  %5366 = vmatpush.bf16.msrb.mxu1 %v6914_v12  ;;  %v6934_v35 = vor.u32 %v7524_v33, %v6931_v4  ;;  %v7519_v15 = vld [vmem:[%s11608_s7 + $0x34] sm:$0xf0]  ;;  %v7062_v12 = vor.u32 %v7556_v1, %v7059_v18 }
 0x553   : > { %v4821_v26 = vpack.c.bf16 %v4802_v6, %v4797_v54  ;;  %v4803_v46 = vld.sshfl [vmem:[#allocation1 + $0x38] sm:$0xff pattern:$0x75316420]  ;;  %v7522_v54 = vld [vmem:[%s11608_s7 + $0x54] sm:$0xf]  ;;  %v6906_v6 = vor.u32 %v7519_v15, %v6905_v59 }
 0x554   : > { %v4777_v55 = vsel %vm4773_vm14, %v4738_v45, %v4768_v61  ;;  %v4822_v50 = vpack.c.bf16 %v4803_v46, %v4798_v32  ;;  %5377 = vmatpush.bf16.msra.mxu2 %v6934_v35  ;;  %v6907_v32 = vld [vmem:[%s11608_s7 + $0x38] sm:$0xf0]  ;;  %v7041_v33 = vld [vmem:[%s11610_s9 + $0xc0] sm:$0xf]  ;;  %v7554_v4 = vld [vmem:[%s11610_s9 + $0xcc] sm:$0xf0] }
 0x555   : > { %4788 = vst [vmem:[#allocation1 + $0x11] ss:$2 sm:$0xff] %v4777_v55  ;;  %5129 = vmatmul.bf16.vlgmr.msrb.gmra.mxu3 %v4821_v26  ;;  %v7552_v35 = vld [vmem:[%s11610_s9 + $0xc4] sm:$0xf]  ;;  %v7042_v15 = vor.u32 %v7554_v4, %v7041_v33  ;;  %v6995_v4 = vld [vmem:[%s11610_s9 + $0x70] sm:$0xf0] }
 0x556   : > { %5181 = vmatpush.bf16.msrb.mxu3 %v7511_v27  ;;  %v6923_v27 = vld [vmem:[%s11608_s7 + $0x58] sm:$0xf0]  ;;  %5367 = vmatpush.bf16.msrb.mxu1 %v6906_v6  ;;  %v7590_v6 = vld [vmem:[%s11610_s9 + $0x1ec] sm:$0xf0] }
 0x557   : > { %v6926_v55 = vor.u32 %v7522_v54, %v6923_v27  ;;  %v7043_v54 = vld [vmem:[%s11610_s9 + $0xd0] sm:$0xf0] }
 0x558   : > { %v4722_v28 = vpop.permute.xlu0 %4721 }
 0x559   : > { %v4743_v2 = vsel %vm4080_vm9, %v4655_v10, %v4722_v28  ;;  %v7520_v28 = vld [vmem:[%s11608_s7 + $0x44] sm:$0xf]  ;;  %5378 = vmatpush.bf16.msra.mxu2 %v6926_v55 }
 0x55a   : > { %v4770_v60 = vrot.slane %v4743_v2, 4  ;;  %5182 = vmatpush.bf16.msrb.mxu3 %v7510_v39  ;;  %v6897_v39 = vld [vmem:[%s11608_s7 + $0x20] sm:$0xf]  ;;  %v6889_v2 = vld [vmem:[%s11608_s7 + $0x10] sm:$0xf] }
 0x55b   : > { %v6898_v38 = vor.u32 %v7517_v48, %v6897_v39  ;;  %v7588_v39 = vld [vmem:[%s11610_s9 + $0x1e4] sm:$0xf]  ;;  %v7187_v48 = vld [vmem:[%s11610_s9 + $0x1f0] sm:$0xf0] }
 0x55c   : > { %v4779_v24 = vsel %vm4773_vm14, %v4739_v37, %v4770_v60  ;;  %v4799_v9 = vld.sshfl [vmem:[#allocation1 + $0x10] sm:$0xff pattern:$0x75316420]  ;;  %v4800_v16 = vld.sshfl [vmem:[#allocation1 + $0x18] sm:$0xff pattern:$0x75316420]  ;;  %v6918_v37 = vor.u32 %v7520_v28, %v6915_v25  ;;  %v6886_v28 = vor.u32 %v10784_v29, %v10789_v19 }
 0x55d   : > { %4804 = vst [vmem:[#allocation1] ss:$2 sm:$0xff] %v4779_v24  ;;  %5368 = vmatpush.bf16.msrb.mxu1 %v6898_v38  ;;  %v7025_v25 = vld [vmem:[%s11610_s9 + $0xa0] sm:$0xf]  ;;  %v7550_v38 = vld [vmem:[%s11610_s9 + $0xac] sm:$0xf0] }
 0x55e   : > { %4806 = vst [vmem:[#allocation1 + $0x10] ss:$2 sm:$0xff] %v4663_v36  ;;  %5183 = vmatpush.bf16.msrb.mxu3 %v7509_v40  ;;  %5379 = vmatpush.bf16.msra.mxu2 %v6918_v37  ;;  %v7027_v37 = vld [vmem:[%s11610_s9 + $0xb0] sm:$0xf0]  ;;  %v7153_v19 = vld [vmem:[%s11610_s9 + $0x1a0] sm:$0xf] }
 0x55f   : > { %4807 = vst [vmem:[#allocation1 + $0x11] ss:$2 sm:$0xff] %v4664_v49  ;;  %v6890_v49 = vor.u32 %v7515_v42, %v6889_v2  ;;  %v7154_v18 = vor.u32 %v7582_v23, %v7153_v19  ;;  %v7530_v19 = vld [vmem:[%s11610_s9 + $0xc] sm:$0xf0]  ;;  %v7528_v23 = vld [vmem:[%s11610_s9 + $0x4] sm:$0xf] }
 0x560   : > { %v4708_v56 = vpop.permute.xlu0 %4707 }
 0x561   : > { %v4740_v20 = vsel %vm4080_vm9, %v4647_v41, %v4708_v56  ;;  %v6910_v56 = vor.u32 %v7518_v13, %v6907_v32  ;;  %5369 = vmatpush.bf16.msrb.mxu1 %v6890_v49  ;;  %v7169_v13 = vld [vmem:[%s11610_s9 + $0x1c0] sm:$0xf] }
 0x562   : > { %v4781_v14 = vsel %vm4773_vm14, %v4740_v20, %v4772_v63  ;;  %5184 = vmatpush.bf16.msrb.mxu3 %v7508_v34  ;;  %v7516_v20 = vld [vmem:[%s11608_s7 + $0x24] sm:$0xf] }
 0x563   : > { %4805 = vst [vmem:[#allocation1 + $0x1] ss:$2 sm:$0xff] %v4781_v14  ;;  %v6899_v14 = vld [vmem:[%s11608_s7 + $0x28] sm:$0xf0]  ;;  %5380 = vmatpush.bf16.msra.mxu2 %v6910_v56  ;;  %v7584_v56 = vld [vmem:[%s11610_s9 + $0x1c4] sm:$0xf] }
 0x565   : > { %5143 = vmatmul.bf16.vlgmr.msra.gmra.mxu3 %v4822_v50 }
 0x566   : > { %v4810_v17 = vld.sshfl [vmem:[#allocation1 + $0x10] sm:$0xff pattern:$0x75316420]  ;;  %5787 = vmatpush.bf16.msra.mxu3 %v7058_v52 }
 0x567   : > { %v4825_v44 = vpack.c.bf16 %v4810_v17, %v4801_v51  ;;  %v7155_v52 = vld [vmem:[%s11610_s9 + $0x1b0] sm:$0xf0] }
 0x56a   : > { %v4808_v5 = vld.sshfl [vmem:[#allocation1] sm:$0xff pattern:$0x75316420]  ;;  %v4809_v8 = vld.sshfl [vmem:[#allocation1 + $0x8] sm:$0xff pattern:$0x75316420]  ;;  %5788 = vmatpush.bf16.msra.mxu3 %v7042_v15 }
 0x56b   : > { %v4823_v22 = vpack.c.bf16 %v4808_v5, %v4799_v9  ;;  %v4824_v7 = vpack.c.bf16 %v4809_v8, %v4800_v16  ;;  %v6881_v9 = vld [vmem:[%s11608_s7] sm:$0xf]  ;;  %v7513_v16 = vld [vmem:[%s11608_s7 + $0x4] sm:$0xf0] }
 0x56c   : > { %v6882_v50 = vor.u32 %v7513_v16, %v6881_v9  ;;  %v7026_v9 = vor.u32 %v7550_v38, %v7025_v25  ;;  %v7586_v16 = vld [vmem:[%s11610_s9 + $0x1cc] sm:$0xf0]  ;;  %v6979_v25 = vld [vmem:[%s11610_s9 + $0x50] sm:$0xf0]  ;;  %v7121_v38 = vld [vmem:[%s11610_s9 + $0x160] sm:$0xf] }
 0x56d   : > { %5157 = vmatmul.bf16.vlgmr.msrb.gmra.mxu2 %v4823_v22  ;;  %5171 = vmatmul.bf16.vlgmr.msrb.gmra.mxu0 %v4824_v7  ;;  %v6902_v22 = vor.u32 %v7516_v20, %v6899_v14  ;;  %v7514_v7 = vld [vmem:[%s11608_s7 + $0x14] sm:$0xf] }
 0x56e   : > { %5370 = vmatpush.bf16.msrb.mxu1 %v6882_v50  ;;  %5789 = vmatpush.bf16.msra.mxu3 %v7026_v9  ;;  %v6961_v9 = vld [vmem:[%s11610_s9 + $0x20] sm:$0xf] }
 0x56f   : > { %5381 = vmatpush.bf16.msra.mxu2 %v6902_v22 }
 0x572   : > { %5813 = vmatpush.bf16.msra.mxu1 %v7062_v12 }
 0x575   : > { %6878 = vmatmul.msk.bf16.vlgmr.msrb.gmra.mxu3 %vm4080_vm9, %v4825_v44 }
 0x5d8   : > { %v5130_v31 = vpop.f32.mrf.mxu3 }
 0x5d9   : > { %v5131_v61 = vadd.f32 %v7806_v62, %v5130_v31 }
 0x5e0   : > { %v5132_v43 = vpop.f32.mrf.mxu3 }
 0x5e1   : > { %v5133_v24 = vadd.f32 %v7806_v62, %v5132_v43  ;;  %v6894_v62 = vor.u32 %v7514_v7, %v6891_v21 }
 0x5e3   : > { %5382 = vmatpush.bf16.msra.mxu2 %v6894_v62 }
 0x5e7   : > { %5383 = vmatpush.bf16.msra.mxu2 %v6886_v28  ;;  %v7536_v28 = vld [vmem:[%s11610_s9 + $0x44] sm:$0xf] }
 0x5e8   : > { %v5144_v47 = vpop.f32.mrf.mxu3 }
 0x5e9   : > { %v5145_v10 = vadd.f32 %v5144_v47, %v5131_v61  ;;  %v7185_v61 = vld [vmem:[%s11610_s9 + $0x1e0] sm:$0xf] }
 0x5ea   : > { %v5172_v60 = vpop.f32.mrf.mxu0  ;;  %v7186_v55 = vor.u32 %v7590_v6, %v7185_v61  ;;  %v7576_v6 = vld [vmem:[%s11610_s9 + $0x184] sm:$0xf] }
 0x5ec   : > { %5800 = vmatpush.bf16.msra.mxu0 %v7186_v55 }
 0x5f0   : > { %v5146_v45 = vpop.f32.mrf.mxu3  ;;  %v5158_v26 = vpop.f32.mrf.mxu2 }
 0x5f1   : > { %v5159_v40 = vadd.f32 %v5158_v26, %v5145_v10  ;;  %v5147_v63 = vadd.f32 %v5146_v45, %v5133_v24  ;;  %v7046_v26 = vor.u32 %v7552_v35, %v7043_v54  ;;  %v7137_v35 = vld [vmem:[%s11610_s9 + $0x180] sm:$0xf]  ;;  %v7158_v54 = vor.u32 %v7580_v3, %v7155_v52  ;;  %v6947_v3 = vld [vmem:[%s11610_s9 + $0x10] sm:$0xf0]  ;;  %v7557_v52 = vld [vmem:[%s11610_s9 + $0xec] sm:$0xf] }
 0x5f2   : > { %v5174_v17 = vpop.f32.mrf.mxu0 }
 0x5f3   : > { %v5173_v36 = vadd.f32 %v5172_v60, %v5159_v40  ;;  %v7190_v60 = vor.u32 %v7588_v39, %v7187_v48  ;;  %v7548_v40 = vld [vmem:[%s11610_s9 + $0xa4] sm:$0xf]  ;;  %5814 = vmatpush.bf16.msra.mxu1 %v7046_v26 }
 0x5f5   : > { %5826 = vmatpush.bf16.msrb.mxu2 %v7190_v60 }
 0x5f8   : > { %v5160_v34 = vpop.f32.mrf.mxu2  ;;  %v5186_v41 = vpop.f32.mrf.mxu3 }
 0x5f9   : > { %v5187_v46 = vadd.f32 %v5186_v41, %v5173_v36  ;;  %v5161_v5 = vadd.f32 %v5160_v34, %v5147_v63  ;;  %v7030_v34 = vor.u32 %v7548_v40, %v7027_v37  ;;  %v7170_v41 = vor.u32 %v7586_v16, %v7169_v13  ;;  %v7572_v37 = vld [vmem:[%s11610_s9 + $0x164] sm:$0xf]  ;;  %v7534_v16 = vld [vmem:[%s11610_s9 + $0x2c] sm:$0xf0] }
 0x5fb   : > { %v5191_v8 = vmax.f32 %v5187_v46, 0.0  ;;  %v5175_v53 = vadd.f32 %v5174_v17, %v5161_v5  ;;  %v7171_v46 = vld [vmem:[%s11610_s9 + $0x1d0] sm:$0xf0]  ;;  %5815 = vmatpush.bf16.msra.mxu1 %v7030_v34  ;;  %5801 = vmatpush.bf16.msra.mxu0 %v7170_v41  ;;  %v6982_v34 = vor.u32 %v7536_v28, %v6979_v25  ;;  %v7562_v28 = vld [vmem:[%s11610_s9 + $0x10c] sm:$0xf0] }
 0x5fc   : > { %v7174_v21 = vor.u32 %v7584_v56, %v7171_v46  ;;  %v7532_v56 = vld [vmem:[%s11610_s9 + $0x24] sm:$0xf]  ;;  %v6963_v46 = vld [vmem:[%s11610_s9 + $0x30] sm:$0xf0] }
 0x5fd   : > { %v5195_v51 = vrot.slane %v5191_v8, 2  ;;  %v5196_v44 = vrot.slane %v5191_v8, 4  ;;  %v5197_v11 = vrot.slane %v5191_v8, 6  ;;  %v5208_v57 = vsel %vm5207_vm15, %v5191_v8, -inf  ;;  %v7009_v8 = vld [vmem:[%s11610_s9 + $0x80] sm:$0xf] }
 0x5fe   : > { %5827 = vmatpush.bf16.msrb.mxu2 %v7174_v21  ;;  %v7560_v25 = vld [vmem:[%s11610_s9 + $0x104] sm:$0xf] }
 0x5ff   : > { %v5209_v31 = vsel %vm5207_vm15, %v5196_v44, -inf  ;;  %v5217_v43 = vsel %vm5207_vm15, %v5195_v51, -inf  ;;  %v5218_v47 = vsel %vm5207_vm15, %v5197_v11, -inf  ;;  %v7546_v44 = vld [vmem:[%s11610_s9 + $0x8c] sm:$0xf0]  ;;  %5802 = vmatpush.bf16.msra.mxu0 %v7154_v18 }
 0x600   : > { %v5210_v58 = vmax.f32 %v5208_v57, %v5209_v31  ;;  %v5219_v30 = vmax.f32 %v5217_v43, %v5218_v47  ;;  %v5188_v0 = vpop.f32.mrf.mxu3  ;;  %v7544_v11 = vld [vmem:[%s11610_s9 + $0x84] sm:$0xf]  ;;  %v7011_v57 = vld [vmem:[%s11610_s9 + $0x90] sm:$0xf0] }
 0x601   : > { %v5189_v59 = vadd.f32 %v5188_v0, %v5175_v53  ;;  %v7010_v53 = vor.u32 %v7546_v44, %v7009_v8  ;;  %v7014_v29 = vor.u32 %v7544_v11, %v7011_v57  ;;  %v7540_v0 = vld [vmem:[%s11610_s9 + $0x64] sm:$0xf] }
 0x602   : > { %v5211_v27 = vrot.slane %v5210_v58, 4  ;;  %v5220_v45 = vrot.slane %v5219_v30, 4  ;;  %v6998_v39 = vor.u32 %v7540_v0, %v6995_v4  ;;  %5828 = vmatpush.bf16.msrb.mxu2 %v7158_v54  ;;  %v7568_v44 = vld [vmem:[%s11610_s9 + $0x144] sm:$0xf]  ;;  %v7067_v0 = vld [vmem:[%s11610_s9 + $0xf8] sm:$0xf0] }
 0x603   : > { %v5192_v10 = vmax.f32 %v5189_v59, 0.0  ;;  %v7578_v59 = vld [vmem:[%s11610_s9 + $0x18c] sm:$0xf0]  ;;  %5790 = vmatpush.bf16.msra.mxu3 %v7010_v53  ;;  %5816 = vmatpush.bf16.msra.mxu1 %v7014_v29  ;;  %v7107_v53 = vld [vmem:[%s11610_s9 + $0x150] sm:$0xf0] }
 0x604   : > { %v5212_v2 = vmax.f32 %v5210_v58, %v5211_v27  ;;  %v5221_v42 = vmax.f32 %v5219_v30, %v5220_v45  ;;  %v6993_v58 = vld [vmem:[%s11610_s9 + $0x60] sm:$0xf]  ;;  %v7542_v30 = vld [vmem:[%s11610_s9 + $0x6c] sm:$0xf0]  ;;  %v7139_v27 = vld [vmem:[%s11610_s9 + $0x190] sm:$0xf0]  ;;  %v7138_v48 = vor.u32 %v7578_v59, %v7137_v35 }
 0x605   : > { %v5198_v32 = vrot.slane %v5192_v10, 2  ;;  %v5199_v49 = vrot.slane %v5192_v10, 4  ;;  %v5200_v24 = vrot.slane %v5192_v10, 6  ;;  %v5226_v20 = vsel %vm5207_vm15, %v5192_v10, -inf  ;;  %v6977_v45 = vld [vmem:[%s11610_s9 + $0x40] sm:$0xf] }
 0x606   : > { %v5213_v36 = vrot.slane %v5212_v2, 2  ;;  %v5222_v63 = vrot.slane %v5221_v42, 2  ;;  %v6994_v61 = vor.u32 %v7542_v30, %v6993_v58  ;;  %v7538_v10 = vld [vmem:[%s11610_s9 + $0x4c] sm:$0xf0]  ;;  %5803 = vmatpush.bf16.msra.mxu0 %v7138_v48  ;;  %v6945_v29 = vld [vmem:[%s11610_s9] sm:$0xf]  ;;  %v7110_v58 = vor.u32 %v7568_v44, %v7107_v53 }
 0x607   : > { %v5227_v14 = vsel %vm5207_vm15, %v5199_v49, -inf  ;;  %v5235_v50 = vsel %vm5207_vm15, %v5198_v32, -inf  ;;  %v5236_v5 = vsel %vm5207_vm15, %v5200_v24, -inf  ;;  %v7142_v32 = vor.u32 %v7576_v6, %v7139_v27  ;;  %v7123_v24 = vld [vmem:[%s11610_s9 + $0x170] sm:$0xf0]  ;;  %5817 = vmatpush.bf16.msra.mxu1 %v6998_v39 }
 0x608   : > { %v5214_v22 = vmax.f32 %v5212_v2, %v5213_v36  ;;  %v5223_v7 = vmax.f32 %v5221_v42, %v5222_v63  ;;  %v5228_v17 = vmax.f32 %v5226_v20, %v5227_v14  ;;  %v5237_v51 = vmax.f32 %v5235_v50, %v5236_v5  ;;  %v7574_v2 = vld [vmem:[%s11610_s9 + $0x16c] sm:$0xf0]  ;;  %5791 = vmatpush.bf16.msra.mxu3 %v6994_v61  ;;  %v7105_v20 = vld [vmem:[%s11610_s9 + $0x140] sm:$0xf]  ;;  %v7564_v4 = vld [vmem:[%s11610_s9 + $0x124] sm:$0xf] }
 0x609   : > { %v6978_v49 = vor.u32 %v7538_v10, %v6977_v45  ;;  %v7122_v41 = vor.u32 %v7574_v2, %v7121_v38  ;;  %v7570_v14 = vld [vmem:[%s11610_s9 + $0x14c] sm:$0xf0]  ;;  %5829 = vmatpush.bf16.msrb.mxu2 %v7142_v32  ;;  %v6946_v30 = vor.u32 %v7530_v19, %v6945_v29  ;;  %v7091_v35 = vld [vmem:[%s11610_s9 + $0x130] sm:$0xf0]  ;;  %v7049_v61 = vld [vmem:[%s11610_s9 + $0xc8] sm:$0xf]  ;;  %v7070_v27 = vor.u32 %v7557_v52, %v7067_v0 }
 0x60a   : > { %v5215_v1 = vrot.slane %v5214_v22, 1  ;;  %v5229_v31 = vrot.slane %v5228_v17, 4  ;;  %v5238_v43 = vrot.slane %v5237_v51, 4  ;;  %v5224_v47 = vrot.slane %v5223_v7, 1  ;;  %v7051_v39 = vld [vmem:[%s11610_s9 + $0xd8] sm:$0xf0] }
 0x60b   : > { %5818 = vmatpush.bf16.msra.mxu1 %v6982_v34  ;;  %5804 = vmatpush.bf16.msra.mxu0 %v7122_v41  ;;  %v7106_v21 = vor.u32 %v7570_v14, %v7105_v20  ;;  %v7094_v48 = vor.u32 %v7564_v4, %v7091_v35  ;;  %v7073_v10 = vld [vmem:[%s11610_s9 + $0x100] sm:$0xf]  ;;  %v7075_v38 = vld [vmem:[%s11610_s9 + $0x110] sm:$0xf0]  ;;  %v7193_v2 = vld [vmem:[%s11610_s9 + $0x1e8] sm:$0xf] }
 0x60c   : > { %v5230_v62 = vmax.f32 %v5228_v17, %v5229_v31  ;;  %v5216_v12 = vmax.f32 %v5214_v22, %v5215_v1  ;;  %v5239_v33 = vmax.f32 %v5237_v51, %v5238_v43  ;;  %v5225_v15 = vmax.f32 %v5223_v7, %v5224_v47  ;;  %5792 = vmatpush.bf16.msra.mxu3 %v6978_v49  ;;  %v7065_v43 = vld [vmem:[%s11610_s9 + $0xe8] sm:$0xf]  ;;  %v7559_v47 = vld [vmem:[%s11610_s9 + $0xf4] sm:$0xf0]  ;;  %v7035_v41 = vld [vmem:[%s11610_s9 + $0xb8] sm:$0xf0] }
 0x60d   : > { %v7126_v7 = vor.u32 %v7572_v37, %v7123_v24  ;;  %v6962_v17 = vor.u32 %v7534_v16, %v6961_v9  ;;  %v6966_v51 = vor.u32 %v7532_v56, %v6963_v46  ;;  %v7066_v54 = vor.u32 %v7559_v47, %v7065_v43  ;;  %v7195_v37 = vld [vmem:[%s11610_s9 + $0x1f8] sm:$0xf0]  ;;  %v7033_v16 = vld [vmem:[%s11610_s9 + $0xa8] sm:$0xf]  ;;  %v7587_v46 = vld [vmem:[%s11610_s9 + $0x1d4] sm:$0xf0] }
 0x60e   : > { %v5231_v26 = vrot.slane %v5230_v62, 2  ;;  %v5240_v55 = vrot.slane %v5239_v33, 2  ;;  %v5244_v40 = vpack.c.bf16 %v5216_v12, %v5216_v12  ;;  %v5245_v13 = vpack.c.bf16 %v5225_v15, %v5225_v15  ;;  %v7566_v12 = vld [vmem:[%s11610_s9 + $0x12c] sm:$0xf0]  ;;  %v7177_v56 = vld [vmem:[%s11610_s9 + $0x1c8] sm:$0xf] }
 0x60f   : > { %5830 = vmatpush.bf16.msrb.mxu2 %v7126_v7  ;;  %5819 = vmatpush.bf16.msra.mxu1 %v6966_v51  ;;  %v6950_v15 = vor.u32 %v7528_v23, %v6947_v3  ;;  %v7074_v32 = vor.u32 %v7562_v28, %v7073_v10  ;;  %v7078_v49 = vor.u32 %v7560_v25, %v7075_v38  ;;  %v7547_v7 = vld [vmem:[%s11610_s9 + $0x94] sm:$0xf0]  ;;  %v7019_v51 = vld [vmem:[%s11610_s9 + $0x98] sm:$0xf0]  ;;  %v7581_v53 = vld [vmem:[%s11610_s9 + $0x1ac] sm:$0xf] }
 0x610   : > { %v5232_v42 = vmax.f32 %v5230_v62, %v5231_v26  ;;  %v5241_v60 = vmax.f32 %v5239_v33, %v5240_v55  ;;  %v5274_v8 = vunpack.c.l.b16 %v5244_v40  ;;  %v5275_v22 = vunpack.c.l.b16 %v5245_v13  ;;  %5793 = vmatpush.bf16.msra.mxu3 %v6962_v17  ;;  %v7089_v62 = vld [vmem:[%s11610_s9 + $0x120] sm:$0xf]  ;;  %5805 = vmatpush.bf16.msra.mxu0 %v7106_v21  ;;  %v7555_v26 = vld [vmem:[%s11610_s9 + $0xd4] sm:$0xf0]  ;;  %v7553_v55 = vld [vmem:[%s11610_s9 + $0xcc] sm:$0xf] }
 0x611   : > { %v7090_v45 = vor.u32 %v7566_v12, %v7089_v62  ;;  %v7589_v40 = vld [vmem:[%s11610_s9 + $0x1ec] sm:$0xf]  ;;  %v7054_v13 = vor.u32 %v7553_v55, %v7051_v39  ;;  %v7178_v14 = vor.u32 %v7587_v46, %v7177_v56  ;;  %v7583_v21 = vld [vmem:[%s11610_s9 + $0x1b4] sm:$0xf0]  ;;  %v7163_v19 = vld [vmem:[%s11610_s9 + $0x1b8] sm:$0xf0] }
 0x612   : > { %v5233_v36 = vrot.slane %v5232_v42, 1  ;;  %v5242_v63 = vrot.slane %v5241_v60, 1  ;;  %v5278_v18 = vsel %vm3727_vm1, %v5275_v22, %v5274_v8  ;;  %v7198_v9 = vor.u32 %v7589_v40, %v7195_v37  ;;  %v7017_v8 = vld [vmem:[%s11610_s9 + $0x88] sm:$0xf]  ;;  %v7545_v17 = vld [vmem:[%s11610_s9 + $0x8c] sm:$0xf]  ;;  %vm6401_vm1 = vmor %vm6400_vm0, %vm4773_vm14 }
 0x613   : > { %5831 = vmatpush.bf16.msrb.mxu2 %v7110_v58  ;;  %5820 = vmatpush.bf16.msra.mxu1 %v6950_v15  ;;  %v7018_v44 = vor.u32 %v7547_v7, %v7017_v8  ;;  %v7001_v23 = vld [vmem:[%s11610_s9 + $0x68] sm:$0xf]  ;;  %v7543_v3 = vld [vmem:[%s11610_s9 + $0x74] sm:$0xf0]  ;;  %v7541_v43 = vld [vmem:[%s11610_s9 + $0x6c] sm:$0xf] }
 0x614   : > { %v5234_v50 = vmax.f32 %v5232_v42, %v5233_v36  ;;  %v5243_v5 = vmax.f32 %v5241_v60, %v5242_v63  ;;  %5794 = vmatpush.bf16.msra.mxu3 %v6946_v30  ;;  %v7591_v42 = vld [vmem:[%s11610_s9 + $0x1f4] sm:$0xf0]  ;;  %v7050_v60 = vor.u32 %v7555_v26, %v7049_v61  ;;  %5806 = vmatpush.bf16.msra.mxu0 %v7090_v45  ;;  %v7549_v63 = vld [vmem:[%s11610_s9 + $0xac] sm:$0xf]  ;;  %v7003_v47 = vld [vmem:[%s11610_s9 + $0x78] sm:$0xf0] }
 0x615   : > { %v7194_v24 = vor.u32 %v7591_v42, %v7193_v2  ;;  %v7551_v36 = vld [vmem:[%s11610_s9 + $0xb4] sm:$0xf0]  ;;  %v7038_v20 = vor.u32 %v7549_v63, %v7035_v41  ;;  %v7145_v52 = vld [vmem:[%s11610_s9 + $0x188] sm:$0xf]  ;;  %v7577_v30 = vld [vmem:[%s11610_s9 + $0x18c] sm:$0xf] }
 0x616   : > { %v5246_v11 = vpack.c.bf16 %v5234_v50, %v5234_v50  ;;  %v5247_v57 = vpack.c.bf16 %v5243_v5, %v5243_v5  ;;  %v7034_v34 = vor.u32 %v7551_v36, %v7033_v16  ;;  %v7585_v50 = vld [vmem:[%s11610_s9 + $0x1cc] sm:$0xf]  ;;  %v7179_v5 = vld [vmem:[%s11610_s9 + $0x1d8] sm:$0xf0]  ;;  %v7579_v58 = vld [vmem:[%s11610_s9 + $0x194] sm:$0xf0] }
 0x617   : > { %5832 = vmatpush.bf16.msrb.mxu2 %v7094_v48  ;;  %v7182_v22 = vor.u32 %v7585_v50, %v7179_v5  ;;  %v7147_v0 = vld [vmem:[%s11610_s9 + $0x198] sm:$0xf0]  ;;  %v7146_v62 = vor.u32 %v7579_v58, %v7145_v52  ;;  %v7539_v4 = vld [vmem:[%s11610_s9 + $0x54] sm:$0xf0]  ;;  %v7537_v35 = vld [vmem:[%s11610_s9 + $0x4c] sm:$0xf] }
 0x618   : > { %v5276_v1 = vunpack.c.l.b16 %v5246_v11  ;;  %v5277_v31 = vunpack.c.l.b16 %v5247_v57  ;;  %5839 = vmatpush.bf16.msrb.mxu3 %v7066_v54  ;;  %5807 = vmatpush.bf16.msra.mxu0 %v7074_v32  ;;  %v7022_v11 = vor.u32 %v7545_v17, %v7019_v51  ;;  %v7161_v57 = vld [vmem:[%s11610_s9 + $0x1a8] sm:$0xf]  ;;  %v7150_v12 = vor.u32 %v7577_v30, %v7147_v0  ;;  %v6987_v15 = vld [vmem:[%s11610_s9 + $0x58] sm:$0xf0]  ;;  %v7575_v61 = vld [vmem:[%s11610_s9 + $0x174] sm:$0xf0] }
 0x619   : > { %v7162_v29 = vor.u32 %v7583_v21, %v7161_v57  ;;  %v7129_v54 = vld [vmem:[%s11610_s9 + $0x168] sm:$0xf]  ;;  %v7131_v45 = vld [vmem:[%s11610_s9 + $0x178] sm:$0xf0]  ;;  %v7535_v39 = vld [vmem:[%s11610_s9 + $0x34] sm:$0xf0] }
 0x61a   : > { %v5279_v33 = vsel %vm3729_vm2, %v5276_v1, %v5278_v18  ;;  %v7166_v1 = vor.u32 %v7581_v53, %v7163_v19  ;;  %v7006_v18 = vor.u32 %v7541_v43, %v7003_v47  ;;  %v6969_v26 = vld [vmem:[%s11610_s9 + $0x28] sm:$0xf]  ;;  %v7130_v55 = vor.u32 %v7575_v61, %v7129_v54  ;;  %v7533_v48 = vld [vmem:[%s11610_s9 + $0x2c] sm:$0xf]  ;;  %v6971_v10 = vld [vmem:[%s11610_s9 + $0x38] sm:$0xf0] }
 0x61b   : > { %v5280_v59 = vsel %vm3731_vm3, %v5277_v31, %v5279_v33  ;;  %5833 = vmatpush.bf16.msrb.mxu2 %v7078_v49  ;;  %v7002_v31 = vor.u32 %v7543_v3, %v7001_v23  ;;  %v6985_v33 = vld [vmem:[%s11610_s9 + $0x48] sm:$0xf]  ;;  %v7571_v38 = vld [vmem:[%s11610_s9 + $0x154] sm:$0xf0]  ;;  %v6970_v2 = vor.u32 %v7535_v39, %v6969_v26  ;;  %v7569_v42 = vld [vmem:[%s11610_s9 + $0x14c] sm:$0xf]  ;;  %v6974_v40 = vor.u32 %v7533_v48, %v6971_v10 }
 0x61c   : > { %v5281_v6 = vpack.c.b16 %v5280_v59, %v5280_v59  ;;  %5840 = vmatpush.bf16.msrb.mxu3 %v7050_v60  ;;  %5852 = vmatpush.bf16.msrb.mxu0 %v7194_v24  ;;  %v6986_v59 = vor.u32 %v7539_v4, %v6985_v33  ;;  %v7113_v25 = vld [vmem:[%s11610_s9 + $0x148] sm:$0xf]  ;;  %v7115_v60 = vld [vmem:[%s11610_s9 + $0x158] sm:$0xf0]  ;;  %v7529_v49 = vld [vmem:[%s11610_s9 + $0xc] sm:$0xf] }
 0x61d   : > { %v6953_v37 = vld [vmem:[%s11610_s9 + $0x8] sm:$0xf]  ;;  %v7114_v32 = vor.u32 %v7571_v38, %v7113_v25  ;;  %v6955_v24 = vld [vmem:[%s11610_s9 + $0x18] sm:$0xf0]  ;;  %v7567_v36 = vld [vmem:[%s11610_s9 + $0x134] sm:$0xf0] }
 0x61e   : > { %5371 = vmatmul.bf16.vlgmr.msrb.gmra.mxu1 %v5281_v6  ;;  %5384 = vmatmul.bf16.vlgmr.msra.gmra.mxu2 %v5281_v6  ;;  %v6990_v6 = vor.u32 %v7537_v35, %v6987_v15  ;;  %v7097_v16 = vld [vmem:[%s11610_s9 + $0x128] sm:$0xf]  ;;  %v7099_v41 = vld [vmem:[%s11610_s9 + $0x138] sm:$0xf0]  ;;  %v6958_v56 = vor.u32 %v7529_v49, %v6955_v24  ;;  %v5264_v46 = vld [vmem:[%s11609_s8] sm:$0x3] }
 0x61f   : > { %5865 = vmatpush.bf16.msrb.mxu1 %v7070_v27  ;;  %5878 = vmatpush.bf16.msra.mxu2 %v7198_v9  ;;  %v7573_v27 = vld [vmem:[%s11610_s9 + $0x16c] sm:$0xf]  ;;  %v7118_v9 = vor.u32 %v7569_v42, %v7115_v60  ;;  %v7081_v50 = vld [vmem:[%s11610_s9 + $0x108] sm:$0xf]  ;;  %v7563_v5 = vld [vmem:[%s11610_s9 + $0x114] sm:$0xf0] }
 0x620   : > { %5841 = vmatpush.bf16.msrb.mxu3 %v7034_v34  ;;  %5853 = vmatpush.bf16.msrb.mxu0 %v7178_v14  ;;  %v7134_v28 = vor.u32 %v7573_v27, %v7131_v45  ;;  %v7565_v34 = vld [vmem:[%s11610_s9 + $0x12c] sm:$0xf]  ;;  %v5266_v7 = vperm.slane %v5264_v46, 0  ;;  %v7082_v17 = vor.u32 %v7563_v5, %v7081_v50  ;;  %v7257_v57 = vld [vmem:[%s11612_s11 + $0x70] sm:$0xf] }
 0x621   : > { %v7102_v14 = vor.u32 %v7565_v34, %v7099_v41  ;;  %v7561_v8 = vld [vmem:[%s11610_s9 + $0x10c] sm:$0xf]  ;;  %v7607_v21 = vld [vmem:[%s11612_s11 + $0x74] sm:$0xf0]  ;;  %v7385_v19 = vld [vmem:[%s11612_s11 + $0x170] sm:$0xf] }
 0x622   : > { %v7639_v23 = vld [vmem:[%s11612_s11 + $0x174] sm:$0xf0]  ;;  %v7258_v3 = vor.u32 %v7607_v21, %v7257_v57  ;;  %v7605_v47 = vld [vmem:[%s11612_s11 + $0x64] sm:$0xf0]  ;;  %v7377_v52 = vld [vmem:[%s11612_s11 + $0x160] sm:$0xf] }
 0x623   : > { %5866 = vmatpush.bf16.msrb.mxu1 %v7054_v13  ;;  %5879 = vmatpush.bf16.msra.mxu2 %v7182_v22  ;;  %v7531_v13 = vld [vmem:[%s11610_s9 + $0x14] sm:$0xf0]  ;;  %v7083_v22 = vld [vmem:[%s11610_s9 + $0x118] sm:$0xf0]  ;;  %v7321_v30 = vld [vmem:[%s11612_s11 + $0xf0] sm:$0xf] }
 0x624   : > { %5842 = vmatpush.bf16.msrb.mxu3 %v7018_v44  ;;  %5854 = vmatpush.bf16.msrb.mxu0 %v7162_v29  ;;  %v6954_v63 = vor.u32 %v7531_v13, %v6953_v37  ;;  %v7086_v51 = vor.u32 %v7561_v8, %v7083_v22  ;;  %v5267_v29 = vperm.slane %v5264_v46, 1  ;;  %v7655_v33 = vld [vmem:[%s11612_s11 + $0x1f4] sm:$0xf0]  ;;  %v7313_v26 = vld [vmem:[%s11612_s11 + $0xe0] sm:$0xf] }
 0x625   : > { %v7603_v15 = vld [vmem:[%s11612_s11 + $0x54] sm:$0xf0]  ;;  %v7621_v48 = vld [vmem:[%s11612_s11 + $0xe4] sm:$0xf0]  ;;  %v7441_v10 = vld [vmem:[%s11612_s11 + $0x1e0] sm:$0xf] }
 0x626   : > { %v7635_v27 = vld [vmem:[%s11612_s11 + $0x154] sm:$0xf0]  ;;  %v7233_v38 = vld [vmem:[%s11612_s11 + $0x40] sm:$0xf]  ;;  %v7601_v42 = vld [vmem:[%s11612_s11 + $0x44] sm:$0xf0]  ;;  %v7314_v13 = vor.u32 %v7621_v48, %v7313_v26 }
 0x627   : > { %5867 = vmatpush.bf16.msrb.mxu1 %v7038_v20  ;;  %5880 = vmatpush.bf16.msra.mxu2 %v7166_v1  ;;  %v7098_v20 = vor.u32 %v7567_v36, %v7097_v16  ;;  %v7249_v1 = vld [vmem:[%s11612_s11 + $0x60] sm:$0xf]  ;;  %v7619_v24 = vld [vmem:[%s11612_s11 + $0xd4] sm:$0xf0]  ;;  %v7234_v36 = vor.u32 %v7601_v42, %v7233_v38  ;;  %v7225_v34 = vld [vmem:[%s11612_s11 + $0x30] sm:$0xf] }
 0x628   : > { %5843 = vmatpush.bf16.msrb.mxu3 %v7002_v31  ;;  %5855 = vmatpush.bf16.msrb.mxu0 %v7146_v62  ;;  %v7386_v31 = vor.u32 %v7639_v23, %v7385_v19  ;;  %v7623_v62 = vld [vmem:[%s11612_s11 + $0xf4] sm:$0xf0]  ;;  %v7250_v35 = vor.u32 %v7605_v47, %v7249_v1  ;;  %v7361_v60 = vld [vmem:[%s11612_s11 + $0x140] sm:$0xf]  ;;  %v7597_v8 = vld [vmem:[%s11612_s11 + $0x24] sm:$0xf0] }
 0x629   : > { %v7322_v45 = vor.u32 %v7623_v62, %v7321_v30  ;;  %v7651_v16 = vld [vmem:[%s11612_s11 + $0x1d4] sm:$0xf0]  ;;  %v7217_v5 = vld [vmem:[%s11612_s11 + $0x20] sm:$0xf]  ;;  %v7593_v23 = vld [vmem:[%s11612_s11 + $0x4] sm:$0xf0] }
 0x62a   : > { %v7599_v41 = vld [vmem:[%s11612_s11 + $0x34] sm:$0xf0]  ;;  %v7281_v21 = vld [vmem:[%s11612_s11 + $0xa0] sm:$0xf]  ;;  %v7273_v1 = vld [vmem:[%s11612_s11 + $0x90] sm:$0xf] }
 0x62b   : > { %5868 = vmatpush.bf16.msrb.mxu1 %v7022_v11  ;;  %5881 = vmatpush.bf16.msra.mxu2 %v7150_v12  ;;  %v7449_v12 = vld [vmem:[%s11612_s11 + $0x1f0] sm:$0xf]  ;;  %v7226_v50 = vor.u32 %v7599_v41, %v7225_v34  ;;  %v7201_v19 = vld [vmem:[%s11612_s11] sm:$0xf]  ;;  %v7243_v38 = vld [vmem:[%s11612_s11 + $0x58] sm:$0xf0] }
 0x62c   : > { %5844 = vmatpush.bf16.msrb.mxu3 %v6986_v59  ;;  %5856 = vmatpush.bf16.msrb.mxu0 %v7130_v55  ;;  %v7241_v59 = vld [vmem:[%s11612_s11 + $0x50] sm:$0xf]  ;;  %v7450_v55 = vor.u32 %v7655_v33, %v7449_v12  ;;  %v7631_v12 = vld [vmem:[%s11612_s11 + $0x134] sm:$0xf0]  ;;  %v7618_v34 = vld [vmem:[%s11612_s11 + $0xd4] sm:$0xf] }
 0x62d   : > { %v7242_v25 = vor.u32 %v7603_v15, %v7241_v59  ;;  %v7353_v62 = vld [vmem:[%s11612_s11 + $0x130] sm:$0xf]  ;;  %v7649_v59 = vld [vmem:[%s11612_s11 + $0x1c4] sm:$0xf0]  ;;  %v7604_v15 = vld [vmem:[%s11612_s11 + $0x64] sm:$0xf] }
 0x62e   : > { %v7417_v48 = vld [vmem:[%s11612_s11 + $0x1b0] sm:$0xf] }
 0x62f   : > { %5869 = vmatpush.bf16.msrb.mxu1 %v7006_v18  ;;  %5882 = vmatpush.bf16.msra.mxu2 %v7134_v28  ;;  %v7637_v18 = vld [vmem:[%s11612_s11 + $0x164] sm:$0xf0] }
 0x630   : > { %5845 = vmatpush.bf16.msrb.mxu3 %v6970_v2  ;;  %5857 = vmatpush.bf16.msrb.mxu0 %v7114_v32  ;;  %v7378_v54 = vor.u32 %v7637_v18, %v7377_v52  ;;  %v7653_v28 = vld [vmem:[%s11612_s11 + $0x1e4] sm:$0xf0]  ;;  %v7305_v32 = vld [vmem:[%s11612_s11 + $0xd0] sm:$0xf]  ;;  %v7606_v52 = vld [vmem:[%s11612_s11 + $0x74] sm:$0xf] }
 0x631   : > { %v7442_v49 = vor.u32 %v7653_v28, %v7441_v10  ;;  %v7259_v18 = vld [vmem:[%s11612_s11 + $0x78] sm:$0xf0]  ;;  %v7647_v28 = vld [vmem:[%s11612_s11 + $0x1b4] sm:$0xf0] }
 0x632   : > { %v7262_v30 = vor.u32 %v7606_v52, %v7259_v18  ;;  %v7379_v52 = vld [vmem:[%s11612_s11 + $0x168] sm:$0xf0]  ;;  %v7654_v18 = vld [vmem:[%s11612_s11 + $0x1f4] sm:$0xf] }
 0x633   : > { %5870 = vmatpush.bf16.msrb.mxu1 %v6990_v6  ;;  %5883 = vmatpush.bf16.msra.mxu2 %v7118_v9  ;;  %v7369_v6 = vld [vmem:[%s11612_s11 + $0x150] sm:$0xf] }
 0x634   : > { %5846 = vmatpush.bf16.msrb.mxu3 %v6954_v63  ;;  %5858 = vmatpush.bf16.msrb.mxu0 %v7098_v20  ;;  %v7370_v2 = vor.u32 %v7635_v27, %v7369_v6  ;;  %v7433_v9 = vld [vmem:[%s11612_s11 + $0x1d0] sm:$0xf]  ;;  %v7297_v20 = vld [vmem:[%s11612_s11 + $0xc0] sm:$0xf]  ;;  %v7622_v6 = vld [vmem:[%s11612_s11 + $0xf4] sm:$0xf] }
 0x635   : > { %v7434_v46 = vor.u32 %v7651_v16, %v7433_v9  ;;  %v7323_v27 = vld [vmem:[%s11612_s11 + $0xf8] sm:$0xf0] }
 0x636   : > { %v7326_v26 = vor.u32 %v7622_v6, %v7323_v27  ;;  %v7371_v6 = vld [vmem:[%s11612_s11 + $0x158] sm:$0xf0]  ;;  %v11493_v27 = vld [vmem:[%s11611_s10] sm:$0xf] }
 0x637   : > { %5871 = vmatpush.bf16.msrb.mxu1 %v6974_v40  ;;  %5884 = vmatpush.bf16.msra.mxu2 %v7102_v14  ;;  %v7633_v40 = vld [vmem:[%s11612_s11 + $0x144] sm:$0xf0] }
 0x638   : > { %5859 = vmatpush.bf16.msrb.mxu0 %v7082_v17  ;;  %v7362_v63 = vor.u32 %v7633_v40, %v7361_v60  ;;  %v7617_v14 = vld [vmem:[%s11612_s11 + $0xc4] sm:$0xf0]  ;;  %v7615_v17 = vld [vmem:[%s11612_s11 + $0xb4] sm:$0xf0]  ;;  %v7620_v60 = vld [vmem:[%s11612_s11 + $0xe4] sm:$0xf] }
 0x639   : > { %v7298_v22 = vor.u32 %v7617_v14, %v7297_v20  ;;  %v7315_v40 = vld [vmem:[%s11612_s11 + $0xe8] sm:$0xf0]  ;;  %v7625_v20 = vld [vmem:[%s11612_s11 + $0x104] sm:$0xf0] }
 0x63b   : > { %5872 = vmatpush.bf16.msrb.mxu1 %v6958_v56  ;;  %5885 = vmatpush.bf16.msra.mxu2 %v7086_v51  ;;  %v7306_v56 = vor.u32 %v7619_v24, %v7305_v32  ;;  %v7218_v51 = vor.u32 %v7597_v8, %v7217_v5  ;;  %v7627_v32 = vld [vmem:[%s11612_s11 + $0x114] sm:$0xf0]  ;;  %v7645_v24 = vld [vmem:[%s11612_s11 + $0x1a4] sm:$0xf0] }
 0x63c   : > { %v7643_v5 = vld [vmem:[%s11612_s11 + $0x194] sm:$0xf0] }
 0x69b   : > { %v5372_v44 = vpop.f32.mrf.mxu1 }
 0x69c   : > { %v5373_v11 = vadd.f32 %v5372_v44, %v5266_v7  ;;  %v7289_v7 = vld [vmem:[%s11612_s11 + $0xb0] sm:$0xf] }
 0x69d   : > { %v7209_v44 = vld [vmem:[%s11612_s11 + $0x10] sm:$0xf]  ;;  %v7290_v57 = vor.u32 %v7615_v17, %v7289_v7  ;;  %v7227_v7 = vld [vmem:[%s11612_s11 + $0x38] sm:$0xf0]  ;;  %v7616_v17 = vld [vmem:[%s11612_s11 + $0xc4] sm:$0xf] }
 0x69e   : > { %v5389_v53 = vmax.f32 %v5373_v11, 0.0  ;;  %v7595_v11 = vld [vmem:[%s11612_s11 + $0x14] sm:$0xf0] }
 0x6a0   : > { %v11205_v43 = vpack.c.bf16 %v5389_v53, %v5389_v53  ;;  %v7613_v53 = vld [vmem:[%s11612_s11 + $0xa4] sm:$0xf0] }
 0x6a1   : > { %v5385_v58 = vpop.f32.mrf.mxu2 }
 0x6a2   : > { %v5386_v0 = vadd.f32 %v5385_v58, %v5267_v29  ;;  %5795 = vmatmul.bf16.vlgmr.msra.gmra.mxu3 %v11205_v43  ;;  %5821 = vmatmul.bf16.vlgmr.msra.gmra.mxu1 %v11205_v43  ;;  %v7210_v29 = vor.u32 %v7595_v11, %v7209_v44  ;;  %v7265_v58 = vld [vmem:[%s11612_s11 + $0x80] sm:$0xf]  ;;  %v7299_v11 = vld [vmem:[%s11612_s11 + $0xc8] sm:$0xf0] }
 0x6a3   : > { %v5374_v4 = vpop.f32.mrf.mxu1  ;;  %6289 = vmatpush.bf16.msra.mxu3 %v7258_v3  ;;  %6315 = vmatpush.bf16.msra.mxu1 %v7386_v31  ;;  %v7282_v3 = vor.u32 %v7613_v53, %v7281_v21  ;;  %v7611_v31 = vld [vmem:[%s11612_s11 + $0x94] sm:$0xf0]  ;;  %v7387_v21 = vld [vmem:[%s11612_s11 + $0x178] sm:$0xf0]  ;;  %v7302_v53 = vor.u32 %v7616_v17, %v7299_v11  ;;  %v7347_v17 = vld [vmem:[%s11612_s11 + $0x128] sm:$0xf0] }
 0x6a4   : > { %v5390_v61 = vmax.f32 %v5386_v0, 0.0  ;;  %v7274_v47 = vor.u32 %v7611_v31, %v7273_v1  ;;  %v7609_v0 = vld [vmem:[%s11612_s11 + $0x84] sm:$0xf0]  ;;  %v7354_v4 = vor.u32 %v7631_v12, %v7353_v62  ;;  %v7219_v1 = vld [vmem:[%s11612_s11 + $0x28] sm:$0xf0] }
 0x6a5   : > { %v7266_v33 = vor.u32 %v7609_v0, %v7265_v58  ;;  %v7614_v31 = vld [vmem:[%s11612_s11 + $0xb4] sm:$0xf]  ;;  %v7451_v0 = vld [vmem:[%s11612_s11 + $0x1f8] sm:$0xf0] }
 0x6a6   : > { %v5392_v39 = vpack.c.bf16 %v5390_v61, %v5390_v61  ;;  %v7251_v61 = vld [vmem:[%s11612_s11 + $0x68] sm:$0xf0]  ;;  %v7419_v11 = vld [vmem:[%s11612_s11 + $0x1b8] sm:$0xf0] }
 0x6a7   : > { %6290 = vmatpush.bf16.msra.mxu3 %v7250_v35  ;;  %6316 = vmatpush.bf16.msra.mxu1 %v7378_v54  ;;  %v7425_v35 = vld [vmem:[%s11612_s11 + $0x1c0] sm:$0xf] }
 0x6a8   : > { %5808 = vmatmul.bf16.vlgmr.msra.gmra.mxu0 %v5392_v39  ;;  %5834 = vmatmul.bf16.vlgmr.msrb.gmra.mxu2 %v5392_v39  ;;  %v7426_v54 = vor.u32 %v7649_v59, %v7425_v35  ;;  %v7211_v35 = vld [vmem:[%s11612_s11 + $0x18] sm:$0xf0]  ;;  %v7612_v59 = vld [vmem:[%s11612_s11 + $0xa4] sm:$0xf] }
 0x6a9   : > { %v5387_v37 = vpop.f32.mrf.mxu2  ;;  %6302 = vmatpush.bf16.msra.mxu0 %v7322_v45  ;;  %6328 = vmatpush.bf16.msrb.mxu2 %v7450_v55  ;;  %v7254_v45 = vor.u32 %v7604_v15, %v7251_v61  ;;  %v7345_v55 = vld [vmem:[%s11612_s11 + $0x120] sm:$0xf]  ;;  %v7634_v61 = vld [vmem:[%s11612_s11 + $0x154] sm:$0xf] }
 0x6aa   : > { %v7337_v37 = vld [vmem:[%s11612_s11 + $0x110] sm:$0xf] }
 0x6ab   : > { %6291 = vmatpush.bf16.msra.mxu3 %v7242_v25  ;;  %6317 = vmatpush.bf16.msra.mxu1 %v7370_v2  ;;  %v7602_v25 = vld [vmem:[%s11612_s11 + $0x54] sm:$0xf]  ;;  %v7418_v2 = vor.u32 %v7647_v28, %v7417_v48  ;;  %v7338_v9 = vor.u32 %v7627_v32, %v7337_v37  ;;  %v7363_v37 = vld [vmem:[%s11612_s11 + $0x148] sm:$0xf0] }
 0x6ac   : > { %v7246_v42 = vor.u32 %v7602_v25, %v7243_v38  ;;  %v7592_v25 = vld [vmem:[%s11612_s11 + $0x4] sm:$0xf]  ;;  %v7203_v38 = vld [vmem:[%s11612_s11 + $0x8] sm:$0xf0] }
 0x6ad   : > { %6303 = vmatpush.bf16.msra.mxu0 %v7314_v13  ;;  %6329 = vmatpush.bf16.msrb.mxu2 %v7442_v49  ;;  %v7318_v13 = vor.u32 %v7620_v60, %v7315_v40  ;;  %v7409_v49 = vld [vmem:[%s11612_s11 + $0x1a0] sm:$0xf]  ;;  %v7275_v60 = vld [vmem:[%s11612_s11 + $0x98] sm:$0xf0]  ;;  %v7632_v40 = vld [vmem:[%s11612_s11 + $0x144] sm:$0xf] }
 0x6ae   : > { %v7410_v16 = vor.u32 %v7645_v24, %v7409_v49  ;;  %v7366_v32 = vor.u32 %v7632_v40, %v7363_v37  ;;  %v7650_v49 = vld [vmem:[%s11612_s11 + $0x1d4] sm:$0xf]  ;;  %v7435_v24 = vld [vmem:[%s11612_s11 + $0x1d8] sm:$0xf0] }
 0x6af   : > { %6292 = vmatpush.bf16.msra.mxu3 %v7234_v36  ;;  %6318 = vmatpush.bf16.msra.mxu1 %v7362_v63  ;;  %v7600_v36 = vld [vmem:[%s11612_s11 + $0x44] sm:$0xf]  ;;  %v7235_v63 = vld [vmem:[%s11612_s11 + $0x48] sm:$0xf0] }
 0x6b0   : > { %v7238_v41 = vor.u32 %v7600_v36, %v7235_v63  ;;  %v7267_v36 = vld [vmem:[%s11612_s11 + $0x88] sm:$0xf0]  ;;  %v7630_v63 = vld [vmem:[%s11612_s11 + $0x134] sm:$0xf] }
 0x6b1   : > { %6304 = vmatpush.bf16.msra.mxu0 %v7306_v56  ;;  %6330 = vmatpush.bf16.msrb.mxu2 %v7434_v46  ;;  %v7307_v56 = vld [vmem:[%s11612_s11 + $0xd8] sm:$0xf0]  ;;  %v7329_v46 = vld [vmem:[%s11612_s11 + $0x100] sm:$0xf] }
 0x6b2   : > { %5847 = vmatmul.bf16.vlgmr.msrb.gmra.mxu3 %v11205_v43  ;;  %5873 = vmatmul.bf16.vlgmr.msrb.gmra.mxu1 %v11205_v43  ;;  %v7202_v43 = vor.u32 %v7593_v23, %v7201_v19  ;;  %v7310_v14 = vor.u32 %v7618_v34, %v7307_v56  ;;  %v7330_v8 = vor.u32 %v7625_v20, %v7329_v46  ;;  %v7393_v19 = vld [vmem:[%s11612_s11 + $0x180] sm:$0xf]  ;;  %v7641_v23 = vld [vmem:[%s11612_s11 + $0x184] sm:$0xf0]  ;;  %v7355_v34 = vld [vmem:[%s11612_s11 + $0x138] sm:$0xf0] }
 0x6b3   : > { %6293 = vmatpush.bf16.msra.mxu3 %v7226_v50  ;;  %6319 = vmatpush.bf16.msra.mxu1 %v7354_v4  ;;  %v7401_v50 = vld [vmem:[%s11612_s11 + $0x190] sm:$0xf]  ;;  %v7394_v58 = vor.u32 %v7641_v23, %v7393_v19  ;;  %v7594_v4 = vld [vmem:[%s11612_s11 + $0x14] sm:$0xf]  ;;  %v7427_v56 = vld [vmem:[%s11612_s11 + $0x1c8] sm:$0xf0] }
 0x6b4   : > { %v7214_v15 = vor.u32 %v7594_v4, %v7211_v35  ;;  %v7626_v23 = vld [vmem:[%s11612_s11 + $0x114] sm:$0xf] }
 0x6b5   : > { %6305 = vmatpush.bf16.msra.mxu0 %v7298_v22  ;;  %6331 = vmatpush.bf16.msrb.mxu2 %v7426_v54  ;;  %v7598_v22 = vld [vmem:[%s11612_s11 + $0x34] sm:$0xf]  ;;  %v7283_v54 = vld [vmem:[%s11612_s11 + $0xa8] sm:$0xf0] }
 0x6b6   : > { %v7230_v44 = vor.u32 %v7598_v22, %v7227_v7  ;;  %v7628_v7 = vld [vmem:[%s11612_s11 + $0x124] sm:$0xf]  ;;  %v7642_v35 = vld [vmem:[%s11612_s11 + $0x194] sm:$0xf] }
 0x6b7   : > { %6294 = vmatpush.bf16.msra.mxu3 %v7218_v51  ;;  %v7402_v51 = vor.u32 %v7643_v5, %v7401_v50  ;;  %v7358_v50 = vor.u32 %v7630_v63, %v7355_v34  ;;  %v5460_v5 = vperm.slane %v11493_v27, 1 }
 0x6b8   : > { %5860 = vmatmul.bf16.vlgmr.msrb.gmra.mxu0 %v5392_v39  ;;  %5886 = vmatmul.bf16.vlgmr.msra.gmra.mxu2 %v5392_v39  ;;  %v7629_v39 = vld [vmem:[%s11612_s11 + $0x124] sm:$0xf0] }
 0x6b9   : > { %6306 = vmatpush.bf16.msra.mxu0 %v7290_v57  ;;  %v7346_v10 = vor.u32 %v7629_v39, %v7345_v55  ;;  %6332 = vmatpush.bf16.msrb.mxu2 %v7418_v2  ;;  %v7638_v57 = vld [vmem:[%s11612_s11 + $0x174] sm:$0xf]  ;;  %v7652_v55 = vld [vmem:[%s11612_s11 + $0x1e4] sm:$0xf]  ;;  %v7443_v39 = vld [vmem:[%s11612_s11 + $0x1e8] sm:$0xf0] }
 0x6ba   : > { %v7446_v28 = vor.u32 %v7652_v55, %v7443_v39  ;;  %v7610_v2 = vld [vmem:[%s11612_s11 + $0x94] sm:$0xf]  ;;  %v7395_v55 = vld [vmem:[%s11612_s11 + $0x188] sm:$0xf0] }
 0x6bb   : > { %6295 = vmatpush.bf16.msra.mxu3 %v7210_v29  ;;  %6320 = vmatpush.bf16.msra.mxu1 %v7346_v10  ;;  %v7390_v29 = vor.u32 %v7638_v57, %v7387_v21  ;;  %v5459_v10 = vperm.slane %v11493_v27, 0  ;;  %v7350_v21 = vor.u32 %v7628_v7, %v7347_v17 }
 0x6bd   : > { %6307 = vmatpush.bf16.msra.mxu0 %v7282_v3  ;;  %6333 = vmatpush.bf16.msrb.mxu2 %v7410_v16  ;;  %v7596_v3 = vld [vmem:[%s11612_s11 + $0x24] sm:$0xf]  ;;  %v7438_v16 = vor.u32 %v7650_v49, %v7435_v24 }
 0x6bf   : > { %6296 = vmatpush.bf16.msra.mxu3 %v7202_v43  ;;  %6321 = vmatpush.bf16.msra.mxu1 %v7338_v9  ;;  %v7291_v43 = vld [vmem:[%s11612_s11 + $0xb8] sm:$0xf0]  ;;  %v7608_v9 = vld [vmem:[%s11612_s11 + $0x84] sm:$0xf] }
 0x6c0   : > { %v7294_v62 = vor.u32 %v7614_v31, %v7291_v43  ;;  %v7644_v31 = vld [vmem:[%s11612_s11 + $0x1a4] sm:$0xf]  ;;  %v7411_v43 = vld [vmem:[%s11612_s11 + $0x1a8] sm:$0xf0] }
 0x6c1   : > { %6308 = vmatpush.bf16.msra.mxu0 %v7274_v47  ;;  %v7636_v47 = vld [vmem:[%s11612_s11 + $0x164] sm:$0xf]  ;;  %6334 = vmatpush.bf16.msrb.mxu2 %v7402_v51 }
 0x6c2   : > { %v7382_v12 = vor.u32 %v7636_v47, %v7379_v52 }
 0x6c3   : > { %6341 = vmatpush.bf16.msrb.mxu3 %v7262_v30  ;;  %6322 = vmatpush.bf16.msra.mxu1 %v7330_v8  ;;  %v7222_v30 = vor.u32 %v7596_v3, %v7219_v1  ;;  %v7339_v3 = vld [vmem:[%s11612_s11 + $0x118] sm:$0xf0] }
 0x6c5   : > { %6309 = vmatpush.bf16.msra.mxu0 %v7266_v33  ;;  %v7454_v33 = vor.u32 %v7654_v18, %v7451_v0  ;;  %6335 = vmatpush.bf16.msrb.mxu2 %v7394_v58 }
 0x6c7   : > { %6342 = vmatpush.bf16.msrb.mxu3 %v7254_v45  ;;  %6367 = vmatpush.bf16.msrb.mxu1 %v7390_v29  ;;  %v7286_v45 = vor.u32 %v7612_v59, %v7283_v54  ;;  %v7403_v59 = vld [vmem:[%s11612_s11 + $0x198] sm:$0xf0] }
 0x6c9   : > { %6354 = vmatpush.bf16.msrb.mxu0 %v7326_v26  ;;  %6380 = vmatpush.bf16.msra.mxu2 %v7454_v33  ;;  %v7374_v26 = vor.u32 %v7634_v61, %v7371_v6  ;;  %v7331_v33 = vld [vmem:[%s11612_s11 + $0x108] sm:$0xf0]  ;;  %v5461_v61 = vperm.slane %v11493_v27, 2  ;;  %v7406_v6 = vor.u32 %v7642_v35, %v7403_v59 }
 0x6cb   : > { %6343 = vmatpush.bf16.msrb.mxu3 %v7246_v42  ;;  %6368 = vmatpush.bf16.msrb.mxu1 %v7382_v12  ;;  %v7206_v42 = vor.u32 %v7592_v25, %v7203_v38  ;;  %v7624_v12 = vld [vmem:[%s11612_s11 + $0x104] sm:$0xf] }
 0x6cc   : > { %v7334_v54 = vor.u32 %v7624_v12, %v7331_v33 }
 0x6cd   : > { %6355 = vmatpush.bf16.msrb.mxu0 %v7318_v13  ;;  %6381 = vmatpush.bf16.msra.mxu2 %v7446_v28  ;;  %v7278_v13 = vor.u32 %v7610_v2, %v7275_v60 }
 0x6cf   : > { %6344 = vmatpush.bf16.msrb.mxu3 %v7238_v41  ;;  %6369 = vmatpush.bf16.msrb.mxu1 %v7374_v26  ;;  %v7648_v41 = vld [vmem:[%s11612_s11 + $0x1c4] sm:$0xf] }
 0x6d0   : > { %v7430_v22 = vor.u32 %v7648_v41, %v7427_v56  ;;  %v7640_v26 = vld [vmem:[%s11612_s11 + $0x184] sm:$0xf] }
 0x6d1   : > { %6356 = vmatpush.bf16.msrb.mxu0 %v7310_v14  ;;  %v7270_v14 = vor.u32 %v7608_v9, %v7267_v36  ;;  %6382 = vmatpush.bf16.msra.mxu2 %v7438_v16  ;;  %v7398_v25 = vor.u32 %v7640_v26, %v7395_v55 }
 0x6d3   : > { %6345 = vmatpush.bf16.msrb.mxu3 %v7230_v44  ;;  %6370 = vmatpush.bf16.msrb.mxu1 %v7366_v32  ;;  %v7646_v44 = vld [vmem:[%s11612_s11 + $0x1b4] sm:$0xf] }
 0x6d4   : > { %v7422_v19 = vor.u32 %v7646_v44, %v7419_v11 }
 0x6d5   : > { %6357 = vmatpush.bf16.msrb.mxu0 %v7302_v53  ;;  %6383 = vmatpush.bf16.msra.mxu2 %v7430_v22 }
 0x6d7   : > { %6346 = vmatpush.bf16.msrb.mxu3 %v7222_v30  ;;  %6371 = vmatpush.bf16.msrb.mxu1 %v7358_v50  ;;  %v7342_v30 = vor.u32 %v7626_v23, %v7339_v3  ;;  %v5963_v50 = vld [vmem:[%s11613_s12] sm:$0x3] }
 0x6d8   : > { %v5965_v22 = vperm.slane %v5963_v50, 0  ;;  %v5966_v7 = vperm.slane %v5963_v50, 1 }
 0x6d9   : > { %6358 = vmatpush.bf16.msrb.mxu0 %v7294_v62  ;;  %6384 = vmatpush.bf16.msra.mxu2 %v7422_v19  ;;  %v7414_v62 = vor.u32 %v7644_v31, %v7411_v43 }
 0x6db   : > { %6347 = vmatpush.bf16.msrb.mxu3 %v7214_v15  ;;  %6372 = vmatpush.bf16.msrb.mxu1 %v7350_v21 }
 0x6dd   : > { %6359 = vmatpush.bf16.msrb.mxu0 %v7286_v45  ;;  %6385 = vmatpush.bf16.msra.mxu2 %v7414_v62 }
 0x6df   : > { %6348 = vmatpush.bf16.msrb.mxu3 %v7206_v42  ;;  %6373 = vmatpush.bf16.msrb.mxu1 %v7342_v30 }
 0x6e1   : > { %6360 = vmatpush.bf16.msrb.mxu0 %v7278_v13  ;;  %6386 = vmatpush.bf16.msra.mxu2 %v7406_v6 }
 0x6e3   : > { %6374 = vmatpush.bf16.msrb.mxu1 %v7334_v54 }
 0x6e5   : > { %6361 = vmatpush.bf16.msrb.mxu0 %v7270_v14  ;;  %6387 = vmatpush.bf16.msra.mxu2 %v7398_v25 }
 0x71f   : > { %v5822_v48 = vpop.f32.mrf.mxu1 }
 0x720   : > { %v5823_v53 = vadd.f32 %v5822_v48, %v5460_v5 }
 0x725   : > { %v5796_v46 = vpop.f32.mrf.mxu3  ;;  %v5809_v20 = vpop.f32.mrf.mxu0 }
 0x726   : > { %v5797_v8 = vadd.f32 %v5796_v46, %v5459_v10  ;;  %v5462_v10 = vperm.slane %v11493_v27, 3 }
 0x727   : > { %v5824_v51 = vpop.f32.mrf.mxu1 }
 0x728   : > { %v5810_v57 = vadd.f32 %v5809_v20, %v5797_v8 }
 0x72a   : > { %v5891_v29 = vmax.f32 %v5810_v57, 0.0 }
 0x72b   : > { %v5835_v1 = vpop.f32.mrf.mxu2 }
 0x72c   : > { %v5895_v47 = vpack.c.bf16 %v5891_v29, %v5891_v29  ;;  %v5836_v52 = vadd.f32 %v5835_v1, %v5823_v53 }
 0x72d   : > { %v5798_v18 = vpop.f32.mrf.mxu3  ;;  %v5811_v58 = vpop.f32.mrf.mxu0 }
 0x72e   : > { %v5892_v0 = vmax.f32 %v5836_v52, 0.0  ;;  %6297 = vmatmul.bf16.vlgmr.msra.gmra.mxu3 %v5895_v47 }
 0x72f   : > { %v5874_v4 = vpop.f32.mrf.mxu1 }
 0x730   : > { %v5896_v15 = vpack.c.bf16 %v5892_v0, %v5892_v0  ;;  %v5875_v42 = vadd.f32 %v5874_v4, %v5462_v10 }
 0x732   : > { %6310 = vmatmul.bf16.vlgmr.msra.gmra.mxu0 %v5896_v15 }
 0x733   : > { %v5837_v45 = vpop.f32.mrf.mxu2 }
 0x735   : > { %v5848_v39 = vpop.f32.mrf.mxu3  ;;  %v5861_v48 = vpop.f32.mrf.mxu0 }
 0x736   : > { %v5849_v28 = vadd.f32 %v5848_v39, %v5461_v61 }
 0x737   : > { %v5876_v38 = vpop.f32.mrf.mxu1 }
 0x738   : > { %v5862_v2 = vadd.f32 %v5861_v48, %v5849_v28 }
 0x73a   : > { %v5893_v60 = vmax.f32 %v5862_v2, 0.0 }
 0x73b   : > { %v5887_v40 = vpop.f32.mrf.mxu2 }
 0x73c   : > { %v5897_v37 = vpack.c.bf16 %v5893_v60, %v5893_v60  ;;  %v5888_v13 = vadd.f32 %v5887_v40, %v5875_v42 }
 0x73d   : > { %v5850_v32 = vpop.f32.mrf.mxu3  ;;  %v5863_v49 = vpop.f32.mrf.mxu0 }
 0x73e   : > { %v5894_v24 = vmax.f32 %v5888_v13, 0.0  ;;  %6323 = vmatmul.bf16.vlgmr.msra.gmra.mxu1 %v5897_v37  ;;  %6349 = vmatmul.bf16.vlgmr.msrb.gmra.mxu3 %v5895_v47 }
 0x740   : > { %v5898_v9 = vpack.c.bf16 %v5894_v24, %v5894_v24 }
 0x742   : > { %6336 = vmatmul.bf16.vlgmr.msrb.gmra.mxu2 %v5898_v9  ;;  %6362 = vmatmul.bf16.vlgmr.msrb.gmra.mxu0 %v5896_v15 }
 0x743   : > { %v5889_v27 = vpop.f32.mrf.mxu2 }
 0x74e   : > { %6375 = vmatmul.bf16.vlgmr.msrb.gmra.mxu1 %v5897_v37 }
 0x752   : > { %6388 = vmatmul.bf16.vlgmr.msra.gmra.mxu2 %v5898_v9 }
 0x7af   : > { %v6311_v16 = vpop.f32.mrf.mxu0 }
 0x7b1   : > { %v6298_v36 = vpop.f32.mrf.mxu3 }
 0x7b2   : > { %v6299_v44 = vadd.f32 %v6298_v36, %v5965_v22 }
 0x7b4   : > { %v6312_v57 = vadd.f32 %v6311_v16, %v6299_v44 }
 0x7b7   : > { %v6313_v63 = vpop.f32.mrf.mxu0 }
 0x7b9   : > { %v6300_v34 = vpop.f32.mrf.mxu3 }
 0x7bb   : > { %v6324_v41 = vpop.f32.mrf.mxu1 }
 0x7bc   : > { %v6325_v29 = vadd.f32 %v6324_v41, %v6312_v57 }
 0x7bf   : > { %v6363_v56 = vpop.f32.mrf.mxu0 }
 0x7c1   : > { %v6350_v46 = vpop.f32.mrf.mxu3 }
 0x7c2   : > { %v6351_v11 = vadd.f32 %v6350_v46, %v5966_v7 }
 0x7c3   : > { %v6326_v20 = vpop.f32.mrf.mxu1 }
 0x7c4   : > { %v6364_v21 = vadd.f32 %v6363_v56, %v6351_v11 }
 0x7c5   : > { %v6337_v14 = vpop.f32.mrf.mxu2 }
 0x7c6   : > { %v6338_v3 = vadd.f32 %v6337_v14, %v6325_v29 }
 0x7c7   : > { %v6365_v5 = vpop.f32.mrf.mxu0 }
 0x7c8   : > { %v6393_v43 = vmax.f32 %v6338_v3, 0.0 }
 0x7c9   : > { %v6352_v8 = vpop.f32.mrf.mxu3 }
 0x7cb   : > { %v6376_v17 = vpop.f32.mrf.mxu1 }
 0x7cc   : > { %v6377_v19 = vadd.f32 %v6376_v17, %v6364_v21 }
 0x7cd   : > { %v6339_v51 = vpop.f32.mrf.mxu2 }
 0x7d3   : > { %v6378_v53 = vpop.f32.mrf.mxu1 }
 0x7d5   : > { %v6389_v23 = vpop.f32.mrf.mxu2 }
 0x7d6   : > { %v6390_v1 = vadd.f32 %v6389_v23, %v6377_v19 }
 0x7d8   : > { %v6394_v31 = vmax.f32 %v6390_v1, 0.0 }
 0x7da   : > { %v6397_v47 = vrot.slane %v6394_v31, 4 }
 0x7dc   : > { %v6398_v52 = vsel %vm4773_vm14, %v6393_v43, %v6397_v47 }
 0x7dd   : > { %6402 = vst.msk [vmem:[%s440_s29] sm:$0xff] %vm6401_vm1, %v6398_v52  ;;  %v6391_v18 = vpop.f32.mrf.mxu2 }
 0x7de PF: > { %s23_s25 = sadd.s32 1, %s7831_s25  }
 0x7df   : > { %p20_p4 = scmp.ge.s32.totalorder %s23_s25, 4  }
 0x7e1   :  { %22 = sbr.rel (!%p20_p4) target bundleno = 1 (0x1), region = 115 }

</bundles_post_ra>
